<compile_context>
chip_gen: v5e
topology: v5e:2x2
jax: 0.10.0
libtpu: 0.0.40
codegen_flags: <defaults>
</compile_context>

<pallas_src>
import math

import jax
import jax.numpy as jnp
from jax.experimental import pallas as pl
from jax.experimental.pallas import tpu as pltpu

DIM = 128            # feature dim (PyTorch default 512, scaled down)
NUM_HEADS = 8
HEAD_DIM = DIM // NUM_HEADS
FFN_DIM = 4 * DIM
BATCH = 256          # total (text, image) pairs
EPS = 1e-5           # nn.LayerNorm default

# Row layout of the packed parameter slab (8, FFN_DIM); DIM-sized vectors live
# in lanes [:DIM] of their row, b1 occupies a full FFN_DIM row.
_N1_G, _N1_B, _N2_G, _N2_B, _BV, _B2, _B1 = range(7)


def _device_kind() -> str:
    try:
        return jax.devices()[0].device_kind.lower()
    except Exception:  # pragma: no cover - defensive; assume generic TPU
        return ""


_KIND = _device_kind()
_IS_V5 = "v5" in _KIND          # v5e/v5p: no bf16-native VPU/EUP -> keep f32 elementwise
_IS_V7 = "v7" in _KIND          # v7x: 2 TensorCores per chip -> CORE_PARALLEL split
_BF16_ELEMENTWISE = not _IS_V5  # bf16 GELU on bf16-native VPUs (v6e/v7x)


def _layernorm(x, gamma, beta):
    # Single-pass formulation: the two reductions are independent (pipeline on
    # the XLUs) and we skip one full-width centering pass before the variance.
    mean = jnp.mean(x, axis=-1, keepdims=True)
    mean_sq = jnp.mean(x * x, axis=-1, keepdims=True)
    var = mean_sq - mean * mean
    return (x - mean) * jax.lax.rsqrt(var + EPS) * gamma + beta


def _gelu_tanh(x):
    # tanh-approximate GELU: a single EUP tanh instead of the erf polynomial.
    c = math.sqrt(2.0 / math.pi)
    return 0.5 * x * (1.0 + jnp.tanh(c * (x + 0.044715 * (x * x * x))))


def cross_attn_fusion_kernel(text_ref, image_ref, vec_ref,
                             wv_ref, w1_ref, w2_ref, out_ref):
    text = text_ref[...].astype(jnp.float32)      # (TB, DIM)
    image = image_ref[...].astype(jnp.float32)    # (TB, DIM)
    vec = vec_ref[...]                            # (8, FFN_DIM) f32 packed params

    n1_g = vec[_N1_G:_N1_G + 1, :DIM]
    n1_b = vec[_N1_B:_N1_B + 1, :DIM]
    n2_g = vec[_N2_G:_N2_G + 1, :DIM]
    n2_b = vec[_N2_B:_N2_B + 1, :DIM]
    bv = vec[_BV:_BV + 1, :DIM]
    b2 = vec[_B2:_B2 + 1, :DIM]
    b1 = vec[_B1:_B1 + 1, :]                      # (1, FFN_DIM)

    # --- attention block (seq_len == 1 -> softmax over one key is identity,
    #     so the attention output equals the V projection) -------------------
    imn = _layernorm(image, n1_g, n1_b)
    v = jnp.dot(imn.astype(jnp.bfloat16), wv_ref[...],
                preferred_element_type=jnp.float32) + bv
    # TODO(synk): attn_dropout / FFN Dropout are identity in eval mode; omitted.
    attn_out = text + v                           # residual + attn_output (f32)

    # --- FFN block: LN -> Linear -> GELU(tanh) -> Linear, residual ----------
    a2 = _layernorm(attn_out, n2_g, n2_b)
    h = jnp.dot(a2.astype(jnp.bfloat16), w1_ref[...],
                preferred_element_type=jnp.float32) + b1
    if _BF16_ELEMENTWISE:
        h = _gelu_tanh(h.astype(jnp.bfloat16))    # bf16 VPU/EUP (v6e/v7x)
    else:
        h = _gelu_tanh(h).astype(jnp.bfloat16)    # f32 VPU on v5e, cast for MXU
    ffn = jnp.dot(h, w2_ref[...],
                  preferred_element_type=jnp.float32) + b2

    out_ref[...] = attn_out + ffn


def _pack_param_slab(p):
    """Pack LN params, biases and the FFN bias into one (8, FFN_DIM) f32 slab."""
    def row(v):
        v = v.astype(jnp.float32)
        return jnp.pad(v, (0, FFN_DIM - v.shape[0]))

    rows = [row(p["n1_g"]), row(p["n1_b"]),
            row(p["n2_g"]), row(p["n2_b"]),
            row(p["bv"]), row(p["b2"]),
            p["b1"].astype(jnp.float32),
            jnp.zeros((FFN_DIM,), jnp.float32)]
    return jnp.stack(rows, axis=0)


def cross_attention_fusion(text_feat, image_feat, params):
    assert text_feat.shape == (BATCH, DIM) and image_feat.shape == (BATCH, DIM)
    vec = _pack_param_slab(params)

    # Activations travel HBM->VMEM in bf16 (they feed the MXU in bf16 anyway);
    # LayerNorm / residual math is done in f32 inside the kernel.
    text_bf = text_feat.astype(jnp.bfloat16)
    image_bf = image_feat.astype(jnp.bfloat16)

    if _IS_V7:
        # Two 128-row tiles, one per TensorCore.
        tb = 128
        semantics = (pltpu.CORE_PARALLEL,)
    else:
        # Single TensorCore (v5e/v6e): one 256-row step — no per-step overhead
        # and the LHS fully fills the 256-row MXU.
        tb = BATCH
        semantics = ("arbitrary",)
    nb = BATCH // tb

    return pl.pallas_call(
        cross_attn_fusion_kernel,
        out_shape=jax.ShapeDtypeStruct((BATCH, DIM), jnp.float32),
        grid=(nb,),
        in_specs=[
            pl.BlockSpec((tb, DIM), lambda i: (i, 0)),          # text tile  (bf16)
            pl.BlockSpec((tb, DIM), lambda i: (i, 0)),          # image tile (bf16)
            pl.BlockSpec((8, FFN_DIM), lambda i: (0, 0)),       # packed params (f32)
            pl.BlockSpec((DIM, DIM), lambda i: (0, 0)),         # wv (bf16)
            pl.BlockSpec((DIM, FFN_DIM), lambda i: (0, 0)),     # w1 (bf16)
            pl.BlockSpec((FFN_DIM, DIM), lambda i: (0, 0)),     # w2 (bf16)
        ],
        out_specs=pl.BlockSpec((tb, DIM), lambda i: (i, 0)),
        compiler_params=pltpu.CompilerParams(dimension_semantics=semantics),
    )(text_bf, image_bf, vec, params["wv"], params["w1"], params["w2"])


def reference(text, image, p):
    """Pure-JAX reference mirroring the FULL PyTorch forward (eval mode),
    including the q/k projections and the per-head softmax, in f32."""
    def ln(x, g, b):
        mu = x.mean(-1, keepdims=True)
        var = ((x - mu) ** 2).mean(-1, keepdims=True)
        return (x - mu) / jnp.sqrt(var + EPS) * g + b

    residual = text
    tn = ln(text, p["n1_g"], p["n1_b"])
    imn = ln(image, p["n1_g"], p["n1_b"])
    q = tn @ p["wq"] + p["bq"]
    k = imn @ p["wk"] + p["bk"]
    v = imn @ p["wv"].astype(jnp.float32) + p["bv"]
    B = q.shape[0]
    qh = q.reshape(B, 1, NUM_HEADS, HEAD_DIM).transpose(0, 2, 1, 3)
    kh = k.reshape(B, 1, NUM_HEADS, HEAD_DIM).transpose(0, 2, 1, 3)
    vh = v.reshape(B, 1, NUM_HEADS, HEAD_DIM).transpose(0, 2, 1, 3)
    aw = jnp.einsum("bhqd,bhkd->bhqk", qh, kh) / math.sqrt(HEAD_DIM)
    aw = jax.nn.softmax(aw, axis=-1)
    ao = jnp.einsum("bhqk,bhkd->bhqd", aw, vh)
    ao = ao.transpose(0, 2, 1, 3).reshape(B, DIM)
    attn_out = residual + ao
    a2 = ln(attn_out, p["n2_g"], p["n2_b"])
    h = a2 @ p["w1"].astype(jnp.float32) + p["b1"]
    h = 0.5 * h * (1.0 + jax.lax.erf(h / math.sqrt(2.0)))   # exact GELU (module default)
    ffn = h @ p["w2"].astype(jnp.float32) + p["b2"]
    return attn_out + ffn


def make_params(key):
    ks = jax.random.split(key, 10)

    def w(k, shape, scale=0.02):
        return (scale * jax.random.normal(k, shape)).astype(jnp.float32)

    return {
        # LayerNorms
        "n1_g": jnp.ones((DIM,), jnp.float32), "n1_b": jnp.zeros((DIM,), jnp.float32),
        "n2_g": jnp.ones((DIM,), jnp.float32), "n2_b": jnp.zeros((DIM,), jnp.float32),
        # q_proj and the K half of kv_proj: provably dead in the forward output
        # (softmax over one key == 1); used only by the reference.
        "wq": w(ks[0], (DIM, DIM)), "bq": w(ks[1], (DIM,)),
        "wk": w(ks[2], (DIM, DIM)), "bk": w(ks[3], (DIM,)),
        # V half of kv_proj (bf16 weights, f32 bias)
        "wv": w(ks[4], (DIM, DIM)).astype(jnp.bfloat16), "bv": w(ks[5], (DIM,)),
        # FFN (bf16 weights, f32 biases)
        "w1": w(ks[6], (DIM, FFN_DIM)).astype(jnp.bfloat16), "b1": w(ks[7], (FFN_DIM,)),
        "w2": w(ks[8], (FFN_DIM, DIM)).astype(jnp.bfloat16), "b2": w(ks[9], (DIM,)),
    }


if __name__ == "__main__":
    root = jax.random.PRNGKey(0)
    k_params, k_text, k_image = jax.random.split(root, 3)
    params = make_params(k_params)
    text_feat = jax.random.normal(k_text, (BATCH, DIM), dtype=jnp.float32)
    image_feat = jax.random.normal(k_image, (BATCH, DIM), dtype=jnp.float32)

    out = jax.block_until_ready(cross_attention_fusion(text_feat, image_feat, params))
    assert out.shape == (BATCH, DIM)

    # 1) Kernel vs full PyTorch-dataflow reference on the SAME (bf16-quantized)
    #    activations the kernel consumed -> isolates kernel-internal error
    #    (bf16 MXU inputs, tanh-GELU, bf16 elementwise).
    t_q = text_feat.astype(jnp.bfloat16).astype(jnp.float32)
    i_q = image_feat.astype(jnp.bfloat16).astype(jnp.float32)
    ref_q = jax.block_until_ready(reference(t_q, i_q, params))
    err_q = float(jnp.max(jnp.abs(out - ref_q)))
    assert err_q < 2e-2, f"mismatch vs reference on quantized inputs: {err_q}"

    # 2) Kernel vs reference on the original f32 inputs (adds only the bf16
    #    input-quantization error of the residual path).
    ref_f32 = jax.block_until_ready(reference(text_feat, image_feat, params))
    err_f32 = float(jnp.max(jnp.abs(out - ref_f32)))
    assert err_f32 < 3e-2, f"mismatch vs f32-input reference: {err_f32}"

    print("KERNEL_OK")
</pallas_src>

<mosaic_0001>
module attributes {stable_mosaic.version = 11 : i64} {
  func.func @cross_attn_fusion_kernel(%arg0: i32, %arg1: memref<256x128xbf16, #tpu.memory_space<vmem>>, %arg2: memref<256x128xbf16, #tpu.memory_space<vmem>>, %arg3: memref<8x512xf32, #tpu.memory_space<vmem>>, %arg4: memref<128x128xbf16, #tpu.memory_space<vmem>>, %arg5: memref<128x512xbf16, #tpu.memory_space<vmem>>, %arg6: memref<512x128xbf16, #tpu.memory_space<vmem>>, %arg7: memref<256x128xf32, #tpu.memory_space<vmem>>) attributes {dimension_semantics = [#tpu.dimension_semantics<arbitrary>], iteration_bounds = array<i64: 1>, scalar_prefetch = 0 : i64, scratch_operands = 0 : i64, tpu.core_type = #tpu.core_type<tc>, window_params = [{transform_indices = @transform_0, window_bounds = array<i64: 256, 128>}, {transform_indices = @transform_1, window_bounds = array<i64: 256, 128>}, {pipeline_mode = #tpu.pipeline_mode<synchronous>, transform_indices = @transform_2, window_bounds = array<i64: 8, 512>}, {pipeline_mode = #tpu.pipeline_mode<synchronous>, transform_indices = @transform_3, window_bounds = array<i64: 128, 128>}, {pipeline_mode = #tpu.pipeline_mode<synchronous>, transform_indices = @transform_4, window_bounds = array<i64: 128, 512>}, {pipeline_mode = #tpu.pipeline_mode<synchronous>, transform_indices = @transform_5, window_bounds = array<i64: 512, 128>}, {transform_indices = @transform_6, window_bounds = array<i64: 256, 128>}]} {
    %c0 = arith.constant 0 : index
    %c0_0 = arith.constant 0 : index
    %0 = vector.load %arg1[%c0, %c0_0] : memref<256x128xbf16, #tpu.memory_space<vmem>>, vector<256x128xbf16>
    %1 = arith.extf %0 : vector<256x128xbf16> to vector<256x128xf32>
    %c0_1 = arith.constant 0 : index
    %c0_2 = arith.constant 0 : index
    %2 = vector.load %arg2[%c0_1, %c0_2] : memref<256x128xbf16, #tpu.memory_space<vmem>>, vector<256x128xbf16>
    %3 = arith.extf %2 : vector<256x128xbf16> to vector<256x128xf32>
    %c0_3 = arith.constant 0 : index
    %c0_4 = arith.constant 0 : index
    %4 = vector.load %arg3[%c0_3, %c0_4] : memref<8x512xf32, #tpu.memory_space<vmem>>, vector<8x512xf32>
    %5 = vector.extract_strided_slice %4 {offsets = [0, 0], sizes = [1, 128], strides = [1, 1]} : vector<8x512xf32> to vector<1x128xf32>
    %6 = vector.extract_strided_slice %4 {offsets = [1, 0], sizes = [1, 128], strides = [1, 1]} : vector<8x512xf32> to vector<1x128xf32>
    %7 = vector.extract_strided_slice %4 {offsets = [2, 0], sizes = [1, 128], strides = [1, 1]} : vector<8x512xf32> to vector<1x128xf32>
    %8 = vector.extract_strided_slice %4 {offsets = [3, 0], sizes = [1, 128], strides = [1, 1]} : vector<8x512xf32> to vector<1x128xf32>
    %9 = vector.extract_strided_slice %4 {offsets = [4, 0], sizes = [1, 128], strides = [1, 1]} : vector<8x512xf32> to vector<1x128xf32>
    %10 = vector.extract_strided_slice %4 {offsets = [5, 0], sizes = [1, 128], strides = [1, 1]} : vector<8x512xf32> to vector<1x128xf32>
    %11 = vector.extract_strided_slice %4 {offsets = [6, 0], sizes = [1, 512], strides = [1, 1]} : vector<8x512xf32> to vector<1x512xf32>
    %cst = arith.constant dense<0.000000e+00> : vector<256xf32>
    %12 = vector.multi_reduction <add>, %3, %cst [1] : vector<256x128xf32> to vector<256xf32>
    %13 = vector.shape_cast %12 : vector<256xf32> to vector<256x1xf32>
    %cst_5 = arith.constant 1.280000e+02 : f32
    %14 = vector.broadcast %cst_5 : f32 to vector<256x1xf32>
    %15 = arith.divf %13, %14 : vector<256x1xf32>
    %16 = arith.mulf %3, %3 : vector<256x128xf32>
    %cst_6 = arith.constant dense<0.000000e+00> : vector<256xf32>
    %17 = vector.multi_reduction <add>, %16, %cst_6 [1] : vector<256x128xf32> to vector<256xf32>
    %18 = vector.shape_cast %17 : vector<256xf32> to vector<256x1xf32>
    %cst_7 = arith.constant 1.280000e+02 : f32
    %19 = vector.broadcast %cst_7 : f32 to vector<256x1xf32>
    %20 = arith.divf %18, %19 : vector<256x1xf32>
    %21 = arith.mulf %15, %15 : vector<256x1xf32>
    %22 = arith.subf %20, %21 : vector<256x1xf32>
    %23 = vector.broadcast %15 : vector<256x1xf32> to vector<256x128xf32>
    %24 = arith.subf %3, %23 : vector<256x128xf32>
    %cst_8 = arith.constant 9.99999974E-6 : f32
    %25 = vector.broadcast %cst_8 : f32 to vector<256x1xf32>
    %26 = arith.addf %22, %25 : vector<256x1xf32>
    %27 = math.rsqrt %26 : vector<256x1xf32>
    %28 = vector.broadcast %27 : vector<256x1xf32> to vector<256x128xf32>
    %29 = arith.mulf %24, %28 : vector<256x128xf32>
    %30 = vector.broadcast %5 : vector<1x128xf32> to vector<256x128xf32>
    %31 = arith.mulf %29, %30 : vector<256x128xf32>
    %32 = vector.broadcast %6 : vector<1x128xf32> to vector<256x128xf32>
    %33 = arith.addf %31, %32 : vector<256x128xf32>
    %34 = arith.truncf %33 : vector<256x128xf32> to vector<256x128xbf16>
    %c0_9 = arith.constant 0 : index
    %c0_10 = arith.constant 0 : index
    %35 = vector.load %arg4[%c0_9, %c0_10] : memref<128x128xbf16, #tpu.memory_space<vmem>>, vector<128x128xbf16>
    %cst_11 = arith.constant dense<0.000000e+00> : vector<256x128xf32>
    %36 = tpu.matmul %34, %35, %cst_11 {dimension_numbers = #tpu.dot_dimension_numbers<[1], [0], [0], [1], [0, 0, 1, 1], [], []>} : vector<256x128xbf16>, vector<128x128xbf16>, vector<256x128xf32> -> vector<256x128xf32>
    %37 = vector.broadcast %9 : vector<1x128xf32> to vector<256x128xf32>
    %38 = arith.addf %36, %37 : vector<256x128xf32>
    %39 = arith.addf %1, %38 : vector<256x128xf32>
    %cst_12 = arith.constant dense<0.000000e+00> : vector<256xf32>
    %40 = vector.multi_reduction <add>, %39, %cst_12 [1] : vector<256x128xf32> to vector<256xf32>
    %41 = vector.shape_cast %40 : vector<256xf32> to vector<256x1xf32>
    %cst_13 = arith.constant 1.280000e+02 : f32
    %42 = vector.broadcast %cst_13 : f32 to vector<256x1xf32>
    %43 = arith.divf %41, %42 : vector<256x1xf32>
    %44 = arith.mulf %39, %39 : vector<256x128xf32>
    %cst_14 = arith.constant dense<0.000000e+00> : vector<256xf32>
    %45 = vector.multi_reduction <add>, %44, %cst_14 [1] : vector<256x128xf32> to vector<256xf32>
    %46 = vector.shape_cast %45 : vector<256xf32> to vector<256x1xf32>
    %cst_15 = arith.constant 1.280000e+02 : f32
    %47 = vector.broadcast %cst_15 : f32 to vector<256x1xf32>
    %48 = arith.divf %46, %47 : vector<256x1xf32>
    %49 = arith.mulf %43, %43 : vector<256x1xf32>
    %50 = arith.subf %48, %49 : vector<256x1xf32>
    %51 = vector.broadcast %43 : vector<256x1xf32> to vector<256x128xf32>
    %52 = arith.subf %39, %51 : vector<256x128xf32>
    %cst_16 = arith.constant 9.99999974E-6 : f32
    %53 = vector.broadcast %cst_16 : f32 to vector<256x1xf32>
    %54 = arith.addf %50, %53 : vector<256x1xf32>
    %55 = math.rsqrt %54 : vector<256x1xf32>
    %56 = vector.broadcast %55 : vector<256x1xf32> to vector<256x128xf32>
    %57 = arith.mulf %52, %56 : vector<256x128xf32>
    %58 = vector.broadcast %7 : vector<1x128xf32> to vector<256x128xf32>
    %59 = arith.mulf %57, %58 : vector<256x128xf32>
    %60 = vector.broadcast %8 : vector<1x128xf32> to vector<256x128xf32>
    %61 = arith.addf %59, %60 : vector<256x128xf32>
    %62 = arith.truncf %61 : vector<256x128xf32> to vector<256x128xbf16>
    %c0_17 = arith.constant 0 : index
    %c0_18 = arith.constant 0 : index
    %63 = vector.load %arg5[%c0_17, %c0_18] : memref<128x512xbf16, #tpu.memory_space<vmem>>, vector<128x512xbf16>
    %cst_19 = arith.constant dense<0.000000e+00> : vector<256x512xf32>
    %64 = tpu.matmul %62, %63, %cst_19 {dimension_numbers = #tpu.dot_dimension_numbers<[1], [0], [0], [1], [0, 0, 1, 1], [], []>} : vector<256x128xbf16>, vector<128x512xbf16>, vector<256x512xf32> -> vector<256x512xf32>
    %65 = vector.broadcast %11 : vector<1x512xf32> to vector<256x512xf32>
    %66 = arith.addf %64, %65 : vector<256x512xf32>
    %67 = arith.truncf %66 : vector<256x512xf32> to vector<256x512xbf16>
    %cst_20 = arith.constant 5.000000e-01 : bf16
    %68 = vector.broadcast %cst_20 : bf16 to vector<256x512xbf16>
    %69 = arith.mulf %68, %67 : vector<256x512xbf16>
    %70 = arith.mulf %67, %67 : vector<256x512xbf16>
    %71 = arith.mulf %70, %67 : vector<256x512xbf16>
    %cst_21 = arith.constant 4.467770e-02 : bf16
    %72 = vector.broadcast %cst_21 : bf16 to vector<256x512xbf16>
    %73 = arith.mulf %72, %71 : vector<256x512xbf16>
    %74 = arith.addf %67, %73 : vector<256x512xbf16>
    %cst_22 = arith.constant 7.968750e-01 : bf16
    %75 = vector.broadcast %cst_22 : bf16 to vector<256x512xbf16>
    %76 = arith.mulf %75, %74 : vector<256x512xbf16>
    %77 = math.tanh %76 : vector<256x512xbf16>
    %cst_23 = arith.constant 1.000000e+00 : bf16
    %78 = vector.broadcast %cst_23 : bf16 to vector<256x512xbf16>
    %79 = arith.addf %78, %77 : vector<256x512xbf16>
    %80 = arith.mulf %69, %79 : vector<256x512xbf16>
    %c0_24 = arith.constant 0 : index
    %c0_25 = arith.constant 0 : index
    %81 = vector.load %arg6[%c0_24, %c0_25] : memref<512x128xbf16, #tpu.memory_space<vmem>>, vector<512x128xbf16>
    %cst_26 = arith.constant dense<0.000000e+00> : vector<256x128xf32>
    %82 = tpu.matmul %80, %81, %cst_26 {dimension_numbers = #tpu.dot_dimension_numbers<[1], [0], [0], [1], [0, 0, 1, 1], [], []>} : vector<256x512xbf16>, vector<512x128xbf16>, vector<256x128xf32> -> vector<256x128xf32>
    %83 = vector.broadcast %10 : vector<1x128xf32> to vector<256x128xf32>
    %84 = arith.addf %82, %83 : vector<256x128xf32>
    %85 = arith.addf %39, %84 : vector<256x128xf32>
    %c0_27 = arith.constant 0 : index
    %c0_28 = arith.constant 0 : index
    %86 = vector.load %arg7[%c0_27, %c0_28] : memref<256x128xf32, #tpu.memory_space<vmem>>, vector<256x128xf32>
    tpu.vector_store %arg7[%c0_27, %c0_28], %85 {strides = array<i32>} : memref<256x128xf32, #tpu.memory_space<vmem>>, vector<256x128xf32>,
    return
  }
  func.func @transform_0(%arg0: i32) -> (i32, i32) {
    %c0_i32 = arith.constant 0 : i32
    %c0_i32_0 = arith.constant 0 : i32
    return %arg0, %c0_i32 : i32, i32
  }
  func.func @transform_1(%arg0: i32) -> (i32, i32) {
    %c0_i32 = arith.constant 0 : i32
    %c0_i32_0 = arith.constant 0 : i32
    return %arg0, %c0_i32 : i32, i32
  }
  func.func @transform_2(%arg0: i32) -> (i32, i32) {
    %c0_i32 = arith.constant 0 : i32
    %c0_i32_0 = arith.constant 0 : i32
    %c0_i32_1 = arith.constant 0 : i32
    return %c0_i32, %c0_i32_0 : i32, i32
  }
  func.func @transform_3(%arg0: i32) -> (i32, i32) {
    %c0_i32 = arith.constant 0 : i32
    %c0_i32_0 = arith.constant 0 : i32
    %c0_i32_1 = arith.constant 0 : i32
    return %c0_i32, %c0_i32_0 : i32, i32
  }
  func.func @transform_4(%arg0: i32) -> (i32, i32) {
    %c0_i32 = arith.constant 0 : i32
    %c0_i32_0 = arith.constant 0 : i32
    %c0_i32_1 = arith.constant 0 : i32
    return %c0_i32, %c0_i32_0 : i32, i32
  }
  func.func @transform_5(%arg0: i32) -> (i32, i32) {
    %c0_i32 = arith.constant 0 : i32
    %c0_i32_0 = arith.constant 0 : i32
    %c0_i32_1 = arith.constant 0 : i32
    return %c0_i32, %c0_i32_0 : i32, i32
  }
  func.func @transform_6(%arg0: i32) -> (i32, i32) {
    %c0_i32 = arith.constant 0 : i32
    %c0_i32_0 = arith.constant 0 : i32
    return %arg0, %c0_i32 : i32, i32
  }
}

</mosaic_0001>

<bundles_post_ra>
// kernel: tpu_custom_call.1
= control target key start
LH: loop header
LB: loop body
LE: loop exit
PB: predicated region body
PF: predicated region fallthrough
CT: control target
= control target key end

     0   :  { %11 = vsyncpa [#allocation3], 0  ;;  %s11727_s0 = inlined_call_operand.hbm [shape: bf16[256,128], index: 0, kind: input, shape index: {}]   ;;  %s11728_s1 = inlined_call_operand.hbm [shape: bf16[256,128], index: 1, kind: input, shape index: {}]   ;;  %s11729_s2 = inlined_call_operand.hbm [shape: f32[8,512], index: 2, kind: input, shape index: {}]   ;;  %s11730_s3 = inlined_call_operand.hbm [shape: bf16[128,128], index: 3, kind: input, shape index: {}]   ;;  %s11731_s4 = inlined_call_operand.hbm [shape: bf16[128,512], index: 4, kind: input, shape index: {}]   ;;  %s11732_s5 = inlined_call_operand.hbm [shape: bf16[512,128], index: 5, kind: input, shape index: {}]   ;;  %s11733_s6 = inlined_call_operand.hbm [shape: f32[256,128], index: 6, kind: output, shape index: {}]  }
   0x1   :  { %12 = vsyncpa [#allocation6], 0 }
   0x2   :  { %13 = vsyncpa [#allocation9], 0 }
   0x3   :  { %14 = vsyncpa [#allocation12], 0 }
   0x4   :  { %15 = vsyncpa [#allocation4], 0  ;;  %s33_s23 = sshll.u32 %s11728_s1, 4  ;;  %s7331_s24 = smov [#allocation5]   ;;  %s34_s23 = int_to_ptr.hbm [resolvable:$true] %s33_s23 }
   0x5   :  { %s35_s25 = sshll.u32 %s7331_s24, 4  ;;  %s57_s28 = sshll.u32 %s11730_s3, 4  ;;  %s36_s25 = int_to_ptr.vmem [resolvable:$true] %s35_s25  ;;  %s58_s28 = int_to_ptr.hbm [resolvable:$true] %s57_s28 }
   0x6   :  { %s7332_s29 = smov 64   ;;  %s7333_s30 = smov 4  }
   0x7   :  { %41 = dma.hbm_to_vmem [thread:$0]  %s34_s23, 2048, %s36_s25, [#allocation6], %s7332_s29, %s7332_s29, %s7333_s30  }
   0x8   :  { %s7334_s7 = smov [#allocation8]   ;;  %s20_s1 = sshll.u32 %s11727_s0, 4  ;;  %s21_s1 = int_to_ptr.hbm [resolvable:$true] %s20_s1 }
   0x9   :  { %s59_s8 = sshll.u32 %s7334_s7, 4  ;;  %s47_s12 = sshll.u32 %s11729_s2, 4  ;;  %s60_s8 = int_to_ptr.vmem [resolvable:$true] %s59_s8  ;;  %s48_s12 = int_to_ptr.hbm [resolvable:$true] %s47_s12 }
   0xa   :  { %65 = dma.hbm_to_vmem [thread:$0]  %s58_s28, 1024, %s60_s8, [#allocation9], %s7332_s29, %s7332_s29, %s7333_s30  }
   0xb   :  { %s7335_s13 = smov [#allocation2]   ;;  %s7336_s15 = smov [#allocation7]  }
   0xc   :  { %s22_s14 = sshll.u32 %s7335_s13, 4  ;;  %s49_s0 = sshll.u32 %s7336_s15, 4  ;;  %s23_s14 = int_to_ptr.vmem [resolvable:$true] %s22_s14  ;;  %s50_s0 = int_to_ptr.vmem [resolvable:$true] %s49_s0 }
   0xd   :  { %28 = dma.hbm_to_vmem [thread:$0]  %s21_s1, 2048, %s23_s14, [#allocation3], %s7332_s29, %s7332_s29, %s7333_s30  }
   0xe   :  { %s70_s18 = sshll.u32 %s11731_s4, 4  ;;  %s7337_s19 = smov [#allocation10]   ;;  %s71_s18 = int_to_ptr.hbm [resolvable:$true] %s70_s18 }
   0xf   :  { %52 = dma.hbm_to_vmem [thread:$0]  %s48_s12, 512, %s50_s0, [#allocation6]  }
  0x10   :  { %s72_s20 = sshll.u32 %s7337_s19, 4  ;;  %s83_s22 = sshll.u32 %s11732_s5, 4  ;;  %s73_s20 = int_to_ptr.vmem [resolvable:$true] %s72_s20  ;;  %s84_s22 = int_to_ptr.hbm [resolvable:$true] %s83_s22 }
  0x11   :  { %s7338_s23 = smov 256   ;;  %s7339_s24 = smov 16  }
  0x12   :  { %78 = dma.hbm_to_vmem [thread:$0]  %s71_s18, 4096, %s73_s20, [#allocation9], %s7338_s23, %s7338_s23, %s7339_s24  }
  0x13   :  { %s7340_s25 = smov [#allocation11]  }
  0x14   :  { %s85_s26 = sshll.u32 %s7340_s25, 4  ;;  %s86_s26 = int_to_ptr.vmem [resolvable:$true] %s85_s26 }
  0x15   :  { %91 = dma.hbm_to_vmem [thread:$0]  %s84_s22, 4096, %s86_s26, [#allocation12], %s7332_s29, %s7332_s29, %s7333_s30  }
  0x16   :  { %7321 = dma.done.wait [#allocation3], 2048  }
  0x17   :  { %7322 = vsyncadd [#allocation3], 4294965248 }
  0x18   :  { %7323 = dma.done.wait [#allocation6], 2560  }
  0x19   :  { %7324 = vsyncadd [#allocation6], 4294964736 }
  0x1a   :  { %7325 = dma.done.wait [#allocation9], 5120  }
  0x1b   :  { %7326 = vsyncadd [#allocation9], 4294962176 }
  0x1c   :  { %7327 = dma.done.wait [#allocation12], 4096  }
  0x1d   :  { %7328 = vsyncadd [#allocation12], 4294963200  ;;  %v6633_v0 = vld [vmem:[#allocation5] sm:$0xff]   ;;  %v6711_v1 = vld [vmem:[#allocation5 + $0x8] sm:$0xff]   ;;  %v7341_v46 = vmov 128.0   ;;  %s7342_s4 = smov [#allocation13]  }
  0x1e   :  { %v7410_v2 = vunpack.c.l.bf16 %v6633_v0  ;;  %v7412_v3 = vunpack.c.l.bf16 %v6711_v1  ;;  %v7418_v5 = vunpack.c.h.bf16 %v6633_v0  ;;  %v7420_v6 = vunpack.c.h.bf16 %v6711_v1  ;;  %v6712_v8 = vld [vmem:[#allocation5 + $0x10] sm:$0xff]   ;;  %v6713_v14 = vld [vmem:[#allocation5 + $0x18] sm:$0xff]   ;;  %v6714_v19 = vld [vmem:[#allocation5 + $0x20] sm:$0xff]   ;;  %s6190_s5 = sshll.u32 %s7342_s4, 4  ;;  %s6192_s29 = sshll.u32 %s11733_s6, 4  ;;  %s6191_s5 = int_to_ptr.vmem [resolvable:$true] %s6190_s5  ;;  %s6193_s29 = int_to_ptr.hbm [resolvable:$true] %s6192_s29 }
  0x1f   :  { %v7428_v10 = vunpack.c.l.bf16 %v6712_v8  ;;  %v7433_v12 = vunpack.c.h.bf16 %v6712_v8  ;;  %v7440_v16 = vunpack.c.l.bf16 %v6713_v14  ;;  %v7444_v18 = vunpack.c.h.bf16 %v6713_v14  ;;  %v6715_v23 = vld [vmem:[#allocation5 + $0x28] sm:$0xff]   ;;  %v6716_v29 = vld [vmem:[#allocation5 + $0x30] sm:$0xff]   ;;  %v6717_v34 = vld [vmem:[#allocation5 + $0x38] sm:$0xff]   ;;  %s7343_s30 = smov 128   ;;  %s7344_s7 = smov 8  }
  0x20   :  { %248 = vadd.xlane.f32.xlu0 %v7410_v2  ;;  %252 = vadd.xlane.f32.xlu2 %v7412_v3  ;;  %v351_v4 = vmul.f32 %v7410_v2, %v7410_v2  ;;  %v352_v7 = vmul.f32 %v7418_v5, %v7418_v5  ;;  %v353_v9 = vmul.f32 %v7412_v3, %v7412_v3  ;;  %v7450_v21 = vunpack.c.h.bf16 %v6714_v19  ;;  %v6718_v38 = vld [vmem:[#allocation5 + $0x40] sm:$0xff]   ;;  %v6719_v45 = vld [vmem:[#allocation5 + $0x48] sm:$0xff]   ;;  %v6503_v51 = vld [vmem:[#allocation8 + $0x38] sm:$0xff] }
  0x21   :  { %v354_v11 = vmul.f32 %v7420_v6, %v7420_v6  ;;  %v356_v13 = vmul.f32 %v7433_v12, %v7433_v12  ;;  %v355_v15 = vmul.f32 %v7428_v10, %v7428_v10  ;;  %v357_v17 = vmul.f32 %v7440_v16, %v7440_v16  ;;  %1106 = vmatpush.bf16.msra.mxu0 %v6503_v51  ;;  %v6502_v53 = vld [vmem:[#allocation8 + $0x30] sm:$0xff]  ;;  %v6722_v54 = vld [vmem:[#allocation5 + $0x60] sm:$0xff]   ;;  %v6501_v59 = vld [vmem:[#allocation8 + $0x28] sm:$0xff] }
  0x22   :  { %383 = vadd.xlane.f32.xlu1 %v351_v4  ;;  %v358_v20 = vmul.f32 %v7444_v18, %v7444_v18  ;;  %v7452_v22 = vunpack.c.l.bf16 %v6714_v19  ;;  %v7458_v25 = vunpack.c.l.bf16 %v6715_v23  ;;  %v360_v26 = vmul.f32 %v7450_v21, %v7450_v21  ;;  %6726 = vmatpush.bf16.msra.mxu1 %v6503_v51  ;;  %v6720_v61 = vld [vmem:[#allocation5 + $0x50] sm:$0xff]   ;;  %v6500_v62 = vld [vmem:[#allocation8 + $0x20] sm:$0xff] }
  0x23   :  { %v7463_v27 = vunpack.c.h.bf16 %v6715_v23  ;;  %v7470_v31 = vunpack.c.l.bf16 %v6716_v29  ;;  %v7474_v33 = vunpack.c.h.bf16 %v6716_v29  ;;  %v7480_v36 = vunpack.c.h.bf16 %v6717_v34  ;;  %6727 = vmatpush.bf16.msra.mxu2 %v6503_v51  ;;  %6728 = vmatpush.bf16.msra.mxu3 %v6503_v51 }
  0x24   :  { %v359_v24 = vmul.f32 %v7452_v22, %v7452_v22  ;;  %v361_v30 = vmul.f32 %v7458_v25, %v7458_v25  ;;  %v7482_v37 = vunpack.c.l.bf16 %v6717_v34  ;;  %v7488_v40 = vunpack.c.l.bf16 %v6718_v38 }
  0x25   :  { %v362_v28 = vmul.f32 %v7463_v27, %v7463_v27  ;;  %v363_v32 = vmul.f32 %v7470_v31, %v7470_v31  ;;  %v364_v35 = vmul.f32 %v7474_v33, %v7474_v33  ;;  %v366_v41 = vmul.f32 %v7480_v36, %v7480_v36  ;;  %1107 = vmatpush.bf16.msra.mxu0 %v6502_v53 }
  0x26   :  { %v365_v39 = vmul.f32 %v7482_v37, %v7482_v37  ;;  %v7493_v42 = vunpack.c.h.bf16 %v6718_v38  ;;  %v367_v44 = vmul.f32 %v7488_v40, %v7488_v40  ;;  %6764 = vrcp.f32 %v7341_v46  ;;  %6729 = vmatpush.bf16.msra.mxu1 %v6502_v53  ;;  %v6496_v38 = vld [vmem:[#allocation8] sm:$0xff] }
  0x27   :  { %v7500_v47 = vunpack.c.l.bf16 %v6719_v45  ;;  %v7504_v50 = vunpack.c.h.bf16 %v6719_v45  ;;  %v7510_v56 = vunpack.c.h.bf16 %v6722_v54  ;;  %v7512_v58 = vunpack.c.l.bf16 %v6722_v54  ;;  %6730 = vmatpush.bf16.msra.mxu2 %v6502_v53  ;;  %6731 = vmatpush.bf16.msra.mxu3 %v6502_v53 }
  0x28   :  { %250 = vadd.xlane.f32.xlu0 %v7418_v5  ;;  %254 = vadd.xlane.f32.xlu2 %v7420_v6  ;;  %v368_v43 = vmul.f32 %v7493_v42, %v7493_v42  ;;  %v7518_v0 = vunpack.c.l.bf16 %v6720_v61 }
  0x29   :  { %v369_v48 = vmul.f32 %v7500_v47, %v7500_v47  ;;  %v370_v55 = vmul.f32 %v7504_v50, %v7504_v50  ;;  %1108 = vmatpush.bf16.msra.mxu0 %v6501_v59  ;;  %v375_v63 = vmul.f32 %v7512_v58, %v7512_v58  ;;  %v376_v4 = vmul.f32 %v7510_v56, %v7510_v56 }
  0x2a   :  { %385 = vadd.xlane.f32.xlu1 %v352_v7  ;;  %6732 = vmatpush.bf16.msra.mxu1 %v6501_v59  ;;  %v6499_v7 = vld [vmem:[#allocation8 + $0x18] sm:$0xff]  ;;  %v371_v23 = vmul.f32 %v7518_v0, %v7518_v0 }
  0x2b   :  { %6733 = vmatpush.bf16.msra.mxu2 %v6501_v59  ;;  %6734 = vmatpush.bf16.msra.mxu3 %v6501_v59  ;;  %v6721_v59 = vld [vmem:[#allocation5 + $0x58] sm:$0xff]  }
  0x2c   :  { %v6765_v49 = vpop.eup %6764 }
  0x2d   :  { %v313_v52 = vmul.f32 128.0, %v6765_v49  ;;  %1109 = vmatpush.bf16.msra.mxu0 %v6500_v62  ;;  %vm317_vm0 = vweird.f32 %v6765_v49 }
  0x2e   :  { %6735 = vmatpush.bf16.msra.mxu1 %v6500_v62 }
  0x2f   :  { %v314_v57 = vsub.f32 1.0, %v313_v52  ;;  %6736 = vmatpush.bf16.msra.mxu2 %v6500_v62  ;;  %6737 = vmatpush.bf16.msra.mxu3 %v6500_v62 }
  0x30   :  { %387 = vadd.xlane.f32.xlu0 %v353_v9  ;;  %256 = vadd.xlane.f32.xlu2 %v7428_v10  ;;  %v7525_v9 = vunpack.c.h.bf16 %v6720_v61 }
  0x31   :  { %v315_v60 = vmul.f32 %v6765_v49, %v314_v57  ;;  %1110 = vmatpush.bf16.msra.mxu0 %v6499_v7 }
  0x32   :  { %389 = vadd.xlane.f32.xlu1 %v354_v11  ;;  %6738 = vmatpush.bf16.msra.mxu1 %v6499_v7  ;;  %v6498_v11 = vld [vmem:[#allocation8 + $0x10] sm:$0xff] }
  0x33   :  { %v316_v1 = vadd.f32 %v6765_v49, %v315_v60  ;;  %6739 = vmatpush.bf16.msra.mxu2 %v6499_v7  ;;  %6740 = vmatpush.bf16.msra.mxu3 %v6499_v7 }
  0x35   :  { %v7523_v8 = vsel %vm317_vm0, %v6765_v49, %v316_v1  ;;  %1111 = vmatpush.bf16.msra.mxu0 %v6498_v11 }
  0x36   :  { %6741 = vmatpush.bf16.msra.mxu1 %v6498_v11 }
  0x37   :  { %6742 = vmatpush.bf16.msra.mxu2 %v6498_v11  ;;  %6743 = vmatpush.bf16.msra.mxu3 %v6498_v11 }
  0x38   :  { %258 = vadd.xlane.f32.xlu0 %v7433_v12  ;;  %393 = vadd.xlane.f32.xlu2 %v356_v13 }
  0x3a   :  { %391 = vadd.xlane.f32.xlu1 %v355_v15 }
  0x40   :  { %260 = vadd.xlane.f32.xlu0 %v7440_v16  ;;  %395 = vadd.xlane.f32.xlu2 %v357_v17  ;;  %v372_v17 = vmul.f32 %v7525_v9, %v7525_v9 }
  0x42   :  { %262 = vadd.xlane.f32.xlu1 %v7444_v18 }
  0x48   :  { %397 = vadd.xlane.f32.xlu0 %v358_v20  ;;  %266 = vadd.xlane.f32.xlu2 %v7450_v21 }
  0x4a   :  { %264 = vadd.xlane.f32.xlu1 %v7452_v22 }
  0x50   :  { %399 = vadd.xlane.f32.xlu0 %v359_v24  ;;  %268 = vadd.xlane.f32.xlu2 %v7458_v25 }
  0x52   :  { %401 = vadd.xlane.f32.xlu1 %v360_v26  ;;  %v6723_v26 = vld [vmem:[#allocation5 + $0x68] sm:$0xff]  }
  0x53   :  { %v7553_v46 = vunpack.c.h.bf16 %v6723_v26 }
  0x55   :  { %v378_v62 = vmul.f32 %v7553_v46, %v7553_v46 }
  0x58   :  { %270 = vadd.xlane.f32.xlu0 %v7463_v27  ;;  %405 = vadd.xlane.f32.xlu2 %v362_v28  ;;  %v6497_v28 = vld [vmem:[#allocation8 + $0x8] sm:$0xff] }
  0x59   :  { %1112 = vmatpush.bf16.msra.mxu0 %v6497_v28  ;;  %6744 = vmatpush.bf16.msra.mxu1 %v6497_v28 }
  0x5a   :  { %403 = vadd.xlane.f32.xlu1 %v361_v30  ;;  %v7538_v30 = vunpack.c.l.bf16 %v6723_v26  ;;  %6745 = vmatpush.bf16.msra.mxu2 %v6497_v28 }
  0x5b   :  { %6746 = vmatpush.bf16.msra.mxu3 %v6497_v28 }
  0x5d   :  { %1113 = vmatpush.bf16.msra.mxu0 %v6496_v38  ;;  %6747 = vmatpush.bf16.msra.mxu1 %v6496_v38 }
  0x5e   :  { %6748 = vmatpush.bf16.msra.mxu2 %v6496_v38 }
  0x5f   :  { %6749 = vmatpush.bf16.msra.mxu3 %v6496_v38 }
  0x60   :  { %272 = vadd.xlane.f32.xlu0 %v7470_v31  ;;  %407 = vadd.xlane.f32.xlu2 %v363_v32 }
  0x62   :  { %274 = vadd.xlane.f32.xlu1 %v7474_v33 }
  0x68   :  { %409 = vadd.xlane.f32.xlu0 %v364_v35  ;;  %278 = vadd.xlane.f32.xlu2 %v7480_v36 }
  0x6a   :  { %276 = vadd.xlane.f32.xlu1 %v7482_v37 }
  0x70   :  { %411 = vadd.xlane.f32.xlu0 %v365_v39  ;;  %280 = vadd.xlane.f32.xlu2 %v7488_v40 }
  0x72   :  { %413 = vadd.xlane.f32.xlu1 %v366_v41  ;;  %v377_v41 = vmul.f32 %v7538_v30, %v7538_v30 }
  0x78   :  { %282 = vadd.xlane.f32.xlu0 %v7493_v42  ;;  %417 = vadd.xlane.f32.xlu2 %v368_v43 }
  0x7a   :  { %415 = vadd.xlane.f32.xlu1 %v367_v44 }
  0x80   :  { %284 = vadd.xlane.f32.xlu0 %v7500_v47  ;;  %419 = vadd.xlane.f32.xlu2 %v369_v48 }
  0x82   :  { %286 = vadd.xlane.f32.xlu1 %v7504_v50 }
  0x88   :  { %421 = vadd.xlane.f32.xlu0 %v370_v55  ;;  %298 = vadd.xlane.f32.xlu2 %v7510_v56 }
  0x8a   :  { %296 = vadd.xlane.f32.xlu1 %v7512_v58 }
  0x90   :  { %431 = vadd.xlane.f32.xlu0 %v375_v63  ;;  %288 = vadd.xlane.f32.xlu2 %v7518_v0  ;;  %v7572_v63 = vunpack.c.h.bf16 %v6721_v59 }
  0x92   :  { %433 = vadd.xlane.f32.xlu1 %v376_v4  ;;  %11924 = vst [vmem:[#allocation19_spill] sm:$0xff] %v7572_v63 }
  0x93   :  { %v249_v13 = vpop.xlane.xlu0 %248  ;;  %v253_v14 = vpop.xlane.xlu2 %252 }
  0x94   :  { %v7528_v15 = vmul.f32 %v7523_v8, %v249_v13  ;;  %v7549_v44 = vmul.f32 %v7523_v8, %v253_v14  ;;  %v7578_v13 = vunpack.c.l.bf16 %v6721_v59 }
  0x95   :  { %v384_v19 = vpop.xlane.xlu1 %383 }
  0x96   :  { %v479_v20 = vmul.f32 %v7528_v15, %v7528_v15  ;;  %v447_v24 = vmul.f32 %v384_v19, %v7523_v8  ;;  %v481_v52 = vmul.f32 %v7549_v44, %v7549_v44  ;;  %11925 = vst [vmem:[#allocation20_spill] sm:$0xff] %v7578_v13  ;;  %v373_v38 = vmul.f32 %v7578_v13, %v7578_v13 }
  0x98   :  { %290 = vadd.xlane.f32.xlu0 %v7525_v9  ;;  %425 = vadd.xlane.f32.xlu2 %v372_v17  ;;  %v511_v29 = vsub.f32 %v447_v24, %v479_v20  ;;  %v6724_v24 = vld [vmem:[#allocation5 + $0x70] sm:$0xff]  }
  0x9a   :  { %423 = vadd.xlane.f32.xlu1 %v371_v23  ;;  %v7540_v32 = vadd.f32 1e-05, %v511_v29 }
  0x9b   :  { %v251_v34 = vpop.xlane.xlu0 %250  ;;  %v255_v35 = vpop.xlane.xlu2 %254 }
  0x9c   :  { %v7543_v39 = vmul.f32 %v7523_v8, %v251_v34  ;;  %6766 = vrsqrt.f32 %v7540_v32  ;;  %v7558_v49 = vmul.f32 %v7523_v8, %v255_v35  ;;  %vm613_vm2 = vweird.f32 %v7540_v32 }
  0x9d   :  { %v386_v43 = vpop.xlane.xlu1 %385 }
  0x9e   :  { %v480_v45 = vmul.f32 %v7543_v39, %v7543_v39  ;;  %v448_v48 = vmul.f32 %v386_v43, %v7523_v8  ;;  %v482_v1 = vmul.f32 %v7558_v49, %v7558_v49 }
  0xa0   :  { %300 = vadd.xlane.f32.xlu0 %v7538_v30  ;;  %435 = vadd.xlane.f32.xlu2 %v377_v41  ;;  %v512_v51 = vsub.f32 %v448_v48, %v480_v45  ;;  %v7602_v48 = vunpack.c.l.bf16 %v6724_v24 }
  0xa2   :  { %302 = vadd.xlane.f32.xlu1 %v7553_v46  ;;  %v7563_v53 = vpop.eup %6766  ;;  %v7565_v54 = vadd.f32 1e-05, %v512_v51  ;;  %11926 = vst [vmem:[#allocation21_spill] sm:$0xff] %v7602_v48 }
  0xa3   :  { %v388_v55 = vpop.xlane.xlu0 %387  ;;  %v257_v57 = vpop.xlane.xlu2 %256  ;;  %v608_v60 = vmul.f32 %v7563_v53, %v7540_v32  ;;  %vm614_vm1 = vweird.f32 %v7563_v53 }
  0xa4   :  { %v449_v61 = vmul.f32 %v388_v55, %v7523_v8  ;;  %6768 = vrsqrt.f32 %v7565_v54  ;;  %v7584_v20 = vmul.f32 %v7523_v8, %v257_v57  ;;  %vm7619_vm3 = vmor %vm613_vm2, %vm614_vm1  ;;  %vm623_vm5 = vweird.f32 %v7565_v54 }
  0xa5   :  { %v390_v4 = vpop.xlane.xlu1 %389  ;;  %v609_v7 = vmul.f32 %v7563_v53, %v608_v60 }
  0xa6   :  { %v513_v11 = vsub.f32 %v449_v61, %v481_v52  ;;  %v450_v14 = vmul.f32 %v390_v4, %v7523_v8  ;;  %v483_v43 = vmul.f32 %v7584_v20, %v7584_v20  ;;  %v374_v61 = vmul.f32 %v7572_v63, %v7572_v63 }
  0xa7   :  { %v610_v17 = vmul.f32 0.5, %v609_v7 }
  0xa8   :  { %v7581_v19 = vadd.f32 1e-05, %v513_v11  ;;  %437 = vadd.xlane.f32.xlu0 %v378_v62  ;;  %294 = vadd.xlane.f32.xlu2 %v7572_v63  ;;  %v514_v23 = vsub.f32 %v450_v14, %v482_v1  ;;  %v7615_v62 = vunpack.c.h.bf16 %v6724_v24  ;;  %v543_v24 = vsub.f32 %v7410_v2, %v7528_v15 }
  0xa9   :  { %v611_v26 = vsub.f32 1.5, %v610_v17  ;;  %v244_v17 = vld [vmem:[#allocation7] sm:$0xff] }
  0xaa   :  { %6770 = vrsqrt.f32 %v7581_v19  ;;  %292 = vadd.xlane.f32.xlu1 %v7578_v13  ;;  %v7589_v28 = vpop.eup %6768  ;;  %v7591_v29 = vadd.f32 1e-05, %v514_v23  ;;  %11927 = vst [vmem:[#allocation22_spill] sm:$0xff] %v7615_v62  ;;  %vm633_vm11 = vweird.f32 %v7581_v19 }
  0xab   :  { %v259_v34 = vpop.xlane.xlu0 %258  ;;  %v394_v35 = vpop.xlane.xlu2 %393  ;;  %v618_v41 = vmul.f32 %v7589_v28, %v7565_v54  ;;  %v612_v51 = vmul.f32 %v7563_v53, %v611_v26  ;;  %vm624_vm4 = vweird.f32 %v7589_v28  ;;  %v544_v54 = vsub.f32 %v7418_v5, %v7543_v39 }
  0xac   :  { %v7600_v45 = vmul.f32 %v7523_v8, %v259_v34  ;;  %6772 = vrsqrt.f32 %v7591_v29  ;;  %v452_v52 = vmul.f32 %v394_v35, %v7523_v8  ;;  %vm7649_vm6 = vmor %vm623_vm5, %vm624_vm4  ;;  %vm643_vm7 = vweird.f32 %v7591_v29 }
  0xad   :  { %v392_v55 = vpop.xlane.xlu1 %391  ;;  %v619_v57 = vmul.f32 %v7589_v28, %v618_v41  ;;  %v616_v32 = vsel %vm7619_vm3, %v7563_v53, %v612_v51  ;;  %v380_v53 = vmul.f32 %v7615_v62, %v7615_v62 }
  0xae   :  { %v484_v59 = vmul.f32 %v7600_v45, %v7600_v45  ;;  %v451_v60 = vmul.f32 %v392_v55, %v7523_v8  ;;  %v7639_v55 = vperm.slane %v244_v17, 0  ;;  %v927_v51 = vmul.f32 %v616_v32, %v543_v24  ;;  %v6725_v32 = vld [vmem:[#allocation5 + $0x78] sm:$0xff]  }
  0xaf   :  { %v620_v7 = vmul.f32 0.5, %v619_v57 }
  0xb0   :  { %v7617_v1 = vpop.eup %6770  ;;  %v516_v11 = vsub.f32 %v452_v52, %v484_v59  ;;  %v515_v14 = vsub.f32 %v451_v60, %v483_v43  ;;  %427 = vadd.xlane.f32.xlu0 %v373_v38  ;;  %304 = vadd.xlane.f32.xlu2 %v7602_v48 }
  0xb1   :  { %v628_v23 = vmul.f32 %v7617_v1, %v7581_v19  ;;  %v621_v26 = vsub.f32 1.5, %v620_v7  ;;  %v379_v7 = vmul.f32 %v7602_v48, %v7602_v48  ;;  %vm634_vm9 = vweird.f32 %v7617_v1 }
  0xb2   :  { %v7631_v34 = vadd.f32 1e-05, %v516_v11  ;;  %v7633_v35 = vadd.f32 1e-05, %v515_v14  ;;  %429 = vadd.xlane.f32.xlu1 %v374_v61  ;;  %v7635_v38 = vpop.eup %6772  ;;  %vm7726_vm12 = vmor %vm633_vm11, %vm634_vm9 }
  0xb3   :  { %v629_v41 = vmul.f32 %v7617_v1, %v628_v23  ;;  %v261_v43 = vpop.xlane.xlu0 %260  ;;  %v396_v52 = vpop.xlane.xlu2 %395  ;;  %v622_v2 = vmul.f32 %v7589_v28, %v621_v26  ;;  %v638_v15 = vmul.f32 %v7635_v38, %v7591_v29  ;;  %vm644_vm8 = vweird.f32 %v7635_v38 }
  0xb4   :  { %6774 = vrsqrt.f32 %v7631_v34  ;;  %v7655_v61 = vmul.f32 %v7523_v8, %v261_v43  ;;  %v453_v4 = vmul.f32 %v396_v52, %v7523_v8  ;;  %v960_v43 = vmul.f32 %v7639_v55, %v927_v51  ;;  %vm7710_vm10 = vmor %vm643_vm7, %vm644_vm8 }
  0xb5   :  { %6776 = vrsqrt.f32 %v7633_v35  ;;  %v263_v57 = vpop.xlane.xlu1 %262  ;;  %v639_v60 = vmul.f32 %v7635_v38, %v638_v15  ;;  %v630_v11 = vmul.f32 0.5, %v629_v41  ;;  %v626_v23 = vsel %vm7649_vm6, %v7589_v28, %v622_v2 }
  0xb6   :  { %v7663_v14 = vmul.f32 %v7523_v8, %v263_v57  ;;  %v485_v26 = vmul.f32 %v7655_v61, %v7655_v61  ;;  %v7671_v52 = vperm.slane %v244_v17, 1  ;;  %v928_v5 = vmul.f32 %v626_v23, %v544_v54 }
  0xb7   :  { %v640_v24 = vmul.f32 0.5, %v639_v60  ;;  %v7677_v28 = vunpack.c.l.bf16 %v6725_v32  ;;  %v631_v57 = vsub.f32 1.5, %v630_v11  ;;  %vm663_vm13 = vweird.f32 %v7631_v34 }
  0xb8   :  { %306 = vadd.xlane.f32.xlu0 %v7615_v62  ;;  %441 = vadd.xlane.f32.xlu2 %v380_v53  ;;  %v517_v15 = vsub.f32 %v453_v4, %v485_v26  ;;  %v486_v51 = vmul.f32 %v7663_v14, %v7663_v14  ;;  %v961_v60 = vmul.f32 %v7639_v55, %v928_v5  ;;  %vm653_vm15 = vweird.f32 %v7633_v35 }
  0xb9   :  { %v641_v41 = vsub.f32 1.5, %v640_v24  ;;  %v381_v54 = vmul.f32 %v7677_v28, %v7677_v28  ;;  %v632_v13 = vmul.f32 %v7617_v1, %v631_v57 }
  0xba   :  { %v7674_v39 = vpop.eup %6774  ;;  %439 = vadd.xlane.f32.xlu1 %v379_v7  ;;  %v993_v7 = vadd.f32 %v7671_v52, %v960_v43  ;;  %v994_v48 = vadd.f32 %v7671_v52, %v961_v60  ;;  %v7697_v62 = vadd.f32 1e-05, %v517_v15  ;;  %v7702_v43 = vunpack.c.h.bf16 %v6725_v32 }
  0xbb   :  { %v7679_v2 = vpop.eup %6776  ;;  %v658_v17 = vmul.f32 %v7674_v39, %v7631_v34  ;;  %v398_v53 = vpop.xlane.xlu0 %397  ;;  %v642_v11 = vmul.f32 %v7635_v38, %v641_v41  ;;  %vm664_vm14 = vweird.f32 %v7674_v39 }
  0xbc   :  { %v267_v59 = vpop.xlane.xlu2 %266  ;;  %v648_v4 = vmul.f32 %v7679_v2, %v7633_v35  ;;  %v454_v24 = vmul.f32 %v398_v53, %v7523_v8  ;;  %v1025_v53 = vpack.c.bf16 %v994_v48, %v993_v7  ;;  %6778 = vrsqrt.f32 %v7697_v62  ;;  %vm7760_vm0 = vmor %vm663_vm13, %vm664_vm14 }
  0xbd   :  { %v659_v23 = vmul.f32 %v7674_v39, %v658_v17  ;;  %v265_v26 = vpop.xlane.xlu1 %264  ;;  %v7715_v15 = vmul.f32 %v7523_v8, %v267_v59  ;;  %v646_v29 = vsel %vm7710_vm10, %v7635_v38, %v642_v11  ;;  %v545_v59 = vsub.f32 %v7412_v3, %v7549_v44 }
  0xbe   :  { %v649_v5 = vmul.f32 %v7679_v2, %v648_v4  ;;  %v7700_v63 = vmul.f32 %v7523_v8, %v265_v26  ;;  %v518_v41 = vsub.f32 %v454_v24, %v486_v51  ;;  %v546_v51 = vsub.f32 %v7420_v6, %v7558_v49  ;;  %1114 = vmatmul.bf16.vlgmr.msra.gmra.mxu0 %v1025_v53 }
  0xbf   :  { %v660_v32 = vmul.f32 0.5, %v659_v23  ;;  %v636_v49 = vsel %vm7726_vm12, %v7617_v1, %v632_v13  ;;  %v488_v4 = vmul.f32 %v7715_v15, %v7715_v15  ;;  %v382_v11 = vmul.f32 %v7702_v43, %v7702_v43 }
  0xc0   :  { %308 = vadd.xlane.f32.xlu0 %v7677_v28  ;;  %443 = vadd.xlane.f32.xlu2 %v381_v54  ;;  %v7719_v57 = vadd.f32 1e-05, %v518_v41  ;;  %v650_v48 = vmul.f32 0.5, %v649_v5  ;;  %v487_v19 = vmul.f32 %v7700_v63, %v7700_v63  ;;  %v930_v54 = vmul.f32 %v646_v29, %v546_v51 }
  0xc1   :  { %v661_v23 = vsub.f32 1.5, %v660_v32  ;;  %v929_v5 = vmul.f32 %v636_v49, %v545_v59  ;;  %vm654_vm1 = vweird.f32 %v7679_v2  ;;  %v547_v35 = vsub.f32 %v7428_v10, %v7584_v20 }
  0xc2   :  { %310 = vadd.xlane.f32.xlu1 %v7702_v43  ;;  %6780 = vrsqrt.f32 %v7719_v57  ;;  %v651_v3 = vsub.f32 1.5, %v650_v48  ;;  %v7748_v13 = vpop.eup %6778  ;;  %v963_v53 = vmul.f32 %v7639_v55, %v930_v54  ;;  %vm7785_vm2 = vmor %vm653_vm15, %vm654_vm1  ;;  %vm673_vm4 = vweird.f32 %v7697_v62 }
  0xc3   :  { %v400_v38 = vpop.xlane.xlu0 %399  ;;  %v662_v29 = vmul.f32 %v7674_v39, %v661_v23  ;;  %v962_v60 = vmul.f32 %v7639_v55, %v929_v5  ;;  %v668_v48 = vmul.f32 %v7748_v13, %v7697_v62  ;;  %vm683_vm9 = vweird.f32 %v7719_v57 }
  0xc4   :  { %v269_v6 = vpop.xlane.xlu2 %268  ;;  %v455_v7 = vmul.f32 %v400_v38, %v7523_v8  ;;  %v652_v51 = vmul.f32 %v7679_v2, %v651_v3  ;;  %v996_v54 = vadd.f32 %v7671_v52, %v963_v53  ;;  %vm674_vm11 = vweird.f32 %v7748_v13 }
  0xc5   :  { %v402_v24 = vpop.xlane.xlu1 %401  ;;  %v7753_v41 = vmul.f32 %v7523_v8, %v269_v6  ;;  %v666_v3 = vsel %vm7760_vm0, %v7674_v39, %v662_v29  ;;  %v669_v5 = vmul.f32 %v7748_v13, %v668_v48  ;;  %vm7906_vm15 = vmor %vm673_vm4, %vm674_vm11 }
  0xc6   :  { %v519_v44 = vsub.f32 %v455_v7, %v487_v19  ;;  %v456_v26 = vmul.f32 %v402_v24, %v7523_v8 }
  0xc7   :  { %v489_v49 = vmul.f32 %v7753_v41, %v7753_v41 }
  0xc8   :  { %v7750_v1 = vadd.f32 1e-05, %v519_v44  ;;  %v520_v17 = vsub.f32 %v456_v26, %v488_v4  ;;  %445 = vadd.xlane.f32.xlu0 %v382_v11  ;;  %v7756_v32 = vpop.eup %6780  ;;  %v548_v11 = vsub.f32 %v7433_v12, %v7600_v45  ;;  %v995_v12 = vadd.f32 %v7671_v52, %v962_v60 }
  0xc9   :  { %v678_v19 = vmul.f32 %v7756_v32, %v7719_v57  ;;  %v656_v45 = vsel %vm7785_vm2, %v7679_v2, %v652_v51  ;;  %vm684_vm10 = vweird.f32 %v7756_v32 }
  0xca   :  { %6782 = vrsqrt.f32 %v7750_v1  ;;  %v7772_v59 = vadd.f32 1e-05, %v520_v17  ;;  %v1026_v34 = vpack.c.bf16 %v996_v54, %v995_v12  ;;  %vm693_vm3 = vweird.f32 %v7750_v1  ;;  %vm7885_vm13 = vmor %vm683_vm9, %vm684_vm10 }
  0xcb   :  { %v271_v38 = vpop.xlane.xlu0 %270  ;;  %v679_v17 = vmul.f32 %v7756_v32, %v678_v19  ;;  %v670_v19 = vmul.f32 0.5, %v669_v5 }
  0xcc   :  { %v406_v6 = vpop.xlane.xlu2 %405  ;;  %v7777_v4 = vmul.f32 %v7523_v8, %v271_v38  ;;  %6784 = vrsqrt.f32 %v7772_v59  ;;  %v932_v38 = vmul.f32 %v666_v3, %v548_v11  ;;  %vm703_vm6 = vweird.f32 %v7772_v59 }
  0xcd   :  { %v458_v7 = vmul.f32 %v406_v6, %v7523_v8  ;;  %v404_v24 = vpop.xlane.xlu1 %403  ;;  %v931_v6 = vmul.f32 %v656_v45, %v547_v35 }
  0xce   :  { %v490_v44 = vmul.f32 %v7777_v4, %v7777_v4  ;;  %v457_v26 = vmul.f32 %v404_v24, %v7523_v8  ;;  %1119 = vmatmul.bf16.gmra.mxu0 %v1026_v34  ;;  %v965_v3 = vmul.f32 %v7639_v55, %v932_v38 }
  0xcf   :  { %v964_v45 = vmul.f32 %v7639_v55, %v931_v6 }
  0xd0   :  { %v7804_v53 = vpop.eup %6782  ;;  %v522_v39 = vsub.f32 %v458_v7, %v490_v44  ;;  %v521_v29 = vsub.f32 %v457_v26, %v489_v49  ;;  %v680_v49 = vmul.f32 0.5, %v679_v17  ;;  %v552_v7 = vsub.f32 %v7450_v21, %v7715_v15 }
  0xd1   :  { %v688_v60 = vmul.f32 %v7804_v53, %v7750_v1  ;;  %vm694_vm5 = vweird.f32 %v7804_v53 }
  0xd2   :  { %v7812_v20 = vadd.f32 1e-05, %v522_v39  ;;  %v7814_v51 = vadd.f32 1e-05, %v521_v29  ;;  %v7816_v48 = vpop.eup %6784  ;;  %v681_v39 = vsub.f32 1.5, %v680_v49  ;;  %v551_v29 = vsub.f32 %v7452_v22, %v7700_v63  ;;  %vm7847_vm8 = vmor %vm693_vm3, %vm694_vm5 }
  0xd3   :  { %v689_v54 = vmul.f32 %v7804_v53, %v688_v60  ;;  %v273_v11 = vpop.xlane.xlu0 %272  ;;  %v698_v24 = vmul.f32 %v7816_v48, %v7772_v59  ;;  %v671_v60 = vsub.f32 1.5, %v670_v19  ;;  %vm704_vm7 = vweird.f32 %v7816_v48 }
  0xd4   :  { %v408_v23 = vpop.xlane.xlu2 %407  ;;  %6786 = vrsqrt.f32 %v7812_v20  ;;  %v7829_v26 = vmul.f32 %v7523_v8, %v273_v11  ;;  %v997_v22 = vadd.f32 %v7671_v52, %v964_v45  ;;  %v998_v63 = vadd.f32 %v7671_v52, %v965_v3  ;;  %vm7865_vm12 = vmor %vm703_vm6, %vm704_vm7 }
  0xd5   :  { %v690_v44 = vmul.f32 0.5, %v689_v54  ;;  %6788 = vrsqrt.f32 %v7814_v51  ;;  %v275_v12 = vpop.xlane.xlu1 %274  ;;  %v699_v35 = vmul.f32 %v7816_v48, %v698_v24  ;;  %v459_v5 = vmul.f32 %v408_v23, %v7523_v8 }
  0xd6   :  { %v7836_v17 = vmul.f32 %v7523_v8, %v275_v12  ;;  %v491_v38 = vmul.f32 %v7829_v26, %v7829_v26  ;;  %vm723_vm14 = vweird.f32 %v7812_v20  ;;  %vm713_vm0 = vweird.f32 %v7814_v51 }
  0xd7   :  { %v691_v34 = vsub.f32 1.5, %v690_v44  ;;  %v700_v54 = vmul.f32 0.5, %v699_v35  ;;  %v682_v44 = vmul.f32 %v7756_v32, %v681_v39 }
  0xd8   :  { %v523_v49 = vsub.f32 %v459_v5, %v491_v38  ;;  %v492_v24 = vmul.f32 %v7836_v17, %v7836_v17 }
  0xd9   :  { %v692_v6 = vmul.f32 %v7804_v53, %v691_v34  ;;  %v701_v19 = vsub.f32 1.5, %v700_v54  ;;  %v672_v54 = vmul.f32 %v7748_v13, %v671_v60 }
  0xda   :  { %v7853_v23 = vpop.eup %6786  ;;  %v7871_v45 = vadd.f32 1e-05, %v523_v49 }
  0xdb   :  { %v7859_v1 = vpop.eup %6788  ;;  %v718_v12 = vmul.f32 %v7853_v23, %v7812_v20  ;;  %v410_v35 = vpop.xlane.xlu0 %409  ;;  %v702_v34 = vmul.f32 %v7816_v48, %v701_v19  ;;  %v696_v59 = vsel %vm7847_vm8, %v7804_v53, %v692_v6  ;;  %vm724_vm1 = vweird.f32 %v7853_v23 }
  0xdc   :  { %v279_v5 = vpop.xlane.xlu2 %278  ;;  %v708_v38 = vmul.f32 %v7859_v1, %v7814_v51  ;;  %v460_v39 = vmul.f32 %v410_v35, %v7523_v8  ;;  %6790 = vrsqrt.f32 %v7871_v45  ;;  %v1027_v35 = vpack.c.bf16 %v998_v63, %v997_v22  ;;  %vm7941_vm3 = vmor %vm723_vm14, %vm724_vm1 }
  0xdd   :  { %v719_v19 = vmul.f32 %v7853_v23, %v718_v12  ;;  %v277_v2 = vpop.xlane.xlu1 %276  ;;  %v706_v57 = vsel %vm7865_vm12, %v7816_v48, %v702_v34  ;;  %v7900_v6 = vmul.f32 %v7523_v8, %v279_v5  ;;  %v935_v12 = vmul.f32 %v696_v59, %v551_v29 }
  0xde   :  { %v709_v10 = vmul.f32 %v7859_v1, %v708_v38  ;;  %v524_v11 = vsub.f32 %v460_v39, %v492_v24  ;;  %v7893_v53 = vmul.f32 %v7523_v8, %v277_v2  ;;  %v686_v48 = vsel %vm7885_vm13, %v7756_v32, %v682_v44  ;;  %1124 = vmatmul.bf16.gmra.mxu0 %v1027_v35 }
  0xdf   :  { %v720_v60 = vmul.f32 0.5, %v719_v19  ;;  %v936_v62 = vmul.f32 %v706_v57, %v552_v7  ;;  %v968_v29 = vmul.f32 %v7639_v55, %v935_v12  ;;  %vm714_vm2 = vweird.f32 %v7859_v1 }
  0xe0   :  { %v710_v2 = vmul.f32 0.5, %v709_v10  ;;  %v7911_v63 = vadd.f32 1e-05, %v524_v11  ;;  %v493_v10 = vmul.f32 %v7893_v53, %v7893_v53  ;;  %v494_v32 = vmul.f32 %v7900_v6, %v7900_v6  ;;  %vm7955_vm4 = vmor %vm713_vm0, %vm714_vm2 }
  0xe1   :  { %v721_v24 = vsub.f32 1.5, %v720_v60  ;;  %v969_v21 = vmul.f32 %v7639_v55, %v936_v62  ;;  %v676_v15 = vsel %vm7906_vm15, %v7748_v13, %v672_v54  ;;  %v11948_v7 = vsub.f32 %v7444_v18, %v7663_v14 }
  0xe2   :  { %v711_v3 = vsub.f32 1.5, %v710_v2  ;;  %6792 = vrsqrt.f32 %v7911_v63  ;;  %v7925_v5 = vpop.eup %6790  ;;  %v553_v18 = vsub.f32 %v7458_v25, %v7753_v41  ;;  %v1001_v54 = vadd.f32 %v7671_v52, %v968_v29 }
  0xe3   :  { %v412_v44 = vpop.xlane.xlu0 %411  ;;  %v934_v38 = vmul.f32 %v686_v48, %v11948_v7  ;;  %v722_v39 = vmul.f32 %v7853_v23, %v721_v24  ;;  %v728_v19 = vmul.f32 %v7925_v5, %v7871_v45  ;;  %v1002_v35 = vadd.f32 %v7671_v52, %v969_v21 }
  0xe4   :  { %v281_v34 = vpop.xlane.xlu2 %280  ;;  %v712_v49 = vmul.f32 %v7859_v1, %v711_v3  ;;  %v461_v13 = vmul.f32 %v412_v44, %v7523_v8  ;;  %v11953_v25 = vsub.f32 %v7440_v16, %v7655_v61  ;;  %v554_v51 = vsub.f32 %v7463_v27, %v7777_v4 }
  0xe5   :  { %v414_v20 = vpop.xlane.xlu1 %413  ;;  %v729_v11 = vmul.f32 %v7925_v5, %v728_v19  ;;  %v7969_v12 = vmul.f32 %v7523_v8, %v281_v34  ;;  %v1029_v22 = vpack.c.bf16 %v1002_v35, %v1001_v54  ;;  %v967_v2 = vmul.f32 %v7639_v55, %v934_v38 }
  0xe6   :  { %v525_v57 = vsub.f32 %v461_v13, %v493_v10  ;;  %v462_v60 = vmul.f32 %v414_v20, %v7523_v8  ;;  %v933_v41 = vmul.f32 %v676_v15, %v11953_v25  ;;  %v716_v29 = vsel %vm7955_vm4, %v7859_v1, %v712_v49 }
  0xe7   :  { %v726_v16 = vsel %vm7941_vm3, %v7853_v23, %v722_v39  ;;  %v730_v27 = vmul.f32 0.5, %v729_v11  ;;  %1134 = vmatmul.bf16.vlgmr.msra.gmra.mxu1 %v1029_v22  ;;  %v937_v1 = vmul.f32 %v716_v29, %v553_v18  ;;  %v495_v23 = vmul.f32 %v7969_v12, %v7969_v12 }
  0xe8   :  { %v7972_v48 = vpop.eup %6792  ;;  %v7974_v24 = vadd.f32 1e-05, %v525_v57  ;;  %v526_v62 = vsub.f32 %v462_v60, %v494_v32  ;;  %v966_v3 = vmul.f32 %v7639_v55, %v933_v41  ;;  %v938_v34 = vmul.f32 %v726_v16, %v554_v51 }
  0xe9   :  { %v738_v61 = vmul.f32 %v7972_v48, %v7911_v63  ;;  %v1000_v15 = vadd.f32 %v7671_v52, %v967_v2  ;;  %v731_v7 = vsub.f32 1.5, %v730_v27  ;;  %vm733_vm5 = vweird.f32 %v7871_v45 }
  0xea   :  { %6794 = vrsqrt.f32 %v7974_v24  ;;  %v7985_v4 = vadd.f32 1e-05, %v526_v62  ;;  %v999_v13 = vadd.f32 %v7671_v52, %v966_v3  ;;  %vm734_vm6 = vweird.f32 %v7925_v5 }
  0xeb   :  { %v739_v10 = vmul.f32 %v7972_v48, %v738_v61  ;;  %v283_v32 = vpop.xlane.xlu0 %282  ;;  %v970_v14 = vmul.f32 %v7639_v55, %v937_v1  ;;  %v971_v20 = vmul.f32 %v7639_v55, %v938_v34  ;;  %v732_v60 = vmul.f32 %v7925_v5, %v731_v7  ;;  %vm8016_vm9 = vmor %vm733_vm5, %vm734_vm6 }
  0xec   :  { %v418_v44 = vpop.xlane.xlu2 %417  ;;  %6796 = vrsqrt.f32 %v7985_v4  ;;  %v7993_v21 = vmul.f32 %v7523_v8, %v283_v32  ;;  %v1028_v57 = vpack.c.bf16 %v1000_v15, %v999_v13  ;;  %vm743_vm7 = vweird.f32 %v7911_v63 }
  0xed   :  { %v740_v38 = vmul.f32 0.5, %v739_v10  ;;  %v464_v39 = vmul.f32 %v418_v44, %v7523_v8  ;;  %v416_v59 = vpop.xlane.xlu1 %415  ;;  %vm744_vm8 = vweird.f32 %v7972_v48  ;;  %v1003_v27 = vadd.f32 %v7671_v52, %v970_v14 }
  0xee   :  { %v496_v49 = vmul.f32 %v7993_v21, %v7993_v21  ;;  %v463_v19 = vmul.f32 %v416_v59, %v7523_v8  ;;  %1129 = vmatmul.bf16.gmra.mxu0 %v1028_v57  ;;  %v1004_v61 = vadd.f32 %v7671_v52, %v971_v20  ;;  %v555_v3 = vsub.f32 %v7470_v31, %v7829_v26  ;;  %vm8033_vm10 = vmor %vm743_vm7, %vm744_vm8 }
  0xef   :  { %v741_v18 = vsub.f32 1.5, %v740_v38  ;;  %v736_v31 = vsel %vm8016_vm9, %v7925_v5, %v732_v60  ;;  %v556_v26 = vsub.f32 %v7474_v33, %v7836_v17  ;;  %v558_v5 = vsub.f32 %v7480_v36, %v7900_v6 }
  0xf0   :  { %v8005_v54 = vpop.eup %6794  ;;  %v528_v35 = vsub.f32 %v464_v39, %v496_v49  ;;  %v527_v11 = vsub.f32 %v463_v19, %v495_v23  ;;  %v1030_v7 = vpack.c.bf16 %v1004_v61, %v1003_v27  ;;  %v939_v59 = vmul.f32 %v736_v31, %v555_v3 }
  0xf1   :  { %v748_v25 = vmul.f32 %v8005_v54, %v7974_v24  ;;  %v742_v62 = vmul.f32 %v7972_v48, %v741_v18  ;;  %v557_v17 = vsub.f32 %v7482_v37, %v7893_v53  ;;  %vm753_vm11 = vweird.f32 %v7974_v24 }
  0xf2   :  { %v8012_v41 = vpop.eup %6796  ;;  %v8020_v22 = vadd.f32 1e-05, %v528_v35  ;;  %v8022_v2 = vadd.f32 1e-05, %v527_v11  ;;  %vm763_vm12 = vweird.f32 %v7985_v4  ;;  %vm754_vm13 = vweird.f32 %v8005_v54 }
  0xf3   :  { %v758_v29 = vmul.f32 %v8012_v41, %v7985_v4  ;;  %v285_v16 = vpop.xlane.xlu0 %284  ;;  %v749_v44 = vmul.f32 %v8005_v54, %v748_v25  ;;  %v746_v38 = vsel %vm8033_vm10, %v7972_v48, %v742_v62  ;;  %v972_v60 = vmul.f32 %v7639_v55, %v939_v59  ;;  %vm8099_vm2 = vmor %vm753_vm11, %vm754_vm13 }
  0xf4   :  { %v420_v45 = vpop.xlane.xlu2 %419  ;;  %6798 = vrsqrt.f32 %v8020_v22  ;;  %v8039_v32 = vmul.f32 %v7523_v8, %v285_v16  ;;  %v940_v18 = vmul.f32 %v746_v38, %v556_v26  ;;  %vm764_vm14 = vweird.f32 %v8012_v41 }
  0xf5   :  { %6800 = vrsqrt.f32 %v8022_v2  ;;  %v287_v1 = vpop.xlane.xlu1 %286  ;;  %v465_v34 = vmul.f32 %v420_v45, %v7523_v8  ;;  %v759_v63 = vmul.f32 %v8012_v41, %v758_v29  ;;  %v750_v49 = vmul.f32 0.5, %v749_v44  ;;  %vm8120_vm5 = vmor %vm763_vm12, %vm764_vm14 }
  0xf6   :  { %v497_v23 = vmul.f32 %v8039_v32, %v8039_v32  ;;  %v8053_v15 = vmul.f32 %v7523_v8, %v287_v1  ;;  %v973_v45 = vmul.f32 %v7639_v55, %v940_v18  ;;  %vm783_vm15 = vweird.f32 %v8020_v22 }
  0xf7   :  { %1139 = vmatmul.bf16.gmra.mxu1 %v1030_v7  ;;  %v760_v19 = vmul.f32 0.5, %v759_v63  ;;  %v751_v25 = vsub.f32 1.5, %v750_v49  ;;  %vm773_vm1 = vweird.f32 %v8022_v2 }
  0xf8   :  { %v529_v39 = vsub.f32 %v465_v34, %v497_v23  ;;  %v498_v20 = vmul.f32 %v8053_v15, %v8053_v15  ;;  %v1005_v34 = vadd.f32 %v7671_v52, %v972_v60  ;;  %v1006_v59 = vadd.f32 %v7671_v52, %v973_v45 }
  0xf9   :  { %v761_v16 = vsub.f32 1.5, %v760_v19  ;;  %v752_v31 = vmul.f32 %v8005_v54, %v751_v25  ;;  %v560_v19 = vsub.f32 %v7493_v42, %v7993_v21 }
  0xfa   :  { %v8060_v33 = vpop.eup %6798  ;;  %v8064_v13 = vadd.f32 1e-05, %v529_v39 }
  0xfb   :  { %v8066_v14 = vpop.eup %6800  ;;  %v778_v48 = vmul.f32 %v8060_v33, %v8020_v22  ;;  %v422_v35 = vpop.xlane.xlu0 %421  ;;  %vm784_vm0 = vweird.f32 %v8060_v33  ;;  %v762_v7 = vmul.f32 %v8012_v41, %v761_v16 }
  0xfc   :  { %v299_v11 = vpop.xlane.xlu2 %298  ;;  %v768_v57 = vmul.f32 %v8066_v14, %v8022_v2  ;;  %6802 = vrsqrt.f32 %v8064_v13  ;;  %v466_v62 = vmul.f32 %v422_v35, %v7523_v8  ;;  %vm774_vm3 = vweird.f32 %v8066_v14  ;;  %vm8109_vm4 = vmor %vm783_vm15, %vm784_vm0 }
  0xfd   :  { %v779_v51 = vmul.f32 %v8060_v33, %v778_v48  ;;  %v297_v29 = vpop.xlane.xlu1 %296  ;;  %v8091_v1 = vmul.f32 %v7523_v8, %v299_v11  ;;  %v559_v11 = vsub.f32 %v7488_v40, %v7969_v12  ;;  %vm8137_vm6 = vmor %vm773_vm1, %vm774_vm3  ;;  %vm793_vm7 = vweird.f32 %v8064_v13 }
  0xfe   :  { %v769_v27 = vmul.f32 %v8066_v14, %v768_v57  ;;  %v8084_v61 = vmul.f32 %v7523_v8, %v297_v29  ;;  %v530_v10 = vsub.f32 %v466_v62, %v498_v20  ;;  %v756_v2 = vsel %vm8099_vm2, %v8005_v54, %v752_v31 }
  0xff   :  { %v780_v3 = vmul.f32 0.5, %v779_v51  ;;  %v504_v21 = vmul.f32 %v8091_v1, %v8091_v1  ;;  %v1031_v62 = vpack.c.bf16 %v1006_v59, %v1005_v34  ;;  %v766_v29 = vsel %vm8120_vm5, %v8012_v41, %v762_v7 }
 0x100   :  { %v770_v44 = vmul.f32 0.5, %v769_v27  ;;  %v8104_v63 = vadd.f32 1e-05, %v530_v10  ;;  %v503_v24 = vmul.f32 %v8084_v61, %v8084_v61  ;;  %v942_v26 = vmul.f32 %v766_v29, %v558_v5 }
 0x101   :  { %v781_v22 = vsub.f32 1.5, %v780_v3 }
 0x102   :  { %v8106_v23 = vpop.eup %6802  ;;  %v771_v39 = vsub.f32 1.5, %v770_v44  ;;  %6804 = vrsqrt.f32 %v8104_v63  ;;  %vm803_vm10 = vweird.f32 %v8104_v63 }
 0x103   :  { %v782_v18 = vmul.f32 %v8060_v33, %v781_v22  ;;  %v788_v48 = vmul.f32 %v8106_v23, %v8064_v13  ;;  %v432_v20 = vpop.xlane.xlu0 %431  ;;  %vm794_vm8 = vweird.f32 %v8106_v23 }
 0x104   :  { %v289_v35 = vpop.xlane.xlu2 %288  ;;  %v772_v4 = vmul.f32 %v8066_v14, %v771_v39  ;;  %v471_v57 = vmul.f32 %v432_v20, %v7523_v8  ;;  %vm8182_vm9 = vmor %vm793_vm7, %vm794_vm8 }
 0x105   :  { %v789_v60 = vmul.f32 %v8106_v23, %v788_v48  ;;  %v434_v40 = vpop.xlane.xlu1 %433  ;;  %v786_v12 = vsel %vm8109_vm4, %v8060_v33, %v782_v18  ;;  %v8163_v54 = vmul.f32 %v7523_v8, %v289_v35 }
 0x106   :  { %v535_v25 = vsub.f32 %v471_v57, %v503_v24  ;;  %v472_v51 = vmul.f32 %v434_v40, %v7523_v8  ;;  %v776_v27 = vsel %vm8137_vm6, %v8066_v14, %v772_v4  ;;  %v944_v33 = vmul.f32 %v786_v12, %v560_v19 }
 0x107   :  { %v790_v16 = vmul.f32 0.5, %v789_v60  ;;  %v943_v10 = vmul.f32 %v776_v27, %v559_v11  ;;  %1144 = vmatmul.bf16.gmra.mxu1 %v1031_v62  ;;  %v941_v14 = vmul.f32 %v756_v2, %v557_v17  ;;  %v499_v6 = vmul.f32 %v8163_v54, %v8163_v54 }
 0x108   :  { %v8160_v45 = vadd.f32 1e-05, %v535_v25  ;;  %v536_v3 = vsub.f32 %v472_v51, %v504_v21  ;;  %v8165_v44 = vpop.eup %6804  ;;  %v977_v41 = vmul.f32 %v7639_v55, %v944_v33  ;;  %v561_v24 = vsub.f32 %v7500_v47, %v8039_v32 }
 0x109   :  { %v791_v34 = vsub.f32 1.5, %v790_v16  ;;  %v798_v31 = vmul.f32 %v8165_v44, %v8104_v63  ;;  %v976_v37 = vmul.f32 %v7639_v55, %v943_v10  ;;  %v974_v47 = vmul.f32 %v7639_v55, %v941_v14 }
 0x10a   :  { %6806 = vrsqrt.f32 %v8160_v45  ;;  %v8186_v38 = vadd.f32 1e-05, %v536_v3  ;;  %v1010_v53 = vadd.f32 %v7671_v52, %v977_v41  ;;  %v975_v32 = vmul.f32 %v7639_v55, %v942_v26 }
 0x10b   :  { %v792_v22 = vmul.f32 %v8106_v23, %v791_v34  ;;  %v291_v39 = vpop.xlane.xlu0 %290  ;;  %v799_v36 = vmul.f32 %v8165_v44, %v798_v31  ;;  %v1009_v49 = vadd.f32 %v7671_v52, %v976_v37  ;;  %vm804_vm11 = vweird.f32 %v8165_v44 }
 0x10c   :  { %v426_v17 = vpop.xlane.xlu2 %425  ;;  %v8194_v5 = vmul.f32 %v7523_v8, %v291_v39  ;;  %6808 = vrsqrt.f32 %v8186_v38  ;;  %v562_v25 = vsub.f32 %v7504_v50, %v8053_v15  ;;  %vm8226_vm12 = vmor %vm803_vm10, %vm804_vm11  ;;  %v1007_v16 = vadd.f32 %v7671_v52, %v974_v47 }
 0x10d   :  { %v468_v13 = vmul.f32 %v426_v17, %v7523_v8  ;;  %v424_v59 = vpop.xlane.xlu1 %423  ;;  %v800_v19 = vmul.f32 0.5, %v799_v36  ;;  %v796_v20 = vsel %vm8182_vm9, %v8106_v23, %v792_v22  ;;  %v1033_v35 = vpack.c.bf16 %v1010_v53, %v1009_v49 }
 0x10e   :  { %v500_v18 = vmul.f32 %v8194_v5, %v8194_v5  ;;  %v467_v48 = vmul.f32 %v424_v59, %v7523_v8  ;;  %v945_v60 = vmul.f32 %v796_v20, %v561_v24  ;;  %v1008_v27 = vadd.f32 %v7671_v52, %v975_v32 }
 0x10f   :  { %v801_v4 = vsub.f32 1.5, %v800_v19  ;;  %1154 = vmatmul.bf16.vlgmr.msra.gmra.mxu2 %v1033_v35  ;;  %vm853_vm13 = vweird.f32 %v8160_v45  ;;  %vm863_vm15 = vweird.f32 %v8186_v38  ;;  %v567_v35 = vsub.f32 %v7512_v58, %v8084_v61 }
 0x110   :  { %v8210_v11 = vpop.eup %6806  ;;  %v531_v42 = vsub.f32 %v467_v48, %v499_v6  ;;  %v532_v21 = vsub.f32 %v468_v13, %v500_v18  ;;  %v978_v10 = vmul.f32 %v7639_v55, %v945_v60  ;;  %v1032_v7 = vpack.c.bf16 %v1008_v27, %v1007_v16 }
 0x111   :  { %v848_v57 = vmul.f32 %v8210_v11, %v8160_v45  ;;  %v802_v23 = vmul.f32 %v8165_v44, %v801_v4  ;;  %vm854_vm14 = vweird.f32 %v8210_v11  ;;  %v568_v6 = vsub.f32 %v7510_v56, %v8091_v1 }
 0x112   :  { %v8216_v40 = vadd.f32 1e-05, %v531_v42  ;;  %v8218_v12 = vadd.f32 1e-05, %v532_v21  ;;  %v8220_v2 = vpop.eup %6808  ;;  %vm8268_vm1 = vmor %vm853_vm13, %vm854_vm14 }
 0x113   :  { %v849_v62 = vmul.f32 %v8210_v11, %v848_v57  ;;  %v301_v29 = vpop.xlane.xlu0 %300  ;;  %v858_v3 = vmul.f32 %v8220_v2, %v8186_v38  ;;  %v806_v14 = vsel %vm8226_vm12, %v8165_v44, %v802_v23  ;;  %vm864_vm0 = vweird.f32 %v8220_v2 }
 0x114   :  { %v436_v33 = vpop.xlane.xlu2 %435  ;;  %6810 = vrsqrt.f32 %v8216_v40  ;;  %v8238_v15 = vmul.f32 %v7523_v8, %v301_v29  ;;  %v946_v39 = vmul.f32 %v806_v14, %v562_v25  ;;  %v1011_v44 = vadd.f32 %v7671_v52, %v978_v10  ;;  %vm8284_vm2 = vmor %vm863_vm15, %vm864_vm0 }
 0x115   :  { %v850_v50 = vmul.f32 0.5, %v849_v62  ;;  %6812 = vrsqrt.f32 %v8218_v12  ;;  %v303_v63 = vpop.xlane.xlu1 %302  ;;  %v859_v34 = vmul.f32 %v8220_v2, %v858_v3  ;;  %v473_v31 = vmul.f32 %v436_v33, %v7523_v8 }
 0x116   :  { %v8243_v41 = vmul.f32 %v7523_v8, %v303_v63  ;;  %v505_v22 = vmul.f32 %v8238_v15, %v8238_v15  ;;  %v979_v17 = vmul.f32 %v7639_v55, %v946_v39  ;;  %vm813_vm3 = vweird.f32 %v8216_v40 }
 0x117   :  { %v851_v26 = vsub.f32 1.5, %v850_v50  ;;  %v860_v37 = vmul.f32 0.5, %v859_v34  ;;  %1149 = vmatmul.bf16.gmra.mxu1 %v1032_v7  ;;  %vm823_vm4 = vweird.f32 %v8218_v12  ;;  %v563_v63 = vsub.f32 %v7518_v0, %v8163_v54 }
 0x118   :  { %v537_v53 = vsub.f32 %v473_v31, %v505_v22  ;;  %v506_v24 = vmul.f32 %v8243_v41, %v8243_v41  ;;  %v1012_v1 = vadd.f32 %v7671_v52, %v979_v17  ;;  %v564_v10 = vsub.f32 %v7525_v9, %v8194_v5 }
 0x119   :  { %v861_v13 = vsub.f32 1.5, %v860_v37  ;;  %v852_v49 = vmul.f32 %v8210_v11, %v851_v26 }
 0x11a   :  { %v8257_v36 = vpop.eup %6810  ;;  %v8274_v48 = vadd.f32 1e-05, %v537_v53  ;;  %v1034_v61 = vpack.c.bf16 %v1012_v1, %v1011_v44 }
 0x11b   :  { %v8263_v59 = vpop.eup %6812  ;;  %v808_v18 = vmul.f32 %v8257_v36, %v8216_v40  ;;  %v438_v56 = vpop.xlane.xlu0 %437  ;;  %v862_v47 = vmul.f32 %v8220_v2, %v861_v13  ;;  %vm814_vm5 = vweird.f32 %v8257_v36  ;;  %v856_v23 = vsel %vm8268_vm1, %v8210_v11, %v852_v49 }
 0x11c   :  { %v295_v20 = vpop.xlane.xlu2 %294  ;;  %v818_v32 = vmul.f32 %v8263_v59, %v8218_v12  ;;  %v474_v4 = vmul.f32 %v438_v56, %v7523_v8  ;;  %6814 = vrsqrt.f32 %v8274_v48  ;;  %vm824_vm6 = vweird.f32 %v8263_v59  ;;  %vm8314_vm7 = vmor %vm813_vm3, %vm814_vm5 }
 0x11d   :  { %v809_v42 = vmul.f32 %v8257_v36, %v808_v18  ;;  %v293_v58 = vpop.xlane.xlu1 %292  ;;  %v866_v25 = vsel %vm8284_vm2, %v8220_v2, %v862_v47  ;;  %v8310_v29 = vmul.f32 %v7523_v8, %v295_v20  ;;  %v951_v27 = vmul.f32 %v856_v23, %v567_v35  ;;  %vm8330_vm8 = vmor %vm823_vm4, %vm824_vm6 }
 0x11e   :  { %v819_v21 = vmul.f32 %v8263_v59, %v818_v32  ;;  %v538_v38 = vsub.f32 %v474_v4, %v506_v24  ;;  %v8297_v57 = vmul.f32 %v7523_v8, %v293_v58  ;;  %v952_v3 = vmul.f32 %v866_v25, %v568_v6 }
 0x11f   :  { %v810_v60 = vmul.f32 0.5, %v809_v42  ;;  %1159 = vmatmul.bf16.gmra.mxu2 %v1034_v61  ;;  %v984_v14 = vmul.f32 %v7639_v55, %v951_v27  ;;  %v502_v9 = vmul.f32 %v8310_v29, %v8310_v29  ;;  %vm873_vm9 = vweird.f32 %v8274_v48 }
 0x120   :  { %v820_v51 = vmul.f32 0.5, %v819_v21  ;;  %v8307_v62 = vadd.f32 1e-05, %v538_v38  ;;  %v501_v2 = vmul.f32 %v8297_v57, %v8297_v57  ;;  %v985_v12 = vmul.f32 %v7639_v55, %v952_v3 }
 0x121   :  { %v811_v16 = vsub.f32 1.5, %v810_v60  ;;  %v1017_v7 = vadd.f32 %v7671_v52, %v984_v14 }
 0x122   :  { %v821_v11 = vsub.f32 1.5, %v820_v51  ;;  %6816 = vrsqrt.f32 %v8307_v62  ;;  %v6815_v50 = vpop.eup %6814  ;;  %v1018_v6 = vadd.f32 %v7671_v52, %v985_v12  ;;  %vm883_vm12 = vweird.f32 %v8307_v62 }
 0x123   :  { %v812_v40 = vmul.f32 %v8257_v36, %v811_v16  ;;  %v428_v31 = vpop.xlane.xlu0 %427  ;;  %v868_v0 = vmul.f32 %v6815_v50, %v8274_v48  ;;  %vm874_vm10 = vweird.f32 %v6815_v50 }
 0x124   :  { %v305_v26 = vpop.xlane.xlu2 %304  ;;  %v822_v22 = vmul.f32 %v8263_v59, %v821_v11  ;;  %v469_v54 = vmul.f32 %v428_v31, %v7523_v8  ;;  %v1037_v20 = vpack.c.bf16 %v1018_v6, %v1017_v7  ;;  %vm8366_vm11 = vmor %vm873_vm9, %vm874_vm10 }
 0x125   :  { %v430_v5 = vpop.xlane.xlu1 %429  ;;  %v816_v39 = vsel %vm8314_vm7, %v8257_v36, %v812_v40  ;;  %v869_v37 = vmul.f32 %v6815_v50, %v868_v0  ;;  %v8352_v13 = vmul.f32 %v7523_v8, %v305_v26 }
 0x126   :  { %v533_v53 = vsub.f32 %v469_v54, %v501_v2  ;;  %v470_v17 = vmul.f32 %v430_v5, %v7523_v8  ;;  %v826_v44 = vsel %vm8330_vm8, %v8263_v59, %v822_v22  ;;  %v947_v24 = vmul.f32 %v816_v39, %v563_v63  ;;  %1174 = vmatmul.bf16.vlgmr.msra.gmra.mxu3 %v1037_v20 }
 0x127   :  { %v870_v19 = vmul.f32 0.5, %v869_v37  ;;  %v948_v56 = vmul.f32 %v826_v44, %v564_v10  ;;  %v569_v59 = vsub.f32 %v7538_v30, %v8238_v15  ;;  %v507_v48 = vmul.f32 %v8352_v13, %v8352_v13 }
 0x128   :  { %v6817_v49 = vpop.eup %6816  ;;  %v8354_v18 = vadd.f32 1e-05, %v533_v53  ;;  %v534_v36 = vsub.f32 %v470_v17, %v502_v9  ;;  %v980_v35 = vmul.f32 %v7639_v55, %v947_v24  ;;  %v570_v63 = vsub.f32 %v7553_v46, %v8243_v41 }
 0x129   :  { %v878_v1 = vmul.f32 %v6817_v49, %v8307_v62  ;;  %v871_v47 = vsub.f32 1.5, %v870_v19  ;;  %v981_v42 = vmul.f32 %v7639_v55, %v948_v56  ;;  %vm884_vm13 = vweird.f32 %v6817_v49 }
 0x12a   :  { %6818 = vrsqrt.f32 %v8354_v18  ;;  %v8361_v45 = vadd.f32 1e-05, %v534_v36  ;;  %v1013_v30 = vadd.f32 %v7671_v52, %v980_v35  ;;  %vm8390_vm14 = vmor %vm883_vm12, %vm884_vm13  ;;  %vm833_vm15 = vweird.f32 %v8354_v18  ;;  %v11982_v36 = vld [vmem:[#allocation20_spill] sm:$0xff] }
 0x12b   :  { %v879_v4 = vmul.f32 %v6817_v49, %v878_v1  ;;  %v307_v15 = vpop.xlane.xlu0 %306  ;;  %v872_v61 = vmul.f32 %v6815_v50, %v871_v47  ;;  %v1014_v60 = vadd.f32 %v7671_v52, %v981_v42  ;;  %v565_v56 = vsub.f32 %v11982_v36, %v8297_v57 }
 0x12c   :  { %v442_v58 = vpop.xlane.xlu2 %441  ;;  %6820 = vrsqrt.f32 %v8361_v45  ;;  %v8377_v21 = vmul.f32 %v7523_v8, %v307_v15  ;;  %vm843_vm0 = vweird.f32 %v8361_v45 }
 0x12d   :  { %v880_v38 = vmul.f32 0.5, %v879_v4  ;;  %v476_v23 = vmul.f32 %v442_v58, %v7523_v8  ;;  %v440_v25 = vpop.xlane.xlu1 %439  ;;  %v876_v27 = vsel %vm8366_vm11, %v6815_v50, %v872_v61  ;;  %v1035_v11 = vpack.c.bf16 %v1014_v60, %v1013_v30  ;;  %v8438_v30 = vld [vmem:[#allocation7] sm:$0xff] }
 0x12e   :  { %v508_v51 = vmul.f32 %v8377_v21, %v8377_v21  ;;  %v475_v16 = vmul.f32 %v440_v25, %v7523_v8  ;;  %v953_v2 = vmul.f32 %v876_v27, %v569_v59  ;;  %v11985_v59 = vld [vmem:[#allocation19_spill] sm:$0xff]  ;;  %v8441_v15 = vperm.slane %v8438_v30, 4 }
 0x12f   :  { %v881_v33 = vsub.f32 1.5, %v880_v38  ;;  %1164 = vmatmul.bf16.gmra.mxu2 %v1035_v11  ;;  %v566_v47 = vsub.f32 %v11985_v59, %v8310_v29 }
 0x130   :  { %v6819_v3 = vpop.eup %6818  ;;  %v540_v40 = vsub.f32 %v476_v23, %v508_v51  ;;  %v539_v34 = vsub.f32 %v475_v16, %v507_v48  ;;  %v986_v0 = vmul.f32 %v7639_v55, %v953_v2 }
 0x131   :  { %v882_v31 = vmul.f32 %v6817_v49, %v881_v33  ;;  %v828_v14 = vmul.f32 %v6819_v3, %v8354_v18  ;;  %vm834_vm1 = vweird.f32 %v6819_v3 }
 0x132   :  { %v6821_v50 = vpop.eup %6820  ;;  %v8395_v26 = vadd.f32 1e-05, %v540_v40  ;;  %v8397_v22 = vadd.f32 1e-05, %v539_v34  ;;  %v1019_v53 = vadd.f32 %v7671_v52, %v986_v0  ;;  %vm8422_vm3 = vmor %vm833_vm15, %vm834_vm1 }
 0x133   :  { %v829_v46 = vmul.f32 %v6819_v3, %v828_v14  ;;  %v838_v41 = vmul.f32 %v6821_v50, %v8361_v45  ;;  %v886_v62 = vsel %vm8390_vm14, %v6817_v49, %v882_v31  ;;  %v309_v9 = vpop.xlane.xlu0 %308  ;;  %vm844_vm2 = vweird.f32 %v6821_v50  ;;  %v8413_v49 = vld [vmem:[#allocation2] sm:$0xff]  }
 0x134   :  { %v444_v54 = vpop.xlane.xlu2 %443  ;;  %6822 = vrsqrt.f32 %v8395_v26  ;;  %v954_v5 = vmul.f32 %v886_v62, %v570_v63  ;;  %v8410_v17 = vmul.f32 %v7523_v8, %v309_v9  ;;  %vm8433_vm4 = vmor %vm843_vm0, %vm844_vm2  ;;  %v6570_v18 = vunpack.c.l.bf16 %v8413_v49  ;;  %v11988_v62 = vld [vmem:[#allocation22_spill] sm:$0xff] }
 0x135   :  { %v830_v12 = vmul.f32 0.5, %v829_v46  ;;  %v839_v7 = vmul.f32 %v6821_v50, %v838_v41  ;;  %6824 = vrsqrt.f32 %v8397_v22  ;;  %v311_v39 = vpop.xlane.xlu1 %310  ;;  %v477_v44 = vmul.f32 %v444_v54, %v7523_v8 }
 0x136   :  { %v987_v37 = vmul.f32 %v7639_v55, %v954_v5  ;;  %v8416_v19 = vmul.f32 %v7523_v8, %v311_v39  ;;  %v509_v35 = vmul.f32 %v8410_v17, %v8410_v17  ;;  %vm903_vm5 = vweird.f32 %v8395_v26  ;;  %v11992_v39 = vld [vmem:[#allocation21_spill] sm:$0xff] }
 0x137   :  { %v831_v6 = vsub.f32 1.5, %v830_v12  ;;  %v840_v24 = vmul.f32 0.5, %v839_v7  ;;  %vm893_vm6 = vweird.f32 %v8397_v22  ;;  %v572_v9 = vsub.f32 %v11988_v62, %v8377_v21 }
 0x138   :  { %v1020_v20 = vadd.f32 %v7671_v52, %v987_v37  ;;  %v541_v61 = vsub.f32 %v477_v44, %v509_v35  ;;  %v510_v45 = vmul.f32 %v8416_v19, %v8416_v19  ;;  %v571_v37 = vsub.f32 %v11992_v39, %v8352_v13 }
 0x139   :  { %v832_v32 = vmul.f32 %v6819_v3, %v831_v6  ;;  %v841_v4 = vsub.f32 1.5, %v840_v24 }
 0x13a   :  { %v6823_v42 = vpop.eup %6822  ;;  %v1038_v58 = vpack.c.bf16 %v1020_v20, %v1019_v53  ;;  %v605_v16 = vadd.f32 1e-05, %v541_v61 }
 0x13b   :  { %v6825_v48 = vpop.eup %6824  ;;  %v842_v29 = vmul.f32 %v6821_v50, %v841_v4  ;;  %v898_v38 = vmul.f32 %v6823_v42, %v8395_v26  ;;  %v836_v60 = vsel %vm8422_vm3, %v6819_v3, %v832_v32  ;;  %v446_v23 = vpop.xlane.xlu0 %445  ;;  %vm904_vm7 = vweird.f32 %v6823_v42 }
 0x13c   :  { %v888_v25 = vmul.f32 %v6825_v48, %v8397_v22  ;;  %1179 = vmatmul.bf16.gmra.mxu3 %v1038_v58  ;;  %v949_v51 = vmul.f32 %v836_v60, %v565_v56  ;;  %v478_v11 = vmul.f32 %v446_v23, %v7523_v8  ;;  %6826 = vrsqrt.f32 %v605_v16  ;;  %v1115_v40 = vpop.f32.mrf.mxu0  ;;  %vm8462_vm9 = vmor %vm903_vm5, %vm904_vm7 }
 0x13d   :  { %v899_v27 = vmul.f32 %v6823_v42, %v898_v38  ;;  %v846_v33 = vsel %vm8433_vm4, %v6821_v50, %v842_v29  ;;  %vm894_vm8 = vweird.f32 %v6825_v48  ;;  %v1116_v14 = vadd.f32 %v1115_v40, %v8441_v15 }
 0x13e   :  { %v889_v2 = vmul.f32 %v6825_v48, %v888_v25  ;;  %v950_v63 = vmul.f32 %v846_v33, %v566_v47  ;;  %v982_v3 = vmul.f32 %v7639_v55, %v949_v51  ;;  %v542_v34 = vsub.f32 %v478_v11, %v510_v45  ;;  %vm8474_vm10 = vmor %vm893_vm6, %vm894_vm8  ;;  %v6700_v45 = vld [vmem:[#allocation2 + $0x28] sm:$0xff]  }
 0x13f   :  { %v900_v10 = vmul.f32 0.5, %v899_v27  ;;  %v8466_v12 = vadd.f32 %v6570_v18, %v1116_v14  ;;  %v6571_v22 = vunpack.c.h.bf16 %v8413_v49  ;;  %vm913_vm11 = vweird.f32 %v605_v16 }
 0x140   :  { %v890_v31 = vmul.f32 0.5, %v889_v2  ;;  %v983_v0 = vmul.f32 %v7639_v55, %v950_v63  ;;  %v1015_v46 = vadd.f32 %v7671_v52, %v982_v3  ;;  %v606_v41 = vadd.f32 1e-05, %v542_v34 }
 0x141   :  { %v901_v50 = vsub.f32 1.5, %v900_v10  ;;  %11991 = vst [vmem:[#allocation20_spill] sm:$0xff] %v8466_v12  ;;  %1227 = vadd.xlane.f32.xlu1 %v8466_v12  ;;  %v1323_v6 = vmul.f32 %v8466_v12, %v8466_v12  ;;  %v573_v38 = vsub.f32 %v7677_v28, %v8410_v17  ;;  %v574_v63 = vsub.f32 %v7702_v43, %v8416_v19 }
 0x142   :  { %v891_v5 = vsub.f32 1.5, %v890_v31  ;;  %v1016_v7 = vadd.f32 %v7671_v52, %v983_v0  ;;  %6828 = vrsqrt.f32 %v606_v41  ;;  %v6827_v26 = vpop.eup %6826  ;;  %vm923_vm14 = vweird.f32 %v606_v41 }
 0x143   :  { %v902_v53 = vmul.f32 %v6823_v42, %v901_v50  ;;  %v908_v36 = vmul.f32 %v6827_v26, %v605_v16  ;;  %1355 = vadd.xlane.f32.xlu0 %v1323_v6  ;;  %vm914_vm12 = vweird.f32 %v6827_v26 }
 0x144   :  { %v892_v44 = vmul.f32 %v6825_v48, %v891_v5  ;;  %v1036_v24 = vpack.c.bf16 %v1016_v7, %v1015_v46  ;;  %v1117_v20 = vpop.f32.mrf.mxu0  ;;  %vm8495_vm13 = vmor %vm913_vm11, %vm914_vm12 }
 0x145   :  { %v906_v13 = vsel %vm8462_vm9, %v6823_v42, %v902_v53  ;;  %v909_v35 = vmul.f32 %v6827_v26, %v908_v36  ;;  %v1118_v47 = vadd.f32 %v1117_v20, %v8441_v15 }
 0x146   :  { %1169 = vmatmul.bf16.gmra.mxu2 %v1036_v24  ;;  %v896_v56 = vsel %vm8474_vm10, %v6825_v48, %v892_v44  ;;  %v956_v1 = vmul.f32 %v906_v13, %v572_v9  ;;  %v6696_v48 = vld [vmem:[#allocation2 + $0x8] sm:$0xff]   ;;  %v6697_v9 = vld [vmem:[#allocation2 + $0x10] sm:$0xff]   ;;  %v6698_v24 = vld [vmem:[#allocation2 + $0x18] sm:$0xff]  }
 0x147   :  { %v955_v59 = vmul.f32 %v896_v56, %v571_v37  ;;  %v910_v57 = vmul.f32 0.5, %v909_v35  ;;  %v8489_v18 = vadd.f32 %v6571_v22, %v1118_v47  ;;  %v6574_v27 = vunpack.c.l.bf16 %v6696_v48 }
 0x148   :  { %v989_v32 = vmul.f32 %v7639_v55, %v956_v1  ;;  %v6829_v4 = vpop.eup %6828  ;;  %v6575_v0 = vunpack.c.h.bf16 %v6696_v48  ;;  %v6578_v7 = vunpack.c.l.bf16 %v6697_v9  ;;  %v6579_v53 = vunpack.c.h.bf16 %v6697_v9  ;;  %v6701_v9 = vld [vmem:[#allocation2 + $0x30] sm:$0xff]  }
 0x149   :  { %v988_v42 = vmul.f32 %v7639_v55, %v955_v59  ;;  %11995 = vst [vmem:[#allocation19_spill] sm:$0xff] %v8489_v18  ;;  %v918_v49 = vmul.f32 %v6829_v4, %v606_v41  ;;  %v911_v61 = vsub.f32 1.5, %v910_v57  ;;  %1229 = vadd.xlane.f32.xlu2 %v8489_v18  ;;  %v1324_v23 = vmul.f32 %v8489_v18, %v8489_v18 }
 0x14a   :  { %v1022_v58 = vadd.f32 %v7671_v52, %v989_v32  ;;  %vm924_vm15 = vweird.f32 %v6829_v4  ;;  %v6582_v13 = vunpack.c.l.bf16 %v6698_v24  ;;  %v6583_v59 = vunpack.c.h.bf16 %v6698_v24  ;;  %v6699_v32 = vld [vmem:[#allocation2 + $0x20] sm:$0xff]  }
 0x14b   :  { %v1021_v29 = vadd.f32 %v7671_v52, %v988_v42  ;;  %v919_v60 = vmul.f32 %v6829_v4, %v918_v49  ;;  %v912_v25 = vmul.f32 %v6827_v26, %v911_v61  ;;  %1357 = vadd.xlane.f32.xlu1 %v1324_v23  ;;  %vm925_vm0 = vmor %vm923_vm14, %vm924_vm15  ;;  %v6587_v57 = vunpack.c.h.bf16 %v6699_v32 }
 0x14c   :  { %v1120_v33 = vpop.f32.mrf.mxu0  ;;  %v6586_v61 = vunpack.c.l.bf16 %v6699_v32 }
 0x14d   :  { %v1039_v51 = vpack.c.bf16 %v1022_v58, %v1021_v29  ;;  %v920_v16 = vmul.f32 0.5, %v919_v60  ;;  %v916_v28 = vsel %vm8495_vm13, %v6827_v26, %v912_v25  ;;  %v1121_v11 = vadd.f32 %v1120_v33, %v8441_v15  ;;  %v6362_v33 = vld [vmem:[#allocation10 + $0xe8] sm:$0xf] }
 0x14e   :  { %v957_v2 = vmul.f32 %v916_v28, %v573_v38  ;;  %v6590_v25 = vunpack.c.l.bf16 %v6700_v45 }
 0x14f   :  { %1184 = vmatmul.bf16.gmra.mxu3 %v1039_v51  ;;  %v921_v17 = vsub.f32 1.5, %v920_v16  ;;  %v8507_v10 = vadd.f32 %v6574_v27, %v1121_v11  ;;  %v6532_v16 = vld [vmem:[#allocation10 + $0xe4] sm:$0xf]  ;;  %v6356_v27 = vld [vmem:[#allocation10 + $0xf0] sm:$0xf0] }
 0x150   :  { %v990_v40 = vmul.f32 %v7639_v55, %v957_v2  ;;  %v6359_v28 = vor.u32 %v6532_v16, %v6356_v27  ;;  %v6322_v16 = vld [vmem:[#allocation10 + $0xa0] sm:$0xf]  ;;  %v6526_v27 = vld [vmem:[#allocation10 + $0xac] sm:$0xf0] }
 0x151   :  { %v922_v3 = vmul.f32 %v6829_v4, %v921_v17  ;;  %11998 = vst [vmem:[#allocation22_spill] sm:$0xff] %v8507_v10  ;;  %1231 = vadd.xlane.f32.xlu2 %v8507_v10  ;;  %v1325_v34 = vmul.f32 %v8507_v10, %v8507_v10  ;;  %v6535_v17 = vld [vmem:[#allocation10 + $0xf4] sm:$0xf0] }
 0x152   :  { %v1023_v43 = vadd.f32 %v7671_v52, %v990_v40  ;;  %v6363_v11 = vor.u32 %v6535_v17, %v6362_v33  ;;  %2298 = vmatpush.bf16.msrb.mxu2 %v6359_v28  ;;  %v6323_v33 = vor.u32 %v6526_v27, %v6322_v16 }
 0x153   :  { %v926_v31 = vsel %vm925_vm0, %v6829_v4, %v922_v3  ;;  %1359 = vadd.xlane.f32.xlu1 %v1325_v34 }
 0x154   :  { %v958_v14 = vmul.f32 %v926_v31, %v574_v63  ;;  %v1122_v46 = vpop.f32.mrf.mxu0  ;;  %v6591_v63 = vunpack.c.h.bf16 %v6700_v45  ;;  %2387 = vmatpush.bf16.msrb.mxu3 %v6363_v11  ;;  %v6354_v31 = vld [vmem:[#allocation10 + $0xe0] sm:$0xf] }
 0x155   :  { %v1123_v19 = vadd.f32 %v1122_v46, %v8441_v15 }
 0x156   :  { %v991_v50 = vmul.f32 %v7639_v55, %v958_v14  ;;  %v6534_v14 = vld [vmem:[#allocation10 + $0xec] sm:$0xf0] }
 0x157   :  { %v8517_v62 = vadd.f32 %v6575_v0, %v1123_v19  ;;  %v6528_v0 = vld [vmem:[#allocation10 + $0xc4] sm:$0xf]  ;;  %v6346_v19 = vld [vmem:[#allocation10 + $0xc8] sm:$0xf] }
 0x158   :  { %v1024_v41 = vadd.f32 %v7671_v52, %v991_v50  ;;  %v6355_v50 = vor.u32 %v6534_v14, %v6354_v31 }
 0x159   :  { %11999 = vst [vmem:[#allocation21_spill] sm:$0xff] %v8517_v62  ;;  %1233 = vadd.xlane.f32.xlu0 %v8517_v62  ;;  %v1326_v5 = vmul.f32 %v8517_v62, %v8517_v62 }
 0x15a   :  { %v1040_v54 = vpack.c.bf16 %v1024_v41, %v1023_v43  ;;  %v6340_v43 = vld [vmem:[#allocation10 + $0xd0] sm:$0xf0]  ;;  %v6531_v41 = vld [vmem:[#allocation10 + $0xd4] sm:$0xf0]  ;;  %2209 = vmatpush.bf16.msrb.mxu1 %v6355_v50 }
 0x15b   :  { %1361 = vadd.xlane.f32.xlu2 %v1326_v5  ;;  %v6347_v5 = vor.u32 %v6531_v41, %v6346_v19 }
 0x15c   :  { %v1125_v39 = vpop.f32.mrf.mxu0 }
 0x15d   :  { %v1126_v55 = vadd.f32 %v1125_v39, %v8441_v15  ;;  %v6364_v39 = vld [vmem:[#allocation10 + $0xf8] sm:$0xf0]  ;;  %2388 = vmatpush.bf16.msrb.mxu3 %v6347_v5 }
 0x15f   :  { %1189 = vmatmul.bf16.gmra.mxu3 %v1040_v54  ;;  %v8523_v37 = vadd.f32 %v6578_v7, %v1126_v55  ;;  %v6343_v54 = vor.u32 %v6528_v0, %v6340_v43  ;;  %v6533_v7 = vld [vmem:[#allocation10 + $0xec] sm:$0xf]  ;;  %v6703_v0 = vld [vmem:[#allocation2 + $0x40] sm:$0xff]  }
 0x160   :  { %v6602_v19 = vunpack.c.l.bf16 %v6703_v0 }
 0x161   :  { %12000 = vst [vmem:[#allocation23_spill] sm:$0xff] %v8523_v37  ;;  %1235 = vadd.xlane.f32.xlu0 %v8523_v37  ;;  %v1327_v52 = vmul.f32 %v8523_v37, %v8523_v37  ;;  %2299 = vmatpush.bf16.msrb.mxu2 %v6343_v54 }
 0x163   :  { %1363 = vadd.xlane.f32.xlu2 %v1327_v52  ;;  %v6367_v52 = vor.u32 %v6533_v7, %v6364_v39 }
 0x164   :  { %v1135_v21 = vpop.f32.mrf.mxu1  ;;  %v1127_v26 = vpop.f32.mrf.mxu0 }
 0x165   :  { %v1128_v44 = vadd.f32 %v1127_v26, %v8441_v15  ;;  %v1136_v48 = vadd.f32 %v1135_v21, %v8441_v15  ;;  %2476 = vmatpush.bf16.msrb.mxu0 %v6367_v52  ;;  %v6704_v52 = vld [vmem:[#allocation2 + $0x48] sm:$0xff]  }
 0x167   :  { %v8529_v6 = vadd.f32 %v6579_v53, %v1128_v44  ;;  %v8551_v23 = vadd.f32 %v6586_v61, %v1136_v48  ;;  %v6594_v53 = vunpack.c.l.bf16 %v6701_v9 }
 0x169   :  { %12001 = vst [vmem:[#allocation24_spill] sm:$0xff] %v8529_v6  ;;  %1237 = vadd.xlane.f32.xlu1 %v8529_v6  ;;  %v1328_v36 = vmul.f32 %v8529_v6, %v8529_v6  ;;  %v1331_v40 = vmul.f32 %v8551_v23, %v8551_v23 }
 0x16a   :  { %12005 = vst [vmem:[#allocation28_spill] sm:$0xff] %v8551_v23 }
 0x16b   :  { %1365 = vadd.xlane.f32.xlu0 %v1328_v36  ;;  %v6338_v36 = vld [vmem:[#allocation10 + $0xc0] sm:$0xf] }
 0x16c   :  { %v1137_v22 = vpop.f32.mrf.mxu1  ;;  %v1130_v56 = vpop.f32.mrf.mxu0 }
 0x16d   :  { %v1131_v1 = vadd.f32 %v1130_v56, %v8441_v15  ;;  %v1138_v42 = vadd.f32 %v1137_v22, %v8441_v15  ;;  %v6524_v22 = vld [vmem:[#allocation10 + $0xa4] sm:$0xf] }
 0x16f   :  { %v8535_v20 = vadd.f32 %v6582_v13, %v1131_v1  ;;  %v8545_v29 = vadd.f32 %v6587_v57, %v1138_v42  ;;  %v6530_v13 = vld [vmem:[#allocation10 + $0xcc] sm:$0xf0]  ;;  %v6529_v57 = vld [vmem:[#allocation10 + $0xcc] sm:$0xf]  ;;  %v6348_v42 = vld [vmem:[#allocation10 + $0xd8] sm:$0xf0] }
 0x170   :  { %v6339_v1 = vor.u32 %v6530_v13, %v6338_v36  ;;  %v6351_v45 = vor.u32 %v6529_v57, %v6348_v42  ;;  %v6606_v36 = vunpack.c.l.bf16 %v6704_v52  ;;  %v6522_v57 = vld [vmem:[#allocation10 + $0x8c] sm:$0xf0] }
 0x171   :  { %12002 = vst [vmem:[#allocation25_spill] sm:$0xff] %v8535_v20  ;;  %1239 = vadd.xlane.f32.xlu1 %v8535_v20  ;;  %v1329_v35 = vmul.f32 %v8535_v20, %v8535_v20  ;;  %v1332_v55 = vmul.f32 %v8545_v29, %v8545_v29 }
 0x172   :  { %12004 = vst [vmem:[#allocation27_spill] sm:$0xff] %v8545_v29  ;;  %2210 = vmatpush.bf16.msrb.mxu1 %v6339_v1  ;;  %2477 = vmatpush.bf16.msrb.mxu0 %v6351_v45  ;;  %v6308_v1 = vld [vmem:[#allocation10 + $0x90] sm:$0xf0]  ;;  %v6607_v45 = vunpack.c.h.bf16 %v6704_v52 }
 0x173   :  { %1367 = vadd.xlane.f32.xlu0 %v1329_v35  ;;  %v6324_v35 = vld [vmem:[#allocation10 + $0xb0] sm:$0xf0] }
 0x174   :  { %v1140_v47 = vpop.f32.mrf.mxu1  ;;  %v1132_v4 = vpop.f32.mrf.mxu0  ;;  %v6327_v32 = vor.u32 %v6524_v22, %v6324_v35  ;;  %v6314_v35 = vld [vmem:[#allocation10 + $0x88] sm:$0xf] }
 0x175   :  { %v1133_v49 = vadd.f32 %v1132_v4, %v8441_v15  ;;  %v1141_v51 = vadd.f32 %v1140_v47, %v8441_v15  ;;  %v6527_v47 = vld [vmem:[#allocation10 + $0xb4] sm:$0xf0] }
 0x176   :  { %2300 = vmatpush.bf16.msrb.mxu2 %v6327_v32  ;;  %2211 = vmatpush.bf16.msrb.mxu1 %v6323_v33  ;;  %v6523_v32 = vld [vmem:[#allocation10 + $0x94] sm:$0xf0]  ;;  %v6516_v33 = vld [vmem:[#allocation10 + $0x64] sm:$0xf] }
 0x177   :  { %v8542_v58 = vadd.f32 %v6583_v59, %v1133_v49  ;;  %v8554_v2 = vadd.f32 %v6590_v25, %v1141_v51  ;;  %v6330_v59 = vld [vmem:[#allocation10 + $0xa8] sm:$0xf]  ;;  %v6595_v49 = vunpack.c.h.bf16 %v6701_v9  ;;  %v6702_v51 = vld [vmem:[#allocation2 + $0x38] sm:$0xff]   ;;  %v6603_v9 = vunpack.c.h.bf16 %v6703_v0 }
 0x178   :  { %v6331_v4 = vor.u32 %v6527_v47, %v6330_v59  ;;  %v6598_v28 = vunpack.c.l.bf16 %v6702_v51  ;;  %v6315_v42 = vor.u32 %v6523_v32, %v6314_v35  ;;  %v6515_v35 = vld [vmem:[#allocation10 + $0x54] sm:$0xf0] }
 0x179   :  { %12003 = vst [vmem:[#allocation26_spill] sm:$0xff] %v8542_v58  ;;  %1241 = vadd.xlane.f32.xlu2 %v8542_v58  ;;  %v1330_v38 = vmul.f32 %v8542_v58, %v8542_v58  ;;  %v1333_v56 = vmul.f32 %v8554_v2, %v8554_v2 }
 0x17a   :  { %12006 = vst [vmem:[#allocation29_spill] sm:$0xff] %v8554_v2  ;;  %2389 = vmatpush.bf16.msrb.mxu3 %v6331_v4  ;;  %v6306_v4 = vld [vmem:[#allocation10 + $0x80] sm:$0xf] }
 0x17b   :  { %1369 = vadd.xlane.f32.xlu1 %v1330_v38  ;;  %1245 = vadd.xlane.f32.xlu0 %v8545_v29 }
 0x17c   :  { %v1142_v60 = vpop.f32.mrf.mxu1 }
 0x17d   :  { %v1143_v3 = vadd.f32 %v1142_v60, %v8441_v15 }
 0x17e   :  { %2390 = vmatpush.bf16.msrb.mxu3 %v6315_v42  ;;  %v6513_v42 = vld [vmem:[#allocation10 + $0x4c] sm:$0xf] }
 0x17f   :  { %v8561_v46 = vadd.f32 %v6591_v63, %v1143_v3  ;;  %v6599_v3 = vunpack.c.h.bf16 %v6702_v51  ;;  %v8612_v51 = vld [vmem:[#allocation2 + $0x50] sm:$0xff]  }
 0x180   :  { %v6611_v32 = vunpack.c.h.bf16 %v8612_v51 }
 0x181   :  { %1243 = vadd.xlane.f32.xlu2 %v8551_v23  ;;  %12007 = vst [vmem:[#allocation30_spill] sm:$0xff] %v8561_v46  ;;  %v1334_v26 = vmul.f32 %v8561_v46, %v8561_v46 }
 0x183   :  { %1371 = vadd.xlane.f32.xlu1 %v1331_v40  ;;  %1247 = vadd.xlane.f32.xlu0 %v8554_v2 }
 0x184   :  { %v1145_v34 = vpop.f32.mrf.mxu1 }
 0x185   :  { %v1146_v21 = vadd.f32 %v1145_v34, %v8441_v15 }
 0x187   :  { %v8569_v24 = vadd.f32 %v6594_v53, %v1146_v21  ;;  %v6525_v53 = vld [vmem:[#allocation10 + $0xac] sm:$0xf]  ;;  %v6332_v21 = vld [vmem:[#allocation10 + $0xb8] sm:$0xf0] }
 0x189   :  { %1373 = vadd.xlane.f32.xlu2 %v1332_v55  ;;  %12008 = vst [vmem:[#allocation31_spill] sm:$0xff] %v8569_v24  ;;  %v1335_v38 = vmul.f32 %v8569_v24, %v8569_v24 }
 0x18b   :  { %1249 = vadd.xlane.f32.xlu1 %v8561_v46  ;;  %1377 = vadd.xlane.f32.xlu0 %v1334_v26 }
 0x18c   :  { %v1147_v44 = vpop.f32.mrf.mxu1 }
 0x18d   :  { %v1148_v61 = vadd.f32 %v1147_v44, %v8441_v15  ;;  %v6335_v44 = vor.u32 %v6525_v53, %v6332_v21  ;;  %v6512_v21 = vld [vmem:[#allocation10 + $0x44] sm:$0xf] }
 0x18f   :  { %v8577_v25 = vadd.f32 %v6595_v49, %v1148_v61  ;;  %2478 = vmatpush.bf16.msrb.mxu0 %v6335_v44  ;;  %v6307_v49 = vor.u32 %v6522_v57, %v6306_v4  ;;  %v6521_v61 = vld [vmem:[#allocation10 + $0x8c] sm:$0xf]  ;;  %v6276_v44 = vld [vmem:[#allocation10 + $0x50] sm:$0xf0] }
 0x191   :  { %1375 = vadd.xlane.f32.xlu2 %v1333_v56  ;;  %12009 = vst [vmem:[#allocation32_spill] sm:$0xff] %v8577_v25  ;;  %v1336_v63 = vmul.f32 %v8577_v25, %v8577_v25  ;;  %v6520_v56 = vld [vmem:[#allocation10 + $0x84] sm:$0xf]  ;;  %2212 = vmatpush.bf16.msrb.mxu1 %v6307_v49  ;;  %v6284_v49 = vld [vmem:[#allocation10 + $0x58] sm:$0xf0] }
 0x192   :  { %v1155_v48 = vpop.f32.mrf.mxu2  ;;  %v6311_v47 = vor.u32 %v6520_v56, %v6308_v1  ;;  %v6279_v1 = vor.u32 %v6512_v21, %v6276_v44  ;;  %v6504_v21 = vld [vmem:[#allocation10 + $0x4] sm:$0xf]  ;;  %v6244_v44 = vld [vmem:[#allocation10 + $0x10] sm:$0xf0] }
 0x193   :  { %1251 = vadd.xlane.f32.xlu1 %v8569_v24  ;;  %1379 = vadd.xlane.f32.xlu0 %v1335_v38  ;;  %v1156_v41 = vadd.f32 %v1155_v48, %v8441_v15  ;;  %v6316_v48 = vld [vmem:[#allocation10 + $0x98] sm:$0xf0] }
 0x194   :  { %v1150_v60 = vpop.f32.mrf.mxu1  ;;  %2301 = vmatpush.bf16.msrb.mxu2 %v6311_v47  ;;  %v6319_v27 = vor.u32 %v6521_v61, %v6316_v48  ;;  %v6514_v47 = vld [vmem:[#allocation10 + $0x4c] sm:$0xf0] }
 0x195   :  { %v1151_v17 = vadd.f32 %v1150_v60, %v8441_v15  ;;  %v8594_v5 = vadd.f32 %v6602_v19, %v1156_v41  ;;  %v6300_v19 = vld [vmem:[#allocation10 + $0x78] sm:$0xf0] }
 0x196   :  { %2479 = vmatpush.bf16.msrb.mxu0 %v6319_v27  ;;  %v6508_v27 = vld [vmem:[#allocation10 + $0x24] sm:$0xf] }
 0x197   :  { %v8584_v31 = vadd.f32 %v6598_v28, %v1151_v17  ;;  %12012 = vst [vmem:[#allocation35_spill] sm:$0xff] %v8594_v5  ;;  %v1339_v59 = vmul.f32 %v8594_v5, %v8594_v5  ;;  %v6292_v28 = vld [vmem:[#allocation10 + $0x70] sm:$0xf0]  ;;  %v6298_v17 = vld [vmem:[#allocation10 + $0x68] sm:$0xf] }
 0x199   :  { %1253 = vadd.xlane.f32.xlu2 %v8577_v25  ;;  %12010 = vst [vmem:[#allocation33_spill] sm:$0xff] %v8584_v31  ;;  %v1337_v43 = vmul.f32 %v8584_v31, %v8584_v31 }
 0x19a   :  { %v1157_v11 = vpop.f32.mrf.mxu2 }
 0x19b   :  { %1381 = vadd.xlane.f32.xlu1 %v1336_v63  ;;  %v1158_v54 = vadd.f32 %v1157_v11, %v8441_v15  ;;  %v6295_v11 = vor.u32 %v6516_v33, %v6292_v28  ;;  %v6519_v63 = vld [vmem:[#allocation10 + $0x74] sm:$0xf0]  ;;  %v6260_v33 = vld [vmem:[#allocation10 + $0x30] sm:$0xf0] }
 0x19c   :  { %v1152_v40 = vpop.f32.mrf.mxu1  ;;  %v6299_v0 = vor.u32 %v6519_v63, %v6298_v17  ;;  %v6511_v63 = vld [vmem:[#allocation10 + $0x34] sm:$0xf0] }
 0x19d   :  { %v1153_v34 = vadd.f32 %v1152_v40, %v8441_v15  ;;  %v8599_v39 = vadd.f32 %v6603_v9, %v1158_v54  ;;  %v6518_v40 = vld [vmem:[#allocation10 + $0x6c] sm:$0xf0]  ;;  %2302 = vmatpush.bf16.msrb.mxu2 %v6295_v11  ;;  %v6263_v11 = vor.u32 %v6508_v27, %v6260_v33 }
 0x19e   :  { %2391 = vmatpush.bf16.msrb.mxu3 %v6299_v0 }
 0x19f   :  { %v8586_v14 = vadd.f32 %v6599_v3, %v1153_v34  ;;  %12013 = vst [vmem:[#allocation36_spill] sm:$0xff] %v8599_v39  ;;  %v1340_v22 = vmul.f32 %v8599_v39, %v8599_v39  ;;  %v6290_v3 = vld [vmem:[#allocation10 + $0x60] sm:$0xf] }
 0x1a1   :  { %12011 = vst [vmem:[#allocation34_spill] sm:$0xff] %v8586_v14  ;;  %1257 = vadd.xlane.f32.xlu0 %v8586_v14  ;;  %1255 = vadd.xlane.f32.xlu2 %v8584_v31  ;;  %v1338_v7 = vmul.f32 %v8586_v14, %v8586_v14 }
 0x1a2   :  { %v1160_v50 = vpop.f32.mrf.mxu2  ;;  %2303 = vmatpush.bf16.msrb.mxu2 %v6279_v1 }
 0x1a3   :  { %1383 = vadd.xlane.f32.xlu1 %v1337_v43  ;;  %v1161_v13 = vadd.f32 %v1160_v50, %v8441_v15  ;;  %v6291_v50 = vor.u32 %v6518_v40, %v6290_v3  ;;  %v6517_v43 = vld [vmem:[#allocation10 + $0x6c] sm:$0xf]  ;;  %v6258_v3 = vld [vmem:[#allocation10 + $0x20] sm:$0xf] }
 0x1a5   :  { %v8609_v38 = vadd.f32 %v6606_v36, %v1161_v13  ;;  %2213 = vmatpush.bf16.msrb.mxu1 %v6291_v50  ;;  %v6282_v36 = vld [vmem:[#allocation10 + $0x48] sm:$0xf]  ;;  %v6510_v50 = vld [vmem:[#allocation10 + $0x2c] sm:$0xf0] }
 0x1a6   :  { %v6283_v4 = vor.u32 %v6515_v35, %v6282_v36  ;;  %2304 = vmatpush.bf16.msrb.mxu2 %v6263_v11  ;;  %v6507_v35 = vld [vmem:[#allocation10 + $0x14] sm:$0xf0] }
 0x1a7   :  { %12014 = vst [vmem:[#allocation37_spill] sm:$0xff] %v8609_v38  ;;  %v1341_v53 = vmul.f32 %v8609_v38, %v8609_v38 }
 0x1a8   :  { %2392 = vmatpush.bf16.msrb.mxu3 %v6283_v4 }
 0x1a9   :  { %1259 = vadd.xlane.f32.xlu0 %v8594_v5  ;;  %1385 = vadd.xlane.f32.xlu2 %v1338_v7  ;;  %v8601_v26 = vpop.f32.mrf.mxu3  ;;  %v6303_v7 = vor.u32 %v6517_v43, %v6300_v19  ;;  %v6509_v43 = vld [vmem:[#allocation10 + $0x2c] sm:$0xf]  ;;  %v6268_v19 = vld [vmem:[#allocation10 + $0x38] sm:$0xf0] }
 0x1aa   :  { %v1162_v55 = vpop.f32.mrf.mxu2  ;;  %v6271_v36 = vor.u32 %v6509_v43, %v6268_v19 }
 0x1ab   :  { %1261 = vadd.xlane.f32.xlu1 %v8599_v39  ;;  %v1163_v60 = vadd.f32 %v1162_v55, %v8441_v15  ;;  %v6610_v55 = vunpack.c.l.bf16 %v8612_v51  ;;  %2480 = vmatpush.bf16.msrb.mxu0 %v6303_v7  ;;  %v6266_v51 = vld [vmem:[#allocation10 + $0x28] sm:$0xf] }
 0x1ac   :  { %v6267_v0 = vor.u32 %v6511_v63, %v6266_v51 }
 0x1ad   :  { %v8615_v41 = vadd.f32 %v6607_v45, %v1163_v60  ;;  %v6287_v60 = vor.u32 %v6513_v42, %v6284_v49  ;;  %v6505_v42 = vld [vmem:[#allocation10 + $0xc] sm:$0xf]  ;;  %v6252_v49 = vld [vmem:[#allocation10 + $0x18] sm:$0xf0] }
 0x1ae   :  { %2393 = vmatpush.bf16.msrb.mxu3 %v6267_v0 }
 0x1af   :  { %12015 = vst [vmem:[#allocation38_spill] sm:$0xff] %v8615_v41  ;;  %v1342_v48 = vmul.f32 %v8615_v41, %v8615_v41  ;;  %2481 = vmatpush.bf16.msrb.mxu0 %v6287_v60 }
 0x1b1   :  { %1389 = vadd.xlane.f32.xlu0 %v1340_v22  ;;  %1387 = vadd.xlane.f32.xlu2 %v1339_v59  ;;  %v8617_v9 = vpop.f32.mrf.mxu3  ;;  %v6274_v59 = vld [vmem:[#allocation10 + $0x40] sm:$0xf] }
 0x1b2   :  { %v1165_v16 = vpop.f32.mrf.mxu2  ;;  %v6275_v57 = vor.u32 %v6514_v47, %v6274_v59  ;;  %v6242_v59 = vld [vmem:[#allocation10] sm:$0xf]  ;;  %v6506_v47 = vld [vmem:[#allocation10 + $0xc] sm:$0xf0] }
 0x1b3   :  { %1263 = vadd.xlane.f32.xlu1 %v8609_v38  ;;  %v1166_v13 = vadd.f32 %v1165_v16, %v8441_v15  ;;  %2482 = vmatpush.bf16.msrb.mxu0 %v6271_v36 }
 0x1b4   :  { %v1228_v34 = vpop.xlane.xlu1 %1227  ;;  %2214 = vmatpush.bf16.msrb.mxu1 %v6275_v57  ;;  %v6243_v57 = vor.u32 %v6506_v47, %v6242_v59 }
 0x1b5   :  { %v8620_v54 = vmul.f32 %v1228_v34, %v7523_v8  ;;  %v8634_v28 = vadd.f32 %v6610_v55, %v1166_v13  ;;  %v6250_v13 = vld [vmem:[#allocation10 + $0x8] sm:$0xf] }
 0x1b6   :  { %v1356_v52 = vpop.xlane.xlu0 %1355  ;;  %v6251_v4 = vor.u32 %v6507_v35, %v6250_v13 }
 0x1b7   :  { %v1451_v22 = vmul.f32 %v8620_v54, %v8620_v54  ;;  %v1419_v56 = vmul.f32 %v1356_v52, %v7523_v8  ;;  %12016 = vst [vmem:[#allocation39_spill] sm:$0xff] %v8634_v28  ;;  %v1343_v1 = vmul.f32 %v8634_v28, %v8634_v28 }
 0x1b8   :  { %2394 = vmatpush.bf16.msrb.mxu3 %v6251_v4 }
 0x1b9   :  { %1391 = vadd.xlane.f32.xlu0 %v1341_v53  ;;  %v1483_v61 = vsub.f32 %v1419_v56, %v1451_v22  ;;  %1265 = vadd.xlane.f32.xlu2 %v8615_v41  ;;  %v6259_v53 = vor.u32 %v6510_v50, %v6258_v3 }
 0x1ba   :  { %v1167_v45 = vpop.f32.mrf.mxu2 }
 0x1bb   :  { %v1168_v16 = vadd.f32 %v1167_v45, %v8441_v15  ;;  %v8636_v17 = vadd.f32 1e-05, %v1483_v61  ;;  %1393 = vadd.xlane.f32.xlu1 %v1342_v48  ;;  %2215 = vmatpush.bf16.msrb.mxu1 %v6259_v53  ;;  %v6255_v48 = vor.u32 %v6505_v42, %v6252_v49 }
 0x1bc   :  { %v1230_v34 = vpop.xlane.xlu2 %1229 }
 0x1bd   :  { %v8638_v40 = vadd.f32 %v6611_v32, %v1168_v16  ;;  %6830 = vrsqrt.f32 %v8636_v17  ;;  %v8642_v7 = vmul.f32 %v1230_v34, %v7523_v8  ;;  %v6247_v32 = vor.u32 %v6504_v21, %v6244_v44  ;;  %v6706_v16 = vld [vmem:[#allocation2 + $0x58] sm:$0xff]   ;;  %2483 = vmatpush.bf16.msrb.mxu0 %v6255_v48 }
 0x1be   :  { %v1358_v52 = vpop.xlane.xlu1 %1357  ;;  %v6614_v3 = vunpack.c.l.bf16 %v6706_v16  ;;  %vm1585_vm2 = vweird.f32 %v8636_v17  ;;  %v6615_v42 = vunpack.c.h.bf16 %v6706_v16 }
 0x1bf   :  { %12017 = vst [vmem:[#allocation40_spill] sm:$0xff] %v8638_v40  ;;  %v8644_v55 = vpop.f32.mrf.mxu3  ;;  %v1452_v22 = vmul.f32 %v8642_v7, %v8642_v7  ;;  %v1420_v56 = vmul.f32 %v1358_v52, %v7523_v8  ;;  %2305 = vmatpush.bf16.msrb.mxu2 %v6247_v32  ;;  %2216 = vmatpush.bf16.msrb.mxu1 %v6243_v57  ;;  %v6707_v32 = vld [vmem:[#allocation2 + $0x60] sm:$0xff]  }
 0x1c0   :  { %v1344_v19 = vmul.f32 %v8638_v40, %v8638_v40  ;;  %v6619_v16 = vunpack.c.h.bf16 %v6707_v32 }
 0x1c1   :  { %1269 = vadd.xlane.f32.xlu0 %v8638_v40  ;;  %v1484_v61 = vsub.f32 %v1420_v56, %v1452_v22  ;;  %1267 = vadd.xlane.f32.xlu2 %v8634_v28 }
 0x1c3   :  { %v6831_v45 = vpop.eup %6830  ;;  %v8653_v60 = vadd.f32 1e-05, %v1484_v61  ;;  %1395 = vadd.xlane.f32.xlu1 %v1343_v1 }
 0x1c4   :  { %v1580_v27 = vmul.f32 %v6831_v45, %v8636_v17  ;;  %v1232_v33 = vpop.xlane.xlu2 %1231  ;;  %vm1586_vm1 = vweird.f32 %v6831_v45 }
 0x1c5   :  { %6832 = vrsqrt.f32 %v8653_v60  ;;  %v8658_v51 = vmul.f32 %v1232_v33, %v7523_v8  ;;  %vm8681_vm3 = vmor %vm1585_vm2, %vm1586_vm1  ;;  %vm1595_vm5 = vweird.f32 %v8653_v60 }
 0x1c6   :  { %v1581_v11 = vmul.f32 %v6831_v45, %v1580_v27  ;;  %v1360_v63 = vpop.xlane.xlu1 %1359 }
 0x1c7   :  { %v1453_v0 = vmul.f32 %v8658_v51, %v8658_v51  ;;  %v1421_v50 = vmul.f32 %v1360_v63, %v7523_v8  ;;  %v8663_v43 = vpop.f32.mrf.mxu3 }
 0x1c8   :  { %v1582_v52 = vmul.f32 0.5, %v1581_v11 }
 0x1c9   :  { %v1170_v34 = vpop.f32.mrf.mxu2  ;;  %v1485_v21 = vsub.f32 %v1421_v50, %v1453_v0  ;;  %1397 = vadd.xlane.f32.xlu2 %v1344_v19  ;;  %v1178_v50 = vadd.f32 %v8617_v9, %v8441_v15 }
 0x1ca   :  { %v1171_v53 = vadd.f32 %v1170_v34, %v8441_v15  ;;  %v1583_v44 = vsub.f32 1.5, %v1582_v52  ;;  %v1515_v34 = vsub.f32 %v8466_v12, %v8620_v54 }
 0x1cb   :  { %v6833_v13 = vpop.eup %6832  ;;  %v8670_v22 = vadd.f32 1e-05, %v1485_v21 }
 0x1cc   :  { %v8668_v36 = vadd.f32 %v6614_v3, %v1171_v53  ;;  %v1584_v56 = vmul.f32 %v6831_v45, %v1583_v44  ;;  %v1590_v1 = vmul.f32 %v6833_v13, %v8653_v60  ;;  %v1234_v35 = vpop.xlane.xlu0 %1233  ;;  %v6618_v3 = vunpack.c.l.bf16 %v6707_v32 }
 0x1cd   :  { %6834 = vrsqrt.f32 %v8670_v22  ;;  %v8676_v59 = vmul.f32 %v1234_v35, %v7523_v8  ;;  %vm1596_vm4 = vweird.f32 %v6833_v13  ;;  %v8720_v32 = vadd.f32 %v6619_v16, %v1178_v50 }
 0x1ce   :  { %12018 = vst [vmem:[#allocation41_spill] sm:$0xff] %v8668_v36  ;;  %1271 = vadd.xlane.f32.xlu0 %v8668_v36  ;;  %v1345_v47 = vmul.f32 %v8668_v36, %v8668_v36  ;;  %v1591_v4 = vmul.f32 %v6833_v13, %v1590_v1  ;;  %v1362_v57 = vpop.xlane.xlu2 %1361  ;;  %v1588_v11 = vsel %vm8681_vm3, %v6831_v45, %v1584_v56  ;;  %v8706_v56 = vperm.slane %v8438_v30, 2  ;;  %vm1597_vm6 = vmor %vm1595_vm5, %vm1596_vm4 }
 0x1cf   :  { %v1454_v48 = vmul.f32 %v8676_v59, %v8676_v59  ;;  %v1422_v27 = vmul.f32 %v1362_v57, %v7523_v8  ;;  %v1176_v45 = vadd.f32 %v8601_v26, %v8441_v15  ;;  %v1899_v21 = vmul.f32 %v1588_v11, %v1515_v34  ;;  %12022 = vst [vmem:[#allocation43_spill] sm:$0xff] %v8720_v32 }
 0x1d0   :  { %v1592_v63 = vmul.f32 0.5, %v1591_v4  ;;  %v1516_v26 = vsub.f32 %v8489_v18, %v8642_v7  ;;  %v6708_v4 = vld [vmem:[#allocation2 + $0x68] sm:$0xff]   ;;  %vm1605_vm8 = vweird.f32 %v8670_v22 }
 0x1d1   :  { %v1172_v49 = vpop.f32.mrf.mxu2  ;;  %v1486_v0 = vsub.f32 %v1422_v27, %v1454_v48  ;;  %1399 = vadd.xlane.f32.xlu2 %v1345_v47  ;;  %v6551_v27 = vld [vmem:[#allocation11 + $0x78] sm:$0xff]  ;;  %v1932_v11 = vmul.f32 %v8706_v56, %v1899_v21  ;;  %v6622_v50 = vunpack.c.l.bf16 %v6708_v4  ;;  %v1181_v21 = vadd.f32 %v8644_v55, %v8441_v15 }
 0x1d2   :  { %v8688_v33 = vpop.f32.mrf.mxu3  ;;  %v1173_v17 = vadd.f32 %v1172_v49, %v8441_v15  ;;  %v1593_v19 = vsub.f32 1.5, %v1592_v63  ;;  %v8724_v49 = vperm.slane %v8438_v30, 3  ;;  %v6559_v63 = vld [vmem:[#allocation11 + $0xb8] sm:$0xff]  ;;  %5855 = vmatpush.bf16.msra.mxu2 %v6551_v27 }
 0x1d3   :  { %v8699_v53 = vpop.eup %6834  ;;  %v8703_v44 = vadd.f32 1e-05, %v1486_v0  ;;  %5944 = vmatpush.bf16.msra.mxu3 %v6559_v63  ;;  %v8755_v27 = vadd.f32 %v6622_v50, %v1181_v21  ;;  %v1348_v21 = vmul.f32 %v8720_v32, %v8720_v32 }
 0x1d4   :  { %v8697_v52 = vadd.f32 %v6615_v42, %v1173_v17  ;;  %v1594_v54 = vmul.f32 %v6833_v13, %v1593_v19  ;;  %v1600_v9 = vmul.f32 %v8699_v53, %v8670_v22  ;;  %v1236_v1 = vpop.xlane.xlu0 %1235  ;;  %v6543_v17 = vld [vmem:[#allocation11 + $0x38] sm:$0xff]  ;;  %vm1606_vm7 = vweird.f32 %v8699_v53 }
 0x1d5   :  { %6836 = vrsqrt.f32 %v8703_v44  ;;  %v8718_v47 = vmul.f32 %v1236_v1, %v7523_v8  ;;  %5766 = vmatpush.bf16.msra.mxu1 %v6543_v17  ;;  %12024 = vst [vmem:[#allocation45_spill] sm:$0xff] %v8755_v27  ;;  %vm8759_vm9 = vmor %vm1605_vm8, %vm1606_vm7  ;;  %vm1615_vm11 = vweird.f32 %v8703_v44 }
 0x1d6   :  { %12021 = vst [vmem:[#allocation42_spill] sm:$0xff] %v8697_v52  ;;  %1273 = vadd.xlane.f32.xlu1 %v8697_v52  ;;  %v1346_v35 = vmul.f32 %v8697_v52, %v8697_v52  ;;  %v1598_v60 = vsel %vm1597_vm6, %v6833_v13, %v1594_v54  ;;  %v1601_v57 = vmul.f32 %v8699_v53, %v1600_v9  ;;  %v1364_v42 = vpop.xlane.xlu2 %1363 }
 0x1d7   :  { %v1900_v61 = vmul.f32 %v1598_v60, %v1516_v26  ;;  %v1455_v7 = vmul.f32 %v8718_v47, %v8718_v47  ;;  %v1423_v48 = vmul.f32 %v1364_v42, %v7523_v8  ;;  %v8730_v13 = vadd.f32 %v6618_v3, %v1176_v45 }
 0x1d8   :  { %1401 = vadd.xlane.f32.xlu0 %v1346_v35  ;;  %v1602_v16 = vmul.f32 0.5, %v1601_v57  ;;  %v1965_v3 = vadd.f32 %v8724_v49, %v1932_v11  ;;  %v6623_v42 = vunpack.c.h.bf16 %v6708_v4  ;;  %v6567_v4 = vld [vmem:[#allocation11 + $0xf8] sm:$0xff] }
 0x1d9   :  { %12023 = vst [vmem:[#allocation44_spill] sm:$0xff] %v8730_v13  ;;  %v1487_v34 = vsub.f32 %v1423_v48, %v1455_v7  ;;  %1277 = vadd.xlane.f32.xlu2 %v8720_v32  ;;  %v1933_v30 = vmul.f32 %v8706_v56, %v1900_v61  ;;  %v1347_v60 = vmul.f32 %v8730_v13, %v8730_v13 }
 0x1da   :  { %v8734_v0 = vpop.f32.mrf.mxu3  ;;  %v1603_v19 = vsub.f32 1.5, %v1602_v16  ;;  %v1183_v61 = vadd.f32 %v8663_v43, %v8441_v15  ;;  %v6709_v16 = vld [vmem:[#allocation2 + $0x70] sm:$0xff]   ;;  %6033 = vmatpush.bf16.msra.mxu0 %v6567_v4 }
 0x1db   :  { %v6837_v54 = vpop.eup %6836  ;;  %v8738_v9 = vadd.f32 1e-05, %v1487_v34  ;;  %v1966_v45 = vadd.f32 %v8724_v49, %v1933_v30  ;;  %v1517_v34 = vsub.f32 %v8507_v10, %v8658_v51 }
 0x1dc   :  { %v1604_v1 = vmul.f32 %v8699_v53, %v1603_v19  ;;  %v1610_v35 = vmul.f32 %v6837_v54, %v8703_v44  ;;  %v1238_v26 = vpop.xlane.xlu1 %1237  ;;  %v8772_v50 = vadd.f32 %v6623_v42, %v1183_v61  ;;  %vm1616_vm10 = vweird.f32 %v6837_v54 }
 0x1dd   :  { %6838 = vrsqrt.f32 %v8738_v9  ;;  %v8750_v55 = vmul.f32 %v1238_v26, %v7523_v8  ;;  %v1997_v57 = vpack.c.bf16 %v1966_v45, %v1965_v3  ;;  %v6626_v45 = vunpack.c.l.bf16 %v6709_v16  ;;  %vm1617_vm12 = vmor %vm1615_vm11, %vm1616_vm10 }
 0x1de   :  { %1275 = vadd.xlane.f32.xlu1 %v8730_v13  ;;  %v1611_v7 = vmul.f32 %v6837_v54, %v1610_v35  ;;  %v1366_v48 = vpop.xlane.xlu0 %1365  ;;  %v1608_v43 = vsel %vm8759_vm9, %v8699_v53, %v1604_v1  ;;  %12027 = vst [vmem:[#allocation46_spill] sm:$0xff] %v8772_v50  ;;  %v1518_v42 = vsub.f32 %v8517_v62, %v8676_v59  ;;  %vm1625_vm14 = vweird.f32 %v8738_v9 }
 0x1df   :  { %v1456_v63 = vmul.f32 %v8750_v55, %v8750_v55  ;;  %v1424_v22 = vmul.f32 %v1366_v48, %v7523_v8  ;;  %2217 = vmatmul.bf16.vlgmr.msrb.gmra.mxu1 %v1997_v57  ;;  %2306 = vmatmul.bf16.vlgmr.msrb.gmra.mxu2 %v1997_v57  ;;  %v1901_v3 = vmul.f32 %v1608_v43, %v1517_v34 }
 0x1e0   :  { %1403 = vadd.xlane.f32.xlu0 %v1347_v60  ;;  %v1612_v17 = vmul.f32 0.5, %v1611_v7  ;;  %2395 = vmatmul.bf16.vlgmr.msrb.gmra.mxu3 %v1997_v57  ;;  %v1186_v60 = vadd.f32 %v8688_v33, %v8441_v15  ;;  %v1350_v11 = vmul.f32 %v8772_v50, %v8772_v50 }
 0x1e1   :  { %v1488_v30 = vsub.f32 %v1424_v22, %v1456_v63  ;;  %2484 = vmatmul.bf16.vlgmr.msrb.gmra.mxu0 %v1997_v57  ;;  %1279 = vadd.xlane.f32.xlu2 %v8755_v27  ;;  %v1934_v22 = vmul.f32 %v8706_v56, %v1901_v3 }
 0x1e2   :  { %v1613_v19 = vsub.f32 1.5, %v1612_v17  ;;  %v8780_v35 = vpop.f32.mrf.mxu3  ;;  %v8802_v43 = vadd.f32 %v6626_v45, %v1186_v60  ;;  %v1188_v17 = vadd.f32 %v8734_v0, %v8441_v15 }
 0x1e3   :  { %v8776_v53 = vpop.eup %6838  ;;  %v8778_v1 = vadd.f32 1e-05, %v1488_v30  ;;  %v1967_v3 = vadd.f32 %v8724_v49, %v1934_v22 }
 0x1e4   :  { %v1614_v51 = vmul.f32 %v6837_v54, %v1613_v19  ;;  %v1620_v26 = vmul.f32 %v8776_v53, %v8738_v9  ;;  %v1240_v57 = vpop.xlane.xlu1 %1239  ;;  %12028 = vst [vmem:[#allocation47_spill] sm:$0xff] %v8802_v43  ;;  %vm1626_vm13 = vweird.f32 %v8776_v53  ;;  %v1519_v9 = vsub.f32 %v8523_v37, %v8718_v47 }
 0x1e5   :  { %6840 = vrsqrt.f32 %v8778_v1  ;;  %v8792_v61 = vmul.f32 %v1240_v57, %v7523_v8  ;;  %v1351_v57 = vmul.f32 %v8802_v43, %v8802_v43  ;;  %vm8828_vm15 = vmor %vm1625_vm14, %vm1626_vm13  ;;  %v1191_v47 = vadd.f32 %v8780_v35, %v8441_v15 }
 0x1e6   :  { %1405 = vadd.xlane.f32.xlu1 %v1348_v21  ;;  %v1618_v7 = vsel %vm1617_vm12, %v6837_v54, %v1614_v51  ;;  %v1621_v44 = vmul.f32 %v8776_v53, %v1620_v26  ;;  %v1368_v48 = vpop.xlane.xlu0 %1367  ;;  %v6627_v54 = vunpack.c.h.bf16 %v6709_v16  ;;  %v1349_v21 = vmul.f32 %v8755_v27, %v8755_v27 }
 0x1e7   :  { %v1902_v33 = vmul.f32 %v1618_v7, %v1518_v42  ;;  %v1457_v59 = vmul.f32 %v8792_v61, %v8792_v61  ;;  %v1425_v63 = vmul.f32 %v1368_v48, %v7523_v8  ;;  %vm1635_vm1 = vweird.f32 %v8778_v1 }
 0x1e8   :  { %1281 = vadd.xlane.f32.xlu0 %v8772_v50  ;;  %v1622_v4 = vmul.f32 0.5, %v1621_v44  ;;  %v8818_v42 = vadd.f32 %v6627_v54, %v1188_v17 }
 0x1e9   :  { %v1489_v34 = vsub.f32 %v1425_v63, %v1457_v59  ;;  %1409 = vadd.xlane.f32.xlu2 %v1350_v11  ;;  %v1935_v30 = vmul.f32 %v8706_v56, %v1902_v33  ;;  %v6710_v33 = vld [vmem:[#allocation2 + $0x78] sm:$0xff]  }
 0x1ea   :  { %v1623_v19 = vsub.f32 1.5, %v1622_v4  ;;  %12029 = vst [vmem:[#allocation48_spill] sm:$0xff] %v8818_v42  ;;  %v1192_v48 = vpop.f32.mrf.mxu3 }
 0x1eb   :  { %v6841_v51 = vpop.eup %6840  ;;  %v8809_v26 = vadd.f32 1e-05, %v1489_v34  ;;  %v1968_v45 = vadd.f32 %v8724_v49, %v1935_v30 }
 0x1ec   :  { %v1624_v16 = vmul.f32 %v8776_v53, %v1623_v19  ;;  %v1630_v0 = vmul.f32 %v6841_v51, %v8778_v1  ;;  %v1242_v60 = vpop.xlane.xlu2 %1241  ;;  %v6631_v19 = vunpack.c.h.bf16 %v6710_v33  ;;  %vm1636_vm0 = vweird.f32 %v6841_v51 }
 0x1ed   :  { %6842 = vrsqrt.f32 %v8809_v26  ;;  %v8822_v7 = vmul.f32 %v1242_v60, %v7523_v8  ;;  %v1998_v44 = vpack.c.bf16 %v1968_v45, %v1967_v3  ;;  %v1352_v3 = vmul.f32 %v8818_v42, %v8818_v42  ;;  %vm1637_vm2 = vmor %vm1635_vm1, %vm1636_vm0 }
 0x1ee   :  { %1407 = vadd.xlane.f32.xlu1 %v1349_v21  ;;  %v1631_v11 = vmul.f32 %v6841_v51, %v1630_v0  ;;  %v1370_v59 = vpop.xlane.xlu1 %1369  ;;  %v1246_v63 = vpop.xlane.xlu0 %1245  ;;  %v1628_v17 = vsel %vm8828_vm15, %v8776_v53, %v1624_v16  ;;  %v1193_v21 = vadd.f32 %v1192_v48, %v8441_v15  ;;  %v6630_v0 = vunpack.c.l.bf16 %v6710_v33 }
 0x1ef   :  { %v1458_v4 = vmul.f32 %v8822_v7, %v8822_v7  ;;  %v1426_v54 = vmul.f32 %v1370_v59, %v7523_v8  ;;  %2222 = vmatmul.bf16.gmra.mxu1 %v1998_v44  ;;  %2311 = vmatmul.bf16.gmra.mxu2 %v1998_v44  ;;  %v1903_v53 = vmul.f32 %v1628_v17, %v1519_v9  ;;  %vm1645_vm4 = vweird.f32 %v8809_v26 }
 0x1f0   :  { %1283 = vadd.xlane.f32.xlu0 %v8802_v43  ;;  %v1632_v34 = vmul.f32 0.5, %v1631_v11  ;;  %2400 = vmatmul.bf16.gmra.mxu3 %v1998_v44  ;;  %v1520_v48 = vsub.f32 %v8529_v6, %v8750_v55  ;;  %v8856_v15 = vadd.f32 %v6631_v19, %v1193_v21  ;;  %v8862_v59 = vadd.f32 %v6630_v0, %v1191_v47  ;;  %v6550_v19 = vld [vmem:[#allocation11 + $0x70] sm:$0xff] }
 0x1f1   :  { %v1490_v30 = vsub.f32 %v1426_v54, %v1458_v4  ;;  %2489 = vmatmul.bf16.gmra.mxu0 %v1998_v44  ;;  %1411 = vadd.xlane.f32.xlu2 %v1351_v57  ;;  %v1936_v17 = vmul.f32 %v8706_v56, %v1903_v53 }
 0x1f2   :  { %v1633_v45 = vsub.f32 1.5, %v1632_v34  ;;  %12032 = vst [vmem:[#allocation49_spill] sm:$0xff] %v8856_v15  ;;  %v1353_v47 = vmul.f32 %v8862_v59, %v8862_v59  ;;  %5856 = vmatpush.bf16.msra.mxu2 %v6550_v19 }
 0x1f3   :  { %v8845_v60 = vpop.eup %6842  ;;  %v8847_v16 = vadd.f32 1e-05, %v1490_v30  ;;  %12033 = vst [vmem:[#allocation50_spill] sm:$0xff] %v8862_v59  ;;  %v8869_v30 = vmul.f32 %v1246_v63, %v7523_v8  ;;  %v1969_v53 = vadd.f32 %v8724_v49, %v1936_v17 }
 0x1f4   :  { %v1634_v11 = vmul.f32 %v6841_v51, %v1633_v45  ;;  %v1640_v57 = vmul.f32 %v8845_v60, %v8809_v26  ;;  %v1244_v44 = vpop.xlane.xlu2 %1243  ;;  %v6558_v45 = vld [vmem:[#allocation11 + $0xb0] sm:$0xff]  ;;  %vm1646_vm3 = vweird.f32 %v8845_v60 }
 0x1f5   :  { %6844 = vrsqrt.f32 %v8847_v16  ;;  %v8859_v35 = vmul.f32 %v1244_v44, %v7523_v8  ;;  %5945 = vmatpush.bf16.msra.mxu3 %v6558_v45  ;;  %vm8888_vm5 = vmor %vm1645_vm4, %vm1646_vm3  ;;  %vm1655_vm7 = vweird.f32 %v8847_v16 }
 0x1f6   :  { %1285 = vadd.xlane.f32.xlu1 %v8818_v42  ;;  %v1638_v33 = vsel %vm1637_vm2, %v6841_v51, %v1634_v11  ;;  %v1641_v1 = vmul.f32 %v8845_v60, %v1640_v57  ;;  %v1372_v22 = vpop.xlane.xlu1 %1371  ;;  %v1248_v4 = vpop.xlane.xlu0 %1247 }
 0x1f7   :  { %v1904_v54 = vmul.f32 %v1638_v33, %v1520_v48  ;;  %v1459_v55 = vmul.f32 %v8859_v35, %v8859_v35  ;;  %v1427_v9 = vmul.f32 %v1372_v22, %v7523_v8 }
 0x1f8   :  { %1413 = vadd.xlane.f32.xlu0 %v1352_v3  ;;  %v1642_v34 = vmul.f32 0.5, %v1641_v1  ;;  %v6542_v3 = vld [vmem:[#allocation11 + $0x30] sm:$0xff]  ;;  %v1460_v1 = vmul.f32 %v8869_v30, %v8869_v30 }
 0x1f9   :  { %v1491_v51 = vsub.f32 %v1427_v9, %v1459_v55  ;;  %1289 = vadd.xlane.f32.xlu2 %v8856_v15  ;;  %v1937_v21 = vmul.f32 %v8706_v56, %v1904_v54  ;;  %5767 = vmatpush.bf16.msra.mxu1 %v6542_v3  ;;  %v1354_v3 = vmul.f32 %v8856_v15, %v8856_v15 }
 0x1fa   :  { %v1643_v0 = vsub.f32 1.5, %v1642_v34 }
 0x1fb   :  { %v6845_v11 = vpop.eup %6844  ;;  %v8875_v57 = vadd.f32 1e-05, %v1491_v51  ;;  %v1970_v63 = vadd.f32 %v8724_v49, %v1937_v21  ;;  %v1521_v21 = vsub.f32 %v8535_v20, %v8792_v61 }
 0x1fc   :  { %v1644_v44 = vmul.f32 %v8845_v60, %v1643_v0  ;;  %v1650_v48 = vmul.f32 %v6845_v11, %v8847_v16  ;;  %v1374_v33 = vpop.xlane.xlu2 %1373  ;;  %v8903_v0 = vmul.f32 %v1248_v4, %v7523_v8  ;;  %vm1656_vm6 = vweird.f32 %v6845_v11 }
 0x1fd   :  { %6846 = vrsqrt.f32 %v8875_v57  ;;  %v1428_v22 = vmul.f32 %v1374_v33, %v7523_v8  ;;  %v1999_v54 = vpack.c.bf16 %v1970_v63, %v1969_v53  ;;  %v6566_v33 = vld [vmem:[#allocation11 + $0xf0] sm:$0xff]  ;;  %vm1657_vm8 = vmor %vm1655_vm7, %vm1656_vm6  ;;  %vm1665_vm10 = vweird.f32 %v8875_v57 }
 0x1fe   :  { %1287 = vadd.xlane.f32.xlu1 %v8862_v59  ;;  %v1651_v55 = vmul.f32 %v6845_v11, %v1650_v48  ;;  %v1250_v9 = vpop.xlane.xlu1 %1249  ;;  %v1378_v17 = vpop.xlane.xlu0 %1377  ;;  %v1648_v26 = vsel %vm8888_vm5, %v8845_v60, %v1644_v44  ;;  %6034 = vmatpush.bf16.msra.mxu0 %v6566_v33 }
 0x1ff   :  { %v1492_v51 = vsub.f32 %v1428_v22, %v1460_v1  ;;  %v8893_v19 = vmul.f32 %v1250_v9, %v7523_v8  ;;  %2227 = vmatmul.bf16.gmra.mxu1 %v1999_v54  ;;  %2316 = vmatmul.bf16.gmra.mxu2 %v1999_v54  ;;  %v1430_v61 = vmul.f32 %v1378_v17, %v7523_v8 }
 0x200   :  { %1415 = vadd.xlane.f32.xlu0 %v1353_v47  ;;  %v1652_v45 = vmul.f32 0.5, %v1651_v55  ;;  %2405 = vmatmul.bf16.gmra.mxu3 %v1999_v54  ;;  %v1905_v44 = vmul.f32 %v1648_v26, %v1521_v21  ;;  %v1461_v55 = vmul.f32 %v8903_v0, %v8903_v0 }
 0x201   :  { %v8905_v47 = vadd.f32 1e-05, %v1492_v51  ;;  %v1462_v53 = vmul.f32 %v8893_v19, %v8893_v19  ;;  %2494 = vmatmul.bf16.gmra.mxu0 %v1999_v54  ;;  %v1522_v54 = vsub.f32 %v8542_v58, %v8822_v7 }
 0x202   :  { %v1653_v63 = vsub.f32 1.5, %v1652_v45  ;;  %v1938_v7 = vmul.f32 %v8706_v56, %v1905_v44 }
 0x203   :  { %v8910_v60 = vpop.eup %6846  ;;  %6848 = vrsqrt.f32 %v8905_v47  ;;  %v1494_v48 = vsub.f32 %v1430_v61, %v1462_v53  ;;  %vm1675_vm13 = vweird.f32 %v8905_v47 }
 0x204   :  { %v1654_v1 = vmul.f32 %v6845_v11, %v1653_v63  ;;  %v1660_v4 = vmul.f32 %v8910_v60, %v8875_v57  ;;  %v1376_v22 = vpop.xlane.xlu2 %1375  ;;  %v1971_v44 = vadd.f32 %v8724_v49, %v1938_v7  ;;  %vm1666_vm9 = vweird.f32 %v8910_v60 }
 0x205   :  { %v8920_v9 = vadd.f32 1e-05, %v1494_v48  ;;  %v1429_v17 = vmul.f32 %v1376_v22, %v7523_v8  ;;  %vm8949_vm11 = vmor %vm1665_vm10, %vm1666_vm9 }
 0x206   :  { %1417 = vadd.xlane.f32.xlu1 %v1354_v3  ;;  %v1658_v34 = vsel %vm1657_vm8, %v6845_v11, %v1654_v1  ;;  %v1661_v16 = vmul.f32 %v8910_v60, %v1660_v4  ;;  %v1252_v51 = vpop.xlane.xlu1 %1251  ;;  %v1380_v45 = vpop.xlane.xlu0 %1379 }
 0x207   :  { %v1906_v21 = vmul.f32 %v1658_v34, %v1522_v54  ;;  %6850 = vrsqrt.f32 %v8920_v9  ;;  %v1493_v26 = vsub.f32 %v1429_v17, %v1461_v55  ;;  %v8927_v53 = vmul.f32 %v1252_v51, %v7523_v8 }
 0x208   :  { %v1662_v3 = vmul.f32 0.5, %v1661_v16  ;;  %v1431_v4 = vmul.f32 %v1380_v45, %v7523_v8  ;;  %vm1695_vm2 = vweird.f32 %v8920_v9 }
 0x209   :  { %v6849_v61 = vpop.eup %6848  ;;  %v8929_v63 = vadd.f32 1e-05, %v1493_v26  ;;  %v1939_v48 = vmul.f32 %v8706_v56, %v1906_v21  ;;  %v1463_v1 = vmul.f32 %v8927_v53, %v8927_v53 }
 0x20a   :  { %v1663_v11 = vsub.f32 1.5, %v1662_v3  ;;  %v1670_v33 = vmul.f32 %v6849_v61, %v8905_v47  ;;  %vm1676_vm12 = vweird.f32 %v6849_v61 }
 0x20b   :  { %6852 = vrsqrt.f32 %v8929_v63  ;;  %v1972_v22 = vadd.f32 %v8724_v49, %v1939_v48  ;;  %v1495_v17 = vsub.f32 %v1431_v4, %v1463_v1  ;;  %vm1677_vm14 = vmor %vm1675_vm13, %vm1676_vm12  ;;  %vm1685_vm1 = vweird.f32 %v8929_v63 }
 0x20c   :  { %v1664_v54 = vmul.f32 %v8910_v60, %v1663_v11  ;;  %v1671_v55 = vmul.f32 %v6849_v61, %v1670_v33  ;;  %v1254_v34 = vpop.xlane.xlu2 %1253 }
 0x20d   :  { %v8941_v16 = vpop.eup %6850  ;;  %v8944_v51 = vmul.f32 %v1254_v34, %v7523_v8  ;;  %v2000_v21 = vpack.c.bf16 %v1972_v22, %v1971_v44  ;;  %v8953_v48 = vadd.f32 1e-05, %v1495_v17  ;;  %v1523_v22 = vsub.f32 %v8551_v23, %v8859_v35 }
 0x20e   :  { %v1672_v26 = vmul.f32 0.5, %v1671_v55  ;;  %v1690_v45 = vmul.f32 %v8941_v16, %v8920_v9  ;;  %v1382_v7 = vpop.xlane.xlu1 %1381  ;;  %v1668_v57 = vsel %vm8949_vm11, %v8910_v60, %v1664_v54  ;;  %v1524_v55 = vsub.f32 %v8545_v29, %v8869_v30  ;;  %v6557_v29 = vld [vmem:[#allocation11 + $0xa8] sm:$0xff] }
 0x20f   :  { %v1464_v11 = vmul.f32 %v8944_v51, %v8944_v51  ;;  %2232 = vmatmul.bf16.gmra.mxu1 %v2000_v21  ;;  %v1432_v4 = vmul.f32 %v1382_v7, %v7523_v8  ;;  %2321 = vmatmul.bf16.gmra.mxu2 %v2000_v21  ;;  %v1907_v54 = vmul.f32 %v1668_v57, %v1523_v22  ;;  %6854 = vrsqrt.f32 %v8953_v48  ;;  %v6541_v57 = vld [vmem:[#allocation11 + $0x28] sm:$0xff] }
 0x210   :  { %v1673_v33 = vsub.f32 1.5, %v1672_v26  ;;  %v1691_v1 = vmul.f32 %v8941_v16, %v1690_v45  ;;  %2410 = vmatmul.bf16.gmra.mxu3 %v2000_v21  ;;  %5768 = vmatpush.bf16.msra.mxu1 %v6541_v57  ;;  %vm1696_vm15 = vweird.f32 %v8941_v16  ;;  %vm1705_vm8 = vweird.f32 %v8953_v48 }
 0x211   :  { %v8962_v44 = vpop.eup %6852  ;;  %2499 = vmatmul.bf16.gmra.mxu0 %v2000_v21  ;;  %v1496_v26 = vsub.f32 %v1432_v4, %v1464_v11  ;;  %v1940_v11 = vmul.f32 %v8706_v56, %v1907_v54  ;;  %5946 = vmatpush.bf16.msra.mxu3 %v6557_v29  ;;  %vm9011_vm4 = vmor %vm1695_vm2, %vm1696_vm15 }
 0x212   :  { %v1674_v17 = vmul.f32 %v6849_v61, %v1673_v33  ;;  %v1680_v60 = vmul.f32 %v8962_v44, %v8929_v63  ;;  %v1692_v34 = vmul.f32 0.5, %v1691_v1  ;;  %v6549_v33 = vld [vmem:[#allocation11 + $0x68] sm:$0xff]  ;;  %vm1686_vm0 = vweird.f32 %v8962_v44 }
 0x213   :  { %v8974_v30 = vadd.f32 1e-05, %v1496_v26  ;;  %5857 = vmatpush.bf16.msra.mxu2 %v6549_v33  ;;  %vm9002_vm3 = vmor %vm1685_vm1, %vm1686_vm0 }
 0x214   :  { %v1258_v45 = vpop.xlane.xlu0 %1257  ;;  %v1678_v7 = vsel %vm1677_vm14, %v6849_v61, %v1674_v17  ;;  %v1681_v35 = vmul.f32 %v8962_v44, %v1680_v60  ;;  %v1256_v21 = vpop.xlane.xlu2 %1255  ;;  %v1693_v1 = vsub.f32 1.5, %v1692_v34 }
 0x215   :  { %v1908_v3 = vmul.f32 %v1678_v7, %v1524_v55  ;;  %v8977_v47 = vmul.f32 %v1256_v21, %v7523_v8  ;;  %6856 = vrsqrt.f32 %v8974_v30  ;;  %v8983_v55 = vpop.eup %6854  ;;  %v8986_v17 = vmul.f32 %v1258_v45, %v7523_v8 }
 0x216   :  { %v1682_v22 = vmul.f32 0.5, %v1681_v35  ;;  %v1384_v23 = vpop.xlane.xlu1 %1383  ;;  %v1694_v54 = vmul.f32 %v8941_v16, %v1693_v1  ;;  %v1973_v35 = vadd.f32 %v8724_v49, %v1940_v11  ;;  %vm1715_vm6 = vweird.f32 %v8974_v30 }
 0x217   :  { %v1465_v61 = vmul.f32 %v8977_v47, %v8977_v47  ;;  %v1433_v60 = vmul.f32 %v1384_v23, %v7523_v8  ;;  %v1941_v34 = vmul.f32 %v8706_v56, %v1908_v3  ;;  %v1700_v23 = vmul.f32 %v8983_v55, %v8953_v48 }
 0x218   :  { %v1683_v4 = vsub.f32 1.5, %v1682_v22  ;;  %v1466_v57 = vmul.f32 %v8986_v17, %v8986_v17  ;;  %vm1706_vm7 = vweird.f32 %v8983_v55 }
 0x219   :  { %v1497_v29 = vsub.f32 %v1433_v60, %v1465_v61  ;;  %v1974_v21 = vadd.f32 %v8724_v49, %v1941_v34  ;;  %v6565_v61 = vld [vmem:[#allocation11 + $0xe8] sm:$0xff]  ;;  %v1525_v34 = vsub.f32 %v8554_v2, %v8903_v0  ;;  %vm9088_vm10 = vmor %vm1705_vm8, %vm1706_vm7  ;;  %v1528_v2 = vsub.f32 %v8577_v25, %v8944_v51 }
 0x21a   :  { %v1684_v26 = vmul.f32 %v8962_v44, %v1683_v4  ;;  %6035 = vmatpush.bf16.msra.mxu0 %v6565_v61 }
 0x21b   :  { %v8999_v3 = vpop.eup %6856  ;;  %v2001_v1 = vpack.c.bf16 %v1974_v21, %v1973_v35  ;;  %v9020_v4 = vadd.f32 1e-05, %v1497_v29  ;;  %v1698_v35 = vsel %vm9011_vm4, %v8941_v16, %v1694_v54  ;;  %v1526_v29 = vsub.f32 %v8561_v46, %v8893_v19 }
 0x21c   :  { %v1260_v7 = vpop.xlane.xlu0 %1259  ;;  %v1386_v45 = vpop.xlane.xlu2 %1385  ;;  %v1688_v9 = vsel %vm9002_vm3, %v8962_v44, %v1684_v26  ;;  %v1710_v11 = vmul.f32 %v8999_v3, %v8974_v30  ;;  %vm1716_vm5 = vweird.f32 %v8999_v3 }
 0x21d   :  { %v1434_v22 = vmul.f32 %v1386_v45, %v7523_v8  ;;  %v1701_v45 = vmul.f32 %v8983_v55, %v1700_v23  ;;  %v1909_v0 = vmul.f32 %v1688_v9, %v1525_v34  ;;  %v9037_v16 = vmul.f32 %v1260_v7, %v7523_v8  ;;  %vm9075_vm9 = vmor %vm1715_vm6, %vm1716_vm5 }
 0x21e   :  { %v1262_v60 = vpop.xlane.xlu1 %1261  ;;  %v1711_v44 = vmul.f32 %v8999_v3, %v1710_v11  ;;  %6858 = vrsqrt.f32 %v9020_v4  ;;  %v1910_v23 = vmul.f32 %v1698_v35, %v1526_v29  ;;  %vm1725_vm14 = vweird.f32 %v9020_v4 }
 0x21f   :  { %v1498_v21 = vsub.f32 %v1434_v22, %v1466_v57  ;;  %2237 = vmatmul.bf16.gmra.mxu1 %v2001_v1  ;;  %v9030_v26 = vmul.f32 %v1262_v60, %v7523_v8  ;;  %2326 = vmatmul.bf16.gmra.mxu2 %v2001_v1  ;;  %v1702_v22 = vmul.f32 0.5, %v1701_v45  ;;  %v1467_v9 = vmul.f32 %v9037_v16, %v9037_v16 }
 0x220   :  { %2415 = vmatmul.bf16.gmra.mxu3 %v2001_v1  ;;  %v1712_v54 = vmul.f32 0.5, %v1711_v44 }
 0x221   :  { %v9034_v33 = vadd.f32 1e-05, %v1498_v21  ;;  %2504 = vmatmul.bf16.gmra.mxu0 %v2001_v1  ;;  %v1468_v61 = vmul.f32 %v9030_v26, %v9030_v26  ;;  %v1942_v1 = vmul.f32 %v8706_v56, %v1909_v0  ;;  %v1943_v21 = vmul.f32 %v8706_v56, %v1910_v23 }
 0x222   :  { %v1713_v11 = vsub.f32 1.5, %v1712_v54  ;;  %v1703_v44 = vsub.f32 1.5, %v1702_v22 }
 0x223   :  { %6860 = vrsqrt.f32 %v9034_v33  ;;  %vm1735_vm13 = vweird.f32 %v9034_v33 }
 0x224   :  { %v1390_v57 = vpop.xlane.xlu0 %1389  ;;  %v1388_v63 = vpop.xlane.xlu2 %1387  ;;  %v1714_v0 = vmul.f32 %v8999_v3, %v1713_v11 }
 0x225   :  { %v1436_v19 = vmul.f32 %v1390_v57, %v7523_v8  ;;  %v1435_v7 = vmul.f32 %v1388_v63, %v7523_v8  ;;  %v9049_v45 = vpop.eup %6858  ;;  %v1975_v63 = vadd.f32 %v8724_v49, %v1942_v1 }
 0x226   :  { %v1264_v34 = vpop.xlane.xlu1 %1263  ;;  %v1720_v22 = vmul.f32 %v9049_v45, %v9020_v4  ;;  %vm1726_vm11 = vweird.f32 %v9049_v45 }
 0x227   :  { %v1500_v60 = vsub.f32 %v1436_v19, %v1468_v61  ;;  %v1499_v35 = vsub.f32 %v1435_v7, %v1467_v9  ;;  %v9052_v29 = vmul.f32 %v1264_v34, %v7523_v8  ;;  %v1976_v19 = vadd.f32 %v8724_v49, %v1943_v21  ;;  %vm9151_vm0 = vmor %vm1725_vm14, %vm1726_vm11 }
 0x228   :  { %v1704_v9 = vmul.f32 %v8983_v55, %v1703_v44 }
 0x229   :  { %v9054_v57 = vpop.eup %6860  ;;  %v9056_v46 = vadd.f32 1e-05, %v1500_v60  ;;  %v9063_v23 = vadd.f32 1e-05, %v1499_v35  ;;  %v1469_v7 = vmul.f32 %v9052_v29, %v9052_v29  ;;  %v2002_v34 = vpack.c.bf16 %v1976_v19, %v1975_v63 }
 0x22a   :  { %v1730_v54 = vmul.f32 %v9054_v57, %v9034_v33  ;;  %v1718_v35 = vsel %vm9075_vm9, %v8999_v3, %v1714_v0  ;;  %v1708_v0 = vsel %vm9088_vm10, %v8983_v55, %v1704_v9  ;;  %v1527_v19 = vsub.f32 %v8569_v24, %v8927_v53  ;;  %v6548_v53 = vld [vmem:[#allocation11 + $0x60] sm:$0xff] }
 0x22b   :  { %6862 = vrsqrt.f32 %v9056_v46  ;;  %v1912_v51 = vmul.f32 %v1718_v35, %v1528_v2  ;;  %v6556_v2 = vld [vmem:[#allocation11 + $0xa0] sm:$0xff]  ;;  %5858 = vmatpush.bf16.msra.mxu2 %v6548_v53  ;;  %vm1736_vm12 = vweird.f32 %v9054_v57  ;;  %vm1755_vm3 = vweird.f32 %v9056_v46 }
 0x22c   :  { %v1392_v61 = vpop.xlane.xlu0 %1391  ;;  %v1266_v1 = vpop.xlane.xlu2 %1265  ;;  %v1731_v21 = vmul.f32 %v9054_v57, %v1730_v54  ;;  %6864 = vrsqrt.f32 %v9063_v23  ;;  %v1911_v30 = vmul.f32 %v1708_v0, %v1527_v19  ;;  %v6540_v35 = vld [vmem:[#allocation11 + $0x20] sm:$0xff]  ;;  %5947 = vmatpush.bf16.msra.mxu3 %v6556_v2  ;;  %vm9144_vm15 = vmor %vm1735_vm13, %vm1736_vm12  ;;  %vm1745_vm4 = vweird.f32 %v9063_v23 }
 0x22d   :  { %v1437_v11 = vmul.f32 %v1392_v61, %v7523_v8  ;;  %v9081_v60 = vmul.f32 %v1266_v1, %v7523_v8  ;;  %v1721_v1 = vmul.f32 %v9049_v45, %v1720_v22  ;;  %v1945_v9 = vmul.f32 %v8706_v56, %v1912_v51  ;;  %5769 = vmatpush.bf16.msra.mxu1 %v6540_v35 }
 0x22e   :  { %v1394_v48 = vpop.xlane.xlu1 %1393  ;;  %v1732_v22 = vmul.f32 0.5, %v1731_v21  ;;  %v1944_v0 = vmul.f32 %v8706_v56, %v1911_v30 }
 0x22f   :  { %v1501_v44 = vsub.f32 %v1437_v11, %v1469_v7  ;;  %v1470_v63 = vmul.f32 %v9081_v60, %v9081_v60  ;;  %v1438_v3 = vmul.f32 %v1394_v48, %v7523_v8  ;;  %2242 = vmatmul.bf16.gmra.mxu1 %v2002_v34  ;;  %2331 = vmatmul.bf16.gmra.mxu2 %v2002_v34  ;;  %v1722_v48 = vmul.f32 0.5, %v1721_v1 }
 0x230   :  { %2420 = vmatmul.bf16.gmra.mxu3 %v2002_v34  ;;  %v1977_v35 = vadd.f32 %v8724_v49, %v1944_v0  ;;  %v6564_v0 = vld [vmem:[#allocation11 + $0xe0] sm:$0xff] }
 0x231   :  { %v9101_v54 = vadd.f32 1e-05, %v1501_v44  ;;  %v1502_v7 = vsub.f32 %v1438_v3, %v1470_v63  ;;  %2509 = vmatmul.bf16.gmra.mxu0 %v2002_v34  ;;  %v9105_v11 = vpop.eup %6862  ;;  %v1733_v34 = vsub.f32 1.5, %v1732_v22  ;;  %v1723_v61 = vsub.f32 1.5, %v1722_v48 }
 0x232   :  { %v9109_v58 = vpop.eup %6864  ;;  %v1750_v63 = vmul.f32 %v9105_v11, %v9056_v46  ;;  %6036 = vmatpush.bf16.msra.mxu0 %v6564_v0  ;;  %vm1756_vm1 = vweird.f32 %v9105_v11  ;;  %v1533_v46 = vsub.f32 %v8609_v38, %v9052_v29 }
 0x233   :  { %v9107_v25 = vadd.f32 1e-05, %v1502_v7  ;;  %6866 = vrsqrt.f32 %v9101_v54  ;;  %v1740_v1 = vmul.f32 %v9109_v58, %v9063_v23  ;;  %v1978_v7 = vadd.f32 %v8724_v49, %v1945_v9  ;;  %vm9201_vm5 = vmor %vm1755_vm3, %vm1756_vm1 }
 0x234   :  { %v1268_v55 = vpop.xlane.xlu2 %1267  ;;  %v1270_v3 = vpop.xlane.xlu0 %1269  ;;  %v1734_v48 = vmul.f32 %v9054_v57, %v1733_v34  ;;  %v1724_v30 = vmul.f32 %v9049_v45, %v1723_v61  ;;  %v1751_v2 = vmul.f32 %v9105_v11, %v1750_v63  ;;  %vm1746_vm2 = vweird.f32 %v9109_v58 }
 0x235   :  { %6868 = vrsqrt.f32 %v9107_v25  ;;  %v9115_v21 = vmul.f32 %v1268_v55, %v7523_v8  ;;  %v1741_v53 = vmul.f32 %v9109_v58, %v1740_v1  ;;  %v2003_v63 = vpack.c.bf16 %v1978_v7, %v1977_v35  ;;  %vm9209_vm6 = vmor %vm1745_vm4, %vm1746_vm2 }
 0x236   :  { %v1396_v44 = vpop.xlane.xlu1 %1395  ;;  %v1752_v35 = vmul.f32 0.5, %v1751_v2  ;;  %vm1775_vm9 = vweird.f32 %v9107_v25  ;;  %vm1765_vm11 = vweird.f32 %v9101_v54 }
 0x237   :  { %v1471_v19 = vmul.f32 %v9115_v21, %v9115_v21  ;;  %v1439_v51 = vmul.f32 %v1396_v44, %v7523_v8  ;;  %v9141_v44 = vmul.f32 %v1270_v3, %v7523_v8  ;;  %v1738_v3 = vsel %vm9144_vm15, %v9054_v57, %v1734_v48 }
 0x238   :  { %v1742_v7 = vmul.f32 0.5, %v1741_v53  ;;  %v1753_v53 = vsub.f32 1.5, %v1752_v35 }
 0x239   :  { %v9126_v22 = vpop.eup %6866  ;;  %v1503_v34 = vsub.f32 %v1439_v51, %v1471_v19  ;;  %v1472_v19 = vmul.f32 %v9141_v44, %v9141_v44  ;;  %v1728_v51 = vsel %vm9151_vm0, %v9049_v45, %v1724_v30 }
 0x23a   :  { %v1760_v4 = vmul.f32 %v9126_v22, %v9101_v54  ;;  %vm1766_vm8 = vweird.f32 %v9126_v22 }
 0x23b   :  { %v9131_v55 = vpop.eup %6868  ;;  %v9168_v48 = vadd.f32 1e-05, %v1503_v34  ;;  %vm9252_vm12 = vmor %vm1765_vm11, %vm1766_vm8 }
 0x23c   :  { %v1770_v9 = vmul.f32 %v9131_v55, %v9107_v25  ;;  %v1398_v24 = vpop.xlane.xlu2 %1397  ;;  %v1761_v45 = vmul.f32 %v9126_v22, %v1760_v4  ;;  %vm1776_vm7 = vweird.f32 %v9131_v55 }
 0x23d   :  { %v1440_v1 = vmul.f32 %v1398_v24, %v7523_v8  ;;  %v1530_v24 = vsub.f32 %v8586_v14, %v8986_v17  ;;  %v1529_v17 = vsub.f32 %v8584_v31, %v8977_v47  ;;  %6870 = vrsqrt.f32 %v9168_v48  ;;  %vm9235_vm10 = vmor %vm1775_vm9, %vm1776_vm7 }
 0x23e   :  { %v1771_v57 = vmul.f32 %v9131_v55, %v1770_v9  ;;  %v1743_v9 = vsub.f32 1.5, %v1742_v7  ;;  %vm1785_vm13 = vweird.f32 %v9168_v48 }
 0x23f   :  { %2247 = vmatmul.bf16.gmra.mxu1 %v2003_v63  ;;  %v1504_v61 = vsub.f32 %v1440_v1, %v1472_v19  ;;  %2336 = vmatmul.bf16.gmra.mxu2 %v2003_v63  ;;  %v1914_v33 = vmul.f32 %v1738_v3, %v1530_v24  ;;  %v1913_v30 = vmul.f32 %v1728_v51, %v1529_v17 }
 0x240   :  { %2425 = vmatmul.bf16.gmra.mxu3 %v2003_v63  ;;  %v1772_v34 = vmul.f32 0.5, %v1771_v57  ;;  %v1754_v3 = vmul.f32 %v9105_v11, %v1753_v53  ;;  %v1744_v51 = vmul.f32 %v9109_v58, %v1743_v9 }
 0x241   :  { %v1272_v20 = vpop.xlane.xlu0 %1271  ;;  %2514 = vmatmul.bf16.gmra.mxu0 %v2003_v63  ;;  %v9179_v1 = vadd.f32 1e-05, %v1504_v61  ;;  %v1947_v47 = vmul.f32 %v8706_v56, %v1914_v33  ;;  %v1762_v63 = vmul.f32 0.5, %v1761_v45  ;;  %v1946_v24 = vmul.f32 %v8706_v56, %v1913_v30 }
 0x242   :  { %v9171_v6 = vmul.f32 %v1272_v20, %v7523_v8  ;;  %v1773_v7 = vsub.f32 1.5, %v1772_v34  ;;  %v1758_v23 = vsel %vm9201_vm5, %v9105_v11, %v1754_v3  ;;  %v1532_v34 = vsub.f32 %v8599_v39, %v9030_v26 }
 0x243   :  { %6872 = vrsqrt.f32 %v9179_v1  ;;  %v1980_v17 = vadd.f32 %v8724_v49, %v1947_v47  ;;  %v9196_v33 = vpop.eup %6870  ;;  %v1763_v30 = vsub.f32 1.5, %v1762_v63  ;;  %v1979_v9 = vadd.f32 %v8724_v49, %v1946_v24 }
 0x244   :  { %v1473_v2 = vmul.f32 %v9171_v6, %v9171_v6  ;;  %v1400_v20 = vpop.xlane.xlu2 %1399  ;;  %v1531_v11 = vsub.f32 %v8594_v5, %v9037_v16  ;;  %v1780_v63 = vmul.f32 %v9196_v33, %v9168_v48  ;;  %v1916_v26 = vmul.f32 %v1758_v23, %v1532_v34 }
 0x245   :  { %v1441_v0 = vmul.f32 %v1400_v20, %v7523_v8  ;;  %v1748_v20 = vsel %vm9209_vm6, %v9109_v58, %v1744_v51  ;;  %v1764_v24 = vmul.f32 %v9126_v22, %v1763_v30  ;;  %v1534_v45 = vsub.f32 %v8615_v41, %v9081_v60  ;;  %v6555_v51 = vld [vmem:[#allocation11 + $0x98] sm:$0xff] }
 0x246   :  { %v1915_v58 = vmul.f32 %v1748_v20, %v1531_v11  ;;  %v1781_v54 = vmul.f32 %v9196_v33, %v1780_v63  ;;  %vm1786_vm14 = vweird.f32 %v9196_v33  ;;  %vm1795_vm15 = vweird.f32 %v9179_v1  ;;  %5948 = vmatpush.bf16.msra.mxu3 %v6555_v51 }
 0x247   :  { %v1505_v4 = vsub.f32 %v1441_v0, %v1473_v2  ;;  %v1774_v0 = vmul.f32 %v9131_v55, %v1773_v7  ;;  %v1768_v60 = vsel %vm9252_vm12, %v9126_v22, %v1764_v24  ;;  %v247_v24 = vld [vmem:[#allocation7 + $0x18] sm:$0xff]  ;;  %vm9335_vm1 = vmor %vm1785_vm13, %vm1786_vm14 }
 0x248   :  { %v1917_v63 = vmul.f32 %v1768_v60, %v1533_v46 }
 0x249   :  { %v1274_v19 = vpop.xlane.xlu1 %1273  ;;  %v9193_v57 = vadd.f32 1e-05, %v1505_v4  ;;  %v2004_v4 = vpack.c.bf16 %v1980_v17, %v1979_v9 }
 0x24a   :  { %v9190_v35 = vmul.f32 %v1274_v19, %v7523_v8  ;;  %v9230_v19 = vpop.eup %6872 }
 0x24b   :  { %v1402_v61 = vpop.xlane.xlu0 %1401  ;;  %6874 = vrsqrt.f32 %v9193_v57  ;;  %vm1796_vm0 = vweird.f32 %v9230_v19  ;;  %vm1805_vm2 = vweird.f32 %v9193_v57 }
 0x24c   :  { %v1474_v53 = vmul.f32 %v9190_v35, %v9190_v35  ;;  %v1442_v2 = vmul.f32 %v1402_v61, %v7523_v8  ;;  %v1278_v47 = vpop.xlane.xlu2 %1277  ;;  %v1778_v61 = vsel %vm9235_vm10, %v9131_v55, %v1774_v0  ;;  %v1948_v0 = vmul.f32 %v8706_v56, %v1915_v58  ;;  %vm9367_vm4 = vmor %vm1795_vm15, %vm1796_vm0 }
 0x24d   :  { %v1918_v9 = vmul.f32 %v1778_v61, %v1534_v45  ;;  %v9273_v11 = vmul.f32 %v1278_v47, %v7523_v8 }
 0x24e   :  { %v1506_v3 = vsub.f32 %v1442_v2, %v1474_v53  ;;  %v1790_v53 = vmul.f32 %v9230_v19, %v9179_v1  ;;  %v1949_v2 = vmul.f32 %v8706_v56, %v1916_v26 }
 0x24f   :  { %2252 = vmatmul.bf16.gmra.mxu1 %v2004_v4  ;;  %2341 = vmatmul.bf16.gmra.mxu2 %v2004_v4  ;;  %v1476_v46 = vmul.f32 %v9273_v11, %v9273_v11 }
 0x250   :  { %v9239_v16 = vadd.f32 1e-05, %v1506_v3  ;;  %2430 = vmatmul.bf16.gmra.mxu3 %v2004_v4  ;;  %v1782_v3 = vmul.f32 0.5, %v1781_v54  ;;  %v1791_v22 = vmul.f32 %v9230_v19, %v1790_v53  ;;  %v1982_v58 = vadd.f32 %v8724_v49, %v1949_v2 }
 0x251   :  { %v1276_v7 = vpop.xlane.xlu1 %1275  ;;  %v9248_v25 = vpop.eup %6874  ;;  %2519 = vmatmul.bf16.gmra.mxu0 %v2004_v4  ;;  %v1981_v53 = vadd.f32 %v8724_v49, %v1948_v0  ;;  %v9296_v2 = vperm.slane %v247_v24, 6  ;;  %v245_v0 = vld [vmem:[#allocation7 + $0x8] sm:$0xff]  ;;  %v246_v24 = vld [vmem:[#allocation7 + $0x10] sm:$0xff] }
 0x252   :  { %v9246_v17 = vmul.f32 %v1276_v7, %v7523_v8  ;;  %6876 = vrsqrt.f32 %v9239_v16  ;;  %v1800_v34 = vmul.f32 %v9248_v25, %v9193_v57  ;;  %v7151_v7 = vld [vmem:[#allocation7] sm:$0xff]  ;;  %vm1806_vm3 = vweird.f32 %v9248_v25 }
 0x253   :  { %v1404_v55 = vpop.xlane.xlu0 %1403  ;;  %v9280_v61 = vperm.slane %v7151_v7, 6  ;;  %v1792_v7 = vmul.f32 0.5, %v1791_v22  ;;  %v2005_v22 = vpack.c.bf16 %v1982_v58, %v1981_v53  ;;  %vm9391_vm6 = vmor %vm1805_vm2, %vm1806_vm3  ;;  %vm1815_vm7 = vweird.f32 %v9239_v16 }
 0x254   :  { %v1475_v23 = vmul.f32 %v9246_v17, %v9246_v17  ;;  %v1443_v20 = vmul.f32 %v1404_v55, %v7523_v8  ;;  %v1280_v29 = vpop.xlane.xlu2 %1279  ;;  %v1801_v45 = vmul.f32 %v9248_v25, %v1800_v34  ;;  %v1951_v55 = vmul.f32 %v8706_v56, %v1918_v9 }
 0x255   :  { %v1950_v9 = vmul.f32 %v8706_v56, %v1917_v63  ;;  %v9310_v39 = vmul.f32 %v1280_v29, %v7523_v8 }
 0x256   :  { %v1507_v4 = vsub.f32 %v1443_v20, %v1475_v23  ;;  %v1783_v20 = vsub.f32 1.5, %v1782_v3  ;;  %v1802_v3 = vmul.f32 0.5, %v1801_v45  ;;  %v1984_v63 = vadd.f32 %v8724_v49, %v1951_v55 }
 0x257   :  { %v1793_v45 = vsub.f32 1.5, %v1792_v7  ;;  %v1983_v51 = vadd.f32 %v8724_v49, %v1950_v9  ;;  %v1477_v9 = vmul.f32 %v9310_v39, %v9310_v39 }
 0x258   :  { %v9283_v47 = vpop.eup %6876  ;;  %v9287_v30 = vadd.f32 1e-05, %v1507_v4  ;;  %v6547_v4 = vld [vmem:[#allocation11 + $0x58] sm:$0xff]  ;;  %v1803_v55 = vsub.f32 1.5, %v1802_v3 }
 0x259   :  { %v1406_v54 = vpop.xlane.xlu1 %1405  ;;  %v1810_v60 = vmul.f32 %v9283_v47, %v9239_v16  ;;  %5859 = vmatpush.bf16.msra.mxu2 %v6547_v4  ;;  %v9329_v7 = vpack.c.bf16 %v1984_v63, %v1983_v51  ;;  %vm1816_vm5 = vweird.f32 %v9283_v47  ;;  %v12065_v16 = vsub.f32 %v8638_v40, %v9141_v44 }
 0x25a   :  { %v1444_v23 = vmul.f32 %v1406_v54, %v7523_v8  ;;  %6878 = vrsqrt.f32 %v9287_v30  ;;  %v1804_v31 = vmul.f32 %v9248_v25, %v1803_v55  ;;  %vm9415_vm8 = vmor %vm1815_vm7, %vm1816_vm5  ;;  %vm1825_vm9 = vweird.f32 %v9287_v30 }
 0x25b   :  { %v1282_v34 = vpop.xlane.xlu0 %1281  ;;  %v1811_v41 = vmul.f32 %v9283_v47, %v1810_v60 }
 0x25c   :  { %v1508_v38 = vsub.f32 %v1444_v23, %v1476_v46  ;;  %v9304_v54 = vmul.f32 %v1282_v34, %v7523_v8  ;;  %v1410_v46 = vpop.xlane.xlu2 %1409  ;;  %v9316_v23 = vperm.slane %v245_v0, 6  ;;  %v1784_v34 = vmul.f32 %v9196_v33, %v1783_v20 }
 0x25d   :  { %v1446_v58 = vmul.f32 %v1410_v46, %v7523_v8  ;;  %v1812_v53 = vmul.f32 0.5, %v1811_v41  ;;  %v1794_v46 = vmul.f32 %v9230_v19, %v1793_v45 }
 0x25e   :  { %v9312_v26 = vadd.f32 1e-05, %v1508_v38  ;;  %v1478_v60 = vmul.f32 %v9304_v54, %v9304_v54  ;;  %v9323_v38 = vperm.slane %v246_v24, 6  ;;  %v2218_v24 = vpop.f32.mrf.mxu1  ;;  %v1788_v48 = vsel %vm9335_vm1, %v9196_v33, %v1784_v34  ;;  %v2485_v14 = vpop.f32.mrf.mxu0 }
 0x25f   :  { %2257 = vmatmul.bf16.gmra.mxu1 %v2005_v22  ;;  %2346 = vmatmul.bf16.gmra.mxu2 %v2005_v22  ;;  %v1813_v4 = vsub.f32 1.5, %v1812_v53  ;;  %v2219_v33 = vadd.f32 %v2218_v24, %v9280_v61  ;;  %v12062_v24 = vsub.f32 %v8634_v28, %v9115_v21  ;;  %v2486_v1 = vadd.f32 %v2485_v14, %v9296_v2 }
 0x260   :  { %6880 = vrsqrt.f32 %v9312_v26  ;;  %v9325_v29 = vpop.eup %6878  ;;  %v1510_v0 = vsub.f32 %v1446_v58, %v1478_v60  ;;  %2435 = vmatmul.bf16.gmra.mxu3 %v2005_v22  ;;  %v6539_v60 = vld [vmem:[#allocation11 + $0x18] sm:$0xff]  ;;  %vm1835_vm13 = vweird.f32 %v9312_v26 }
 0x261   :  { %v1408_v20 = vpop.xlane.xlu1 %1407  ;;  %v1820_v3 = vmul.f32 %v9325_v29, %v9287_v30  ;;  %2524 = vmatmul.bf16.gmra.mxu0 %v2005_v22  ;;  %vm1826_vm10 = vweird.f32 %v9325_v29  ;;  %5770 = vmatpush.bf16.msra.mxu1 %v6539_v60 }
 0x262   :  { %v1445_v63 = vmul.f32 %v1408_v20, %v7523_v8  ;;  %v9351_v58 = vadd.f32 1e-05, %v1510_v0  ;;  %v2307_v34 = vpop.f32.mrf.mxu2  ;;  %vm9468_vm12 = vmor %vm1825_vm9, %vm1826_vm10 }
 0x263   :  { %v1284_v51 = vpop.xlane.xlu0 %1283  ;;  %v1821_v5 = vmul.f32 %v9325_v29, %v1820_v3  ;;  %v2396_v45 = vpop.f32.mrf.mxu3 }
 0x264   :  { %v1509_v20 = vsub.f32 %v1445_v63, %v1477_v9  ;;  %6882 = vrsqrt.f32 %v9351_v58  ;;  %v9359_v0 = vmul.f32 %v1284_v51, %v7523_v8  ;;  %v2308_v9 = vadd.f32 %v2307_v34, %v9316_v23 }
 0x265   :  { %v1822_v55 = vmul.f32 0.5, %v1821_v5  ;;  %v2397_v3 = vadd.f32 %v2396_v45, %v9323_v38  ;;  %v1919_v63 = vmul.f32 %v1788_v48, %v12062_v24  ;;  %v1798_v51 = vsel %vm9367_vm4, %v9230_v19, %v1794_v46  ;;  %v1412_v45 = vpop.xlane.xlu2 %1411 }
 0x266   :  { %v9361_v22 = vpop.eup %6880  ;;  %v9371_v41 = vadd.f32 1e-05, %v1509_v20  ;;  %v1814_v5 = vmul.f32 %v9283_v47, %v1813_v4  ;;  %v2565_v34 = vpack.c.bf16 %v2308_v9, %v2219_v33  ;;  %v1447_v19 = vmul.f32 %v1412_v45, %v7523_v8  ;;  %v2220_v21 = vpop.f32.mrf.mxu1 }
 0x267   :  { %v1830_v20 = vmul.f32 %v9361_v22, %v9312_v26  ;;  %v2566_v14 = vpack.c.bf16 %v2486_v1, %v2397_v3  ;;  %v1479_v4 = vmul.f32 %v9359_v0, %v9359_v0  ;;  %v1808_v48 = vsel %vm9391_vm6, %v9248_v25, %v1804_v31 }
 0x268   :  { %6884 = vrsqrt.f32 %v9371_v41  ;;  %v1823_v46 = vsub.f32 1.5, %v1822_v55  ;;  %v9402_v33 = vunpack.c.l.bf16 %v2565_v34  ;;  %v9404_v57 = vunpack.c.h.bf16 %v2565_v34 }
 0x269   :  { %v9411_v9 = vmul.f32 %v1798_v51, %v12065_v16  ;;  %v1539_v31 = vsub.f32 %v8730_v13, %v9246_v17  ;;  %v1818_v44 = vsel %vm9415_vm8, %v9283_v47, %v1814_v5  ;;  %v1831_v55 = vmul.f32 %v9361_v22, %v1830_v20 }
 0x26a   :  { %v9406_v53 = vpop.eup %6882  ;;  %v9430_v51 = vunpack.c.l.bf16 %v2566_v14  ;;  %v12068_v1 = vsub.f32 %v8668_v36, %v9171_v6  ;;  %v2949_v34 = vmul.f32 %v9402_v33, %v9402_v33  ;;  %v9439_v45 = vunpack.c.h.bf16 %v2566_v14  ;;  %v2309_v13 = vpop.f32.mrf.mxu2 }
 0x26b   :  { %v1850_v24 = vmul.f32 %v9406_v53, %v9351_v58  ;;  %v1511_v16 = vsub.f32 %v1447_v19, %v1479_v4  ;;  %v1824_v5 = vmul.f32 %v9325_v29, %v1823_v46  ;;  %v2950_v6 = vmul.f32 %v9404_v57, %v9404_v57 }
 0x26c   :  { %v9435_v17 = vmul.f32 %v1808_v48, %v12068_v1  ;;  %v2487_v48 = vpop.f32.mrf.mxu0  ;;  %v12069_v3 = vsub.f32 %v8697_v52, %v9190_v35  ;;  %v9458_v4 = vmul.f32 %v8706_v56, %v1919_v63  ;;  %v1832_v46 = vmul.f32 0.5, %v1831_v55 }
 0x26d   :  { %v1851_v20 = vmul.f32 %v9406_v53, %v1850_v24  ;;  %vm1836_vm11 = vweird.f32 %v9361_v22  ;;  %v3077_v24 = vpack.c.bf16 %v2950_v6, %v2949_v34  ;;  %v2951_v25 = vmul.f32 %v9430_v51, %v9430_v51 }
 0x26e   :  { %v9441_v47 = vpop.eup %6884  ;;  %v9451_v1 = vmul.f32 %v1818_v44, %v12069_v3  ;;  %v2221_v35 = vadd.f32 %v2220_v21, %v9280_v61  ;;  %v6563_v44 = vld [vmem:[#allocation11 + $0xd8] sm:$0xff]  ;;  %v2952_v55 = vmul.f32 %v9439_v45, %v9439_v45  ;;  %v9475_v34 = vadd.f32 %v2487_v48, %v9296_v2  ;;  %vm9519_vm2 = vmor %vm1835_vm13, %vm1836_vm11 }
 0x26f   :  { %v1840_v19 = vmul.f32 %v9441_v47, %v9371_v41  ;;  %v1852_v63 = vmul.f32 0.5, %v1851_v20  ;;  %v9477_v6 = vadd.f32 1e-05, %v1511_v16  ;;  %2262 = vmatmul.bf16.gmra.mxu1 %v9329_v7  ;;  %v1828_v21 = vsel %vm9468_vm12, %v9325_v29, %v1824_v5  ;;  %6037 = vmatpush.bf16.msra.mxu0 %v6563_v44 }
 0x270   :  { %v3141_v30 = vunpack.c.l.bf16 %v3077_v24  ;;  %v3142_v14 = vunpack.c.h.bf16 %v3077_v24  ;;  %vm1855_vm14 = vweird.f32 %v9351_v58  ;;  %v2757_v48 = vmul.f32 0.5, %v9402_v33  ;;  %2351 = vmatmul.bf16.gmra.mxu2 %v9329_v7  ;;  %2440 = vmatmul.bf16.gmra.mxu3 %v9329_v7 }
 0x271   :  { %v1841_v16 = vmul.f32 %v9441_v47, %v1840_v19  ;;  %v3078_v52 = vpack.c.bf16 %v2952_v55, %v2951_v25  ;;  %6886 = vrsqrt.f32 %v9477_v6  ;;  %v1833_v29 = vsub.f32 1.5, %v1832_v46  ;;  %2529 = vmatmul.bf16.gmra.mxu0 %v9329_v7  ;;  %v2398_v7 = vpop.f32.mrf.mxu3 }
 0x272   :  { %v2758_v60 = vmul.f32 0.5, %v9404_v57  ;;  %v3269_v5 = vmul.f32 %v3141_v30, %v9402_v33  ;;  %v3270_v24 = vmul.f32 %v3142_v14, %v9404_v57  ;;  %v1853_v44 = vsub.f32 1.5, %v1852_v63 }
 0x273   :  { %v3143_v19 = vunpack.c.l.bf16 %v3078_v52  ;;  %v3144_v3 = vunpack.c.h.bf16 %v3078_v52  ;;  %v2310_v25 = vadd.f32 %v2309_v13, %v9316_v23  ;;  %v9497_v55 = vmul.f32 %v1828_v21, %v1539_v31 }
 0x274   :  { %vm1856_vm15 = vweird.f32 %v9406_v53  ;;  %v3397_v20 = vpack.c.bf16 %v3270_v24, %v3269_v5  ;;  %v2759_v46 = vmul.f32 0.5, %v9430_v51  ;;  %v1842_v36 = vmul.f32 0.5, %v1841_v16 }
 0x275   :  { %v2760_v40 = vmul.f32 0.5, %v9439_v45  ;;  %v3271_v30 = vmul.f32 %v3143_v19, %v9430_v51  ;;  %v3272_v14 = vmul.f32 %v3144_v3, %v9439_v45  ;;  %v1834_v63 = vmul.f32 %v9361_v22, %v1833_v29  ;;  %vm9529_vm3 = vmor %vm1855_vm14, %vm1856_vm15 }
 0x276   :  { %v3461_v52 = vunpack.c.l.bf16 %v3397_v20  ;;  %v3462_v28 = vunpack.c.h.bf16 %v3397_v20  ;;  %v2567_v13 = vpack.c.bf16 %v2310_v25, %v2221_v35  ;;  %v1854_v21 = vmul.f32 %v9406_v53, %v1853_v44 }
 0x277   :  { %v9505_v31 = vpop.eup %6886  ;;  %vm1846_vm0 = vweird.f32 %v9441_v47  ;;  %v9509_v5 = vpack.c.bf16 %v2758_v60, %v2757_v48  ;;  %v3398_v16 = vpack.c.bf16 %v3272_v14, %v3271_v30  ;;  %vm1845_vm1 = vweird.f32 %v9371_v41  ;;  %v1286_v30 = vpop.xlane.xlu1 %1285 }
 0x278   :  { %v3589_v24 = vmul.f32 0.044677734, %v3461_v52  ;;  %v3590_v19 = vmul.f32 0.044677734, %v3462_v28  ;;  %v1860_v3 = vmul.f32 %v9505_v31, %v9477_v6  ;;  %v2399_v29 = vadd.f32 %v2398_v7, %v9323_v38  ;;  %vm9571_vm6 = vmor %vm1845_vm1, %vm1846_vm0 }
 0x279   :  { %v1843_v20 = vsub.f32 1.5, %v1842_v36  ;;  %v9523_v48 = vpack.c.bf16 %v2760_v40, %v2759_v46  ;;  %v3463_v60 = vunpack.c.l.bf16 %v3398_v16  ;;  %v3464_v44 = vunpack.c.h.bf16 %v3398_v16 }
 0x27a   :  { %v3717_v25 = vpack.c.bf16 %v3590_v19, %v3589_v24  ;;  %v1861_v26 = vmul.f32 %v9505_v31, %v1860_v3  ;;  %v9534_v14 = vunpack.c.l.bf16 %v2567_v13  ;;  %v9536_v7 = vunpack.c.h.bf16 %v2567_v13 }
 0x27b   :  { %v1838_v40 = vsel %vm9519_vm2, %v9361_v22, %v1834_v63  ;;  %v1858_v36 = vsel %vm9529_vm3, %v9406_v53, %v1854_v21  ;;  %v3591_v58 = vmul.f32 0.044677734, %v3463_v60  ;;  %v3592_v46 = vmul.f32 0.044677734, %v3464_v44 }
 0x27c   :  { %v3781_v52 = vunpack.c.l.bf16 %v3717_v25  ;;  %v3782_v16 = vunpack.c.h.bf16 %v3717_v25  ;;  %v1862_v24 = vmul.f32 0.5, %v1861_v26  ;;  %v2568_v19 = vpack.c.bf16 %v9475_v34, %v2399_v29 }
 0x27d   :  { %v3718_v3 = vpack.c.bf16 %v3592_v46, %v3591_v58  ;;  %v9546_v37 = vmul.f32 %v1286_v30, %v7523_v8  ;;  %v2953_v13 = vmul.f32 %v9534_v14, %v9534_v14  ;;  %v2954_v22 = vmul.f32 %v9536_v7, %v9536_v7 }
 0x27e   :  { %v12076_v53 = vsub.f32 %v8772_v50, %v9304_v54  ;;  %v1844_v21 = vmul.f32 %v9441_v47, %v1843_v20  ;;  %v3909_v35 = vadd.f32 %v3781_v52, %v9402_v33  ;;  %v3910_v34 = vadd.f32 %v3782_v16, %v9404_v57 }
 0x27f   :  { %v3783_v29 = vunpack.c.l.bf16 %v3718_v3  ;;  %v3784_v60 = vunpack.c.h.bf16 %v3718_v3  ;;  %v1863_v44 = vsub.f32 1.5, %v1862_v24  ;;  %v3079_v28 = vpack.c.bf16 %v2954_v22, %v2953_v13 }
 0x280   :  { %v1926_v63 = vmul.f32 %v1858_v36, %v12076_v53  ;;  %v12077_v25 = vsub.f32 %v8720_v32, %v9273_v11  ;;  %vm1865_vm4 = vweird.f32 %v9477_v6  ;;  %vm1866_vm5 = vweird.f32 %v9505_v31 }
 0x281   :  { %v9565_v54 = vunpack.c.l.bf16 %v2568_v19  ;;  %v3911_v57 = vadd.f32 %v3783_v29, %v9430_v51  ;;  %v3912_v11 = vadd.f32 %v3784_v60, %v9439_v45  ;;  %v3145_v20 = vunpack.c.l.bf16 %v3079_v28  ;;  %vm9592_vm7 = vmor %vm1865_vm4, %vm1866_vm5 }
 0x282   :  { %v9561_v26 = vmul.f32 %v1838_v40, %v12077_v25  ;;  %v3146_v30 = vunpack.c.h.bf16 %v3079_v28  ;;  %v1290_v40 = vpop.xlane.xlu2 %1289  ;;  %v1959_v36 = vmul.f32 %v8706_v56, %v1926_v63  ;;  %v1848_v58 = vsel %vm9571_vm6, %v9441_v47, %v1844_v21 }
 0x283   :  { %v4037_v46 = vpack.c.bf16 %v3910_v34, %v3909_v35  ;;  %v9581_v52 = vunpack.c.h.bf16 %v2568_v19  ;;  %v1864_v41 = vmul.f32 %v9505_v31, %v1863_v44  ;;  %v1480_v16 = vmul.f32 %v9546_v37, %v9546_v37  ;;  %v1414_v35 = vpop.xlane.xlu0 %1413 }
 0x284   :  { %v3273_v51 = vmul.f32 %v3145_v20, %v9534_v14  ;;  %v3274_v45 = vmul.f32 %v3146_v30, %v9536_v7  ;;  %v4038_v24 = vpack.c.bf16 %v3912_v11, %v3911_v57  ;;  %v2955_v19 = vmul.f32 %v9565_v54, %v9565_v54 }
 0x285   :  { %v9601_v13 = vmul.f32 %v1290_v40, %v7523_v8  ;;  %v12082_v22 = vsub.f32 %v8755_v27, %v9310_v39  ;;  %v2761_v6 = vmul.f32 0.5, %v9534_v14  ;;  %v2762_v63 = vmul.f32 0.5, %v9536_v7  ;;  %v2223_v27 = vpop.f32.mrf.mxu1 }
 0x286   :  { %v3399_v21 = vpack.c.bf16 %v3274_v45, %v3273_v51  ;;  %v9611_v34 = vadd.f32 %v8724_v49, %v1959_v36  ;;  %v4101_v29 = vunpack.c.l.bf16 %v4037_v46  ;;  %v2763_v60 = vmul.f32 0.5, %v9565_v54 }
 0x287   :  { %v9606_v53 = vmul.f32 %v1848_v58, %v12082_v22  ;;  %v2956_v44 = vmul.f32 %v9581_v52, %v9581_v52  ;;  %v4102_v28 = vunpack.c.h.bf16 %v4037_v46  ;;  %v1868_v39 = vsel %vm9592_vm7, %v9505_v31, %v1864_v41  ;;  %v2312_v22 = vpop.f32.mrf.mxu2 }
 0x288   :  { %v3465_v25 = vunpack.c.l.bf16 %v3399_v21  ;;  %v2764_v33 = vmul.f32 0.5, %v9581_v52  ;;  %v4103_v57 = vunpack.c.l.bf16 %v4038_v24  ;;  %v3466_v11 = vunpack.c.h.bf16 %v3399_v21  ;;  %v2401_v21 = vpop.f32.mrf.mxu3 }
 0x289   :  { %v3080_v20 = vpack.c.bf16 %v2956_v44, %v2955_v19  ;;  %v9622_v30 = vmul.f32 %v9601_v13, %v9601_v13  ;;  %v4104_v40 = vunpack.c.h.bf16 %v4038_v24  ;;  %v9624_v36 = vpack.c.bf16 %v2762_v63, %v2761_v6  ;;  %v1288_v24 = vpop.xlane.xlu1 %1287 }
 0x28a   :  { %v3593_v58 = vmul.f32 0.044677734, %v3465_v25  ;;  %v1448_v46 = vmul.f32 %v1414_v35, %v7523_v8  ;;  %v12083_v51 = vsub.f32 %v8802_v43, %v9359_v0  ;;  %v3594_v41 = vmul.f32 0.044677734, %v3466_v11  ;;  %v2490_v0 = vpop.f32.mrf.mxu0 }
 0x28b   :  { %v3147_v45 = vunpack.c.l.bf16 %v3080_v20  ;;  %v3148_v3 = vunpack.c.h.bf16 %v3080_v20  ;;  %v4229_v19 = vmul.f32 0.796875, %v4101_v29  ;;  %v4230_v44 = vmul.f32 0.796875, %v4102_v28 }
 0x28c   :  { %v1927_v31 = vmul.f32 %v1868_v39, %v12083_v51  ;;  %v9630_v47 = vpack.c.bf16 %v2764_v33, %v2763_v60  ;;  %v1512_v50 = vsub.f32 %v1448_v46, %v1480_v16  ;;  %v4231_v6 = vmul.f32 0.796875, %v4103_v57 }
 0x28d   :  { %v3719_v63 = vpack.c.bf16 %v3594_v41, %v3593_v58  ;;  %v3275_v25 = vmul.f32 %v3147_v45, %v9565_v54  ;;  %v3276_v35 = vmul.f32 %v3148_v3, %v9581_v52  ;;  %v4232_v39 = vmul.f32 0.796875, %v4104_v40  ;;  %v1416_v40 = vpop.xlane.xlu0 %1415 }
 0x28e   :  { %v9634_v11 = vadd.f32 1e-05, %v1512_v50  ;;  %v2313_v20 = vadd.f32 %v2312_v22, %v9316_v23  ;;  %v2402_v29 = vadd.f32 %v2401_v21, %v9323_v38  ;;  %v9639_v16 = vmul.f32 %v1288_v24, %v7523_v8 }
 0x28f   :  { %v3785_v28 = vunpack.c.l.bf16 %v3719_v63  ;;  %v3786_v60 = vunpack.c.h.bf16 %v3719_v63  ;;  %v3400_v33 = vpack.c.bf16 %v3276_v35, %v3275_v25  ;;  %v4357_v57 = vpack.c.bf16 %v4230_v44, %v4229_v19 }
 0x290   :  { %v2224_v58 = vadd.f32 %v2223_v27, %v9280_v61  ;;  %v2491_v46 = vadd.f32 %v2490_v0, %v9296_v2  ;;  %6888 = vrsqrt.f32 %v9634_v11  ;;  %v4358_v3 = vpack.c.bf16 %v4232_v39, %v4231_v6 }
 0x291   :  { %v3913_v50 = vadd.f32 %v3785_v28, %v9534_v14  ;;  %v3914_v51 = vadd.f32 %v3786_v60, %v9536_v7  ;;  %v3467_v41 = vunpack.c.l.bf16 %v3400_v33  ;;  %v3468_v45 = vunpack.c.h.bf16 %v3400_v33 }
 0x292   :  { %v1960_v22 = vmul.f32 %v8706_v56, %v1927_v31  ;;  %v2569_v21 = vpack.c.bf16 %v2313_v20, %v2224_v58  ;;  %v2570_v24 = vpack.c.bf16 %v2491_v46, %v2402_v29  ;;  %v1481_v27 = vmul.f32 %v9639_v16, %v9639_v16 }
 0x293   :  { %v3595_v63 = vmul.f32 0.044677734, %v3467_v41  ;;  %v3596_v19 = vmul.f32 0.044677734, %v3468_v45  ;;  %v1449_v44 = vmul.f32 %v1416_v40, %v7523_v8  ;;  %v4421_v6 = vunpack.c.l.bf16 %v4357_v57 }
 0x294   :  { %v9650_v25 = vunpack.c.l.bf16 %v2569_v21  ;;  %v9652_v35 = vunpack.c.h.bf16 %v2569_v21  ;;  %v9654_v14 = vunpack.c.l.bf16 %v2570_v24  ;;  %v9656_v7 = vunpack.c.h.bf16 %v2570_v24 }
 0x295   :  { %v4039_v0 = vpack.c.bf16 %v3914_v51, %v3913_v50  ;;  %v3720_v31 = vpack.c.bf16 %v3596_v19, %v3595_v63  ;;  %v4422_v58 = vunpack.c.h.bf16 %v4357_v57  ;;  %v1513_v50 = vsub.f32 %v1449_v44, %v1481_v27 }
 0x296   :  { %12084 = vst [vmem:[#allocation51_spill] sm:$0xff] %v9650_v25  ;;  %v9660_v20 = vpop.eup %6888  ;;  %v2957_v29 = vmul.f32 %v9650_v25, %v9650_v25  ;;  %v2958_v28 = vmul.f32 %v9652_v35, %v9652_v35  ;;  %v2959_v60 = vmul.f32 %v9654_v14, %v9654_v14  ;;  %v2960_v33 = vmul.f32 %v9656_v7, %v9656_v7 }
 0x297   :  { %12085 = vst [vmem:[#allocation52_spill] sm:$0xff] %v9652_v35  ;;  %v3787_v46 = vunpack.c.l.bf16 %v3720_v31  ;;  %v3788_v40 = vunpack.c.h.bf16 %v3720_v31  ;;  %v4423_v51 = vunpack.c.l.bf16 %v4358_v3  ;;  %v1870_v41 = vmul.f32 %v9660_v20, %v9634_v11 }
 0x298   :  { %12086 = vst [vmem:[#allocation53_spill] sm:$0xff] %v9654_v14  ;;  %v3081_v45 = vpack.c.bf16 %v2958_v28, %v2957_v29  ;;  %v3082_v21 = vpack.c.bf16 %v2960_v33, %v2959_v60  ;;  %v4105_v24 = vunpack.c.l.bf16 %v4039_v0  ;;  %v4106_v63 = vunpack.c.h.bf16 %v4039_v0  ;;  %v1418_v33 = vpop.xlane.xlu1 %1417 }
 0x299   :  { %12087 = vst [vmem:[#allocation54_spill] sm:$0xff] %v9656_v7  ;;  %v3915_v19 = vadd.f32 %v3787_v46, %v9565_v54  ;;  %v3916_v39 = vadd.f32 %v3788_v40, %v9581_v52  ;;  %v1871_v43 = vmul.f32 %v9660_v20, %v1870_v41  ;;  %6890 = vtanh.f32 %v4421_v6  ;;  %v2314_v40 = vpop.f32.mrf.mxu2  ;;  %v2225_v41 = vpop.f32.mrf.mxu1 }
 0x29a   :  { %v3149_v32 = vunpack.c.l.bf16 %v3081_v45  ;;  %v3150_v62 = vunpack.c.h.bf16 %v3081_v45  ;;  %v3151_v57 = vunpack.c.l.bf16 %v3082_v21  ;;  %v3152_v27 = vunpack.c.h.bf16 %v3082_v21 }
 0x29b   :  { %v4040_v31 = vpack.c.bf16 %v3916_v39, %v3915_v19  ;;  %v9675_v44 = vadd.f32 1e-05, %v1513_v50  ;;  %v4424_v10 = vunpack.c.h.bf16 %v4358_v3  ;;  %6892 = vtanh.f32 %v4422_v58 }
 0x29c   :  { %v3277_v29 = vmul.f32 %v3149_v32, %v9650_v25  ;;  %v3278_v28 = vmul.f32 %v3150_v62, %v9652_v35  ;;  %v3279_v0 = vmul.f32 %v3151_v57, %v9654_v14  ;;  %v4233_v54 = vmul.f32 0.796875, %v4105_v24 }
 0x29d   :  { %v4234_v52 = vmul.f32 0.796875, %v4106_v63  ;;  %v3280_v60 = vmul.f32 %v3152_v27, %v9656_v7  ;;  %6894 = vtanh.f32 %v4423_v51  ;;  %v9682_v6 = vadd.f32 %v8724_v49, %v1960_v22  ;;  %v2492_v63 = vpop.f32.mrf.mxu0 }
 0x29e   :  { %v1872_v39 = vmul.f32 0.5, %v1871_v43  ;;  %v3401_v46 = vpack.c.bf16 %v3278_v28, %v3277_v29  ;;  %v4107_v3 = vunpack.c.l.bf16 %v4040_v31  ;;  %v4108_v50 = vunpack.c.h.bf16 %v4040_v31  ;;  %v2403_v29 = vpop.f32.mrf.mxu3 }
 0x29f   :  { %v3402_v32 = vpack.c.bf16 %v3280_v60, %v3279_v0  ;;  %6896 = vrsqrt.f32 %v9675_v44  ;;  %v1450_v45 = vmul.f32 %v1418_v33, %v7523_v8  ;;  %v9686_v21 = vpop.eup %6890  ;;  %v4359_v51 = vpack.c.bf16 %v4234_v52, %v4233_v54 }
 0x2a0   :  { %6898 = vtanh.f32 %v4424_v10  ;;  %v3469_v62 = vunpack.c.l.bf16 %v3401_v46  ;;  %v3470_v58 = vunpack.c.h.bf16 %v3401_v46  ;;  %v2315_v43 = vadd.f32 %v2314_v40, %v9316_v23 }
 0x2a1   :  { %v3471_v24 = vunpack.c.l.bf16 %v3402_v32  ;;  %v3472_v22 = vunpack.c.h.bf16 %v3402_v32  ;;  %v2226_v31 = vadd.f32 %v2225_v41, %v9280_v61  ;;  %v1514_v27 = vsub.f32 %v1450_v45, %v9622_v30  ;;  %v9691_v10 = vpop.eup %6892 }
 0x2a2   :  { %v3597_v19 = vmul.f32 0.044677734, %v3469_v62  ;;  %v3598_v57 = vmul.f32 0.044677734, %v3470_v58  ;;  %v4235_v28 = vmul.f32 0.796875, %v4107_v3  ;;  %v4236_v0 = vmul.f32 0.796875, %v4108_v50 }
 0x2a3   :  { %v1873_v8 = vsub.f32 1.5, %v1872_v39  ;;  %v3599_v60 = vmul.f32 0.044677734, %v3471_v24  ;;  %v9693_v33 = vpop.eup %6894  ;;  %vm1875_vm8 = vweird.f32 %v9634_v11  ;;  %v3600_v52 = vmul.f32 0.044677734, %v3472_v22  ;;  %v2228_v11 = vpop.f32.mrf.mxu1 }
 0x2a4   :  { %v3721_v54 = vpack.c.bf16 %v3598_v57, %v3597_v19  ;;  %v2493_v46 = vadd.f32 %v2492_v63, %v9296_v2  ;;  %v4425_v32 = vunpack.c.l.bf16 %v4359_v51  ;;  %vm1876_vm9 = vweird.f32 %v9660_v20 }
 0x2a5   :  { %v9697_v40 = vpop.eup %6896  ;;  %v2571_v30 = vpack.c.bf16 %v2315_v43, %v2226_v31  ;;  %v2404_v41 = vadd.f32 %v2403_v29, %v9323_v38  ;;  %v3722_v62 = vpack.c.bf16 %v3600_v52, %v3599_v60  ;;  %v9703_v58 = vadd.f32 1e-05, %v1514_v27  ;;  %vm9714_vm10 = vmor %vm1875_vm8, %vm1876_vm9 }
 0x2a6   :  { %v9701_v3 = vpop.eup %6898  ;;  %v3789_v39 = vunpack.c.l.bf16 %v3721_v54  ;;  %v3790_v50 = vunpack.c.h.bf16 %v3721_v54  ;;  %v4426_v45 = vunpack.c.h.bf16 %v4359_v51  ;;  %v4360_v24 = vpack.c.bf16 %v4236_v0, %v4235_v28 }
 0x2a7   :  { %v1874_v22 = vmul.f32 %v9660_v20, %v1873_v8  ;;  %v1880_v63 = vmul.f32 %v9697_v40, %v9675_v44  ;;  %v3791_v57 = vunpack.c.l.bf16 %v3722_v62  ;;  %v3792_v31 = vunpack.c.h.bf16 %v3722_v62  ;;  %v6546_v62 = vld [vmem:[#allocation11 + $0x50] sm:$0xff] }
 0x2a8   :  { %v3917_v19 = vadd.f32 %v3789_v39, %v9650_v25  ;;  %v3918_v43 = vadd.f32 %v3790_v50, %v9652_v35  ;;  %v9719_v29 = vunpack.c.l.bf16 %v2571_v30  ;;  %v9721_v28 = vunpack.c.h.bf16 %v2571_v30  ;;  %5860 = vmatpush.bf16.msra.mxu2 %v6546_v62 }
 0x2a9   :  { %v1881_v51 = vmul.f32 %v9697_v40, %v1880_v63  ;;  %v2572_v0 = vpack.c.bf16 %v2493_v46, %v2404_v41  ;;  %v3919_v60 = vadd.f32 %v3791_v57, %v9654_v14  ;;  %v3920_v54 = vadd.f32 %v3792_v31, %v9656_v7  ;;  %v6554_v63 = vld [vmem:[#allocation11 + $0x90] sm:$0xff] }
 0x2aa   :  { %12090 = vst [vmem:[#allocation55_spill] sm:$0xff] %v9719_v29  ;;  %v4041_v8 = vpack.c.bf16 %v3918_v43, %v3917_v19  ;;  %6900 = vrsqrt.f32 %v9703_v58  ;;  %v2961_v52 = vmul.f32 %v9719_v29, %v9719_v29  ;;  %v2962_v39 = vmul.f32 %v9721_v28, %v9721_v28  ;;  %5949 = vmatpush.bf16.msra.mxu3 %v6554_v63 }
 0x2ab   :  { %12091 = vst [vmem:[#allocation56_spill] sm:$0xff] %v9721_v28  ;;  %v9732_v50 = vunpack.c.l.bf16 %v2572_v0  ;;  %6902 = vtanh.f32 %v4425_v32  ;;  %v4427_v46 = vunpack.c.l.bf16 %v4360_v24  ;;  %v1878_v30 = vsel %vm9714_vm10, %v9660_v20, %v1874_v22 }
 0x2ac   :  { %v1882_v41 = vmul.f32 0.5, %v1881_v51  ;;  %v4109_v19 = vunpack.c.l.bf16 %v4041_v8  ;;  %v4110_v43 = vunpack.c.h.bf16 %v4041_v8  ;;  %v3083_v57 = vpack.c.bf16 %v2962_v39, %v2961_v52  ;;  %v2495_v51 = vpop.f32.mrf.mxu0 }
 0x2ad   :  { %12092 = vst [vmem:[#allocation57_spill] sm:$0xff] %v9732_v50  ;;  %v9737_v31 = vunpack.c.h.bf16 %v2572_v0  ;;  %6904 = vtanh.f32 %v4426_v45  ;;  %v4428_v18 = vunpack.c.h.bf16 %v4360_v24  ;;  %v4042_v12 = vpack.c.bf16 %v3920_v54, %v3919_v60 }
 0x2ae   :  { %vm1885_vm11 = vweird.f32 %v9675_v44  ;;  %v12094_v32 = vsub.f32 %v8818_v42, %v9546_v37  ;;  %v3153_v22 = vunpack.c.l.bf16 %v3083_v57  ;;  %v2963_v27 = vmul.f32 %v9732_v50, %v9732_v50 }
 0x2af   :  { %12093 = vst [vmem:[#allocation58_spill] sm:$0xff] %v9737_v31  ;;  %v1953_v0 = vmul.f32 %v8706_v56, %v9411_v9  ;;  %6906 = vtanh.f32 %v4427_v46  ;;  %v1883_v24 = vsub.f32 1.5, %v1882_v41  ;;  %v3154_v8 = vunpack.c.h.bf16 %v3083_v57 }
 0x2b0   :  { %v9743_v20 = vmul.f32 %v1878_v30, %v12094_v32  ;;  %v9749_v45 = vpop.eup %6900  ;;  %v2229_v60 = vadd.f32 %v2228_v11, %v9280_v61  ;;  %v4237_v54 = vmul.f32 0.796875, %v4109_v19  ;;  %v4238_v52 = vmul.f32 0.796875, %v4110_v43  ;;  %v2317_v30 = vpop.f32.mrf.mxu2 }
 0x2b1   :  { %v3281_v37 = vmul.f32 %v3153_v22, %v9719_v29  ;;  %v2964_v39 = vmul.f32 %v9737_v31, %v9737_v31  ;;  %v9755_v62 = vpop.eup %6902  ;;  %v4111_v63 = vunpack.c.l.bf16 %v4042_v12  ;;  %v4112_v32 = vunpack.c.h.bf16 %v4042_v12 }
 0x2b2   :  { %vm1886_vm12 = vweird.f32 %v9697_v40  ;;  %v2496_v9 = vadd.f32 %v2495_v51, %v9296_v2  ;;  %v1890_v46 = vmul.f32 %v9749_v45, %v9703_v58  ;;  %v3282_v11 = vmul.f32 %v3154_v8, %v9721_v28 }
 0x2b3   :  { %v3084_v41 = vpack.c.bf16 %v2964_v39, %v2963_v27  ;;  %v1986_v19 = vadd.f32 %v8724_v49, %v1953_v0  ;;  %v9763_v43 = vpop.eup %6904  ;;  %6908 = vtanh.f32 %v4428_v18  ;;  %v9766_v57 = vmul.f32 %v9697_v40, %v1883_v24  ;;  %vm9779_vm13 = vmor %vm1885_vm11, %vm1886_vm12  ;;  %v2406_v39 = vpop.f32.mrf.mxu3 }
 0x2b4   :  { %v1985_v12 = vadd.f32 %v8724_v49, %v9458_v4  ;;  %v2318_v22 = vadd.f32 %v2317_v30, %v9316_v23  ;;  %v9771_v51 = vpack.c.bf16 %v4238_v52, %v4237_v54  ;;  %v3403_v42 = vpack.c.bf16 %v3282_v11, %v3281_v37 }
 0x2b5   :  { %v3155_v7 = vunpack.c.l.bf16 %v3084_v41  ;;  %v3156_v14 = vunpack.c.h.bf16 %v3084_v41  ;;  %v9773_v8 = vpop.eup %6906  ;;  %v4239_v27 = vmul.f32 0.796875, %v4111_v63  ;;  %v4240_v0 = vmul.f32 0.796875, %v4112_v32 }
 0x2b6   :  { %12095 = vst [vmem:[#allocation59_spill] sm:$0xff] %v9771_v51  ;;  %v2007_v4 = vpack.c.bf16 %v1986_v19, %v1985_v12  ;;  %v2573_v24 = vpack.c.bf16 %v2318_v22, %v2229_v60  ;;  %v1891_v54 = vmul.f32 %v9749_v45, %v1890_v46  ;;  %v3473_v52 = vunpack.c.l.bf16 %v3403_v42 }
 0x2b7   :  { %v3474_v37 = vunpack.c.h.bf16 %v3403_v42  ;;  %v3283_v30 = vmul.f32 %v3155_v7, %v9732_v50  ;;  %v3284_v63 = vmul.f32 %v3156_v14, %v9737_v31  ;;  %v2407_v11 = vadd.f32 %v2406_v39, %v9323_v38  ;;  %v6538_v39 = vld [vmem:[#allocation11 + $0x10] sm:$0xff] }
 0x2b8   :  { %2267 = vmatmul.bf16.gmra.mxu1 %v2007_v4  ;;  %2356 = vmatmul.bf16.gmra.mxu2 %v2007_v4  ;;  %v9786_v32 = vunpack.c.l.bf16 %v2573_v24  ;;  %v9788_v44 = vunpack.c.h.bf16 %v2573_v24  ;;  %v1888_v60 = vsel %vm9779_vm13, %v9697_v40, %v9766_v57  ;;  %vm1895_vm14 = vweird.f32 %v9703_v58 }
 0x2b9   :  { %vm1896_vm15 = vweird.f32 %v9749_v45  ;;  %v3601_v42 = vmul.f32 0.044677734, %v3473_v52  ;;  %v3602_v14 = vmul.f32 0.044677734, %v3474_v37  ;;  %2445 = vmatmul.bf16.gmra.mxu3 %v2007_v4  ;;  %2534 = vmatmul.bf16.gmra.mxu0 %v2007_v4  ;;  %v9798_v7 = vpop.eup %6908  ;;  %v3404_v19 = vpack.c.bf16 %v3284_v63, %v3283_v30  ;;  %v6562_v52 = vld [vmem:[#allocation11 + $0xd0] sm:$0xff] }
 0x2ba   :  { %12098 = vst [vmem:[#allocation60_spill] sm:$0xff] %v9786_v32  ;;  %v2965_v12 = vmul.f32 %v9786_v32, %v9786_v32  ;;  %v2966_v22 = vmul.f32 %v9788_v44, %v9788_v44  ;;  %v9805_v40 = vpack.c.bf16 %v4240_v0, %v4239_v27  ;;  %v1892_v57 = vmul.f32 0.5, %v1891_v54  ;;  %5771 = vmatpush.bf16.msra.mxu1 %v6538_v39  ;;  %vm9838_vm0 = vmor %vm1895_vm14, %vm1896_vm15 }
 0x2bb   :  { %12099 = vst [vmem:[#allocation61_spill] sm:$0xff] %v9788_v44  ;;  %v3723_v18 = vpack.c.bf16 %v3602_v14, %v3601_v42  ;;  %v2574_v24 = vpack.c.bf16 %v2496_v9, %v2407_v11  ;;  %v3475_v37 = vunpack.c.l.bf16 %v3404_v19  ;;  %v3476_v4 = vunpack.c.h.bf16 %v3404_v19  ;;  %6038 = vmatpush.bf16.msra.mxu0 %v6562_v52 }
 0x2bc   :  { %12100 = vst [vmem:[#allocation62_spill] sm:$0xff] %v9805_v40  ;;  %v3085_v41 = vpack.c.bf16 %v2966_v22, %v2965_v12  ;;  %v1955_v46 = vmul.f32 %v8706_v56, %v9451_v1  ;;  %v1893_v11 = vsub.f32 1.5, %v1892_v57  ;;  %v2319_v1 = vpop.f32.mrf.mxu2  ;;  %v1954_v19 = vmul.f32 %v8706_v56, %v9435_v17 }
 0x2bd   :  { %v3793_v30 = vunpack.c.l.bf16 %v3723_v18  ;;  %v3794_v63 = vunpack.c.h.bf16 %v3723_v18  ;;  %v9809_v51 = vunpack.c.l.bf16 %v2574_v24  ;;  %v9811_v35 = vunpack.c.h.bf16 %v2574_v24 }
 0x2be   :  { %v3603_v27 = vmul.f32 0.044677734, %v3475_v37  ;;  %v3604_v0 = vmul.f32 0.044677734, %v3476_v4  ;;  %v3157_v54 = vunpack.c.l.bf16 %v3085_v41  ;;  %v3158_v9 = vunpack.c.h.bf16 %v3085_v41  ;;  %v2230_v37 = vpop.f32.mrf.mxu1 }
 0x2bf   :  { %12101 = vst [vmem:[#allocation63_spill] sm:$0xff] %v9809_v51  ;;  %v2967_v42 = vmul.f32 %v9809_v51, %v9809_v51  ;;  %v2968_v14 = vmul.f32 %v9811_v35, %v9811_v35  ;;  %v3921_v12 = vadd.f32 %v3793_v30, %v9719_v29  ;;  %v3922_v22 = vadd.f32 %v3794_v63, %v9721_v28 }
 0x2c0   :  { %12102 = vst [vmem:[#allocation64_spill] sm:$0xff] %v9811_v35  ;;  %v3285_v18 = vmul.f32 %v3157_v54, %v9786_v32  ;;  %v3286_v24 = vmul.f32 %v3158_v9, %v9788_v44  ;;  %v12103_v41 = vsub.f32 %v8862_v59, %v9639_v16  ;;  %v3724_v39 = vpack.c.bf16 %v3604_v0, %v3603_v27 }
 0x2c1   :  { %v3086_v52 = vpack.c.bf16 %v2968_v14, %v2967_v42  ;;  %v1988_v4 = vadd.f32 %v8724_v49, %v1955_v46  ;;  %v2320_v63 = vadd.f32 %v2319_v1, %v9316_v23  ;;  %v1894_v54 = vmul.f32 %v9749_v45, %v1893_v11  ;;  %v2497_v14 = vpop.f32.mrf.mxu0 }
 0x2c2   :  { %v9826_v57 = vmul.f32 %v1888_v60, %v12103_v41  ;;  %v3405_v29 = vpack.c.bf16 %v3286_v24, %v3285_v18  ;;  %v1987_v16 = vadd.f32 %v8724_v49, %v1954_v19  ;;  %v4043_v46 = vpack.c.bf16 %v3922_v22, %v3921_v12  ;;  %v2408_v19 = vpop.f32.mrf.mxu3 }
 0x2c3   :  { %v3159_v9 = vunpack.c.l.bf16 %v3086_v52  ;;  %v3160_v28 = vunpack.c.h.bf16 %v3086_v52  ;;  %v2231_v42 = vadd.f32 %v2230_v37, %v9280_v61  ;;  %v3795_v1 = vunpack.c.l.bf16 %v3724_v39 }
 0x2c4   :  { %v3477_v27 = vunpack.c.l.bf16 %v3405_v29  ;;  %v3478_v0 = vunpack.c.h.bf16 %v3405_v29  ;;  %v2008_v24 = vpack.c.bf16 %v1988_v4, %v1987_v16  ;;  %v3796_v41 = vunpack.c.h.bf16 %v3724_v39 }
 0x2c5   :  { %v3287_v11 = vmul.f32 %v3159_v9, %v9809_v51  ;;  %v3288_v18 = vmul.f32 %v3160_v28, %v9811_v35  ;;  %v2575_v30 = vpack.c.bf16 %v2320_v63, %v2231_v42  ;;  %v1898_v12 = vsel %vm9838_vm0, %v9749_v45, %v1894_v54 }
 0x2c6   :  { %v3605_v52 = vmul.f32 0.044677734, %v3477_v27  ;;  %v3606_v58 = vmul.f32 0.044677734, %v3478_v0  ;;  %v2498_v29 = vadd.f32 %v2497_v14, %v9296_v2  ;;  %v2409_v37 = vadd.f32 %v2408_v19, %v9323_v38  ;;  %v2233_v14 = vpop.f32.mrf.mxu1 }
 0x2c7   :  { %v3406_v22 = vpack.c.bf16 %v3288_v18, %v3287_v11  ;;  %v4113_v17 = vunpack.c.l.bf16 %v4043_v46  ;;  %v4114_v59 = vunpack.c.h.bf16 %v4043_v46  ;;  %v9850_v40 = vunpack.c.l.bf16 %v2575_v30 }
 0x2c8   :  { %v3725_v9 = vpack.c.bf16 %v3606_v58, %v3605_v52  ;;  %2272 = vmatmul.bf16.gmra.mxu1 %v2008_v24  ;;  %2361 = vmatmul.bf16.gmra.mxu2 %v2008_v24  ;;  %v9852_v4 = vunpack.c.h.bf16 %v2575_v30  ;;  %v2576_v63 = vpack.c.bf16 %v2498_v29, %v2409_v37  ;;  %v3923_v45 = vadd.f32 %v3795_v1, %v9732_v50  ;;  %v2322_v30 = vpop.f32.mrf.mxu2 }
 0x2c9   :  { %12106 = vst [vmem:[#allocation65_spill] sm:$0xff] %v9850_v40  ;;  %v3479_v28 = vunpack.c.l.bf16 %v3406_v22  ;;  %v3480_v39 = vunpack.c.h.bf16 %v3406_v22  ;;  %2450 = vmatmul.bf16.gmra.mxu3 %v2008_v24  ;;  %2539 = vmatmul.bf16.gmra.mxu0 %v2008_v24  ;;  %v3924_v54 = vadd.f32 %v3796_v41, %v9737_v31  ;;  %v2969_v0 = vmul.f32 %v9850_v40, %v9850_v40 }
 0x2ca   :  { %12107 = vst [vmem:[#allocation66_spill] sm:$0xff] %v9852_v4  ;;  %v3797_v16 = vunpack.c.l.bf16 %v3725_v9  ;;  %v3798_v60 = vunpack.c.h.bf16 %v3725_v9  ;;  %v2970_v42 = vmul.f32 %v9852_v4, %v9852_v4  ;;  %v9862_v19 = vunpack.c.l.bf16 %v2576_v63 }
 0x2cb   :  { %v3607_v27 = vmul.f32 0.044677734, %v3479_v28  ;;  %v3608_v46 = vmul.f32 0.044677734, %v3480_v39  ;;  %v1956_v1 = vmul.f32 %v8706_v56, %v9497_v55  ;;  %v4241_v24 = vmul.f32 0.796875, %v4113_v17 }
 0x2cc   :  { %v3925_v11 = vadd.f32 %v3797_v16, %v9786_v32  ;;  %v3926_v18 = vadd.f32 %v3798_v60, %v9788_v44  ;;  %12108 = vst [vmem:[#allocation67_spill] sm:$0xff] %v9862_v19  ;;  %v3087_v52 = vpack.c.bf16 %v2970_v42, %v2969_v0  ;;  %v9866_v58 = vunpack.c.h.bf16 %v2576_v63 }
 0x2cd   :  { %v3726_v41 = vpack.c.bf16 %v3608_v46, %v3607_v27  ;;  %v4242_v22 = vmul.f32 0.796875, %v4114_v59  ;;  %v2971_v29 = vmul.f32 %v9862_v19, %v9862_v19  ;;  %v2234_v37 = vadd.f32 %v2233_v14, %v9280_v61 }
 0x2ce   :  { %v2323_v9 = vadd.f32 %v2322_v30, %v9316_v23  ;;  %v4044_v28 = vpack.c.bf16 %v3924_v54, %v3923_v45  ;;  %v4045_v39 = vpack.c.bf16 %v3926_v18, %v3925_v11  ;;  %v3161_v16 = vunpack.c.l.bf16 %v3087_v52  ;;  %v2411_v54 = vpop.f32.mrf.mxu3 }
 0x2cf   :  { %v3162_v60 = vunpack.c.h.bf16 %v3087_v52  ;;  %v12109_v55 = vsub.f32 %v8856_v15, %v9601_v13  ;;  %v2972_v63 = vmul.f32 %v9866_v58, %v9866_v58  ;;  %v1957_v27 = vmul.f32 %v8706_v56, %v9561_v26  ;;  %v2500_v26 = vpop.f32.mrf.mxu0 }
 0x2d0   :  { %v2577_v59 = vpack.c.bf16 %v2323_v9, %v2234_v37  ;;  %v3799_v46 = vunpack.c.l.bf16 %v3726_v41  ;;  %v3800_v0 = vunpack.c.h.bf16 %v3726_v41  ;;  %v3289_v42 = vmul.f32 %v3161_v16, %v9850_v40 }
 0x2d1   :  { %v9875_v17 = vmul.f32 %v1898_v12, %v12109_v55  ;;  %v3290_v45 = vmul.f32 %v3162_v60, %v9852_v4  ;;  %v9883_v14 = vpack.c.bf16 %v4242_v22, %v4241_v24  ;;  %v3088_v30 = vpack.c.bf16 %v2972_v63, %v2971_v29 }
 0x2d2   :  { %v9885_v13 = vunpack.c.l.bf16 %v2577_v59  ;;  %v9888_v12 = vadd.f32 %v8724_v49, %v1956_v1  ;;  %v4115_v11 = vunpack.c.l.bf16 %v4044_v28  ;;  %v4116_v18 = vunpack.c.h.bf16 %v4044_v28 }
 0x2d3   :  { %12110 = vst [vmem:[#allocation68_spill] sm:$0xff] %v9883_v14  ;;  %v4117_v52 = vunpack.c.l.bf16 %v4045_v39  ;;  %v3407_v37 = vpack.c.bf16 %v3290_v45, %v3289_v42  ;;  %v3163_v9 = vunpack.c.l.bf16 %v3088_v30  ;;  %v3164_v41 = vunpack.c.h.bf16 %v3088_v30  ;;  %v2324_v45 = vpop.f32.mrf.mxu2 }
 0x2d4   :  { %12111 = vst [vmem:[#allocation69_spill] sm:$0xff] %v9885_v13  ;;  %v9890_v55 = vunpack.c.h.bf16 %v2577_v59  ;;  %v2412_v16 = vadd.f32 %v2411_v54, %v9323_v38  ;;  %v3927_v24 = vadd.f32 %v3799_v46, %v9809_v51  ;;  %v3928_v22 = vadd.f32 %v3800_v0, %v9811_v35  ;;  %v2235_v35 = vpop.f32.mrf.mxu1 }
 0x2d5   :  { %v3481_v29 = vunpack.c.l.bf16 %v3407_v37  ;;  %v3482_v60 = vunpack.c.h.bf16 %v3407_v37  ;;  %v3291_v1 = vmul.f32 %v3163_v9, %v9862_v19  ;;  %v3292_v63 = vmul.f32 %v3164_v41, %v9866_v58 }
 0x2d6   :  { %12112 = vst [vmem:[#allocation70_spill] sm:$0xff] %v9890_v55  ;;  %v2501_v28 = vadd.f32 %v2500_v26, %v9296_v2  ;;  %v2973_v42 = vmul.f32 %v9885_v13, %v9885_v13  ;;  %v4243_v59 = vmul.f32 0.796875, %v4115_v11  ;;  %v4118_v30 = vunpack.c.h.bf16 %v4045_v39 }
 0x2d7   :  { %v3609_v15 = vmul.f32 0.044677734, %v3481_v29  ;;  %v3610_v54 = vmul.f32 0.044677734, %v3482_v60  ;;  %v4244_v44 = vmul.f32 0.796875, %v4116_v18  ;;  %v3408_v46 = vpack.c.bf16 %v3292_v63, %v3291_v1 }
 0x2d8   :  { %v2974_v0 = vmul.f32 %v9890_v55, %v9890_v55  ;;  %v2578_v37 = vpack.c.bf16 %v2501_v28, %v2412_v16  ;;  %v4245_v9 = vmul.f32 0.796875, %v4117_v52  ;;  %v4046_v51 = vpack.c.bf16 %v3928_v22, %v3927_v24 }
 0x2d9   :  { %v3727_v41 = vpack.c.bf16 %v3610_v54, %v3609_v15  ;;  %v2325_v26 = vadd.f32 %v2324_v45, %v9316_v23  ;;  %v3483_v32 = vunpack.c.l.bf16 %v3408_v46  ;;  %v3484_v31 = vunpack.c.h.bf16 %v3408_v46  ;;  %v2413_v54 = vpop.f32.mrf.mxu3 }
 0x2da   :  { %v3089_v50 = vpack.c.bf16 %v2974_v0, %v2973_v42  ;;  %v9903_v14 = vunpack.c.l.bf16 %v2578_v37  ;;  %v4246_v39 = vmul.f32 0.796875, %v4118_v30  ;;  %v2236_v18 = vadd.f32 %v2235_v35, %v9280_v61 }
 0x2db   :  { %v3801_v11 = vunpack.c.l.bf16 %v3727_v41  ;;  %v3802_v29 = vunpack.c.h.bf16 %v3727_v41  ;;  %v3611_v60 = vmul.f32 0.044677734, %v3483_v32  ;;  %v3612_v1 = vmul.f32 0.044677734, %v3484_v31 }
 0x2dc   :  { %12113 = vst [vmem:[#allocation71_spill] sm:$0xff] %v9903_v14  ;;  %v3165_v63 = vunpack.c.l.bf16 %v3089_v50  ;;  %v3166_v16 = vunpack.c.h.bf16 %v3089_v50  ;;  %v4119_v28 = vunpack.c.l.bf16 %v4046_v51  ;;  %v9906_v52 = vunpack.c.h.bf16 %v2578_v37  ;;  %v2502_v37 = vpop.f32.mrf.mxu0 }
 0x2dd   :  { %v2975_v15 = vmul.f32 %v9903_v14, %v9903_v14  ;;  %v1990_v24 = vadd.f32 %v8724_v49, %v1957_v27  ;;  %v3728_v22 = vpack.c.bf16 %v3612_v1, %v3611_v60  ;;  %v2579_v30 = vpack.c.bf16 %v2325_v26, %v2236_v18 }
 0x2de   :  { %12114 = vst [vmem:[#allocation72_spill] sm:$0xff] %v9906_v52  ;;  %v3293_v42 = vmul.f32 %v3165_v63, %v9885_v13  ;;  %v3294_v45 = vmul.f32 %v3166_v16, %v9890_v55  ;;  %v9913_v35 = vpack.c.bf16 %v4244_v44, %v4243_v59  ;;  %v9915_v31 = vpack.c.bf16 %v4246_v39, %v4245_v9 }
 0x2df   :  { %v4120_v50 = vunpack.c.h.bf16 %v4046_v51  ;;  %v2976_v32 = vmul.f32 %v9906_v52, %v9906_v52  ;;  %v3929_v46 = vadd.f32 %v3801_v11, %v9850_v40  ;;  %v3930_v0 = vadd.f32 %v3802_v29, %v9852_v4  ;;  %v6545_v40 = vld [vmem:[#allocation11 + $0x48] sm:$0xff] }
 0x2e0   :  { %12115 = vst [vmem:[#allocation73_spill] sm:$0xff] %v9913_v35  ;;  %v3409_v27 = vpack.c.bf16 %v3294_v45, %v3293_v42  ;;  %v9921_v41 = vunpack.c.l.bf16 %v2579_v30  ;;  %v4247_v60 = vmul.f32 0.796875, %v4119_v28  ;;  %v9923_v26 = vunpack.c.h.bf16 %v2579_v30  ;;  %v6553_v35 = vld [vmem:[#allocation11 + $0x88] sm:$0xff]  ;;  %5861 = vmatpush.bf16.msra.mxu2 %v6545_v40 }
 0x2e1   :  { %v3090_v1 = vpack.c.bf16 %v2976_v32, %v2975_v15  ;;  %v2414_v44 = vadd.f32 %v2413_v54, %v9323_v38  ;;  %v3803_v59 = vunpack.c.l.bf16 %v3728_v22  ;;  %v3804_v9 = vunpack.c.h.bf16 %v3728_v22  ;;  %5950 = vmatpush.bf16.msra.mxu3 %v6553_v35 }
 0x2e2   :  { %12116 = vst [vmem:[#allocation74_spill] sm:$0xff] %v9921_v41  ;;  %v3485_v51 = vunpack.c.l.bf16 %v3409_v27  ;;  %v3486_v39 = vunpack.c.h.bf16 %v3409_v27  ;;  %v4248_v18 = vmul.f32 0.796875, %v4120_v50  ;;  %v2503_v11 = vadd.f32 %v2502_v37, %v9296_v2  ;;  %v2238_v50 = vpop.f32.mrf.mxu1 }
 0x2e3   :  { %12117 = vst [vmem:[#allocation75_spill] sm:$0xff] %v9923_v26  ;;  %v3167_v63 = vunpack.c.l.bf16 %v3090_v1  ;;  %v3168_v16 = vunpack.c.h.bf16 %v3090_v1  ;;  %v9927_v29 = vpack.c.bf16 %v3930_v0, %v3929_v46  ;;  %v2977_v28 = vmul.f32 %v9921_v41, %v9921_v41 }
 0x2e4   :  { %v3613_v42 = vmul.f32 0.044677734, %v3485_v51  ;;  %v3614_v45 = vmul.f32 0.044677734, %v3486_v39  ;;  %v2978_v54 = vmul.f32 %v9923_v26, %v9923_v26  ;;  %v3931_v32 = vadd.f32 %v3803_v59, %v9862_v19 }
 0x2e5   :  { %v3295_v30 = vmul.f32 %v3167_v63, %v9903_v14  ;;  %v3296_v22 = vmul.f32 %v3168_v16, %v9906_v52  ;;  %v3932_v46 = vadd.f32 %v3804_v9, %v9866_v58  ;;  %v2580_v27 = vpack.c.bf16 %v2503_v11, %v2414_v44 }
 0x2e6   :  { %v3729_v0 = vpack.c.bf16 %v3614_v45, %v3613_v42  ;;  %v9938_v37 = vpack.c.bf16 %v4248_v18, %v4247_v60  ;;  %v3091_v51 = vpack.c.bf16 %v2978_v54, %v2977_v28  ;;  %v2009_v39 = vpack.c.bf16 %v1990_v24, %v9888_v12  ;;  %v2327_v60 = vpop.f32.mrf.mxu2 }
 0x2e7   :  { %v3410_v1 = vpack.c.bf16 %v3296_v22, %v3295_v30  ;;  %v4121_v63 = vunpack.c.l.bf16 %v9927_v29  ;;  %v2239_v4 = vadd.f32 %v2238_v50, %v9280_v61  ;;  %v4048_v44 = vpack.c.bf16 %v3932_v46, %v3931_v32 }
 0x2e8   :  { %12118 = vst [vmem:[#allocation76_spill] sm:$0xff] %v9938_v37  ;;  %v3805_v15 = vunpack.c.l.bf16 %v3729_v0  ;;  %v3806_v16 = vunpack.c.h.bf16 %v3729_v0  ;;  %v3169_v19 = vunpack.c.l.bf16 %v3091_v51  ;;  %v3170_v9 = vunpack.c.h.bf16 %v3091_v51  ;;  %2277 = vmatmul.bf16.gmra.mxu1 %v2009_v39  ;;  %2366 = vmatmul.bf16.gmra.mxu2 %v2009_v39 }
 0x2e9   :  { %v3487_v25 = vunpack.c.l.bf16 %v3410_v1  ;;  %v3488_v59 = vunpack.c.h.bf16 %v3410_v1  ;;  %v9945_v24 = vunpack.c.l.bf16 %v2580_v27  ;;  %2455 = vmatmul.bf16.gmra.mxu3 %v2009_v39  ;;  %2544 = vmatmul.bf16.gmra.mxu0 %v2009_v39  ;;  %v9949_v22 = vunpack.c.h.bf16 %v2580_v27 }
 0x2ea   :  { %v3933_v18 = vadd.f32 %v3805_v15, %v9885_v13  ;;  %v3934_v12 = vadd.f32 %v3806_v16, %v9890_v55  ;;  %v3297_v45 = vmul.f32 %v3169_v19, %v9921_v41  ;;  %v3298_v28 = vmul.f32 %v3170_v9, %v9923_v26 }
 0x2eb   :  { %12119 = vst [vmem:[#allocation77_spill] sm:$0xff] %v9945_v24  ;;  %v3615_v11 = vmul.f32 0.044677734, %v3487_v25  ;;  %v3616_v42 = vmul.f32 0.044677734, %v3488_v59  ;;  %v2979_v15 = vmul.f32 %v9945_v24, %v9945_v24  ;;  %v2328_v54 = vadd.f32 %v2327_v60, %v9316_v23 }
 0x2ec   :  { %v4049_v30 = vpack.c.bf16 %v3934_v12, %v3933_v18  ;;  %12120 = vst [vmem:[#allocation78_spill] sm:$0xff] %v9949_v22  ;;  %v3411_v46 = vpack.c.bf16 %v3298_v28, %v3297_v45  ;;  %v4122_v19 = vunpack.c.h.bf16 %v9927_v29  ;;  %v4249_v0 = vmul.f32 0.796875, %v4121_v63  ;;  %v2416_v18 = vpop.f32.mrf.mxu3  ;;  %v2505_v29 = vpop.f32.mrf.mxu0 }
 0x2ed   :  { %v3730_v25 = vpack.c.bf16 %v3616_v42, %v3615_v11  ;;  %v2980_v40 = vmul.f32 %v9949_v22, %v9949_v22  ;;  %v2581_v35 = vpack.c.bf16 %v2328_v54, %v2239_v4  ;;  %v4123_v16 = vunpack.c.l.bf16 %v4048_v44 }
 0x2ee   :  { %v4125_v27 = vunpack.c.l.bf16 %v4049_v30  ;;  %v4126_v1 = vunpack.c.h.bf16 %v4049_v30  ;;  %v3489_v51 = vunpack.c.l.bf16 %v3411_v46  ;;  %v3490_v39 = vunpack.c.h.bf16 %v3411_v46 }
 0x2ef   :  { %v4124_v59 = vunpack.c.h.bf16 %v4048_v44  ;;  %v3092_v9 = vpack.c.bf16 %v2980_v40, %v2979_v15  ;;  %v9959_v60 = vunpack.c.l.bf16 %v2581_v35  ;;  %v3807_v12 = vunpack.c.l.bf16 %v3730_v25 }
 0x2f0   :  { %v3808_v11 = vunpack.c.h.bf16 %v3730_v25  ;;  %v3617_v42 = vmul.f32 0.044677734, %v3489_v51  ;;  %v3618_v45 = vmul.f32 0.044677734, %v3490_v39  ;;  %v4250_v63 = vmul.f32 0.796875, %v4122_v19 }
 0x2f1   :  { %12121 = vst [vmem:[#allocation79_spill] sm:$0xff] %v9959_v60  ;;  %v3171_v28 = vunpack.c.l.bf16 %v3092_v9  ;;  %v3172_v32 = vunpack.c.h.bf16 %v3092_v9  ;;  %v9961_v50 = vunpack.c.h.bf16 %v2581_v35  ;;  %v4253_v4 = vmul.f32 0.796875, %v4125_v27 }
 0x2f2   :  { %v4254_v30 = vmul.f32 0.796875, %v4126_v1  ;;  %v3731_v54 = vpack.c.bf16 %v3618_v45, %v3617_v42  ;;  %v2417_v46 = vadd.f32 %v2416_v18, %v9323_v38  ;;  %v2506_v40 = vadd.f32 %v2505_v29, %v9296_v2 }
 0x2f3   :  { %12122 = vst [vmem:[#allocation80_spill] sm:$0xff] %v9961_v50  ;;  %v3299_v44 = vmul.f32 %v3171_v28, %v9945_v24  ;;  %v3300_v15 = vmul.f32 %v3172_v32, %v9949_v22  ;;  %v2981_v25 = vmul.f32 %v9959_v60, %v9959_v60  ;;  %v4251_v51 = vmul.f32 0.796875, %v4123_v16 }
 0x2f4   :  { %v4252_v19 = vmul.f32 0.796875, %v4124_v59  ;;  %v3935_v39 = vadd.f32 %v3807_v12, %v9903_v14  ;;  %v3936_v35 = vadd.f32 %v3808_v11, %v9906_v52  ;;  %v2982_v9 = vmul.f32 %v9961_v50, %v9961_v50 }
 0x2f5   :  { %v3412_v1 = vpack.c.bf16 %v3300_v15, %v3299_v44  ;;  %v2582_v18 = vpack.c.bf16 %v2506_v40, %v2417_v46  ;;  %v9974_v42 = vpack.c.bf16 %v4250_v63, %v4249_v0  ;;  %v9976_v32 = vpack.c.bf16 %v4254_v30, %v4253_v4  ;;  %v6537_v44 = vld [vmem:[#allocation11 + $0x8] sm:$0xff]  ;;  %v2240_v46 = vpop.f32.mrf.mxu1  ;;  %v2329_v40 = vpop.f32.mrf.mxu2 }
 0x2f6   :  { %v3809_v45 = vunpack.c.l.bf16 %v3731_v54  ;;  %v3810_v29 = vunpack.c.h.bf16 %v3731_v54  ;;  %v3093_v59 = vpack.c.bf16 %v2982_v9, %v2981_v25  ;;  %v9980_v12 = vpack.c.bf16 %v4252_v19, %v4251_v51  ;;  %v6561_v15 = vld [vmem:[#allocation11 + $0xc8] sm:$0xff]  ;;  %5772 = vmatpush.bf16.msra.mxu1 %v6537_v44 }
 0x2f7   :  { %12123 = vst [vmem:[#allocation81_spill] sm:$0xff] %v9976_v32  ;;  %v3491_v28 = vunpack.c.l.bf16 %v3412_v1  ;;  %v3492_v16 = vunpack.c.h.bf16 %v3412_v1  ;;  %v9978_v55 = vunpack.c.l.bf16 %v2582_v18  ;;  %v4050_v11 = vpack.c.bf16 %v3936_v35, %v3935_v39  ;;  %6039 = vmatpush.bf16.msra.mxu0 %v6561_v15  ;;  %v2418_v35 = vpop.f32.mrf.mxu3 }
 0x2f8   :  { %12124 = vst [vmem:[#allocation82_spill] sm:$0xff] %v9980_v12  ;;  %v9982_v27 = vunpack.c.h.bf16 %v2582_v18  ;;  %v9986_v0 = vmul.f32 %v8706_v56, %v9606_v53  ;;  %v3173_v30 = vunpack.c.l.bf16 %v3093_v59  ;;  %v3174_v54 = vunpack.c.h.bf16 %v3093_v59 }
 0x2f9   :  { %v3619_v63 = vmul.f32 0.044677734, %v3491_v28  ;;  %v3620_v4 = vmul.f32 0.044677734, %v3492_v16  ;;  %v3937_v19 = vadd.f32 %v3809_v45, %v9921_v41  ;;  %v3938_v39 = vadd.f32 %v3810_v29, %v9923_v26  ;;  %v2507_v45 = vpop.f32.mrf.mxu0 }
 0x2fa   :  { %v3301_v53 = vmul.f32 %v3173_v30, %v9959_v60  ;;  %v3302_v9 = vmul.f32 %v3174_v54, %v9961_v50  ;;  %v2983_v18 = vmul.f32 %v9978_v55, %v9978_v55  ;;  %v4127_v28 = vunpack.c.l.bf16 %v4050_v11 }
 0x2fb   :  { %v3732_v1 = vpack.c.bf16 %v3620_v4, %v3619_v63  ;;  %v2984_v16 = vmul.f32 %v9982_v27, %v9982_v27  ;;  %v2241_v59 = vadd.f32 %v2240_v46, %v9280_v61  ;;  %v2330_v29 = vadd.f32 %v2329_v40, %v9316_v23 }
 0x2fc   :  { %v3413_v51 = vpack.c.bf16 %v3302_v9, %v3301_v53  ;;  %v2419_v63 = vadd.f32 %v2418_v35, %v9323_v38  ;;  %v4128_v4 = vunpack.c.h.bf16 %v4050_v11  ;;  %v4051_v30 = vpack.c.bf16 %v3938_v39, %v3937_v19 }
 0x2fd   :  { %v3811_v44 = vunpack.c.l.bf16 %v3732_v1  ;;  %v3812_v15 = vunpack.c.h.bf16 %v3732_v1  ;;  %v3094_v54 = vpack.c.bf16 %v2984_v16, %v2983_v18  ;;  %v2583_v25 = vpack.c.bf16 %v2330_v29, %v2241_v59 }
 0x2fe   :  { %v3493_v14 = vunpack.c.l.bf16 %v3413_v51  ;;  %v3494_v26 = vunpack.c.h.bf16 %v3413_v51  ;;  %v2508_v41 = vadd.f32 %v2507_v45, %v9296_v2  ;;  %v4255_v18 = vmul.f32 0.796875, %v4127_v28 }
 0x2ff   :  { %v3939_v52 = vadd.f32 %v3811_v44, %v9945_v24  ;;  %v3175_v13 = vunpack.c.l.bf16 %v3094_v54  ;;  %v3176_v46 = vunpack.c.h.bf16 %v3094_v54  ;;  %v10003_v32 = vunpack.c.l.bf16 %v2583_v25 }
 0x300   :  { %v10005_v40 = vunpack.c.h.bf16 %v2583_v25  ;;  %v3940_v1 = vadd.f32 %v3812_v15, %v9949_v22  ;;  %v3621_v53 = vmul.f32 0.044677734, %v3493_v14  ;;  %v3622_v35 = vmul.f32 0.044677734, %v3494_v26 }
 0x301   :  { %v2584_v11 = vpack.c.bf16 %v2508_v41, %v2419_v63  ;;  %v3303_v19 = vmul.f32 %v3175_v13, %v9978_v55  ;;  %v3304_v39 = vmul.f32 %v3176_v46, %v9982_v27  ;;  %v2985_v51 = vmul.f32 %v10003_v32, %v10003_v32 }
 0x302   :  { %v2986_v9 = vmul.f32 %v10005_v40, %v10005_v40  ;;  %v4256_v16 = vmul.f32 0.796875, %v4128_v4  ;;  %v3733_v59 = vpack.c.bf16 %v3622_v35, %v3621_v53  ;;  %v4129_v45 = vunpack.c.l.bf16 %v4051_v30  ;;  %v2243_v53 = vpop.f32.mrf.mxu1 }
 0x303   :  { %v10014_v25 = vunpack.c.l.bf16 %v2584_v11  ;;  %v4130_v29 = vunpack.c.h.bf16 %v4051_v30  ;;  %v3414_v14 = vpack.c.bf16 %v3304_v39, %v3303_v19  ;;  %v4052_v41 = vpack.c.bf16 %v3940_v1, %v3939_v52  ;;  %v2332_v19 = vpop.f32.mrf.mxu2 }
 0x304   :  { %v3095_v26 = vpack.c.bf16 %v2986_v9, %v2985_v51  ;;  %v3813_v44 = vunpack.c.l.bf16 %v3733_v59  ;;  %v3814_v13 = vunpack.c.h.bf16 %v3733_v59  ;;  %v10016_v15 = vunpack.c.h.bf16 %v2584_v11 }
 0x305   :  { %12125 = vst [vmem:[#allocation83_spill] sm:$0xff] %v10014_v25  ;;  %v3495_v63 = vunpack.c.l.bf16 %v3414_v14  ;;  %v3496_v54 = vunpack.c.h.bf16 %v3414_v14  ;;  %v10018_v24 = vpack.c.bf16 %v4256_v16, %v4255_v18  ;;  %v2987_v30 = vmul.f32 %v10014_v25, %v10014_v25 }
 0x306   :  { %12126 = vst [vmem:[#allocation84_spill] sm:$0xff] %v10016_v15  ;;  %v3177_v46 = vunpack.c.l.bf16 %v3095_v26  ;;  %v3178_v22 = vunpack.c.h.bf16 %v3095_v26  ;;  %v3941_v28 = vadd.f32 %v3813_v44, %v9959_v60  ;;  %v3942_v4 = vadd.f32 %v3814_v13, %v9961_v50  ;;  %v2510_v44 = vpop.f32.mrf.mxu0 }
 0x307   :  { %v3623_v35 = vmul.f32 0.044677734, %v3495_v63  ;;  %v3624_v52 = vmul.f32 0.044677734, %v3496_v54  ;;  %v10026_v39 = vmul.f32 0.796875, %v4129_v45  ;;  %v10028_v51 = vmul.f32 0.796875, %v4130_v29 }
 0x308   :  { %v3305_v1 = vmul.f32 %v3177_v46, %v10003_v32  ;;  %v3306_v11 = vmul.f32 %v3178_v22, %v10005_v40  ;;  %v2988_v9 = vmul.f32 %v10016_v15, %v10016_v15  ;;  %v1991_v18 = vadd.f32 %v8724_v49, %v9986_v0 }
 0x309   :  { %v4131_v16 = vunpack.c.l.bf16 %v4052_v41  ;;  %v3734_v59 = vpack.c.bf16 %v3624_v52, %v3623_v35  ;;  %v2244_v26 = vadd.f32 %v2243_v53, %v9280_v61  ;;  %v4053_v13 = vpack.c.bf16 %v3942_v4, %v3941_v28 }
 0x30a   :  { %v3415_v14 = vpack.c.bf16 %v3306_v11, %v3305_v1  ;;  %v3096_v63 = vpack.c.bf16 %v2988_v9, %v2987_v30  ;;  %v2010_v22 = vpack.c.bf16 %v9611_v34, %v1991_v18  ;;  %v2333_v45 = vadd.f32 %v2332_v19, %v9316_v23 }
 0x30b   :  { %v3815_v29 = vunpack.c.l.bf16 %v3734_v59  ;;  %v3816_v54 = vunpack.c.h.bf16 %v3734_v59  ;;  %v4132_v60 = vunpack.c.h.bf16 %v4052_v41  ;;  %v2511_v0 = vadd.f32 %v2510_v44, %v9296_v2 }
 0x30c   :  { %v3497_v46 = vunpack.c.l.bf16 %v3415_v14  ;;  %v3498_v50 = vunpack.c.h.bf16 %v3415_v14  ;;  %v3179_v37 = vunpack.c.l.bf16 %v3096_v63  ;;  %v3180_v12 = vunpack.c.h.bf16 %v3096_v63  ;;  %2282 = vmatmul.bf16.gmra.mxu1 %v2010_v22  ;;  %2371 = vmatmul.bf16.gmra.mxu2 %v2010_v22 }
 0x30d   :  { %v3943_v53 = vadd.f32 %v3815_v29, %v9978_v55  ;;  %v3944_v28 = vadd.f32 %v3816_v54, %v9982_v27  ;;  %2460 = vmatmul.bf16.gmra.mxu3 %v2010_v22  ;;  %2549 = vmatmul.bf16.gmra.mxu0 %v2010_v22  ;;  %v4259_v34 = vmul.f32 0.796875, %v4131_v16  ;;  %v2585_v41 = vpack.c.bf16 %v2333_v45, %v2244_v26  ;;  %v2421_v29 = vpop.f32.mrf.mxu3 }
 0x30e   :  { %v3625_v4 = vmul.f32 0.044677734, %v3497_v46  ;;  %v3626_v30 = vmul.f32 0.044677734, %v3498_v50  ;;  %v3307_v35 = vmul.f32 %v3179_v37, %v10014_v25  ;;  %v3308_v52 = vmul.f32 %v3180_v12, %v10016_v15 }
 0x30f   :  { %v4133_v1 = vunpack.c.l.bf16 %v4053_v13  ;;  %v4134_v11 = vunpack.c.h.bf16 %v4053_v13  ;;  %v4054_v19 = vpack.c.bf16 %v3944_v28, %v3943_v53  ;;  %v4260_v18 = vmul.f32 0.796875, %v4132_v60 }
 0x310   :  { %v3735_v9 = vpack.c.bf16 %v3626_v30, %v3625_v4  ;;  %v3416_v59 = vpack.c.bf16 %v3308_v52, %v3307_v35  ;;  %v10042_v14 = vunpack.c.l.bf16 %v2585_v41  ;;  %v1961_v44 = vmul.f32 %v8706_v56, %v9743_v20 }
 0x311   :  { %v4135_v50 = vunpack.c.l.bf16 %v4054_v19  ;;  %v4136_v63 = vunpack.c.h.bf16 %v4054_v19  ;;  %v10046_v12 = vunpack.c.h.bf16 %v2585_v41  ;;  %v4261_v13 = vmul.f32 0.796875, %v4133_v1 }
 0x312   :  { %12127 = vst [vmem:[#allocation85_spill] sm:$0xff] %v10042_v14  ;;  %v3817_v22 = vunpack.c.l.bf16 %v3735_v9  ;;  %v3818_v16 = vunpack.c.h.bf16 %v3735_v9  ;;  %v3499_v37 = vunpack.c.l.bf16 %v3416_v59  ;;  %v3500_v54 = vunpack.c.h.bf16 %v3416_v59 }
 0x313   :  { %12128 = vst [vmem:[#allocation86_spill] sm:$0xff] %v10046_v12  ;;  %v2989_v26 = vmul.f32 %v10042_v14, %v10042_v14  ;;  %v4262_v60 = vmul.f32 0.796875, %v4134_v11  ;;  %v4263_v45 = vmul.f32 0.796875, %v4135_v50  ;;  %v4264_v46 = vmul.f32 0.796875, %v4136_v63 }
 0x314   :  { %v3627_v53 = vmul.f32 0.044677734, %v3499_v37  ;;  %v3628_v28 = vmul.f32 0.044677734, %v3500_v54  ;;  %v2990_v20 = vmul.f32 %v10046_v12, %v10046_v12  ;;  %v2422_v4 = vadd.f32 %v2421_v29, %v9323_v38  ;;  %v2245_v29 = vpop.f32.mrf.mxu1  ;;  %v2334_v54 = vpop.f32.mrf.mxu2 }
 0x315   :  { %v3945_v35 = vadd.f32 %v3817_v22, %v10003_v32  ;;  %v3946_v52 = vadd.f32 %v3818_v16, %v10005_v40  ;;  %v1994_v41 = vadd.f32 %v8724_v49, %v1961_v44  ;;  %v10060_v59 = vpack.c.bf16 %v10028_v51, %v10026_v39 }
 0x316   :  { %v3736_v11 = vpack.c.bf16 %v3628_v28, %v3627_v53  ;;  %v3097_v19 = vpack.c.bf16 %v2990_v20, %v2989_v26  ;;  %v2586_v9 = vpack.c.bf16 %v2511_v0, %v2422_v4  ;;  %v10062_v50 = vpack.c.bf16 %v4260_v18, %v4259_v34 }
 0x317   :  { %v10064_v63 = vpack.c.bf16 %v4262_v60, %v4261_v13  ;;  %v1962_v22 = vmul.f32 %v8706_v56, %v9826_v57  ;;  %v10068_v16 = vpack.c.bf16 %v4264_v46, %v4263_v45  ;;  %v1963_v0 = vmul.f32 %v8706_v56, %v9875_v17  ;;  %v6544_v46 = vld [vmem:[#allocation11 + $0x40] sm:$0xff] }
 0x318   :  { %v3181_v44 = vunpack.c.l.bf16 %v3097_v19  ;;  %v3182_v37 = vunpack.c.h.bf16 %v3097_v19  ;;  %v10072_v26 = vpack.c.bf16 %v3946_v52, %v3945_v35  ;;  %v10074_v39 = vunpack.c.l.bf16 %v2586_v9  ;;  %v2423_v19 = vpop.f32.mrf.mxu3  ;;  %v6552_v45 = vld [vmem:[#allocation11 + $0x80] sm:$0xff]  ;;  %5862 = vmatpush.bf16.msra.mxu2 %v6544_v46 }
 0x319   :  { %12129 = vst [vmem:[#allocation87_spill] sm:$0xff] %v10064_v63  ;;  %v10076_v51 = vunpack.c.h.bf16 %v2586_v9  ;;  %v2011_v34 = vpack.c.bf16 %v1994_v41, %v9682_v6  ;;  %v3819_v18 = vunpack.c.l.bf16 %v3736_v11  ;;  %v3820_v13 = vunpack.c.h.bf16 %v3736_v11  ;;  %v2512_v11 = vpop.f32.mrf.mxu0  ;;  %5951 = vmatpush.bf16.msra.mxu3 %v6552_v45 }
 0x31a   :  { %12130 = vst [vmem:[#allocation88_spill] sm:$0xff] %v10068_v16  ;;  %v3309_v57 = vmul.f32 %v3181_v44, %v10042_v14  ;;  %v3310_v60 = vmul.f32 %v3182_v37, %v10046_v12  ;;  %v2991_v56 = vmul.f32 %v10074_v39, %v10074_v39  ;;  %v2335_v28 = vadd.f32 %v2334_v54, %v9316_v23 }
 0x31b   :  { %12131 = vst [vmem:[#allocation89_spill] sm:$0xff] %v10074_v39  ;;  %v2992_v17 = vmul.f32 %v10076_v51, %v10076_v51  ;;  %v10089_v6 = vadd.f32 %v8724_v49, %v1962_v22  ;;  %v10092_v20 = vadd.f32 %v8724_v49, %v1963_v0  ;;  %v4137_v35 = vunpack.c.l.bf16 %v10072_v26 }
 0x31c   :  { %12132 = vst [vmem:[#allocation90_spill] sm:$0xff] %v10076_v51  ;;  %v3417_v53 = vpack.c.bf16 %v3310_v60, %v3309_v57  ;;  %2287 = vmatmul.bf16.gmra.mxu1 %v2011_v34  ;;  %v2246_v41 = vadd.f32 %v2245_v29, %v9280_v61  ;;  %2376 = vmatmul.bf16.gmra.mxu2 %v2011_v34  ;;  %v4138_v60 = vunpack.c.h.bf16 %v10072_v26  ;;  %v2248_v4 = vpop.f32.mrf.mxu1 }
 0x31d   :  { %v3098_v52 = vpack.c.bf16 %v2992_v17, %v2991_v56  ;;  %2465 = vmatmul.bf16.gmra.mxu3 %v2011_v34  ;;  %v3947_v9 = vadd.f32 %v3819_v18, %v10014_v25  ;;  %v3948_v44 = vadd.f32 %v3820_v13, %v10016_v15  ;;  %2554 = vmatmul.bf16.gmra.mxu0 %v2011_v34 }
 0x31e   :  { %v3501_v22 = vunpack.c.l.bf16 %v3417_v53  ;;  %v3502_v37 = vunpack.c.h.bf16 %v3417_v53  ;;  %v2587_v0 = vpack.c.bf16 %v2335_v28, %v2246_v41  ;;  %v2424_v57 = vadd.f32 %v2423_v19, %v9323_v38  ;;  %v2337_v19 = vpop.f32.mrf.mxu2 }
 0x31f   :  { %v3183_v49 = vunpack.c.l.bf16 %v3098_v52  ;;  %v3184_v54 = vunpack.c.h.bf16 %v3098_v52  ;;  %v2513_v17 = vadd.f32 %v2512_v11, %v9296_v2  ;;  %v10108_v28 = vmul.f32 0.796875, %v4137_v35 }
 0x320   :  { %v3629_v56 = vmul.f32 0.044677734, %v3501_v22  ;;  %v3630_v29 = vmul.f32 0.044677734, %v3502_v37  ;;  %v10104_v53 = vunpack.c.l.bf16 %v2587_v0  ;;  %v10106_v34 = vunpack.c.h.bf16 %v2587_v0 }
 0x321   :  { %v3311_v18 = vmul.f32 %v3183_v49, %v10074_v39  ;;  %v3312_v13 = vmul.f32 %v3184_v54, %v10076_v51  ;;  %v10110_v52 = vpack.c.bf16 %v3948_v44, %v3947_v9  ;;  %v2588_v41 = vpack.c.bf16 %v2513_v17, %v2424_v57 }
 0x322   :  { %12133 = vst [vmem:[#allocation91_spill] sm:$0xff] %v10104_v53  ;;  %v3737_v26 = vpack.c.bf16 %v3630_v29, %v3629_v56  ;;  %v2993_v22 = vmul.f32 %v10104_v53, %v10104_v53  ;;  %v2994_v37 = vmul.f32 %v10106_v34, %v10106_v34  ;;  %v2249_v49 = vadd.f32 %v2248_v4, %v9280_v61 }
 0x323   :  { %12134 = vst [vmem:[#allocation92_spill] sm:$0xff] %v10106_v34  ;;  %v3418_v11 = vpack.c.bf16 %v3312_v13, %v3311_v18  ;;  %v10117_v35 = vunpack.c.l.bf16 %v2588_v41  ;;  %v10119_v9 = vunpack.c.h.bf16 %v2588_v41  ;;  %v2338_v56 = vadd.f32 %v2337_v19, %v9316_v23 }
 0x324   :  { %v3821_v54 = vunpack.c.l.bf16 %v3737_v26  ;;  %v3822_v0 = vunpack.c.h.bf16 %v3737_v26  ;;  %v3099_v46 = vpack.c.bf16 %v2994_v37, %v2993_v22  ;;  %v4266_v1 = vmul.f32 0.796875, %v4138_v60 }
 0x325   :  { %12135 = vst [vmem:[#allocation93_spill] sm:$0xff] %v10117_v35  ;;  %v3503_v44 = vunpack.c.l.bf16 %v3418_v11  ;;  %v3504_v57 = vunpack.c.h.bf16 %v3418_v11  ;;  %v2995_v18 = vmul.f32 %v10117_v35, %v10117_v35  ;;  %v2996_v45 = vmul.f32 %v10119_v9, %v10119_v9 }
 0x326   :  { %12136 = vst [vmem:[#allocation94_spill] sm:$0xff] %v10119_v9  ;;  %v3949_v29 = vadd.f32 %v3821_v54, %v10042_v14  ;;  %v3950_v17 = vadd.f32 %v3822_v0, %v10046_v12  ;;  %v3185_v26 = vunpack.c.l.bf16 %v3099_v46  ;;  %v3186_v41 = vunpack.c.h.bf16 %v3099_v46  ;;  %v2515_v0 = vpop.f32.mrf.mxu0 }
 0x327   :  { %v3631_v4 = vmul.f32 0.044677734, %v3503_v44  ;;  %v3632_v13 = vmul.f32 0.044677734, %v3504_v57  ;;  %v3100_v11 = vpack.c.bf16 %v2996_v45, %v2995_v18  ;;  %v2589_v22 = vpack.c.bf16 %v2338_v56, %v2249_v49 }
 0x328   :  { %v4057_v30 = vpack.c.bf16 %v3950_v17, %v3949_v29  ;;  %v3313_v19 = vmul.f32 %v3185_v26, %v10104_v53  ;;  %v3314_v54 = vmul.f32 %v3186_v41, %v10106_v34  ;;  %v2012_v12 = vpack.c.bf16 %v10092_v20, %v10089_v6 }
 0x329   :  { %v3738_v37 = vpack.c.bf16 %v3632_v13, %v3631_v4  ;;  %v4139_v14 = vunpack.c.l.bf16 %v10110_v52  ;;  %v3187_v44 = vunpack.c.l.bf16 %v3100_v11  ;;  %v3188_v57 = vunpack.c.h.bf16 %v3100_v11  ;;  %v2426_v4 = vpop.f32.mrf.mxu3 }
 0x32a   :  { %v4141_v63 = vunpack.c.l.bf16 %v4057_v30  ;;  %v4140_v46 = vunpack.c.h.bf16 %v10110_v52  ;;  %v3419_v17 = vpack.c.bf16 %v3314_v54, %v3313_v19  ;;  %v4142_v49 = vunpack.c.h.bf16 %v4057_v30 }
 0x32b   :  { %v3823_v60 = vunpack.c.l.bf16 %v3738_v37  ;;  %v3824_v29 = vunpack.c.h.bf16 %v3738_v37  ;;  %v3315_v56 = vmul.f32 %v3187_v44, %v10117_v35  ;;  %v3316_v18 = vmul.f32 %v3188_v57, %v10119_v9 }
 0x32c   :  { %v10136_v45 = vunpack.c.l.bf16 %v2589_v22  ;;  %2292 = vmatmul.bf16.gmra.mxu1 %v2012_v12  ;;  %v3505_v13 = vunpack.c.l.bf16 %v3419_v17  ;;  %v3506_v26 = vunpack.c.h.bf16 %v3419_v17  ;;  %2381 = vmatmul.bf16.gmra.mxu2 %v2012_v12  ;;  %v4269_v52 = vmul.f32 0.796875, %v4141_v63 }
 0x32d   :  { %v3951_v6 = vadd.f32 %v3823_v60, %v10074_v39  ;;  %v3952_v20 = vadd.f32 %v3824_v29, %v10076_v51  ;;  %2470 = vmatmul.bf16.gmra.mxu3 %v2012_v12  ;;  %v3420_v41 = vpack.c.bf16 %v3316_v18, %v3315_v56  ;;  %v2516_v30 = vadd.f32 %v2515_v0, %v9296_v2 }
 0x32e   :  { %12137 = vst [vmem:[#allocation95_spill] sm:$0xff] %v10136_v45  ;;  %v10141_v11 = vunpack.c.h.bf16 %v2589_v22  ;;  %2559 = vmatmul.bf16.gmra.mxu0 %v2012_v12  ;;  %v3633_v19 = vmul.f32 0.044677734, %v3505_v13  ;;  %v3634_v54 = vmul.f32 0.044677734, %v3506_v26  ;;  %v2427_v44 = vadd.f32 %v2426_v4, %v9323_v38  ;;  %v2250_v13 = vpop.f32.mrf.mxu1  ;;  %v2517_v26 = vpop.f32.mrf.mxu0 }
 0x32f   :  { %v4058_v37 = vpack.c.bf16 %v3952_v20, %v3951_v6  ;;  %v4270_v57 = vmul.f32 0.796875, %v4142_v49  ;;  %v3507_v60 = vunpack.c.l.bf16 %v3420_v41  ;;  %v3508_v39 = vunpack.c.h.bf16 %v3420_v41 }
 0x330   :  { %12138 = vst [vmem:[#allocation96_spill] sm:$0xff] %v10141_v11  ;;  %v2997_v29 = vmul.f32 %v10136_v45, %v10136_v45  ;;  %v3739_v63 = vpack.c.bf16 %v3634_v54, %v3633_v19  ;;  %v2998_v0 = vmul.f32 %v10141_v11, %v10141_v11  ;;  %v2590_v12 = vpack.c.bf16 %v2516_v30, %v2427_v44  ;;  %v2339_v54 = vpop.f32.mrf.mxu2 }
 0x331   :  { %v4143_v17 = vunpack.c.l.bf16 %v4058_v37  ;;  %v4144_v51 = vunpack.c.h.bf16 %v4058_v37  ;;  %v3635_v22 = vmul.f32 0.044677734, %v3507_v60  ;;  %v3636_v56 = vmul.f32 0.044677734, %v3508_v39  ;;  %v2428_v25 = vpop.f32.mrf.mxu3 }
 0x332   :  { %v10150_v18 = vpack.c.bf16 %v9691_v10, %v9686_v21  ;;  %v4267_v4 = vmul.f32 0.796875, %v4139_v14  ;;  %v4268_v49 = vmul.f32 0.796875, %v4140_v46  ;;  %v3825_v6 = vunpack.c.l.bf16 %v3739_v63  ;;  %v6536_v14 = vld [vmem:[#allocation11] sm:$0xff] }
 0x333   :  { %v3826_v20 = vunpack.c.h.bf16 %v3739_v63  ;;  %v4271_v41 = vmul.f32 0.796875, %v4143_v17  ;;  %v4272_v15 = vmul.f32 0.796875, %v4144_v51  ;;  %v3101_v37 = vpack.c.bf16 %v2998_v0, %v2997_v29  ;;  %v6560_v46 = vld [vmem:[#allocation11 + $0xc0] sm:$0xff]  ;;  %5773 = vmatpush.bf16.msra.mxu1 %v6536_v14 }
 0x334   :  { %v10152_v19 = vunpack.c.l.bf16 %v2590_v12  ;;  %v10155_v39 = vpack.c.bf16 %v4266_v1, %v10108_v28  ;;  %v10157_v30 = vpack.c.bf16 %v4270_v57, %v4269_v52  ;;  %v3740_v21 = vpack.c.bf16 %v3636_v56, %v3635_v22  ;;  %6040 = vmatpush.bf16.msra.mxu0 %v6560_v46 }
 0x335   :  { %v10159_v10 = vunpack.c.h.bf16 %v2590_v12  ;;  %v3953_v44 = vadd.f32 %v3825_v6, %v10104_v53  ;;  %v3954_v60 = vadd.f32 %v3826_v20, %v10106_v34  ;;  %v3189_v51 = vunpack.c.l.bf16 %v3101_v37 }
 0x336   :  { %12139 = vst [vmem:[#allocation97_spill] sm:$0xff] %v10152_v19  ;;  %v3190_v29 = vunpack.c.h.bf16 %v3101_v37  ;;  %v10164_v63 = vpack.c.bf16 %v4268_v49, %v4267_v4  ;;  %v2999_v1 = vmul.f32 %v10152_v19, %v10152_v19  ;;  %v10170_v28 = vpack.c.bf16 %v9763_v43, %v9755_v62 }
 0x337   :  { %12140 = vst [vmem:[#allocation98_spill] sm:$0xff] %v10157_v30  ;;  %v10172_v52 = vpack.c.bf16 %v4272_v15, %v4271_v41  ;;  %v3317_v57 = vmul.f32 %v3189_v51, %v10136_v45  ;;  %v3827_v56 = vunpack.c.l.bf16 %v3740_v21  ;;  %v3000_v12 = vmul.f32 %v10159_v10, %v10159_v10 }
 0x338   :  { %12141 = vst [vmem:[#allocation99_spill] sm:$0xff] %v10159_v10  ;;  %v3318_v0 = vmul.f32 %v3190_v29, %v10141_v11  ;;  %v2251_v4 = vadd.f32 %v2250_v13, %v9280_v61  ;;  %v2340_v49 = vadd.f32 %v2339_v54, %v9316_v23  ;;  %v10182_v62 = vpack.c.bf16 %v3954_v60, %v3953_v44  ;;  %v2520_v60 = vpop.f32.mrf.mxu0 }
 0x339   :  { %12142 = vst [vmem:[#allocation100_spill] sm:$0xff] %v10172_v52  ;;  %v3828_v43 = vunpack.c.h.bf16 %v3740_v21  ;;  %v3102_v41 = vpack.c.bf16 %v3000_v12, %v2999_v1  ;;  %v2518_v37 = vadd.f32 %v2517_v26, %v9296_v2  ;;  %v2429_v13 = vadd.f32 %v2428_v25, %v9323_v38  ;;  %v2253_v21 = vpop.f32.mrf.mxu1  ;;  %v2342_v12 = vpop.f32.mrf.mxu2 }
 0x33a   :  { %v3421_v15 = vpack.c.bf16 %v3318_v0, %v3317_v57  ;;  %v2591_v14 = vpack.c.bf16 %v2340_v49, %v2251_v4  ;;  %v3955_v54 = vadd.f32 %v3827_v56, %v10117_v35  ;;  %v4145_v57 = vunpack.c.l.bf16 %v10182_v62  ;;  %v2431_v4 = vpop.f32.mrf.mxu3 }
 0x33b   :  { %v3191_v17 = vunpack.c.l.bf16 %v3102_v41  ;;  %v3192_v6 = vunpack.c.h.bf16 %v3102_v41  ;;  %v3956_v1 = vadd.f32 %v3828_v43, %v10119_v9  ;;  %v2592_v46 = vpack.c.bf16 %v2518_v37, %v2429_v13 }
 0x33c   :  { %v3509_v51 = vunpack.c.l.bf16 %v3421_v15  ;;  %v3510_v29 = vunpack.c.h.bf16 %v3421_v15  ;;  %v10189_v44 = vunpack.c.l.bf16 %v2591_v14  ;;  %v10195_v15 = vunpack.c.h.bf16 %v2591_v14 }
 0x33d   :  { %v3319_v49 = vmul.f32 %v3191_v17, %v10152_v19  ;;  %v3320_v25 = vmul.f32 %v3192_v6, %v10159_v10  ;;  %v2254_v20 = vadd.f32 %v2253_v21, %v9280_v61  ;;  %v2521_v22 = vadd.f32 %v2520_v60, %v9296_v2 }
 0x33e   :  { %12143 = vst [vmem:[#allocation101_spill] sm:$0xff] %v10189_v44  ;;  %v3637_v26 = vmul.f32 0.044677734, %v3509_v51  ;;  %v3638_v0 = vmul.f32 0.044677734, %v3510_v29  ;;  %v3001_v56 = vmul.f32 %v10189_v44, %v10189_v44  ;;  %v3002_v51 = vmul.f32 %v10195_v15, %v10195_v15 }
 0x33f   :  { %12144 = vst [vmem:[#allocation102_spill] sm:$0xff] %v10195_v15  ;;  %v3422_v43 = vpack.c.bf16 %v3320_v25, %v3319_v49  ;;  %v2343_v29 = vadd.f32 %v2342_v12, %v9316_v23  ;;  %v2432_v17 = vadd.f32 %v2431_v4, %v9323_v38  ;;  %v10205_v9 = vunpack.c.l.bf16 %v2592_v46 }
 0x340   :  { %v3741_v41 = vpack.c.bf16 %v3638_v0, %v3637_v26  ;;  %v10207_v35 = vunpack.c.h.bf16 %v2592_v46  ;;  %v3103_v13 = vpack.c.bf16 %v3002_v51, %v3001_v56  ;;  %v4146_v46 = vunpack.c.h.bf16 %v10182_v62 }
 0x341   :  { %12145 = vst [vmem:[#allocation103_spill] sm:$0xff] %v10205_v9  ;;  %v3511_v26 = vunpack.c.l.bf16 %v3422_v43  ;;  %v3512_v37 = vunpack.c.h.bf16 %v3422_v43  ;;  %v2593_v21 = vpack.c.bf16 %v2343_v29, %v2254_v20  ;;  %v3003_v49 = vmul.f32 %v10205_v9, %v10205_v9 }
 0x342   :  { %v3829_v6 = vunpack.c.l.bf16 %v3741_v41  ;;  %v3830_v14 = vunpack.c.h.bf16 %v3741_v41  ;;  %12146 = vst [vmem:[#allocation104_spill] sm:$0xff] %v10207_v35  ;;  %v3004_v12 = vmul.f32 %v10207_v35, %v10207_v35  ;;  %v3193_v41 = vunpack.c.l.bf16 %v3103_v13 }
 0x343   :  { %v3639_v4 = vmul.f32 0.044677734, %v3511_v26  ;;  %v3640_v25 = vmul.f32 0.044677734, %v3512_v37  ;;  %v3194_v34 = vunpack.c.h.bf16 %v3103_v13  ;;  %v10216_v56 = vunpack.c.l.bf16 %v2593_v21 }
 0x344   :  { %v3957_v60 = vadd.f32 %v3829_v6, %v10136_v45  ;;  %v3958_v0 = vadd.f32 %v3830_v14, %v10141_v11  ;;  %v3104_v43 = vpack.c.bf16 %v3004_v12, %v3003_v49  ;;  %v3321_v51 = vmul.f32 %v3193_v41, %v10189_v44 }
 0x345   :  { %12147 = vst [vmem:[#allocation105_spill] sm:$0xff] %v10216_v56  ;;  %v3742_v20 = vpack.c.bf16 %v3640_v25, %v3639_v4  ;;  %v3322_v29 = vmul.f32 %v3194_v34, %v10195_v15  ;;  %v2594_v6 = vpack.c.bf16 %v2521_v22, %v2432_v17  ;;  %v4060_v14 = vpack.c.bf16 %v3956_v1, %v3955_v54 }
 0x346   :  { %v4061_v53 = vpack.c.bf16 %v3958_v0, %v3957_v60  ;;  %v3195_v11 = vunpack.c.l.bf16 %v3104_v43  ;;  %v3196_v45 = vunpack.c.h.bf16 %v3104_v43  ;;  %v10220_v30 = vunpack.c.h.bf16 %v2593_v21 }
 0x347   :  { %v4273_v26 = vmul.f32 0.796875, %v4145_v57  ;;  %v3831_v37 = vunpack.c.l.bf16 %v3742_v20  ;;  %v3832_v13 = vunpack.c.h.bf16 %v3742_v20  ;;  %v3423_v16 = vpack.c.bf16 %v3322_v29, %v3321_v51 }
 0x348   :  { %12148 = vst [vmem:[#allocation106_spill] sm:$0xff] %v10220_v30  ;;  %v4149_v62 = vunpack.c.l.bf16 %v4061_v53  ;;  %v3323_v60 = vmul.f32 %v3195_v11, %v10205_v9  ;;  %v3324_v0 = vmul.f32 %v3196_v45, %v10207_v35  ;;  %v3005_v49 = vmul.f32 %v10216_v56, %v10216_v56 }
 0x349   :  { %v3959_v34 = vadd.f32 %v3831_v37, %v10152_v19  ;;  %v3960_v22 = vadd.f32 %v3832_v13, %v10159_v10  ;;  %v3513_v54 = vunpack.c.l.bf16 %v3423_v16  ;;  %v3514_v1 = vunpack.c.h.bf16 %v3423_v16 }
 0x34a   :  { %v4150_v17 = vunpack.c.h.bf16 %v4061_v53  ;;  %v3424_v21 = vpack.c.bf16 %v3324_v0, %v3323_v60  ;;  %v3006_v57 = vmul.f32 %v10220_v30, %v10220_v30  ;;  %v10230_v12 = vunpack.c.l.bf16 %v2594_v6 }
 0x34b   :  { %v4062_v4 = vpack.c.bf16 %v3960_v22, %v3959_v34  ;;  %v3641_v11 = vmul.f32 0.044677734, %v3513_v54  ;;  %v3642_v25 = vmul.f32 0.044677734, %v3514_v1  ;;  %v10232_v45 = vunpack.c.h.bf16 %v2594_v6 }
 0x34c   :  { %12149 = vst [vmem:[#allocation107_spill] sm:$0xff] %v10230_v12  ;;  %v4274_v41 = vmul.f32 0.796875, %v4146_v46  ;;  %v4147_v43 = vunpack.c.l.bf16 %v4060_v14  ;;  %v3515_v20 = vunpack.c.l.bf16 %v3424_v21  ;;  %v3516_v51 = vunpack.c.h.bf16 %v3424_v21 }
 0x34d   :  { %12150 = vst [vmem:[#allocation108_spill] sm:$0xff] %v10232_v45  ;;  %v4148_v29 = vunpack.c.h.bf16 %v4060_v14  ;;  %v4277_v37 = vmul.f32 0.796875, %v4149_v62  ;;  %v3743_v13 = vpack.c.bf16 %v3642_v25, %v3641_v11  ;;  %v3105_v16 = vpack.c.bf16 %v3006_v57, %v3005_v49 }
 0x34e   :  { %v3643_v53 = vmul.f32 0.044677734, %v3515_v20  ;;  %v3644_v60 = vmul.f32 0.044677734, %v3516_v51  ;;  %v3007_v0 = vmul.f32 %v10230_v12, %v10230_v12  ;;  %v3008_v34 = vmul.f32 %v10232_v45, %v10232_v45 }
 0x34f   :  { %v4278_v22 = vmul.f32 0.796875, %v4150_v17  ;;  %v4151_v54 = vunpack.c.l.bf16 %v4062_v4  ;;  %v3833_v6 = vunpack.c.l.bf16 %v3743_v13  ;;  %v3834_v1 = vunpack.c.h.bf16 %v3743_v13 }
 0x350   :  { %v3744_v46 = vpack.c.bf16 %v3644_v60, %v3643_v53  ;;  %v3197_v10 = vunpack.c.l.bf16 %v3105_v16  ;;  %v3198_v19 = vunpack.c.h.bf16 %v3105_v16  ;;  %v3106_v21 = vpack.c.bf16 %v3008_v34, %v3007_v0  ;;  %v2255_v16 = vpop.f32.mrf.mxu1  ;;  %v2522_v0 = vpop.f32.mrf.mxu0 }
 0x351   :  { %v4152_v62 = vunpack.c.h.bf16 %v4062_v4  ;;  %v3961_v49 = vadd.f32 %v3833_v6, %v10189_v44  ;;  %v3962_v57 = vadd.f32 %v3834_v1, %v10195_v15  ;;  %v10243_v51 = vpack.c.bf16 %v4274_v41, %v4273_v26  ;;  %v2344_v44 = vpop.f32.mrf.mxu2  ;;  %v2433_v1 = vpop.f32.mrf.mxu3 }
 0x352   :  { %v3835_v11 = vunpack.c.l.bf16 %v3744_v46  ;;  %v3836_v25 = vunpack.c.h.bf16 %v3744_v46  ;;  %v3325_v20 = vmul.f32 %v3197_v10, %v10216_v56  ;;  %v3326_v17 = vmul.f32 %v3198_v19, %v10220_v30 }
 0x353   :  { %v4275_v13 = vmul.f32 0.796875, %v4147_v43  ;;  %v4276_v53 = vmul.f32 0.796875, %v4148_v29  ;;  %v3199_v60 = vunpack.c.l.bf16 %v3106_v21  ;;  %v10245_v34 = vpack.c.bf16 %v4278_v22, %v4277_v37 }
 0x354   :  { %v4279_v4 = vmul.f32 0.796875, %v4151_v54  ;;  %v3425_v14 = vpack.c.bf16 %v3326_v17, %v3325_v20  ;;  %v3200_v6 = vunpack.c.h.bf16 %v3106_v21  ;;  %v4280_v15 = vmul.f32 0.796875, %v4152_v62 }
 0x355   :  { %12151 = vst [vmem:[#allocation109_spill] sm:$0xff] %v10245_v34  ;;  %v10247_v46 = vpack.c.bf16 %v3962_v57, %v3961_v49  ;;  %v3963_v10 = vadd.f32 %v3835_v11, %v10205_v9  ;;  %v3327_v19 = vmul.f32 %v3199_v60, %v10230_v12  ;;  %v3964_v26 = vadd.f32 %v3836_v25, %v10207_v35 }
 0x356   :  { %v3517_v41 = vunpack.c.l.bf16 %v3425_v14  ;;  %v3518_v43 = vunpack.c.h.bf16 %v3425_v14  ;;  %v3328_v29 = vmul.f32 %v3200_v6, %v10232_v45  ;;  %v2256_v37 = vadd.f32 %v2255_v16, %v9280_v61 }
 0x357   :  { %v2523_v22 = vadd.f32 %v2522_v0, %v9296_v2  ;;  %v2345_v54 = vadd.f32 %v2344_v44, %v9316_v23  ;;  %v2434_v21 = vadd.f32 %v2433_v1, %v9323_v38  ;;  %v10257_v62 = vpack.c.bf16 %v4276_v53, %v4275_v13 }
 0x358   :  { %v3645_v57 = vmul.f32 0.044677734, %v3517_v41  ;;  %v3646_v11 = vmul.f32 0.044677734, %v3518_v43  ;;  %v3426_v20 = vpack.c.bf16 %v3328_v29, %v3327_v19  ;;  %v10261_v60 = vpack.c.bf16 %v4280_v15, %v4279_v4 }
 0x359   :  { %v2595_v14 = vpack.c.bf16 %v2345_v54, %v2256_v37  ;;  %v2596_v17 = vpack.c.bf16 %v2523_v22, %v2434_v21  ;;  %v4153_v16 = vunpack.c.l.bf16 %v10247_v46  ;;  %v4064_v0 = vpack.c.bf16 %v3964_v26, %v3963_v10 }
 0x35a   :  { %v3745_v6 = vpack.c.bf16 %v3646_v11, %v3645_v57  ;;  %v3519_v44 = vunpack.c.l.bf16 %v3426_v20  ;;  %v3520_v35 = vunpack.c.h.bf16 %v3426_v20  ;;  %v4154_v53 = vunpack.c.h.bf16 %v10247_v46 }
 0x35b   :  { %v10264_v1 = vunpack.c.l.bf16 %v2595_v14  ;;  %v10266_v13 = vunpack.c.h.bf16 %v2595_v14  ;;  %v10269_v25 = vunpack.c.l.bf16 %v2596_v17  ;;  %v10277_v37 = vunpack.c.h.bf16 %v2596_v17 }
 0x35c   :  { %v3837_v41 = vunpack.c.l.bf16 %v3745_v6  ;;  %v3838_v43 = vunpack.c.h.bf16 %v3745_v6  ;;  %v3647_v19 = vmul.f32 0.044677734, %v3519_v44  ;;  %v3648_v29 = vmul.f32 0.044677734, %v3520_v35 }
 0x35d   :  { %12152 = vst [vmem:[#allocation110_spill] sm:$0xff] %v10269_v25  ;;  %v3009_v15 = vmul.f32 %v10264_v1, %v10264_v1  ;;  %v3010_v4 = vmul.f32 %v10266_v13, %v10266_v13  ;;  %v3011_v46 = vmul.f32 %v10269_v25, %v10269_v25  ;;  %v4155_v22 = vunpack.c.l.bf16 %v4064_v0 }
 0x35e   :  { %v3965_v10 = vadd.f32 %v3837_v41, %v10216_v56  ;;  %v3966_v26 = vadd.f32 %v3838_v43, %v10220_v30  ;;  %12153 = vst [vmem:[#allocation111_spill] sm:$0xff] %v10277_v37  ;;  %v4156_v54 = vunpack.c.h.bf16 %v4064_v0  ;;  %v3746_v21 = vpack.c.bf16 %v3648_v29, %v3647_v19 }
 0x35f   :  { %v3107_v57 = vpack.c.bf16 %v3010_v4, %v3009_v15  ;;  %v3012_v11 = vmul.f32 %v10277_v37, %v10277_v37  ;;  %v4742_v20 = vunpack.c.h.bf16 %v10150_v18  ;;  %v4745_v14 = vunpack.c.l.bf16 %v10170_v28 }
 0x360   :  { %v4065_v35 = vpack.c.bf16 %v3966_v26, %v3965_v10  ;;  %v3839_v6 = vunpack.c.l.bf16 %v3746_v21  ;;  %v3840_v44 = vunpack.c.h.bf16 %v3746_v21  ;;  %v4746_v56 = vunpack.c.h.bf16 %v10170_v28 }
 0x361   :  { %v3201_v41 = vunpack.c.l.bf16 %v3107_v57  ;;  %v3202_v17 = vunpack.c.h.bf16 %v3107_v57  ;;  %v3108_v30 = vpack.c.bf16 %v3012_v11, %v3011_v46  ;;  %v12154_v21 = vunpack.c.l.bf16 %v10150_v18 }
 0x362   :  { %v4157_v43 = vunpack.c.l.bf16 %v4065_v35  ;;  %v4158_v49 = vunpack.c.h.bf16 %v4065_v35  ;;  %v3967_v0 = vadd.f32 %v3839_v6, %v10230_v12  ;;  %v3968_v19 = vadd.f32 %v3840_v44, %v10232_v45 }
 0x363   :  { %v3329_v29 = vmul.f32 %v3201_v41, %v10264_v1  ;;  %v3330_v15 = vmul.f32 %v3202_v17, %v10266_v13  ;;  %v3203_v10 = vunpack.c.l.bf16 %v3108_v30  ;;  %v3204_v26 = vunpack.c.h.bf16 %v3108_v30 }
 0x364   :  { %v4285_v4 = vmul.f32 0.796875, %v4157_v43  ;;  %v4869_v34 = vadd.f32 1.0, %v12154_v21  ;;  %v4286_v57 = vmul.f32 0.796875, %v4158_v49  ;;  %v4066_v9 = vpack.c.bf16 %v3968_v19, %v3967_v0 }
 0x365   :  { %v3427_v35 = vpack.c.bf16 %v3330_v15, %v3329_v29  ;;  %v4870_v46 = vadd.f32 1.0, %v4742_v20  ;;  %v3331_v28 = vmul.f32 %v3203_v10, %v10269_v25  ;;  %v3332_v11 = vmul.f32 %v3204_v26, %v10277_v37 }
 0x366   :  { %v4873_v6 = vadd.f32 1.0, %v4745_v14  ;;  %v4874_v44 = vadd.f32 1.0, %v4746_v56  ;;  %v4281_v45 = vmul.f32 0.796875, %v4153_v16  ;;  %v4282_v12 = vmul.f32 0.796875, %v4154_v53 }
 0x367   :  { %v3521_v17 = vunpack.c.l.bf16 %v3427_v35  ;;  %v3522_v43 = vunpack.c.h.bf16 %v3427_v35  ;;  %v4283_v30 = vmul.f32 0.796875, %v4155_v22  ;;  %v3428_v52 = vpack.c.bf16 %v3332_v11, %v3331_v28 }
 0x368   :  { %v4997_v18 = vpack.c.bf16 %v4870_v46, %v4869_v34  ;;  %v4284_v21 = vmul.f32 0.796875, %v4156_v54  ;;  %v4159_v49 = vunpack.c.l.bf16 %v4066_v9  ;;  %v10295_v20 = vpack.c.bf16 %v4286_v57, %v4285_v4 }
 0x369   :  { %v3649_v0 = vmul.f32 0.044677734, %v3521_v17  ;;  %v3650_v19 = vmul.f32 0.044677734, %v3522_v43  ;;  %v3523_v29 = vunpack.c.l.bf16 %v3428_v52  ;;  %v3524_v15 = vunpack.c.h.bf16 %v3428_v52 }
 0x36a   :  { %v4999_v10 = vpack.c.bf16 %v4874_v44, %v4873_v6  ;;  %v4160_v14 = vunpack.c.h.bf16 %v4066_v9  ;;  %v5061_v26 = vunpack.c.l.bf16 %v9509_v5  ;;  %v5189_v16 = vunpack.c.l.bf16 %v4997_v18 }
 0x36b   :  { %v3747_v56 = vpack.c.bf16 %v3650_v19, %v3649_v0  ;;  %v3651_v41 = vmul.f32 0.044677734, %v3523_v29  ;;  %v3652_v35 = vmul.f32 0.044677734, %v3524_v15  ;;  %v5065_v53 = vunpack.c.l.bf16 %v9624_v36 }
 0x36c   :  { %v5193_v22 = vunpack.c.l.bf16 %v4999_v10  ;;  %v4287_v34 = vmul.f32 0.796875, %v4159_v49  ;;  %v5062_v28 = vunpack.c.h.bf16 %v9509_v5  ;;  %v5317_v57 = vmul.f32 %v5189_v16, %v5061_v26  ;;  %v2258_v26 = vpop.f32.mrf.mxu1 }
 0x36d   :  { %v3841_v54 = vunpack.c.l.bf16 %v3747_v56  ;;  %v3842_v46 = vunpack.c.h.bf16 %v3747_v56  ;;  %v3748_v4 = vpack.c.bf16 %v3652_v35, %v3651_v41  ;;  %v5066_v52 = vunpack.c.h.bf16 %v9624_v36 }
 0x36e   :  { %v5321_v11 = vmul.f32 %v5193_v22, %v5065_v53  ;;  %v5190_v44 = vunpack.c.h.bf16 %v4997_v18  ;;  %v5194_v17 = vunpack.c.h.bf16 %v4999_v10  ;;  %v4678_v49 = vpack.c.bf16 %v9701_v3, %v9693_v33  ;;  %v2525_v53 = vpop.f32.mrf.mxu0 }
 0x36f   :  { %v3969_v9 = vadd.f32 %v3841_v54, %v10264_v1  ;;  %v3970_v6 = vadd.f32 %v3842_v46, %v10266_v13  ;;  %v3843_v43 = vunpack.c.l.bf16 %v3748_v4  ;;  %v3844_v0 = vunpack.c.h.bf16 %v3748_v4 }
 0x370   :  { %v5445_v19 = vpack.c.bf16 %v5321_v11, %v5317_v57  ;;  %v5318_v15 = vmul.f32 %v5190_v44, %v5062_v28  ;;  %v5322_v5 = vmul.f32 %v5194_v17, %v5066_v52  ;;  %v4680_v41 = vpack.c.bf16 %v9798_v7, %v9773_v8  ;;  %v2347_v57 = vpop.f32.mrf.mxu2 }
 0x371   :  { %v4067_v29 = vpack.c.bf16 %v3970_v6, %v3969_v9  ;;  %v4288_v56 = vmul.f32 0.796875, %v4160_v14  ;;  %v3971_v36 = vadd.f32 %v3843_v43, %v10269_v25  ;;  %v4743_v16 = vunpack.c.l.bf16 %v4678_v49 }
 0x372   :  { %5774 = vmatmul.bf16.vlgmr.msra.gmra.mxu1 %v5445_v19  ;;  %v4744_v18 = vunpack.c.h.bf16 %v4678_v49  ;;  %v3972_v35 = vadd.f32 %v3844_v0, %v10277_v37  ;;  %v5446_v22 = vpack.c.bf16 %v5322_v5, %v5318_v15  ;;  %v4747_v54 = vunpack.c.l.bf16 %v4680_v41 }
 0x373   :  { %v4161_v10 = vunpack.c.l.bf16 %v4067_v29  ;;  %v4162_v33 = vunpack.c.h.bf16 %v4067_v29  ;;  %v4748_v3 = vunpack.c.h.bf16 %v4680_v41  ;;  %v4871_v46 = vadd.f32 1.0, %v4743_v16 }
 0x374   :  { %v4872_v28 = vadd.f32 1.0, %v4744_v18  ;;  %v10310_v8 = vpack.c.bf16 %v4282_v12, %v4281_v45  ;;  %v2259_v7 = vadd.f32 %v2258_v26, %v9280_v61  ;;  %5863 = vmatmul.bf16.vlgmr.msra.gmra.mxu2 %v5446_v22  ;;  %v4875_v14 = vadd.f32 1.0, %v4747_v54 }
 0x375   :  { %v10313_v11 = vpack.c.bf16 %v4284_v21, %v4283_v30  ;;  %v2526_v52 = vadd.f32 %v2525_v53, %v9296_v2  ;;  %v4876_v9 = vadd.f32 1.0, %v4748_v3  ;;  %v10318_v43 = vpack.c.bf16 %v4288_v56, %v4287_v34 }
 0x376   :  { %v4998_v6 = vpack.c.bf16 %v4872_v28, %v4871_v46  ;;  %v4068_v0 = vpack.c.bf16 %v3972_v35, %v3971_v36  ;;  %v4289_v12 = vmul.f32 0.796875, %v4161_v10  ;;  %v4290_v45 = vmul.f32 0.796875, %v4162_v33  ;;  %v2436_v10 = vpop.f32.mrf.mxu3 }
 0x377   :  { %12155 = vst [vmem:[#allocation112_spill] sm:$0xff] %v10318_v43  ;;  %v5000_v19 = vpack.c.bf16 %v4876_v9, %v4875_v14  ;;  %v5063_v29 = vunpack.c.l.bf16 %v9523_v48  ;;  %v5067_v30 = vunpack.c.l.bf16 %v9630_v47  ;;  %v2348_v15 = vadd.f32 %v2347_v57, %v9316_v23 }
 0x378   :  { %v5191_v49 = vunpack.c.l.bf16 %v4998_v6  ;;  %v5192_v21 = vunpack.c.h.bf16 %v4998_v6  ;;  %v5064_v41 = vunpack.c.h.bf16 %v9523_v48  ;;  %v5068_v26 = vunpack.c.h.bf16 %v9630_v47 }
 0x379   :  { %v5195_v5 = vunpack.c.l.bf16 %v5000_v19  ;;  %v5196_v16 = vunpack.c.h.bf16 %v5000_v19  ;;  %v4163_v34 = vunpack.c.l.bf16 %v4068_v0  ;;  %v4164_v56 = vunpack.c.h.bf16 %v4068_v0 }
 0x37a   :  { %v5319_v36 = vmul.f32 %v5191_v49, %v5063_v29  ;;  %v2597_v18 = vpack.c.bf16 %v2348_v15, %v2259_v7  ;;  %v5320_v53 = vmul.f32 %v5192_v21, %v5064_v41  ;;  %v2437_v54 = vadd.f32 %v2436_v10, %v9323_v38  ;;  %v2260_v7 = vpop.f32.mrf.mxu1  ;;  %v2349_v49 = vpop.f32.mrf.mxu2  ;;  %v12161_v15 = vld [vmem:[#allocation51_spill] sm:$0xff]  ;;  %v12162_v41 = vld [vmem:[#allocation52_spill] sm:$0xff] }
 0x37b   :  { %v5323_v35 = vmul.f32 %v5195_v5, %v5067_v30  ;;  %v5324_v22 = vmul.f32 %v5196_v16, %v5068_v26  ;;  %v10332_v47 = vpack.c.bf16 %v4290_v45, %v4289_v12  ;;  %v10334_v9 = vmul.f32 0.796875, %v4163_v34  ;;  %v2527_v45 = vpop.f32.mrf.mxu0  ;;  %v12163_v16 = vld [vmem:[#allocation55_spill] sm:$0xff]  ;;  %v12164_v10 = vld [vmem:[#allocation56_spill] sm:$0xff] }
 0x37c   :  { %v10328_v46 = vunpack.c.l.bf16 %v2597_v18  ;;  %v10330_v48 = vunpack.c.h.bf16 %v2597_v18  ;;  %v2598_v57 = vpack.c.bf16 %v2526_v52, %v2437_v54  ;;  %v10336_v6 = vmul.f32 0.796875, %v4164_v56 }
 0x37d   :  { %12158 = vst [vmem:[#allocation115_spill] sm:$0xff] %v10332_v47  ;;  %v5447_v28 = vpack.c.bf16 %v5323_v35, %v5319_v36  ;;  %v5448_v14 = vpack.c.bf16 %v5324_v22, %v5320_v53  ;;  %v2261_v52 = vadd.f32 %v2260_v7, %v9280_v61  ;;  %v2350_v30 = vadd.f32 %v2349_v49, %v9316_v23 }
 0x37e   :  { %12156 = vst [vmem:[#allocation113_spill] sm:$0xff] %v10328_v46  ;;  %v3013_v0 = vmul.f32 %v10328_v46, %v10328_v46  ;;  %v3014_v19 = vmul.f32 %v10330_v48, %v10330_v48  ;;  %v10342_v29 = vunpack.c.l.bf16 %v2598_v57  ;;  %v10344_v12 = vunpack.c.h.bf16 %v2598_v57 }
 0x37f   :  { %12157 = vst [vmem:[#allocation114_spill] sm:$0xff] %v10330_v48  ;;  %5952 = vmatmul.bf16.vlgmr.msra.gmra.mxu3 %v5447_v28  ;;  %6041 = vmatmul.bf16.vlgmr.msra.gmra.mxu0 %v5448_v14  ;;  %v2765_v5 = vmul.f32 0.5, %v12161_v15  ;;  %v2766_v26 = vmul.f32 0.5, %v12162_v41  ;;  %v2769_v34 = vmul.f32 0.5, %v12163_v16  ;;  %v2599_v18 = vpack.c.bf16 %v2350_v30, %v2261_v52  ;;  %v2438_v28 = vpop.f32.mrf.mxu3  ;;  %v12165_v14 = vld [vmem:[#allocation59_spill] sm:$0xff]  ;;  %v12169_v30 = vld [vmem:[#allocation68_spill] sm:$0xff] }
 0x380   :  { %12159 = vst [vmem:[#allocation116_spill] sm:$0xff] %v10342_v29  ;;  %v3109_v21 = vpack.c.bf16 %v3014_v19, %v3013_v0  ;;  %v3015_v56 = vmul.f32 %v10342_v29, %v10342_v29  ;;  %v3016_v36 = vmul.f32 %v10344_v12, %v10344_v12  ;;  %v2770_v35 = vmul.f32 0.5, %v12164_v10 }
 0x381   :  { %12160 = vst [vmem:[#allocation117_spill] sm:$0xff] %v10344_v12  ;;  %v2528_v54 = vadd.f32 %v2527_v45, %v9296_v2  ;;  %v12166_v57 = vunpack.c.l.bf16 %v12165_v14  ;;  %v10359_v0 = vunpack.c.l.bf16 %v2599_v18  ;;  %v10361_v19 = vunpack.c.h.bf16 %v2599_v18 }
 0x382   :  { %v3205_v53 = vunpack.c.l.bf16 %v3109_v21  ;;  %v3206_v22 = vunpack.c.h.bf16 %v3109_v21  ;;  %v3110_v7 = vpack.c.bf16 %v3016_v36, %v3015_v56  ;;  %v2439_v49 = vadd.f32 %v2438_v28, %v9323_v38 }
 0x383   :  { %6910 = vtanh.f32 %v12166_v57  ;;  %12167 = vst [vmem:[#allocation51_spill] sm:$0xff] %v10359_v0  ;;  %v4433_v41 = vunpack.c.l.bf16 %v12169_v30  ;;  %v4434_v21 = vunpack.c.h.bf16 %v12169_v30  ;;  %v3017_v10 = vmul.f32 %v10359_v0, %v10359_v0 }
 0x384   :  { %12168 = vst [vmem:[#allocation52_spill] sm:$0xff] %v10361_v19  ;;  %v3333_v15 = vmul.f32 %v3205_v53, %v10328_v46  ;;  %v3334_v52 = vmul.f32 %v3206_v22, %v10330_v48  ;;  %v3207_v45 = vunpack.c.l.bf16 %v3110_v7  ;;  %v3208_v16 = vunpack.c.h.bf16 %v3110_v7 }
 0x385   :  { %v3018_v56 = vmul.f32 %v10361_v19, %v10361_v19  ;;  %v2600_v18 = vpack.c.bf16 %v2528_v54, %v2439_v49  ;;  %v10372_v57 = vpack.c.bf16 %v2766_v26, %v2765_v5  ;;  %v12170_v53 = vunpack.c.h.bf16 %v12165_v14 }
 0x386   :  { %v3429_v36 = vpack.c.bf16 %v3334_v52, %v3333_v15  ;;  %v3335_v22 = vmul.f32 %v3207_v45, %v10342_v29  ;;  %v3336_v28 = vmul.f32 %v3208_v16, %v10344_v12 }
 0x387   :  { %6912 = vtanh.f32 %v12170_v53  ;;  %v3111_v30 = vpack.c.bf16 %v3018_v56, %v3017_v10  ;;  %v10378_v17 = vunpack.c.l.bf16 %v2600_v18  ;;  %v10380_v44 = vunpack.c.h.bf16 %v2600_v18 }
 0x388   :  { %6914 = vtanh.f32 %v4433_v41  ;;  %v3525_v3 = vunpack.c.l.bf16 %v3429_v36  ;;  %v3526_v33 = vunpack.c.h.bf16 %v3429_v36  ;;  %v3430_v15 = vpack.c.bf16 %v3336_v28, %v3335_v22 }
 0x389   :  { %v6911_v7 = vpop.eup %6910  ;;  %12171 = vst [vmem:[#allocation55_spill] sm:$0xff] %v10378_v17  ;;  %v3209_v54 = vunpack.c.l.bf16 %v3111_v30  ;;  %v3210_v5 = vunpack.c.h.bf16 %v3111_v30  ;;  %6916 = vtanh.f32 %v4434_v21  ;;  %v3019_v49 = vmul.f32 %v10378_v17, %v10378_v17  ;;  %v12173_v21 = vld [vmem:[#allocation53_spill] sm:$0xff] }
 0x38a   :  { %12172 = vst [vmem:[#allocation56_spill] sm:$0xff] %v10380_v44  ;;  %v3653_v26 = vmul.f32 0.044677734, %v3525_v3  ;;  %v3654_v14 = vmul.f32 0.044677734, %v3526_v33  ;;  %v3020_v52 = vmul.f32 %v10380_v44, %v10380_v44  ;;  %v3527_v41 = vunpack.c.l.bf16 %v3430_v15 }
 0x38b   :  { %v3528_v45 = vunpack.c.h.bf16 %v3430_v15  ;;  %v3337_v16 = vmul.f32 %v3209_v54, %v10359_v0  ;;  %v3338_v10 = vmul.f32 %v3210_v5, %v10361_v19  ;;  %v10388_v53 = vpack.c.bf16 %v2770_v35, %v2769_v34 }
 0x38c   :  { %v3749_v36 = vpack.c.bf16 %v3654_v14, %v3653_v26  ;;  %v3112_v18 = vpack.c.bf16 %v3020_v52, %v3019_v49  ;;  %v10391_v3 = vmul.f32 0.5, %v12173_v21  ;;  %v3655_v22 = vmul.f32 0.044677734, %v3527_v41 }
 0x38d   :  { %v6913_v56 = vpop.eup %6912  ;;  %v3656_v28 = vmul.f32 0.044677734, %v3528_v45  ;;  %v3431_v30 = vpack.c.bf16 %v3338_v10, %v3337_v16 }
 0x38e   :  { %v6915_v33 = vpop.eup %6914  ;;  %v3845_v43 = vunpack.c.l.bf16 %v3749_v36  ;;  %v3846_v15 = vunpack.c.h.bf16 %v3749_v36  ;;  %v3211_v37 = vunpack.c.l.bf16 %v3112_v18  ;;  %v3212_v54 = vunpack.c.h.bf16 %v3112_v18 }
 0x38f   :  { %v6917_v25 = vpop.eup %6916  ;;  %v3750_v5 = vpack.c.bf16 %v3656_v28, %v3655_v22  ;;  %v3529_v47 = vunpack.c.l.bf16 %v3431_v30  ;;  %v3530_v26 = vunpack.c.h.bf16 %v3431_v30  ;;  %v4681_v14 = vpack.c.bf16 %v6913_v56, %v6911_v7 }
 0x390   :  { %v3973_v34 = vadd.f32 %v3845_v43, %v10328_v46  ;;  %v3974_v35 = vadd.f32 %v3846_v15, %v10330_v48  ;;  %v3339_v49 = vmul.f32 %v3211_v37, %v10378_v17  ;;  %v3340_v52 = vmul.f32 %v3212_v54, %v10380_v44 }
 0x391   :  { %v3847_v41 = vunpack.c.l.bf16 %v3750_v5  ;;  %v3848_v45 = vunpack.c.h.bf16 %v3750_v5  ;;  %v3657_v16 = vmul.f32 0.044677734, %v3529_v47  ;;  %v3658_v10 = vmul.f32 0.044677734, %v3530_v26 }
 0x392   :  { %v4069_v36 = vpack.c.bf16 %v3974_v35, %v3973_v34  ;;  %v3432_v21 = vpack.c.bf16 %v3340_v52, %v3339_v49  ;;  %v4683_v18 = vpack.c.bf16 %v6917_v25, %v6915_v33  ;;  %v4749_v56 = vunpack.c.l.bf16 %v4681_v14 }
 0x393   :  { %v3975_v28 = vadd.f32 %v3847_v41, %v10342_v29  ;;  %v3976_v7 = vadd.f32 %v3848_v45, %v10344_v12  ;;  %v3751_v43 = vpack.c.bf16 %v3658_v10, %v3657_v16  ;;  %v4750_v4 = vunpack.c.h.bf16 %v4681_v14 }
 0x394   :  { %v4165_v30 = vunpack.c.l.bf16 %v4069_v36  ;;  %v3531_v15 = vunpack.c.l.bf16 %v3432_v21  ;;  %v3532_v37 = vunpack.c.h.bf16 %v3432_v21  ;;  %v4166_v54 = vunpack.c.h.bf16 %v4069_v36 }
 0x395   :  { %v4070_v48 = vpack.c.bf16 %v3976_v7, %v3975_v28  ;;  %v3849_v5 = vunpack.c.l.bf16 %v3751_v43  ;;  %v3850_v47 = vunpack.c.h.bf16 %v3751_v43  ;;  %v4753_v35 = vunpack.c.l.bf16 %v4683_v18  ;;  %v12174_v7 = vld [vmem:[#allocation54_spill] sm:$0xff] }
 0x396   :  { %v3659_v26 = vmul.f32 0.044677734, %v3531_v15  ;;  %v3660_v34 = vmul.f32 0.044677734, %v3532_v37  ;;  %v5070_v25 = vunpack.c.h.bf16 %v10372_v57  ;;  %v4754_v16 = vunpack.c.h.bf16 %v4683_v18 }
 0x397   :  { %v4167_v33 = vunpack.c.l.bf16 %v4070_v48  ;;  %v4168_v49 = vunpack.c.h.bf16 %v4070_v48  ;;  %v3977_v52 = vadd.f32 %v3849_v5, %v10359_v0  ;;  %v3978_v41 = vadd.f32 %v3850_v47, %v10361_v19  ;;  %v12175_v5 = vld [vmem:[#allocation57_spill] sm:$0xff] }
 0x398   :  { %v3752_v45 = vpack.c.bf16 %v3660_v34, %v3659_v26  ;;  %v4877_v10 = vadd.f32 1.0, %v4749_v56  ;;  %v4878_v21 = vadd.f32 1.0, %v4750_v4  ;;  %v4293_v14 = vmul.f32 0.796875, %v4165_v30  ;;  %v12176_v56 = vld [vmem:[#allocation58_spill] sm:$0xff] }
 0x399   :  { %v4294_v36 = vmul.f32 0.796875, %v4166_v54  ;;  %v4071_v28 = vpack.c.bf16 %v3978_v41, %v3977_v52  ;;  %v2768_v43 = vmul.f32 0.5, %v12174_v7  ;;  %v4881_v22 = vadd.f32 1.0, %v4753_v35 }
 0x39a   :  { %v3851_v15 = vunpack.c.l.bf16 %v3752_v45  ;;  %v3852_v37 = vunpack.c.h.bf16 %v3752_v45  ;;  %v5074_v12 = vunpack.c.h.bf16 %v10388_v53  ;;  %v4295_v29 = vmul.f32 0.796875, %v4167_v33 }
 0x39b   :  { %v4296_v48 = vmul.f32 0.796875, %v4168_v49  ;;  %v4882_v46 = vadd.f32 1.0, %v4754_v16  ;;  %v2771_v0 = vmul.f32 0.5, %v12175_v5  ;;  %v5001_v4 = vpack.c.bf16 %v4878_v21, %v4877_v10  ;;  %v12179_v16 = vld [vmem:[#allocation73_spill] sm:$0xff]  ;;  %v12180_v10 = vld [vmem:[#allocation62_spill] sm:$0xff]  ;;  %v2263_v5 = vpop.f32.mrf.mxu1 }
 0x39c   :  { %v3979_v47 = vadd.f32 %v3851_v15, %v10378_v17  ;;  %v3980_v18 = vadd.f32 %v3852_v37, %v10380_v44  ;;  %v2772_v30 = vmul.f32 0.5, %v12176_v56  ;;  %v10410_v54 = vpack.c.bf16 %v4294_v36, %v4293_v14 }
 0x39d   :  { %v4169_v26 = vunpack.c.l.bf16 %v4071_v28  ;;  %v4170_v34 = vunpack.c.h.bf16 %v4071_v28  ;;  %v10413_v35 = vpack.c.bf16 %v2768_v43, %v10391_v3  ;;  %v5003_v33 = vpack.c.bf16 %v4882_v46, %v4881_v22 }
 0x39e   :  { %12177 = vst [vmem:[#allocation59_spill] sm:$0xff] %v10410_v54  ;;  %v4072_v52 = vpack.c.bf16 %v3980_v18, %v3979_v47  ;;  %v5197_v49 = vunpack.c.l.bf16 %v5001_v4  ;;  %v5198_v41 = vunpack.c.h.bf16 %v5001_v4  ;;  %v10415_v45 = vpack.c.bf16 %v4296_v48, %v4295_v29  ;;  %v2352_v29 = vpop.f32.mrf.mxu2  ;;  %v2530_v48 = vpop.f32.mrf.mxu0 }
 0x39f   :  { %v4435_v7 = vunpack.c.l.bf16 %v12179_v16  ;;  %v4436_v15 = vunpack.c.h.bf16 %v12179_v16  ;;  %v12181_v21 = vunpack.c.l.bf16 %v12180_v10  ;;  %v5201_v37 = vunpack.c.l.bf16 %v5003_v33 }
 0x3a0   :  { %12178 = vst [vmem:[#allocation68_spill] sm:$0xff] %v10415_v45  ;;  %v4171_v14 = vunpack.c.l.bf16 %v4072_v52  ;;  %v4172_v36 = vunpack.c.h.bf16 %v4072_v52  ;;  %v10421_v28 = vpack.c.bf16 %v2772_v30, %v2771_v0  ;;  %v4297_v3 = vmul.f32 0.796875, %v4169_v26 }
 0x3a1   :  { %6918 = vtanh.f32 %v12181_v21  ;;  %v4298_v43 = vmul.f32 0.796875, %v4170_v34  ;;  %v5202_v46 = vunpack.c.h.bf16 %v5003_v33  ;;  %v12182_v22 = vunpack.c.h.bf16 %v12180_v10 }
 0x3a2   :  { %v12183_v47 = vunpack.c.l.bf16 %v10372_v57  ;;  %v12184_v4 = vunpack.c.l.bf16 %v10388_v53  ;;  %v5326_v16 = vmul.f32 %v5198_v41, %v5070_v25  ;;  %v4299_v52 = vmul.f32 0.796875, %v4171_v14 }
 0x3a3   :  { %6920 = vtanh.f32 %v12182_v22  ;;  %v4300_v0 = vmul.f32 0.796875, %v4172_v36  ;;  %v5330_v30 = vmul.f32 %v5202_v46, %v5074_v12  ;;  %v10431_v26 = vpack.c.bf16 %v10336_v6, %v10334_v9  ;;  %v12195_v12 = vld [vmem:[#allocation64_spill] sm:$0xff] }
 0x3a4   :  { %v5325_v18 = vmul.f32 %v5197_v49, %v12183_v47  ;;  %v5329_v56 = vmul.f32 %v5201_v37, %v12184_v4  ;;  %6922 = vtanh.f32 %v4435_v7  ;;  %v2264_v34 = vadd.f32 %v2263_v5, %v9280_v61  ;;  %v2441_v5 = vpop.f32.mrf.mxu3  ;;  %v2265_v49 = vpop.f32.mrf.mxu1 }
 0x3a5   :  { %6924 = vtanh.f32 %v4436_v15  ;;  %12185 = vst [vmem:[#allocation53_spill] sm:$0xff] %v10431_v26  ;;  %v2353_v10 = vadd.f32 %v2352_v29, %v9316_v23  ;;  %v2531_v25 = vadd.f32 %v2530_v48, %v9296_v2  ;;  %v5450_v41 = vpack.c.bf16 %v5330_v30, %v5326_v16 }
 0x3a6   :  { %v5449_v33 = vpack.c.bf16 %v5329_v56, %v5325_v18  ;;  %v10440_v15 = vpack.c.bf16 %v4298_v43, %v4297_v3  ;;  %v10442_v21 = vpack.c.bf16 %v4300_v0, %v4299_v52  ;;  %v5071_v14 = vunpack.c.l.bf16 %v10413_v35  ;;  %v12188_v18 = vld [vmem:[#allocation60_spill] sm:$0xff]  ;;  %v12189_v56 = vld [vmem:[#allocation61_spill] sm:$0xff]  ;;  %v2354_v7 = vpop.f32.mrf.mxu2 }
 0x3a7   :  { %v6919_v57 = vpop.eup %6918  ;;  %v2601_v9 = vpack.c.bf16 %v2353_v10, %v2264_v34  ;;  %5868 = vmatmul.bf16.gmra.mxu2 %v5450_v41  ;;  %v5075_v36 = vunpack.c.l.bf16 %v10421_v28  ;;  %v5072_v37 = vunpack.c.h.bf16 %v10413_v35  ;;  %v2442_v3 = vadd.f32 %v2441_v5, %v9323_v38  ;;  %v12190_v52 = vld [vmem:[#allocation65_spill] sm:$0xff]  ;;  %v12191_v41 = vld [vmem:[#allocation66_spill] sm:$0xff] }
 0x3a8   :  { %12186 = vst [vmem:[#allocation54_spill] sm:$0xff] %v10440_v15  ;;  %5779 = vmatmul.bf16.gmra.mxu1 %v5449_v33  ;;  %v5076_v47 = vunpack.c.h.bf16 %v10421_v28  ;;  %v2773_v4 = vmul.f32 0.5, %v12188_v18  ;;  %v2774_v16 = vmul.f32 0.5, %v12189_v56  ;;  %v10456_v0 = vmul.f32 0.5, %v12190_v52  ;;  %v12192_v28 = vld [vmem:[#allocation63_spill] sm:$0xff] }
 0x3a9   :  { %v6921_v6 = vpop.eup %6920  ;;  %12187 = vst [vmem:[#allocation57_spill] sm:$0xff] %v10442_v21  ;;  %v10447_v29 = vunpack.c.l.bf16 %v2601_v9  ;;  %v10449_v48 = vunpack.c.h.bf16 %v2601_v9  ;;  %v10463_v9 = vmul.f32 0.5, %v12191_v41  ;;  %v10473_v53 = vmul.f32 0.5, %v12195_v12 }
 0x3aa   :  { %v6923_v46 = vpop.eup %6922  ;;  %v4682_v22 = vpack.c.bf16 %v6921_v6, %v6919_v57  ;;  %v2602_v57 = vpack.c.bf16 %v2531_v25, %v2442_v3  ;;  %v10466_v6 = vmul.f32 0.5, %v12192_v28  ;;  %v10475_v45 = vpack.c.bf16 %v2774_v16, %v2773_v4 }
 0x3ab   :  { %v6925_v43 = vpop.eup %6924  ;;  %v3021_v33 = vmul.f32 %v10447_v29, %v10447_v29  ;;  %v3022_v10 = vmul.f32 %v10449_v48, %v10449_v48  ;;  %v2355_v12 = vadd.f32 %v2354_v7, %v9316_v23  ;;  %v2266_v16 = vadd.f32 %v2265_v49, %v9280_v61 }
 0x3ac   :  { %v4684_v35 = vpack.c.bf16 %v6925_v43, %v6923_v46  ;;  %v4751_v30 = vunpack.c.l.bf16 %v4682_v22  ;;  %v4752_v34 = vunpack.c.h.bf16 %v4682_v22  ;;  %v10468_v43 = vunpack.c.l.bf16 %v2602_v57  ;;  %v2443_v44 = vpop.f32.mrf.mxu3 }
 0x3ad   :  { %v3113_v46 = vpack.c.bf16 %v3022_v10, %v3021_v33  ;;  %v10470_v22 = vunpack.c.h.bf16 %v2602_v57 }
 0x3ae   :  { %v4755_v5 = vunpack.c.l.bf16 %v4684_v35  ;;  %v4756_v18 = vunpack.c.h.bf16 %v4684_v35  ;;  %v4879_v56 = vadd.f32 1.0, %v4751_v30  ;;  %v4880_v52 = vadd.f32 1.0, %v4752_v34  ;;  %12193 = vst [vmem:[#allocation58_spill] sm:$0xff] %v10468_v43  ;;  %v2532_v34 = vpop.f32.mrf.mxu0 }
 0x3af   :  { %12194 = vst [vmem:[#allocation73_spill] sm:$0xff] %v10470_v22  ;;  %v3213_v28 = vunpack.c.l.bf16 %v3113_v46  ;;  %v3214_v21 = vunpack.c.h.bf16 %v3113_v46  ;;  %v3023_v35 = vmul.f32 %v10468_v43, %v10468_v43  ;;  %v3024_v30 = vmul.f32 %v10470_v22, %v10470_v22 }
 0x3b0   :  { %v4883_v25 = vadd.f32 1.0, %v4755_v5  ;;  %v4884_v3 = vadd.f32 1.0, %v4756_v18  ;;  %v5002_v41 = vpack.c.bf16 %v4880_v52, %v4879_v56  ;;  %v2533_v54 = vadd.f32 %v2532_v34, %v9296_v2 }
 0x3b1   :  { %v3341_v5 = vmul.f32 %v3213_v28, %v10447_v29  ;;  %v3342_v18 = vmul.f32 %v3214_v21, %v10449_v48  ;;  %v3114_v4 = vpack.c.bf16 %v3024_v30, %v3023_v35  ;;  %v2444_v28 = vadd.f32 %v2443_v44, %v9323_v38 }
 0x3b2   :  { %v5004_v33 = vpack.c.bf16 %v4884_v3, %v4883_v25  ;;  %v5199_v10 = vunpack.c.l.bf16 %v5002_v41  ;;  %v5200_v57 = vunpack.c.h.bf16 %v5002_v41  ;;  %v2603_v3 = vpack.c.bf16 %v2355_v12, %v2266_v16 }
 0x3b3   :  { %v3433_v15 = vpack.c.bf16 %v3342_v18, %v3341_v5  ;;  %v3215_v17 = vunpack.c.l.bf16 %v3114_v4  ;;  %v3216_v25 = vunpack.c.h.bf16 %v3114_v4  ;;  %v4442_v4 = vunpack.c.h.bf16 %v9974_v42 }
 0x3b4   :  { %v5203_v56 = vunpack.c.l.bf16 %v5004_v33  ;;  %v5327_v52 = vmul.f32 %v5199_v10, %v5071_v14  ;;  %v5204_v46 = vunpack.c.h.bf16 %v5004_v33  ;;  %v5328_v19 = vmul.f32 %v5200_v57, %v5072_v37 }
 0x3b5   :  { %v3533_v26 = vunpack.c.l.bf16 %v3433_v15  ;;  %v3534_v21 = vunpack.c.h.bf16 %v3433_v15  ;;  %v3343_v35 = vmul.f32 %v3215_v17, %v10468_v43  ;;  %v3344_v49 = vmul.f32 %v3216_v25, %v10470_v22 }
 0x3b6   :  { %v5331_v41 = vmul.f32 %v5203_v56, %v5075_v36  ;;  %v5332_v7 = vmul.f32 %v5204_v46, %v5076_v47  ;;  %v10489_v33 = vunpack.c.l.bf16 %v2603_v3  ;;  %v10491_v34 = vunpack.c.h.bf16 %v2603_v3 }
 0x3b7   :  { %v3661_v10 = vmul.f32 0.044677734, %v3533_v26  ;;  %v3662_v5 = vmul.f32 0.044677734, %v3534_v21  ;;  %v3434_v12 = vpack.c.bf16 %v3344_v49, %v3343_v35  ;;  %v2604_v36 = vpack.c.bf16 %v2533_v54, %v2444_v28 }
 0x3b8   :  { %v5451_v14 = vpack.c.bf16 %v5331_v41, %v5327_v52  ;;  %v5452_v30 = vpack.c.bf16 %v5332_v7, %v5328_v19  ;;  %12196 = vst [vmem:[#allocation62_spill] sm:$0xff] %v10489_v33  ;;  %v3025_v44 = vmul.f32 %v10489_v33, %v10489_v33  ;;  %v3026_v17 = vmul.f32 %v10491_v34, %v10491_v34 }
 0x3b9   :  { %v4441_v15 = vunpack.c.l.bf16 %v9974_v42  ;;  %v12197_v19 = vunpack.c.l.bf16 %v9915_v31  ;;  %v3753_v37 = vpack.c.bf16 %v3662_v5, %v3661_v10  ;;  %v3535_v47 = vunpack.c.l.bf16 %v3434_v12 }
 0x3ba   :  { %5957 = vmatmul.bf16.gmra.mxu3 %v5451_v14  ;;  %6046 = vmatmul.bf16.gmra.mxu0 %v5452_v30  ;;  %v3536_v57 = vunpack.c.h.bf16 %v3434_v12  ;;  %v10500_v26 = vunpack.c.l.bf16 %v2604_v36  ;;  %v3115_v18 = vpack.c.bf16 %v3026_v17, %v3025_v44  ;;  %v10502_v54 = vunpack.c.h.bf16 %v2604_v36  ;;  %v12200_v36 = vld [vmem:[#allocation67_spill] sm:$0xff] }
 0x3bb   :  { %6926 = vtanh.f32 %v12197_v19  ;;  %v12199_v16 = vunpack.c.h.bf16 %v9915_v31  ;;  %v3853_v56 = vunpack.c.l.bf16 %v3753_v37  ;;  %v3854_v52 = vunpack.c.h.bf16 %v3753_v37 }
 0x3bc   :  { %12198 = vst [vmem:[#allocation60_spill] sm:$0xff] %v10502_v54  ;;  %v3663_v46 = vmul.f32 0.044677734, %v3535_v47  ;;  %v3664_v25 = vmul.f32 0.044677734, %v3536_v57  ;;  %v3217_v3 = vunpack.c.l.bf16 %v3115_v18  ;;  %v3218_v41 = vunpack.c.h.bf16 %v3115_v18 }
 0x3bd   :  { %6928 = vtanh.f32 %v12199_v16  ;;  %v3027_v7 = vmul.f32 %v10500_v26, %v10500_v26  ;;  %v3028_v28 = vmul.f32 %v10502_v54, %v10502_v54  ;;  %v3981_v21 = vadd.f32 %v3853_v56, %v10447_v29 }
 0x3be   :  { %v3982_v35 = vadd.f32 %v3854_v52, %v10449_v48  ;;  %v3754_v42 = vpack.c.bf16 %v3664_v25, %v3663_v46  ;;  %6930 = vtanh.f32 %v4441_v15  ;;  %v3345_v49 = vmul.f32 %v3217_v3, %v10489_v33 }
 0x3bf   :  { %v3346_v14 = vmul.f32 %v3218_v41, %v10491_v34  ;;  %v3116_v30 = vpack.c.bf16 %v3028_v28, %v3027_v7  ;;  %6932 = vtanh.f32 %v4442_v4  ;;  %v10516_v44 = vmul.f32 0.5, %v12200_v36 }
 0x3c0   :  { %v4073_v10 = vpack.c.bf16 %v3982_v35, %v3981_v21  ;;  %v3855_v5 = vunpack.c.l.bf16 %v3754_v42  ;;  %v3856_v12 = vunpack.c.h.bf16 %v3754_v42  ;;  %v10519_v57 = vmul.f32 0.5, %v9866_v58 }
 0x3c1   :  { %v6927_v31 = vpop.eup %6926  ;;  %v3435_v19 = vpack.c.bf16 %v3346_v14, %v3345_v49  ;;  %v3219_v37 = vunpack.c.l.bf16 %v3116_v30  ;;  %v3220_v47 = vunpack.c.h.bf16 %v3116_v30  ;;  %v10525_v4 = vpack.c.bf16 %v10463_v9, %v10456_v0 }
 0x3c2   :  { %v3983_v15 = vadd.f32 %v3855_v5, %v10468_v43  ;;  %v3984_v18 = vadd.f32 %v3856_v12, %v10470_v22  ;;  %v4173_v41 = vunpack.c.l.bf16 %v4073_v10  ;;  %v10533_v0 = vpack.c.bf16 %v10473_v53, %v10466_v6 }
 0x3c3   :  { %v6929_v17 = vpop.eup %6928  ;;  %v3537_v56 = vunpack.c.l.bf16 %v3435_v19  ;;  %v3538_v52 = vunpack.c.h.bf16 %v3435_v19  ;;  %v3347_v46 = vmul.f32 %v3219_v37, %v10500_v26  ;;  %v3348_v25 = vmul.f32 %v3220_v47, %v10502_v54 }
 0x3c4   :  { %v6931_v3 = vpop.eup %6930  ;;  %v4074_v58 = vpack.c.bf16 %v3984_v18, %v3983_v15  ;;  %v4685_v7 = vpack.c.bf16 %v6929_v17, %v6927_v31  ;;  %v4174_v9 = vunpack.c.h.bf16 %v4073_v10  ;;  %v5081_v30 = vunpack.c.l.bf16 %v10525_v4  ;;  %v12201_v15 = vld [vmem:[#allocation82_spill] sm:$0xff] }
 0x3c5   :  { %v6933_v21 = vpop.eup %6932  ;;  %v3665_v35 = vmul.f32 0.044677734, %v3537_v56  ;;  %v3666_v42 = vmul.f32 0.044677734, %v3538_v52  ;;  %v3436_v49 = vpack.c.bf16 %v3348_v25, %v3347_v46  ;;  %v5082_v5 = vunpack.c.h.bf16 %v10525_v4 }
 0x3c6   :  { %v4687_v14 = vpack.c.bf16 %v6933_v21, %v6931_v3  ;;  %v4757_v31 = vunpack.c.l.bf16 %v4685_v7  ;;  %v4301_v17 = vmul.f32 0.796875, %v4173_v41  ;;  %v4175_v37 = vunpack.c.l.bf16 %v4074_v58 }
 0x3c7   :  { %v3755_v12 = vpack.c.bf16 %v3666_v42, %v3665_v35  ;;  %v3539_v36 = vunpack.c.l.bf16 %v3436_v49  ;;  %v3540_v19 = vunpack.c.h.bf16 %v3436_v49  ;;  %v4176_v47 = vunpack.c.h.bf16 %v4074_v58 }
 0x3c8   :  { %v4443_v18 = vunpack.c.l.bf16 %v12201_v15  ;;  %v4302_v6 = vmul.f32 0.796875, %v4174_v9  ;;  %v4758_v10 = vunpack.c.h.bf16 %v4685_v7  ;;  %v4761_v25 = vunpack.c.l.bf16 %v4687_v14  ;;  %v2268_v9 = vpop.f32.mrf.mxu1  ;;  %v2535_v7 = vpop.f32.mrf.mxu0 }
 0x3c9   :  { %v3857_v56 = vunpack.c.l.bf16 %v3755_v12  ;;  %v3858_v52 = vunpack.c.h.bf16 %v3755_v12  ;;  %v3667_v46 = vmul.f32 0.044677734, %v3539_v36  ;;  %v3668_v53 = vmul.f32 0.044677734, %v3540_v19 }
 0x3ca   :  { %v4762_v3 = vunpack.c.h.bf16 %v4687_v14  ;;  %v4885_v42 = vadd.f32 1.0, %v4757_v31  ;;  %v4303_v49 = vmul.f32 0.796875, %v4175_v37  ;;  %v4304_v41 = vmul.f32 0.796875, %v4176_v47 }
 0x3cb   :  { %v3985_v21 = vadd.f32 %v3857_v56, %v10489_v33  ;;  %v3986_v4 = vadd.f32 %v3858_v52, %v10491_v34  ;;  %v3756_v35 = vpack.c.bf16 %v3668_v53, %v3667_v46  ;;  %v4886_v28 = vadd.f32 1.0, %v4758_v10  ;;  %v12202_v56 = vld [vmem:[#allocation76_spill] sm:$0xff] }
 0x3cc   :  { %v4889_v58 = vadd.f32 1.0, %v4761_v25  ;;  %v4890_v12 = vadd.f32 1.0, %v4762_v3  ;;  %v10540_v36 = vpack.c.bf16 %v4302_v6, %v4301_v17  ;;  %v4444_v14 = vunpack.c.h.bf16 %v12201_v15 }
 0x3cd   :  { %v4075_v16 = vpack.c.bf16 %v3986_v4, %v3985_v21  ;;  %v3859_v22 = vunpack.c.l.bf16 %v3756_v35  ;;  %v3860_v43 = vunpack.c.h.bf16 %v3756_v35  ;;  %v5005_v19 = vpack.c.bf16 %v4886_v28, %v4885_v42 }
 0x3ce   :  { %v12203_v33 = vunpack.c.l.bf16 %v12202_v56  ;;  %v5007_v46 = vpack.c.bf16 %v4890_v12, %v4889_v58  ;;  %v12204_v17 = vunpack.c.h.bf16 %v12202_v56  ;;  %v10549_v6 = vpack.c.bf16 %v4304_v41, %v4303_v49 }
 0x3cf   :  { %v4177_v52 = vunpack.c.l.bf16 %v4075_v16  ;;  %v4178_v31 = vunpack.c.h.bf16 %v4075_v16  ;;  %v3987_v37 = vadd.f32 %v3859_v22, %v10500_v26  ;;  %v3988_v47 = vadd.f32 %v3860_v43, %v10502_v54  ;;  %v2357_v43 = vpop.f32.mrf.mxu2 }
 0x3d0   :  { %6934 = vtanh.f32 %v12203_v33  ;;  %v5205_v53 = vunpack.c.l.bf16 %v5005_v19  ;;  %v5206_v10 = vunpack.c.h.bf16 %v5005_v19  ;;  %12205 = vst [vmem:[#allocation61_spill] sm:$0xff] %v10549_v6  ;;  %v2269_v28 = vadd.f32 %v2268_v9, %v9280_v61 }
 0x3d1   :  { %6936 = vtanh.f32 %v12204_v17  ;;  %v2536_v15 = vadd.f32 %v2535_v7, %v9296_v2  ;;  %v4076_v33 = vpack.c.bf16 %v3988_v47, %v3987_v37  ;;  %v5209_v25 = vunpack.c.l.bf16 %v5007_v46 }
 0x3d2   :  { %6938 = vtanh.f32 %v4443_v18  ;;  %v5210_v16 = vunpack.c.h.bf16 %v5007_v46  ;;  %v10555_v22 = vpack.c.bf16 %v10519_v57, %v10516_v44  ;;  %v4305_v21 = vmul.f32 0.796875, %v4177_v52  ;;  %v2446_v46 = vpop.f32.mrf.mxu3 }
 0x3d3   :  { %v4306_v4 = vmul.f32 0.796875, %v4178_v31  ;;  %6940 = vtanh.f32 %v4444_v14  ;;  %v12206_v42 = vunpack.c.l.bf16 %v10475_v45  ;;  %v5337_v41 = vmul.f32 %v5209_v25, %v5081_v30 }
 0x3d4   :  { %v12207_v18 = vunpack.c.h.bf16 %v10475_v45  ;;  %v5338_v12 = vmul.f32 %v5210_v16, %v5082_v5  ;;  %v2358_v7 = vadd.f32 %v2357_v43, %v9316_v23  ;;  %v4179_v56 = vunpack.c.l.bf16 %v4076_v33 }
 0x3d5   :  { %v5333_v49 = vmul.f32 %v5205_v53, %v12206_v42  ;;  %v4180_v14 = vunpack.c.h.bf16 %v4076_v33  ;;  %v5079_v30 = vunpack.c.l.bf16 %v10533_v0  ;;  %v5083_v45 = vunpack.c.l.bf16 %v10555_v22 }
 0x3d6   :  { %v6935_v35 = vpop.eup %6934  ;;  %v5334_v58 = vmul.f32 %v5206_v10, %v12207_v18  ;;  %v2605_v5 = vpack.c.bf16 %v2358_v7, %v2269_v28  ;;  %v10568_v53 = vpack.c.bf16 %v4306_v4, %v4305_v21  ;;  %v5080_v10 = vunpack.c.h.bf16 %v10533_v0  ;;  %v2537_v18 = vpop.f32.mrf.mxu0 }
 0x3d7   :  { %v6937_v19 = vpop.eup %6936  ;;  %v5453_v52 = vpack.c.bf16 %v5337_v41, %v5333_v49  ;;  %v5084_v17 = vunpack.c.h.bf16 %v10555_v22  ;;  %v2447_v33 = vadd.f32 %v2446_v46, %v9323_v38  ;;  %v10577_v49 = vmul.f32 0.796875, %v4179_v56  ;;  %v2270_v41 = vpop.f32.mrf.mxu1 }
 0x3d8   :  { %v5454_v31 = vpack.c.bf16 %v5338_v12, %v5334_v58  ;;  %v6939_v37 = vpop.eup %6938  ;;  %v4686_v47 = vpack.c.bf16 %v6937_v19, %v6935_v35  ;;  %v10573_v35 = vunpack.c.l.bf16 %v2605_v5  ;;  %v10575_v42 = vunpack.c.h.bf16 %v2605_v5 }
 0x3d9   :  { %5784 = vmatmul.bf16.gmra.mxu1 %v5453_v52  ;;  %v6941_v25 = vpop.eup %6940  ;;  %v10579_v28 = vmul.f32 0.796875, %v4180_v14  ;;  %v2606_v4 = vpack.c.bf16 %v2536_v15, %v2447_v33  ;;  %v2271_v15 = vadd.f32 %v2270_v41, %v9280_v61  ;;  %v12212_v41 = vld [vmem:[#allocation81_spill] sm:$0xff] }
 0x3da   :  { %5873 = vmatmul.bf16.gmra.mxu2 %v5454_v31  ;;  %v4759_v16 = vunpack.c.l.bf16 %v4686_v47  ;;  %v4760_v43 = vunpack.c.h.bf16 %v4686_v47  ;;  %12208 = vst [vmem:[#allocation65_spill] sm:$0xff] %v10573_v35  ;;  %v4688_v21 = vpack.c.bf16 %v6941_v25, %v6939_v37  ;;  %v3029_v22 = vmul.f32 %v10573_v35, %v10573_v35  ;;  %v2359_v47 = vpop.f32.mrf.mxu2  ;;  %v2448_v44 = vpop.f32.mrf.mxu3 }
 0x3db   :  { %12209 = vst [vmem:[#allocation66_spill] sm:$0xff] %v10575_v42  ;;  %v3030_v12 = vmul.f32 %v10575_v42, %v10575_v42  ;;  %v10585_v52 = vunpack.c.l.bf16 %v2606_v4  ;;  %v10587_v56 = vunpack.c.h.bf16 %v2606_v4  ;;  %v2538_v37 = vadd.f32 %v2537_v18, %v9296_v2 }
 0x3dc   :  { %v4887_v0 = vadd.f32 1.0, %v4759_v16  ;;  %v4888_v58 = vadd.f32 1.0, %v4760_v43  ;;  %v4763_v7 = vunpack.c.l.bf16 %v4688_v21  ;;  %v4764_v19 = vunpack.c.h.bf16 %v4688_v21 }
 0x3dd   :  { %12210 = vst [vmem:[#allocation63_spill] sm:$0xff] %v10585_v52  ;;  %v3117_v31 = vpack.c.bf16 %v3030_v12, %v3029_v22  ;;  %v3031_v33 = vmul.f32 %v10585_v52, %v10585_v52  ;;  %v3032_v25 = vmul.f32 %v10587_v56, %v10587_v56  ;;  %v12213_v22 = vunpack.c.l.bf16 %v12212_v41 }
 0x3de   :  { %12211 = vst [vmem:[#allocation64_spill] sm:$0xff] %v10587_v56  ;;  %v5006_v14 = vpack.c.bf16 %v4888_v58, %v4887_v0  ;;  %v4891_v5 = vadd.f32 1.0, %v4763_v7  ;;  %v4892_v46 = vadd.f32 1.0, %v4764_v19  ;;  %v2360_v58 = vadd.f32 %v2359_v47, %v9316_v23 }
 0x3df   :  { %v3221_v21 = vunpack.c.l.bf16 %v3117_v31  ;;  %v3222_v4 = vunpack.c.h.bf16 %v3117_v31  ;;  %v3118_v0 = vpack.c.bf16 %v3032_v25, %v3031_v33  ;;  %6942 = vtanh.f32 %v12213_v22 }
 0x3e0   :  { %v5207_v16 = vunpack.c.l.bf16 %v5006_v14  ;;  %v5208_v43 = vunpack.c.h.bf16 %v5006_v14  ;;  %v5008_v57 = vpack.c.bf16 %v4892_v46, %v4891_v5  ;;  %v2607_v31 = vpack.c.bf16 %v2360_v58, %v2271_v15 }
 0x3e1   :  { %v3349_v7 = vmul.f32 %v3221_v21, %v10573_v35  ;;  %v3350_v19 = vmul.f32 %v3222_v4, %v10575_v42  ;;  %v3223_v6 = vunpack.c.l.bf16 %v3118_v0  ;;  %v3224_v14 = vunpack.c.h.bf16 %v3118_v0 }
 0x3e2   :  { %v5335_v18 = vmul.f32 %v5207_v16, %v5079_v30  ;;  %v5336_v12 = vmul.f32 %v5208_v43, %v5080_v10  ;;  %v5211_v9 = vunpack.c.l.bf16 %v5008_v57  ;;  %v5212_v3 = vunpack.c.h.bf16 %v5008_v57 }
 0x3e3   :  { %v3437_v54 = vpack.c.bf16 %v3350_v19, %v3349_v7  ;;  %v2449_v5 = vadd.f32 %v2448_v44, %v9323_v38  ;;  %v12214_v47 = vunpack.c.h.bf16 %v12212_v41  ;;  %v3351_v30 = vmul.f32 %v3223_v6, %v10585_v52  ;;  %v12219_v19 = vld [vmem:[#allocation70_spill] sm:$0xff] }
 0x3e4   :  { %v5339_v46 = vmul.f32 %v5211_v9, %v5083_v45  ;;  %v5340_v33 = vmul.f32 %v5212_v3, %v5084_v17  ;;  %v3352_v10 = vmul.f32 %v3224_v14, %v10587_v56  ;;  %v10605_v43 = vunpack.c.l.bf16 %v2607_v31 }
 0x3e5   :  { %6944 = vtanh.f32 %v12214_v47  ;;  %v3541_v25 = vunpack.c.l.bf16 %v3437_v54  ;;  %v3542_v16 = vunpack.c.h.bf16 %v3437_v54  ;;  %v10607_v57 = vunpack.c.h.bf16 %v2607_v31  ;;  %v6943_v21 = vpop.eup %6942 }
 0x3e6   :  { %v5455_v4 = vpack.c.bf16 %v5339_v46, %v5335_v18  ;;  %v5456_v15 = vpack.c.bf16 %v5340_v33, %v5336_v12  ;;  %v3438_v0 = vpack.c.bf16 %v3352_v10, %v3351_v30  ;;  %v2608_v44 = vpack.c.bf16 %v2538_v37, %v2449_v5  ;;  %v12218_v37 = vld [vmem:[#allocation69_spill] sm:$0xff] }
 0x3e7   :  { %12215 = vst [vmem:[#allocation67_spill] sm:$0xff] %v10607_v57  ;;  %v3669_v58 = vmul.f32 0.044677734, %v3541_v25  ;;  %v3670_v41 = vmul.f32 0.044677734, %v3542_v16  ;;  %v3033_v3 = vmul.f32 %v10605_v43, %v10605_v43  ;;  %v3034_v6 = vmul.f32 %v10607_v57, %v10607_v57 }
 0x3e8   :  { %5962 = vmatmul.bf16.gmra.mxu3 %v5455_v4  ;;  %6051 = vmatmul.bf16.gmra.mxu0 %v5456_v15  ;;  %v3543_v54 = vunpack.c.l.bf16 %v3438_v0  ;;  %v3544_v9 = vunpack.c.h.bf16 %v3438_v0  ;;  %v10613_v45 = vunpack.c.l.bf16 %v2608_v44  ;;  %v10615_v17 = vunpack.c.h.bf16 %v2608_v44 }
 0x3e9   :  { %v3757_v18 = vpack.c.bf16 %v3670_v41, %v3669_v58  ;;  %v3119_v12 = vpack.c.bf16 %v3034_v6, %v3033_v3  ;;  %v2781_v7 = vmul.f32 0.5, %v12218_v37  ;;  %v2782_v14 = vmul.f32 0.5, %v12219_v19 }
 0x3ea   :  { %12216 = vst [vmem:[#allocation82_spill] sm:$0xff] %v10613_v45  ;;  %v3671_v31 = vmul.f32 0.044677734, %v3543_v54  ;;  %v3672_v5 = vmul.f32 0.044677734, %v3544_v9  ;;  %v3035_v47 = vmul.f32 %v10613_v45, %v10613_v45  ;;  %v3036_v46 = vmul.f32 %v10615_v17, %v10615_v17 }
 0x3eb   :  { %12217 = vst [vmem:[#allocation76_spill] sm:$0xff] %v10615_v17  ;;  %v6945_v22 = vpop.eup %6944  ;;  %v3861_v33 = vunpack.c.l.bf16 %v3757_v18  ;;  %v3862_v30 = vunpack.c.h.bf16 %v3757_v18  ;;  %v3225_v10 = vunpack.c.l.bf16 %v3119_v12  ;;  %v3226_v25 = vunpack.c.h.bf16 %v3119_v12 }
 0x3ec   :  { %v3758_v16 = vpack.c.bf16 %v3672_v5, %v3671_v31  ;;  %v3120_v4 = vpack.c.bf16 %v3036_v46, %v3035_v47  ;;  %v4449_v15 = vunpack.c.l.bf16 %v10060_v59  ;;  %v4450_v0 = vunpack.c.h.bf16 %v10060_v59 }
 0x3ed   :  { %v3989_v44 = vadd.f32 %v3861_v33, %v10573_v35  ;;  %v3990_v58 = vadd.f32 %v3862_v30, %v10575_v42  ;;  %v3353_v41 = vmul.f32 %v3225_v10, %v10605_v43  ;;  %v3354_v3 = vmul.f32 %v3226_v25, %v10607_v57  ;;  %v12220_v10 = vld [vmem:[#allocation74_spill] sm:$0xff] }
 0x3ee   :  { %v3863_v6 = vunpack.c.l.bf16 %v3758_v16  ;;  %v3864_v54 = vunpack.c.h.bf16 %v3758_v16  ;;  %v3227_v9 = vunpack.c.l.bf16 %v3120_v4  ;;  %v3228_v18 = vunpack.c.h.bf16 %v3120_v4 }
 0x3ef   :  { %v4077_v37 = vpack.c.bf16 %v3990_v58, %v3989_v44  ;;  %v3439_v12 = vpack.c.bf16 %v3354_v3, %v3353_v41  ;;  %6946 = vtanh.f32 %v4449_v15  ;;  %v4689_v19 = vpack.c.bf16 %v6945_v22, %v6943_v21  ;;  %v12221_v15 = vld [vmem:[#allocation75_spill] sm:$0xff] }
 0x3f0   :  { %v3991_v31 = vadd.f32 %v3863_v6, %v10585_v52  ;;  %v3992_v59 = vadd.f32 %v3864_v54, %v10587_v56  ;;  %v3355_v5 = vmul.f32 %v3227_v9, %v10613_v45  ;;  %v3356_v47 = vmul.f32 %v3228_v18, %v10615_v17 }
 0x3f1   :  { %v10635_v46 = vpack.c.bf16 %v10579_v28, %v10577_v49  ;;  %v3545_v33 = vunpack.c.l.bf16 %v3439_v12  ;;  %v3546_v30 = vunpack.c.h.bf16 %v3439_v12  ;;  %v2785_v25 = vmul.f32 0.5, %v12220_v10  ;;  %v12222_v12 = vld [vmem:[#allocation71_spill] sm:$0xff]  ;;  %v12223_v10 = vld [vmem:[#allocation72_spill] sm:$0xff] }
 0x3f2   :  { %v4078_v16 = vpack.c.bf16 %v3992_v59, %v3991_v31  ;;  %v3440_v4 = vpack.c.bf16 %v3356_v47, %v3355_v5  ;;  %v2786_v21 = vmul.f32 0.5, %v12221_v15  ;;  %6948 = vtanh.f32 %v4450_v0 }
 0x3f3   :  { %v3673_v22 = vmul.f32 0.044677734, %v3545_v33  ;;  %v3674_v44 = vmul.f32 0.044677734, %v3546_v30  ;;  %v10639_v58 = vpack.c.bf16 %v2782_v14, %v2781_v7  ;;  %v4765_v41 = vunpack.c.l.bf16 %v4689_v19 }
 0x3f4   :  { %v4181_v3 = vunpack.c.l.bf16 %v4077_v37  ;;  %v4182_v6 = vunpack.c.h.bf16 %v4077_v37  ;;  %v3547_v54 = vunpack.c.l.bf16 %v3440_v4  ;;  %v3548_v9 = vunpack.c.h.bf16 %v3440_v4 }
 0x3f5   :  { %v6947_v49 = vpop.eup %6946  ;;  %v3759_v28 = vpack.c.bf16 %v3674_v44, %v3673_v22  ;;  %v4766_v18 = vunpack.c.h.bf16 %v4689_v19  ;;  %v2783_v56 = vmul.f32 0.5, %v12222_v12  ;;  %v2784_v31 = vmul.f32 0.5, %v12223_v10  ;;  %v2273_v44 = vpop.f32.mrf.mxu1 }
 0x3f6   :  { %v4183_v59 = vunpack.c.l.bf16 %v4078_v16  ;;  %v4184_v5 = vunpack.c.h.bf16 %v4078_v16  ;;  %v3675_v47 = vmul.f32 0.044677734, %v3547_v54  ;;  %v3676_v0 = vmul.f32 0.044677734, %v3548_v9 }
 0x3f7   :  { %v3865_v33 = vunpack.c.l.bf16 %v3759_v28  ;;  %v3866_v30 = vunpack.c.h.bf16 %v3759_v28  ;;  %v2899_v7 = vpack.c.bf16 %v2786_v21, %v2785_v25  ;;  %v4893_v14 = vadd.f32 1.0, %v4765_v41 }
 0x3f8   :  { %v6949_v15 = vpop.eup %6948  ;;  %v4309_v52 = vmul.f32 0.796875, %v4181_v3  ;;  %v4310_v37 = vmul.f32 0.796875, %v4182_v6  ;;  %v3760_v42 = vpack.c.bf16 %v3676_v0, %v3675_v47  ;;  %v4894_v4 = vadd.f32 1.0, %v4766_v18 }
 0x3f9   :  { %v3993_v22 = vadd.f32 %v3865_v33, %v10605_v43  ;;  %v3994_v19 = vadd.f32 %v3866_v30, %v10607_v57  ;;  %v4691_v12 = vpack.c.bf16 %v6949_v15, %v6947_v49  ;;  %v5085_v10 = vunpack.c.l.bf16 %v10639_v58 }
 0x3fa   :  { %v4311_v16 = vmul.f32 0.796875, %v4183_v59  ;;  %v4312_v54 = vmul.f32 0.796875, %v4184_v5  ;;  %v3867_v9 = vunpack.c.l.bf16 %v3760_v42  ;;  %v3868_v35 = vunpack.c.h.bf16 %v3760_v42 }
 0x3fb   :  { %v4079_v28 = vpack.c.bf16 %v3994_v19, %v3993_v22  ;;  %v4769_v25 = vunpack.c.l.bf16 %v4691_v12  ;;  %v4770_v21 = vunpack.c.h.bf16 %v4691_v12  ;;  %v5009_v41 = vpack.c.bf16 %v4894_v4, %v4893_v14  ;;  %v12226_v12 = vld [vmem:[#allocation77_spill] sm:$0xff] }
 0x3fc   :  { %v10646_v3 = vpack.c.bf16 %v4310_v37, %v4309_v52  ;;  %v3995_v6 = vadd.f32 %v3867_v9, %v10613_v45  ;;  %v3996_v18 = vadd.f32 %v3868_v35, %v10615_v17  ;;  %v2274_v47 = vadd.f32 %v2273_v44, %v9280_v61  ;;  %v12227_v9 = vld [vmem:[#allocation78_spill] sm:$0xff] }
 0x3fd   :  { %v4185_v0 = vunpack.c.l.bf16 %v4079_v28  ;;  %v4186_v49 = vunpack.c.h.bf16 %v4079_v28  ;;  %v4897_v33 = vadd.f32 1.0, %v4769_v25  ;;  %v4898_v30 = vadd.f32 1.0, %v4770_v21  ;;  %v2540_v25 = vpop.f32.mrf.mxu0 }
 0x3fe   :  { %12224 = vst [vmem:[#allocation81_spill] sm:$0xff] %v10646_v3  ;;  %v10651_v59 = vpack.c.bf16 %v4312_v54, %v4311_v16  ;;  %v4080_v5 = vpack.c.bf16 %v3996_v18, %v3995_v6  ;;  %v5089_v42 = vunpack.c.l.bf16 %v2899_v7  ;;  %v5213_v15 = vunpack.c.l.bf16 %v5009_v41 }
 0x3ff   :  { %v5011_v22 = vpack.c.bf16 %v4898_v30, %v4897_v33  ;;  %v5086_v14 = vunpack.c.h.bf16 %v10639_v58  ;;  %v5090_v52 = vunpack.c.h.bf16 %v2899_v7  ;;  %v5214_v37 = vunpack.c.h.bf16 %v5009_v41 }
 0x400   :  { %12225 = vst [vmem:[#allocation69_spill] sm:$0xff] %v10651_v59  ;;  %v4187_v4 = vunpack.c.l.bf16 %v4080_v5  ;;  %v4188_v19 = vunpack.c.h.bf16 %v4080_v5  ;;  %v2787_v35 = vmul.f32 0.5, %v12226_v12  ;;  %v2788_v44 = vmul.f32 0.5, %v12227_v9  ;;  %v2362_v5 = vpop.f32.mrf.mxu2  ;;  %v12232_v9 = vld [vmem:[#allocation79_spill] sm:$0xff] }
 0x401   :  { %v4313_v17 = vmul.f32 0.796875, %v4185_v0  ;;  %v4314_v28 = vmul.f32 0.796875, %v4186_v49  ;;  %v5217_v21 = vunpack.c.l.bf16 %v5011_v22  ;;  %v5218_v16 = vunpack.c.h.bf16 %v5011_v22 }
 0x402   :  { %v5341_v54 = vmul.f32 %v5213_v15, %v5085_v10  ;;  %v10656_v6 = vpack.c.bf16 %v2784_v31, %v2783_v56  ;;  %v4451_v18 = vunpack.c.l.bf16 %v10062_v50  ;;  %v4452_v58 = vunpack.c.h.bf16 %v10062_v50 }
 0x403   :  { %v5345_v7 = vmul.f32 %v5217_v21, %v5089_v42  ;;  %v5342_v41 = vmul.f32 %v5214_v37, %v5086_v14  ;;  %v5346_v33 = vmul.f32 %v5218_v16, %v5090_v52  ;;  %v12228_v30 = vunpack.c.l.bf16 %v10018_v24  ;;  %v12237_v52 = vld [vmem:[#allocation84_spill] sm:$0xff] }
 0x404   :  { %v4315_v12 = vmul.f32 0.796875, %v4187_v4  ;;  %v4316_v0 = vmul.f32 0.796875, %v4188_v19  ;;  %v2541_v49 = vadd.f32 %v2540_v25, %v9296_v2  ;;  %v12229_v22 = vunpack.c.h.bf16 %v10018_v24  ;;  %v12233_v25 = vld [vmem:[#allocation80_spill] sm:$0xff] }
 0x405   :  { %6950 = vtanh.f32 %v12228_v30  ;;  %v5457_v56 = vpack.c.bf16 %v5345_v7, %v5341_v54  ;;  %v5458_v31 = vpack.c.bf16 %v5346_v33, %v5342_v41  ;;  %v10665_v10 = vpack.c.bf16 %v2788_v44, %v2787_v35  ;;  %v2451_v35 = vpop.f32.mrf.mxu3 }
 0x406   :  { %6952 = vtanh.f32 %v12229_v22  ;;  %v2363_v15 = vadd.f32 %v2362_v5, %v9316_v23  ;;  %v10672_v37 = vpack.c.bf16 %v4314_v28, %v4313_v17  ;;  %v10675_v4 = vpack.c.bf16 %v4316_v0, %v4315_v12 }
 0x407   :  { %6954 = vtanh.f32 %v4451_v18  ;;  %5789 = vmatmul.bf16.gmra.mxu1 %v5457_v56  ;;  %5878 = vmatmul.bf16.gmra.mxu2 %v5458_v31  ;;  %v2789_v44 = vmul.f32 0.5, %v12232_v9  ;;  %v2790_v21 = vmul.f32 0.5, %v12233_v25  ;;  %v5088_v18 = vunpack.c.h.bf16 %v10656_v6 }
 0x408   :  { %6956 = vtanh.f32 %v4452_v58  ;;  %12230 = vst [vmem:[#allocation70_spill] sm:$0xff] %v10672_v37  ;;  %v2609_v19 = vpack.c.bf16 %v2363_v15, %v2274_v47  ;;  %v5092_v17 = vunpack.c.h.bf16 %v10665_v10  ;;  %v2452_v28 = vadd.f32 %v2451_v35, %v9323_v38  ;;  %v2275_v15 = vpop.f32.mrf.mxu1 }
 0x409   :  { %12231 = vst [vmem:[#allocation74_spill] sm:$0xff] %v10675_v4  ;;  %v10688_v47 = vmul.f32 0.5, %v10003_v32  ;;  %v10691_v33 = vmul.f32 0.5, %v10005_v40  ;;  %v10694_v0 = vmul.f32 0.5, %v9978_v55  ;;  %v10697_v22 = vmul.f32 0.5, %v9982_v27  ;;  %v12234_v40 = vld [vmem:[#allocation83_spill] sm:$0xff] }
 0x40a   :  { %v10683_v7 = vunpack.c.l.bf16 %v2609_v19  ;;  %v10685_v41 = vunpack.c.h.bf16 %v2609_v19  ;;  %v2610_v12 = vpack.c.bf16 %v2541_v49, %v2452_v28  ;;  %v10703_v19 = vpack.c.bf16 %v2790_v21, %v2789_v44 }
 0x40b   :  { %v6951_v16 = vpop.eup %6950  ;;  %v10706_v35 = vmul.f32 0.5, %v12234_v40  ;;  %v2276_v28 = vadd.f32 %v2275_v15, %v9280_v61  ;;  %v10714_v14 = vmul.f32 0.5, %v12237_v52  ;;  %v2542_v40 = vpop.f32.mrf.mxu0 }
 0x40c   :  { %v6953_v58 = vpop.eup %6952  ;;  %v3037_v31 = vmul.f32 %v10683_v7, %v10683_v7  ;;  %v3038_v32 = vmul.f32 %v10685_v41, %v10685_v41  ;;  %v10708_v25 = vunpack.c.l.bf16 %v2610_v12 }
 0x40d   :  { %v6955_v30 = vpop.eup %6954  ;;  %v4690_v5 = vpack.c.bf16 %v6953_v58, %v6951_v16  ;;  %v10710_v16 = vunpack.c.h.bf16 %v2610_v12  ;;  %v2364_v58 = vpop.f32.mrf.mxu2 }
 0x40e   :  { %v6957_v56 = vpop.eup %6956  ;;  %12235 = vst [vmem:[#allocation75_spill] sm:$0xff] %v10708_v25  ;;  %v3121_v27 = vpack.c.bf16 %v3038_v32, %v3037_v31  ;;  %v2365_v15 = vadd.f32 %v2364_v58, %v9316_v23  ;;  %v2453_v45 = vpop.f32.mrf.mxu3  ;;  %v12238_v58 = vunpack.c.l.bf16 %v10656_v6 }
 0x40f   :  { %v4692_v49 = vpack.c.bf16 %v6957_v56, %v6955_v30  ;;  %v4767_v9 = vunpack.c.l.bf16 %v4690_v5  ;;  %v4768_v55 = vunpack.c.h.bf16 %v4690_v5  ;;  %12236 = vst [vmem:[#allocation71_spill] sm:$0xff] %v10710_v16  ;;  %v3039_v5 = vmul.f32 %v10708_v25, %v10708_v25 }
 0x410   :  { %v3229_v54 = vunpack.c.l.bf16 %v3121_v27  ;;  %v3230_v30 = vunpack.c.h.bf16 %v3121_v27  ;;  %v3040_v12 = vmul.f32 %v10710_v16, %v10710_v16  ;;  %v2611_v4 = vpack.c.bf16 %v2365_v15, %v2276_v28 }
 0x411   :  { %v4771_v42 = vunpack.c.l.bf16 %v4692_v49  ;;  %v4772_v44 = vunpack.c.h.bf16 %v4692_v49  ;;  %v4895_v21 = vadd.f32 1.0, %v4767_v9  ;;  %v4896_v50 = vadd.f32 1.0, %v4768_v55 }
 0x412   :  { %v3357_v52 = vmul.f32 %v3229_v54, %v10683_v7  ;;  %v3358_v49 = vmul.f32 %v3230_v30, %v10685_v41  ;;  %v3122_v9 = vpack.c.bf16 %v3040_v12, %v3039_v5  ;;  %v2543_v55 = vadd.f32 %v2542_v40, %v9296_v2 }
 0x413   :  { %v4899_v56 = vadd.f32 1.0, %v4771_v42  ;;  %v4900_v31 = vadd.f32 1.0, %v4772_v44  ;;  %v5010_v32 = vpack.c.bf16 %v4896_v50, %v4895_v21  ;;  %v2454_v42 = vadd.f32 %v2453_v45, %v9323_v38 }
 0x414   :  { %v3441_v3 = vpack.c.bf16 %v3358_v49, %v3357_v52  ;;  %v3231_v37 = vunpack.c.l.bf16 %v3122_v9  ;;  %v3232_v57 = vunpack.c.h.bf16 %v3122_v9  ;;  %v12239_v28 = vunpack.c.l.bf16 %v10665_v10 }
 0x415   :  { %v5012_v24 = vpack.c.bf16 %v4900_v31, %v4899_v56  ;;  %v5215_v27 = vunpack.c.l.bf16 %v5010_v32  ;;  %v5216_v59 = vunpack.c.h.bf16 %v5010_v32  ;;  %v10731_v32 = vunpack.c.l.bf16 %v2611_v4 }
 0x416   :  { %v3549_v30 = vunpack.c.l.bf16 %v3441_v3  ;;  %v3550_v5 = vunpack.c.h.bf16 %v3441_v3  ;;  %v3359_v40 = vmul.f32 %v3231_v37, %v10708_v25  ;;  %v3360_v12 = vmul.f32 %v3232_v57, %v10710_v16 }
 0x417   :  { %v5219_v50 = vunpack.c.l.bf16 %v5012_v24  ;;  %v5343_v44 = vmul.f32 %v5215_v27, %v12238_v58  ;;  %v5220_v54 = vunpack.c.h.bf16 %v5012_v24  ;;  %v5344_v21 = vmul.f32 %v5216_v59, %v5088_v18  ;;  %v12242_v27 = vld [vmem:[#allocation87_spill] sm:$0xff] }
 0x418   :  { %v10733_v15 = vunpack.c.h.bf16 %v2611_v4  ;;  %v3677_v45 = vmul.f32 0.044677734, %v3549_v30  ;;  %v3678_v52 = vmul.f32 0.044677734, %v3550_v5  ;;  %v3442_v6 = vpack.c.bf16 %v3360_v12, %v3359_v40 }
 0x419   :  { %v5347_v56 = vmul.f32 %v5219_v50, %v12239_v28  ;;  %v5348_v31 = vmul.f32 %v5220_v54, %v5092_v17  ;;  %v2612_v49 = vpack.c.bf16 %v2543_v55, %v2454_v42  ;;  %v3041_v3 = vmul.f32 %v10731_v32, %v10731_v32 }
 0x41a   :  { %v3042_v57 = vmul.f32 %v10733_v15, %v10733_v15  ;;  %v3761_v37 = vpack.c.bf16 %v3678_v52, %v3677_v45  ;;  %v3551_v10 = vunpack.c.l.bf16 %v3442_v6  ;;  %v3552_v18 = vunpack.c.h.bf16 %v3442_v6 }
 0x41b   :  { %v5459_v24 = vpack.c.bf16 %v5347_v56, %v5343_v44  ;;  %v5460_v59 = vpack.c.bf16 %v5348_v31, %v5344_v21  ;;  %v10739_v17 = vunpack.c.l.bf16 %v2612_v49  ;;  %v10741_v9 = vunpack.c.h.bf16 %v2612_v49 }
 0x41c   :  { %v3123_v4 = vpack.c.bf16 %v3042_v57, %v3041_v3  ;;  %v10745_v55 = vpack.c.bf16 %v10691_v33, %v10688_v47  ;;  %v12243_v42 = vunpack.c.l.bf16 %v12242_v27  ;;  %v3869_v50 = vunpack.c.l.bf16 %v3761_v37 }
 0x41d   :  { %12240 = vst [vmem:[#allocation72_spill] sm:$0xff] %v10739_v17  ;;  %5967 = vmatmul.bf16.gmra.mxu3 %v5459_v24  ;;  %6056 = vmatmul.bf16.gmra.mxu0 %v5460_v59  ;;  %v3870_v58 = vunpack.c.h.bf16 %v3761_v37  ;;  %v3679_v44 = vmul.f32 0.044677734, %v3551_v10  ;;  %v3680_v54 = vmul.f32 0.044677734, %v3552_v18  ;;  %v3043_v5 = vmul.f32 %v10739_v17, %v10739_v17 }
 0x41e   :  { %12241 = vst [vmem:[#allocation77_spill] sm:$0xff] %v10741_v9  ;;  %6958 = vtanh.f32 %v12243_v42  ;;  %v3233_v21 = vunpack.c.l.bf16 %v3123_v4  ;;  %v3234_v30 = vunpack.c.h.bf16 %v3123_v4  ;;  %v3044_v40 = vmul.f32 %v10741_v9, %v10741_v9 }
 0x41f   :  { %v3997_v12 = vadd.f32 %v3869_v50, %v10683_v7  ;;  %v3998_v47 = vadd.f32 %v3870_v58, %v10685_v41  ;;  %v3762_v33 = vpack.c.bf16 %v3680_v54, %v3679_v44  ;;  %v4457_v28 = vunpack.c.l.bf16 %v10155_v39 }
 0x420   :  { %v3361_v56 = vmul.f32 %v3233_v21, %v10731_v32  ;;  %v3362_v31 = vmul.f32 %v3234_v30, %v10733_v15  ;;  %v3124_v45 = vpack.c.bf16 %v3044_v40, %v3043_v5  ;;  %v4458_v52 = vunpack.c.h.bf16 %v10155_v39 }
 0x421   :  { %v4081_v6 = vpack.c.bf16 %v3998_v47, %v3997_v12  ;;  %v3871_v49 = vunpack.c.l.bf16 %v3762_v33  ;;  %v3872_v24 = vunpack.c.h.bf16 %v3762_v33  ;;  %v12244_v59 = vunpack.c.h.bf16 %v12242_v27 }
 0x422   :  { %v3443_v57 = vpack.c.bf16 %v3362_v31, %v3361_v56  ;;  %v3235_v37 = vunpack.c.l.bf16 %v3124_v45  ;;  %v3236_v10 = vunpack.c.h.bf16 %v3124_v45  ;;  %v10763_v18 = vpack.c.bf16 %v10697_v22, %v10694_v0 }
 0x423   :  { %6960 = vtanh.f32 %v12244_v59  ;;  %v3999_v4 = vadd.f32 %v3871_v49, %v10708_v25  ;;  %v4000_v42 = vadd.f32 %v3872_v24, %v10710_v16  ;;  %v5093_v39 = vunpack.c.l.bf16 %v10703_v19 }
 0x424   :  { %v6959_v3 = vpop.eup %6958  ;;  %6962 = vtanh.f32 %v4457_v28  ;;  %v3553_v50 = vunpack.c.l.bf16 %v3443_v57  ;;  %v3554_v58 = vunpack.c.h.bf16 %v3443_v57  ;;  %v3363_v27 = vmul.f32 %v3235_v37, %v10739_v17 }
 0x425   :  { %v3364_v44 = vmul.f32 %v3236_v10, %v10741_v9  ;;  %v4189_v54 = vunpack.c.l.bf16 %v4081_v6  ;;  %v4190_v21 = vunpack.c.h.bf16 %v4081_v6  ;;  %v4082_v30 = vpack.c.bf16 %v4000_v42, %v3999_v4 }
 0x426   :  { %6964 = vtanh.f32 %v4458_v52  ;;  %v3681_v5 = vmul.f32 0.044677734, %v3553_v50  ;;  %v3682_v0 = vmul.f32 0.044677734, %v3554_v58  ;;  %v10775_v52 = vpack.c.bf16 %v10714_v14, %v10706_v35 }
 0x427   :  { %v3444_v22 = vpack.c.bf16 %v3364_v44, %v3363_v27  ;;  %v4191_v47 = vunpack.c.l.bf16 %v4082_v30  ;;  %v4192_v33 = vunpack.c.h.bf16 %v4082_v30  ;;  %v4317_v6 = vmul.f32 0.796875, %v4189_v54 }
 0x428   :  { %v3763_v31 = vpack.c.bf16 %v3682_v0, %v3681_v5  ;;  %v4318_v57 = vmul.f32 0.796875, %v4190_v21  ;;  %v4459_v37 = vunpack.c.l.bf16 %v10164_v63 }
 0x429   :  { %v6961_v12 = vpop.eup %6960  ;;  %v3555_v45 = vunpack.c.l.bf16 %v3444_v22  ;;  %v3556_v49 = vunpack.c.h.bf16 %v3444_v22  ;;  %v4319_v27 = vmul.f32 0.796875, %v4191_v47  ;;  %v4320_v44 = vmul.f32 0.796875, %v4192_v33  ;;  %v2278_v47 = vpop.f32.mrf.mxu1 }
 0x42a   :  { %v4693_v24 = vpack.c.bf16 %v6961_v12, %v6959_v3  ;;  %v6963_v59 = vpop.eup %6962  ;;  %v3873_v10 = vunpack.c.l.bf16 %v3763_v31  ;;  %v3874_v4 = vunpack.c.h.bf16 %v3763_v31  ;;  %v10780_v22 = vpack.c.bf16 %v4318_v57, %v4317_v6  ;;  %v12246_v12 = vld [vmem:[#allocation88_spill] sm:$0xff]  ;;  %v2545_v33 = vpop.f32.mrf.mxu0 }
 0x42b   :  { %v3683_v42 = vmul.f32 0.044677734, %v3555_v45  ;;  %v3684_v50 = vmul.f32 0.044677734, %v3556_v49  ;;  %v12247_v56 = vunpack.c.l.bf16 %v12246_v12 }
 0x42c   :  { %v6965_v58 = vpop.eup %6964  ;;  %v4773_v30 = vunpack.c.l.bf16 %v4693_v24  ;;  %v4774_v5 = vunpack.c.h.bf16 %v4693_v24  ;;  %v4001_v3 = vadd.f32 %v3873_v10, %v10731_v32  ;;  %v4002_v54 = vadd.f32 %v3874_v4, %v10733_v15  ;;  %12245 = vst [vmem:[#allocation78_spill] sm:$0xff] %v10780_v22 }
 0x42d   :  { %v3764_v21 = vpack.c.bf16 %v3684_v50, %v3683_v42  ;;  %v4695_v0 = vpack.c.bf16 %v6965_v58, %v6963_v59  ;;  %6966 = vtanh.f32 %v12247_v56  ;;  %v4460_v10 = vunpack.c.h.bf16 %v10164_v63 }
 0x42e   :  { %v4901_v14 = vadd.f32 1.0, %v4773_v30  ;;  %v4902_v35 = vadd.f32 1.0, %v4774_v5  ;;  %v4083_v31 = vpack.c.bf16 %v4002_v54, %v4001_v3  ;;  %v12248_v4 = vunpack.c.h.bf16 %v12246_v12  ;;  %v2367_v54 = vpop.f32.mrf.mxu2 }
 0x42f   :  { %v3875_v45 = vunpack.c.l.bf16 %v3764_v21  ;;  %v3876_v49 = vunpack.c.h.bf16 %v3764_v21  ;;  %v4777_v40 = vunpack.c.l.bf16 %v4695_v0  ;;  %v4778_v24 = vunpack.c.h.bf16 %v4695_v0 }
 0x430   :  { %v5013_v28 = vpack.c.bf16 %v4902_v35, %v4901_v14  ;;  %6968 = vtanh.f32 %v12248_v4  ;;  %v10787_v59 = vpack.c.bf16 %v4320_v44, %v4319_v27  ;;  %v5095_v56 = vunpack.c.l.bf16 %v10763_v18  ;;  %v2456_v35 = vpop.f32.mrf.mxu3 }
 0x431   :  { %v4003_v6 = vadd.f32 %v3875_v45, %v10739_v17  ;;  %v4004_v57 = vadd.f32 %v3876_v49, %v10741_v9  ;;  %v2279_v42 = vadd.f32 %v2278_v47, %v9280_v61  ;;  %v2546_v50 = vadd.f32 %v2545_v33, %v9296_v2 }
 0x432   :  { %12249 = vst [vmem:[#allocation79_spill] sm:$0xff] %v10787_v59  ;;  %v4905_v58 = vadd.f32 1.0, %v4777_v40  ;;  %v4906_v30 = vadd.f32 1.0, %v4778_v24  ;;  %v4193_v5 = vunpack.c.l.bf16 %v4083_v31  ;;  %v4194_v3 = vunpack.c.h.bf16 %v4083_v31 }
 0x433   :  { %v5221_v63 = vunpack.c.l.bf16 %v5013_v28  ;;  %6970 = vtanh.f32 %v4459_v37  ;;  %v6967_v21 = vpop.eup %6966  ;;  %v5222_v0 = vunpack.c.h.bf16 %v5013_v28  ;;  %v10798_v45 = vpack.c.bf16 %v4004_v57, %v4003_v6 }
 0x434   :  { %v5015_v44 = vpack.c.bf16 %v4906_v30, %v4905_v58  ;;  %6972 = vtanh.f32 %v4460_v10  ;;  %v2368_v47 = vadd.f32 %v2367_v54, %v9316_v23  ;;  %v10802_v33 = vmul.f32 0.796875, %v4193_v5 }
 0x435   :  { %v10804_v24 = vmul.f32 0.796875, %v4194_v3  ;;  %v5349_v28 = vmul.f32 %v5221_v63, %v5093_v39  ;;  %v12250_v4 = vunpack.c.l.bf16 %v10745_v55  ;;  %v12251_v6 = vunpack.c.h.bf16 %v10703_v19 }
 0x436   :  { %v6969_v40 = vpop.eup %6968  ;;  %v5225_v49 = vunpack.c.l.bf16 %v5015_v44  ;;  %v5226_v31 = vunpack.c.h.bf16 %v5015_v44  ;;  %v12252_v30 = vunpack.c.h.bf16 %v10745_v55  ;;  %v2613_v12 = vpack.c.bf16 %v2368_v47, %v2279_v42 }
 0x437   :  { %v4694_v10 = vpack.c.bf16 %v6969_v40, %v6967_v21  ;;  %v5350_v57 = vmul.f32 %v5222_v0, %v12251_v6  ;;  %v2457_v27 = vadd.f32 %v2456_v35, %v9323_v38  ;;  %v5096_v47 = vunpack.c.h.bf16 %v10763_v18 }
 0x438   :  { %v5353_v58 = vmul.f32 %v5225_v49, %v12250_v4  ;;  %v5354_v44 = vmul.f32 %v5226_v31, %v12252_v30  ;;  %v10816_v40 = vunpack.c.l.bf16 %v2613_v12  ;;  %v10818_v49 = vunpack.c.h.bf16 %v2613_v12  ;;  %v2547_v30 = vpop.f32.mrf.mxu0 }
 0x439   :  { %v6971_v54 = vpop.eup %6970  ;;  %v4775_v3 = vunpack.c.l.bf16 %v4694_v10  ;;  %v4776_v14 = vunpack.c.h.bf16 %v4694_v10  ;;  %v2614_v31 = vpack.c.bf16 %v2546_v50, %v2457_v27  ;;  %v2280_v10 = vpop.f32.mrf.mxu1  ;;  %v5100_v50 = vunpack.c.h.bf16 %v10775_v52 }
 0x43a   :  { %v6973_v39 = vpop.eup %6972  ;;  %v5461_v63 = vpack.c.bf16 %v5353_v58, %v5349_v28  ;;  %v5462_v21 = vpack.c.bf16 %v5354_v44, %v5350_v57  ;;  %12253 = vst [vmem:[#allocation80_spill] sm:$0xff] %v10816_v40  ;;  %v3045_v35 = vmul.f32 %v10816_v40, %v10816_v40  ;;  %v3046_v28 = vmul.f32 %v10818_v49, %v10818_v49  ;;  %v2369_v44 = vpop.f32.mrf.mxu2 }
 0x43b   :  { %12254 = vst [vmem:[#allocation83_spill] sm:$0xff] %v10818_v49  ;;  %v4696_v19 = vpack.c.bf16 %v6973_v39, %v6971_v54  ;;  %v4903_v0 = vadd.f32 1.0, %v4775_v3  ;;  %v4904_v55 = vadd.f32 1.0, %v4776_v14  ;;  %v10826_v6 = vunpack.c.l.bf16 %v2614_v31 }
 0x43c   :  { %5794 = vmatmul.bf16.gmra.mxu1 %v5461_v63  ;;  %5883 = vmatmul.bf16.gmra.mxu2 %v5462_v21  ;;  %v3125_v27 = vpack.c.bf16 %v3046_v28, %v3045_v35  ;;  %v10829_v14 = vunpack.c.h.bf16 %v2614_v31  ;;  %v2281_v57 = vadd.f32 %v2280_v10, %v9280_v61  ;;  %v2548_v35 = vadd.f32 %v2547_v30, %v9296_v2  ;;  %v2458_v10 = vpop.f32.mrf.mxu3 }
 0x43d   :  { %v4779_v4 = vunpack.c.l.bf16 %v4696_v19  ;;  %v4780_v12 = vunpack.c.h.bf16 %v4696_v19  ;;  %v5014_v58 = vpack.c.bf16 %v4904_v55, %v4903_v0  ;;  %12255 = vst [vmem:[#allocation84_spill] sm:$0xff] %v10826_v6  ;;  %v3047_v19 = vmul.f32 %v10826_v6, %v10826_v6 }
 0x43e   :  { %12256 = vst [vmem:[#allocation87_spill] sm:$0xff] %v10829_v14  ;;  %v3237_v21 = vunpack.c.l.bf16 %v3125_v27  ;;  %v3238_v42 = vunpack.c.h.bf16 %v3125_v27  ;;  %v3048_v0 = vmul.f32 %v10829_v14, %v10829_v14  ;;  %v2370_v28 = vadd.f32 %v2369_v44, %v9316_v23 }
 0x43f   :  { %v4907_v54 = vadd.f32 1.0, %v4779_v4  ;;  %v4908_v3 = vadd.f32 1.0, %v4780_v12  ;;  %v5223_v39 = vunpack.c.l.bf16 %v5014_v58  ;;  %v5224_v63 = vunpack.c.h.bf16 %v5014_v58 }
 0x440   :  { %v3365_v4 = vmul.f32 %v3237_v21, %v10816_v40  ;;  %v3366_v12 = vmul.f32 %v3238_v42, %v10818_v49  ;;  %v3126_v58 = vpack.c.bf16 %v3048_v0, %v3047_v19  ;;  %v2459_v27 = vadd.f32 %v2458_v10, %v9323_v38 }
 0x441   :  { %v5016_v55 = vpack.c.bf16 %v4908_v3, %v4907_v54  ;;  %v5351_v31 = vmul.f32 %v5223_v39, %v5095_v56  ;;  %v5352_v59 = vmul.f32 %v5224_v63, %v5096_v47  ;;  %v2615_v9 = vpack.c.bf16 %v2370_v28, %v2281_v57 }
 0x442   :  { %v3445_v54 = vpack.c.bf16 %v3366_v12, %v3365_v4  ;;  %v3239_v3 = vunpack.c.l.bf16 %v3126_v58  ;;  %v3240_v18 = vunpack.c.h.bf16 %v3126_v58  ;;  %v2616_v56 = vpack.c.bf16 %v2548_v35, %v2459_v27 }
 0x443   :  { %v5227_v5 = vunpack.c.l.bf16 %v5016_v55  ;;  %v5228_v37 = vunpack.c.h.bf16 %v5016_v55  ;;  %v12257_v30 = vunpack.c.l.bf16 %v10775_v52  ;;  %v10845_v17 = vunpack.c.l.bf16 %v2615_v9 }
 0x444   :  { %v10847_v21 = vunpack.c.h.bf16 %v2615_v9  ;;  %v3557_v42 = vunpack.c.l.bf16 %v3445_v54  ;;  %v3558_v19 = vunpack.c.h.bf16 %v3445_v54  ;;  %v3367_v0 = vmul.f32 %v3239_v3, %v10826_v6 }
 0x445   :  { %v5355_v39 = vmul.f32 %v5227_v5, %v12257_v30  ;;  %v5356_v44 = vmul.f32 %v5228_v37, %v5100_v50  ;;  %12258 = vst [vmem:[#allocation88_spill] sm:$0xff] %v10845_v17  ;;  %v3368_v55 = vmul.f32 %v3240_v18, %v10829_v14  ;;  %v3049_v63 = vmul.f32 %v10845_v17, %v10845_v17 }
 0x446   :  { %12259 = vst [vmem:[#allocation118_spill] sm:$0xff] %v10847_v21  ;;  %v3050_v52 = vmul.f32 %v10847_v21, %v10847_v21  ;;  %v3685_v5 = vmul.f32 0.044677734, %v3557_v42  ;;  %v3686_v37 = vmul.f32 0.044677734, %v3558_v19  ;;  %v10855_v35 = vunpack.c.l.bf16 %v2616_v56 }
 0x447   :  { %v5463_v47 = vpack.c.bf16 %v5355_v39, %v5351_v31  ;;  %v5464_v57 = vpack.c.bf16 %v5356_v44, %v5352_v59  ;;  %v3446_v50 = vpack.c.bf16 %v3368_v55, %v3367_v0  ;;  %v12261_v9 = vunpack.c.l.bf16 %v10798_v45  ;;  %v12263_v59 = vld [vmem:[#allocation85_spill] sm:$0xff]  ;;  %v12264_v39 = vld [vmem:[#allocation86_spill] sm:$0xff] }
 0x448   :  { %12260 = vst [vmem:[#allocation119_spill] sm:$0xff] %v10855_v35  ;;  %v3127_v10 = vpack.c.bf16 %v3050_v52, %v3049_v63  ;;  %v10861_v31 = vunpack.c.h.bf16 %v2616_v56  ;;  %v2797_v4 = vmul.f32 0.5, %v12263_v59  ;;  %v3765_v12 = vpack.c.bf16 %v3686_v37, %v3685_v5 }
 0x449   :  { %v10859_v28 = vmul.f32 0.796875, %v12261_v9  ;;  %5972 = vmatmul.bf16.gmra.mxu3 %v5463_v47  ;;  %6061 = vmatmul.bf16.gmra.mxu0 %v5464_v57  ;;  %v3559_v58 = vunpack.c.l.bf16 %v3446_v50  ;;  %v3560_v27 = vunpack.c.h.bf16 %v3446_v50  ;;  %v3051_v54 = vmul.f32 %v10855_v35, %v10855_v35 }
 0x44a   :  { %12262 = vst [vmem:[#allocation120_spill] sm:$0xff] %v10861_v31  ;;  %v3241_v3 = vunpack.c.l.bf16 %v3127_v10  ;;  %v3242_v18 = vunpack.c.h.bf16 %v3127_v10  ;;  %v3052_v30 = vmul.f32 %v10861_v31, %v10861_v31  ;;  %v2798_v44 = vmul.f32 0.5, %v12264_v39 }
 0x44b   :  { %v3877_v42 = vunpack.c.l.bf16 %v3765_v12  ;;  %v3878_v19 = vunpack.c.h.bf16 %v3765_v12  ;;  %v3687_v0 = vmul.f32 0.044677734, %v3559_v58  ;;  %v3688_v56 = vmul.f32 0.044677734, %v3560_v27  ;;  %v12265_v12 = vld [vmem:[#allocation98_spill] sm:$0xff] }
 0x44c   :  { %v3369_v55 = vmul.f32 %v3241_v3, %v10845_v17  ;;  %v3370_v47 = vmul.f32 %v3242_v18, %v10847_v21  ;;  %v3128_v57 = vpack.c.bf16 %v3052_v30, %v3051_v54  ;;  %v4465_v63 = vunpack.c.l.bf16 %v10243_v51 }
 0x44d   :  { %v4005_v52 = vadd.f32 %v3877_v42, %v10816_v40  ;;  %v4006_v5 = vadd.f32 %v3878_v19, %v10818_v49  ;;  %v3766_v37 = vpack.c.bf16 %v3688_v56, %v3687_v0  ;;  %v4466_v50 = vunpack.c.h.bf16 %v10243_v51  ;;  %v12268_v56 = vld [vmem:[#allocation91_spill] sm:$0xff] }
 0x44e   :  { %v3447_v9 = vpack.c.bf16 %v3370_v47, %v3369_v55  ;;  %v3243_v10 = vunpack.c.l.bf16 %v3128_v57  ;;  %v3244_v59 = vunpack.c.h.bf16 %v3128_v57  ;;  %v12266_v58 = vunpack.c.l.bf16 %v12265_v12  ;;  %v12269_v47 = vld [vmem:[#allocation92_spill] sm:$0xff] }
 0x44f   :  { %v4085_v27 = vpack.c.bf16 %v4006_v5, %v4005_v52  ;;  %v3879_v3 = vunpack.c.l.bf16 %v3766_v37  ;;  %v3880_v39 = vunpack.c.h.bf16 %v3766_v37  ;;  %v12267_v54 = vunpack.c.h.bf16 %v12265_v12 }
 0x450   :  { %6974 = vtanh.f32 %v12266_v58  ;;  %v3561_v18 = vunpack.c.l.bf16 %v3447_v9  ;;  %v3562_v30 = vunpack.c.h.bf16 %v3447_v9  ;;  %v3371_v42 = vmul.f32 %v3243_v10, %v10855_v35 }
 0x451   :  { %6976 = vtanh.f32 %v12267_v54  ;;  %v3372_v19 = vmul.f32 %v3244_v59, %v10861_v31  ;;  %v4007_v51 = vadd.f32 %v3879_v3, %v10826_v6  ;;  %v4008_v0 = vadd.f32 %v3880_v39, %v10829_v14 }
 0x452   :  { %v2801_v55 = vmul.f32 0.5, %v12268_v56  ;;  %v2802_v57 = vmul.f32 0.5, %v12269_v47  ;;  %v3689_v52 = vmul.f32 0.044677734, %v3561_v18  ;;  %v3690_v5 = vmul.f32 0.044677734, %v3562_v30 }
 0x453   :  { %v3448_v37 = vpack.c.bf16 %v3372_v19, %v3371_v42  ;;  %6978 = vtanh.f32 %v4465_v63  ;;  %v4197_v12 = vunpack.c.l.bf16 %v4085_v27  ;;  %v4198_v58 = vunpack.c.h.bf16 %v4085_v27  ;;  %v2283_v19 = vpop.f32.mrf.mxu1 }
 0x454   :  { %v4086_v54 = vpack.c.bf16 %v4008_v0, %v4007_v51  ;;  %6980 = vtanh.f32 %v4466_v50  ;;  %v12270_v10 = vunpack.c.h.bf16 %v10798_v45  ;;  %v3767_v49 = vpack.c.bf16 %v3690_v5, %v3689_v52 }
 0x455   :  { %v3563_v3 = vunpack.c.l.bf16 %v3448_v37  ;;  %v3564_v6 = vunpack.c.h.bf16 %v3448_v37  ;;  %v10887_v40 = vpack.c.bf16 %v2798_v44, %v2797_v4  ;;  %v10889_v18 = vpack.c.bf16 %v2802_v57, %v2801_v55 }
 0x456   :  { %v6975_v9 = vpop.eup %6974  ;;  %v4324_v59 = vmul.f32 0.796875, %v12270_v10  ;;  %v4199_v14 = vunpack.c.l.bf16 %v4086_v54  ;;  %v4200_v56 = vunpack.c.h.bf16 %v4086_v54  ;;  %v3881_v30 = vunpack.c.l.bf16 %v3767_v49 }
 0x457   :  { %v6977_v39 = vpop.eup %6976  ;;  %v3882_v63 = vunpack.c.h.bf16 %v3767_v49  ;;  %v3691_v42 = vmul.f32 0.044677734, %v3563_v3  ;;  %v3692_v27 = vmul.f32 0.044677734, %v3564_v6  ;;  %v4325_v50 = vmul.f32 0.796875, %v4197_v12 }
 0x458   :  { %v4326_v51 = vmul.f32 0.796875, %v4198_v58  ;;  %v4327_v0 = vmul.f32 0.796875, %v4199_v14  ;;  %v4328_v45 = vmul.f32 0.796875, %v4200_v56  ;;  %v4009_v52 = vadd.f32 %v3881_v30, %v10845_v17 }
 0x459   :  { %v6979_v47 = vpop.eup %6978  ;;  %v4010_v5 = vadd.f32 %v3882_v63, %v10847_v21  ;;  %v3768_v37 = vpack.c.bf16 %v3692_v27, %v3691_v42  ;;  %v4697_v54 = vpack.c.bf16 %v6977_v39, %v6975_v9  ;;  %v10895_v44 = vpack.c.bf16 %v10804_v24, %v10802_v33 }
 0x45a   :  { %v6981_v4 = vpop.eup %6980  ;;  %v10898_v49 = vpack.c.bf16 %v4324_v59, %v10859_v28  ;;  %v10901_v6 = vadd.f32 %v2283_v19, %v9280_v61  ;;  %v5101_v14 = vunpack.c.l.bf16 %v10887_v40  ;;  %v10904_v10 = vpack.c.bf16 %v4326_v51, %v4325_v50  ;;  %v12275_v59 = vld [vmem:[#allocation89_spill] sm:$0xff]  ;;  %v12276_v51 = vld [vmem:[#allocation90_spill] sm:$0xff] }
 0x45b   :  { %12271 = vst [vmem:[#allocation85_spill] sm:$0xff] %v10895_v44  ;;  %v4087_v55 = vpack.c.bf16 %v4010_v5, %v4009_v52  ;;  %v3883_v57 = vunpack.c.l.bf16 %v3768_v37  ;;  %v3884_v12 = vunpack.c.h.bf16 %v3768_v37  ;;  %v4699_v58 = vpack.c.bf16 %v6981_v4, %v6979_v47 }
 0x45c   :  { %12272 = vst [vmem:[#allocation86_spill] sm:$0xff] %v10898_v49  ;;  %v4781_v9 = vunpack.c.l.bf16 %v4697_v54  ;;  %v4782_v3 = vunpack.c.h.bf16 %v4697_v54  ;;  %v5105_v39 = vunpack.c.l.bf16 %v10889_v18  ;;  %v10907_v33 = vpack.c.bf16 %v4328_v45, %v4327_v0 }
 0x45d   :  { %12273 = vst [vmem:[#allocation98_spill] sm:$0xff] %v10904_v10  ;;  %v4011_v24 = vadd.f32 %v3883_v57, %v10855_v35  ;;  %v4012_v28 = vadd.f32 %v3884_v12, %v10861_v31  ;;  %v2799_v56 = vmul.f32 0.5, %v12275_v59  ;;  %v4785_v30 = vunpack.c.l.bf16 %v4699_v58  ;;  %v12277_v57 = vld [vmem:[#allocation93_spill] sm:$0xff]  ;;  %v12278_v31 = vld [vmem:[#allocation94_spill] sm:$0xff] }
 0x45e   :  { %12274 = vst [vmem:[#allocation91_spill] sm:$0xff] %v10907_v33  ;;  %v4786_v63 = vunpack.c.h.bf16 %v4699_v58  ;;  %v4909_v42 = vadd.f32 1.0, %v4781_v9  ;;  %v4910_v27 = vadd.f32 1.0, %v4782_v3  ;;  %v4201_v19 = vunpack.c.l.bf16 %v4087_v55 }
 0x45f   :  { %v4202_v47 = vunpack.c.h.bf16 %v4087_v55  ;;  %v4088_v50 = vpack.c.bf16 %v4012_v28, %v4011_v24  ;;  %v2800_v52 = vmul.f32 0.5, %v12276_v51  ;;  %v4913_v5 = vadd.f32 1.0, %v4785_v30  ;;  %v2372_v51 = vpop.f32.mrf.mxu2 }
 0x460   :  { %v4914_v37 = vadd.f32 1.0, %v4786_v63  ;;  %v5017_v54 = vpack.c.bf16 %v4910_v27, %v4909_v42  ;;  %v5102_v0 = vunpack.c.h.bf16 %v10887_v40  ;;  %v2803_v12 = vmul.f32 0.5, %v12277_v57  ;;  %v2550_v40 = vpop.f32.mrf.mxu0 }
 0x461   :  { %v4203_v45 = vunpack.c.l.bf16 %v4088_v50  ;;  %v4204_v4 = vunpack.c.h.bf16 %v4088_v50  ;;  %v2804_v59 = vmul.f32 0.5, %v12278_v31  ;;  %v5106_v9 = vunpack.c.h.bf16 %v10889_v18 }
 0x462   :  { %v5019_v35 = vpack.c.bf16 %v4914_v37, %v4913_v5  ;;  %v5229_v58 = vunpack.c.l.bf16 %v5017_v54  ;;  %v5230_v3 = vunpack.c.h.bf16 %v5017_v54  ;;  %v4329_v55 = vmul.f32 0.796875, %v4201_v19  ;;  %v12279_v5 = vld [vmem:[#allocation100_spill] sm:$0xff] }
 0x463   :  { %v4330_v24 = vmul.f32 0.796875, %v4202_v47  ;;  %v10917_v28 = vpack.c.bf16 %v2800_v52, %v2799_v56  ;;  %v4467_v30 = vunpack.c.l.bf16 %v10257_v62  ;;  %v4331_v63 = vmul.f32 0.796875, %v4203_v45 }
 0x464   :  { %v4332_v42 = vmul.f32 0.796875, %v4204_v4  ;;  %v5233_v27 = vunpack.c.l.bf16 %v5019_v35  ;;  %v5234_v50 = vunpack.c.h.bf16 %v5019_v35  ;;  %v5357_v57 = vmul.f32 %v5229_v58, %v5101_v14 }
 0x465   :  { %v10920_v21 = vpack.c.bf16 %v2804_v59, %v2803_v12  ;;  %v4468_v31 = vunpack.c.h.bf16 %v10257_v62  ;;  %v12280_v18 = vunpack.c.l.bf16 %v12279_v5  ;;  %v5358_v47 = vmul.f32 %v5230_v3, %v5102_v0 }
 0x466   :  { %v5361_v19 = vmul.f32 %v5233_v27, %v5105_v39  ;;  %v5362_v56 = vmul.f32 %v5234_v50, %v5106_v9  ;;  %v12281_v52 = vunpack.c.h.bf16 %v12279_v5  ;;  %v2551_v54 = vadd.f32 %v2550_v40, %v9296_v2  ;;  %v12291_v39 = vld [vmem:[#allocation104_spill] sm:$0xff] }
 0x467   :  { %6982 = vtanh.f32 %v12280_v18  ;;  %v2373_v35 = vadd.f32 %v2372_v51, %v9316_v23  ;;  %v10933_v0 = vpack.c.bf16 %v4330_v24, %v4329_v55  ;;  %v10936_v59 = vpack.c.bf16 %v4332_v42, %v4331_v63  ;;  %v12284_v63 = vld [vmem:[#allocation95_spill] sm:$0xff]  ;;  %v12285_v51 = vld [vmem:[#allocation96_spill] sm:$0xff]  ;;  %v12287_v18 = vld [vmem:[#allocation102_spill] sm:$0xff] }
 0x468   :  { %6984 = vtanh.f32 %v12281_v52  ;;  %v5465_v45 = vpack.c.bf16 %v5361_v19, %v5357_v57  ;;  %v5466_v62 = vpack.c.bf16 %v5362_v56, %v5358_v47  ;;  %v5103_v58 = vunpack.c.l.bf16 %v10917_v28  ;;  %v2552_v10 = vpop.f32.mrf.mxu0 }
 0x469   :  { %6986 = vtanh.f32 %v4467_v30  ;;  %12282 = vst [vmem:[#allocation92_spill] sm:$0xff] %v10933_v0  ;;  %v2617_v12 = vpack.c.bf16 %v2373_v35, %v10901_v6  ;;  %v5104_v3 = vunpack.c.h.bf16 %v10917_v28  ;;  %v2461_v30 = vpop.f32.mrf.mxu3  ;;  %v2805_v42 = vmul.f32 0.5, %v12284_v63  ;;  %v12289_v63 = vld [vmem:[#allocation99_spill] sm:$0xff] }
 0x46a   :  { %6988 = vtanh.f32 %v4468_v31  ;;  %12283 = vst [vmem:[#allocation89_spill] sm:$0xff] %v10936_v59  ;;  %5799 = vmatmul.bf16.gmra.mxu1 %v5465_v45  ;;  %5888 = vmatmul.bf16.gmra.mxu2 %v5466_v62  ;;  %v2462_v6 = vadd.f32 %v2461_v30, %v9323_v38  ;;  %v2806_v57 = vmul.f32 0.5, %v12285_v51  ;;  %v12286_v31 = vld [vmem:[#allocation101_spill] sm:$0xff]  ;;  %v10953_v28 = vmul.f32 0.5, %v12287_v18  ;;  %v2285_v62 = vpop.f32.mrf.mxu1 }
 0x46b   :  { %v10942_v50 = vunpack.c.l.bf16 %v2617_v12  ;;  %v10944_v55 = vunpack.c.h.bf16 %v2617_v12  ;;  %v10950_v5 = vmul.f32 0.5, %v12286_v31  ;;  %v12288_v12 = vld [vmem:[#allocation97_spill] sm:$0xff]  ;;  %v10963_v51 = vmul.f32 0.5, %v12289_v63  ;;  %v12290_v31 = vld [vmem:[#allocation103_spill] sm:$0xff] }
 0x46c   :  { %v2618_v35 = vpack.c.bf16 %v2551_v54, %v2462_v6  ;;  %v10960_v30 = vmul.f32 0.5, %v12288_v12  ;;  %v10966_v18 = vmul.f32 0.5, %v12290_v31  ;;  %v2286_v6 = vadd.f32 %v2285_v62, %v9280_v61  ;;  %v2374_v12 = vpop.f32.mrf.mxu2 }
 0x46d   :  { %v6983_v40 = vpop.eup %6982  ;;  %v3053_v56 = vmul.f32 %v10942_v50, %v10942_v50  ;;  %v3054_v52 = vmul.f32 %v10944_v55, %v10944_v55  ;;  %v10976_v9 = vpack.c.bf16 %v2806_v57, %v2805_v42 }
 0x46e   :  { %v6985_v24 = vpop.eup %6984  ;;  %v10971_v27 = vunpack.c.l.bf16 %v2618_v35  ;;  %v10973_v54 = vunpack.c.h.bf16 %v2618_v35 }
 0x46f   :  { %v6987_v19 = vpop.eup %6986  ;;  %v4698_v47 = vpack.c.bf16 %v6985_v24, %v6983_v40  ;;  %v10969_v40 = vmul.f32 0.5, %v12291_v39  ;;  %v3129_v37 = vpack.c.bf16 %v3054_v52, %v3053_v56 }
 0x470   :  { %v6989_v45 = vpop.eup %6988  ;;  %12292 = vst [vmem:[#allocation90_spill] sm:$0xff] %v10971_v27 }
 0x471   :  { %v4700_v24 = vpack.c.bf16 %v6989_v45, %v6987_v19  ;;  %v4783_v4 = vunpack.c.l.bf16 %v4698_v47  ;;  %v4784_v14 = vunpack.c.h.bf16 %v4698_v47  ;;  %12293 = vst [vmem:[#allocation93_spill] sm:$0xff] %v10973_v54  ;;  %v3245_v39 = vunpack.c.l.bf16 %v3129_v37  ;;  %v2463_v49 = vpop.f32.mrf.mxu3 }
 0x472   :  { %v3246_v0 = vunpack.c.h.bf16 %v3129_v37  ;;  %v3055_v19 = vmul.f32 %v10971_v27, %v10971_v27  ;;  %v3056_v47 = vmul.f32 %v10973_v54, %v10973_v54  ;;  %v2375_v45 = vadd.f32 %v2374_v12, %v9316_v23 }
 0x473   :  { %v4787_v63 = vunpack.c.l.bf16 %v4700_v24  ;;  %v4788_v33 = vunpack.c.h.bf16 %v4700_v24  ;;  %v4911_v31 = vadd.f32 1.0, %v4783_v4  ;;  %v4912_v59 = vadd.f32 1.0, %v4784_v14 }
 0x474   :  { %v3373_v42 = vmul.f32 %v3245_v39, %v10942_v50  ;;  %v3374_v57 = vmul.f32 %v3246_v0, %v10944_v55  ;;  %v3130_v4 = vpack.c.bf16 %v3056_v47, %v3055_v19  ;;  %v2553_v14 = vadd.f32 %v2552_v10, %v9296_v2 }
 0x475   :  { %v4915_v56 = vadd.f32 1.0, %v4787_v63  ;;  %v4916_v52 = vadd.f32 1.0, %v4788_v33  ;;  %v5018_v35 = vpack.c.bf16 %v4912_v59, %v4911_v31  ;;  %v2619_v17 = vpack.c.bf16 %v2375_v45, %v2286_v6 }
 0x476   :  { %v3449_v16 = vpack.c.bf16 %v3374_v57, %v3373_v42  ;;  %v3247_v25 = vunpack.c.l.bf16 %v3130_v4  ;;  %v3248_v22 = vunpack.c.h.bf16 %v3130_v4  ;;  %v2464_v33 = vadd.f32 %v2463_v49, %v9323_v38 }
 0x477   :  { %v5020_v62 = vpack.c.bf16 %v4916_v52, %v4915_v56  ;;  %v5231_v37 = vunpack.c.l.bf16 %v5018_v35  ;;  %v5232_v24 = vunpack.c.h.bf16 %v5018_v35  ;;  %v12294_v19 = vunpack.c.l.bf16 %v10920_v21 }
 0x478   :  { %v3565_v39 = vunpack.c.l.bf16 %v3449_v16  ;;  %v3566_v44 = vunpack.c.h.bf16 %v3449_v16  ;;  %v3375_v0 = vmul.f32 %v3247_v25, %v10971_v27  ;;  %v3376_v10 = vmul.f32 %v3248_v22, %v10973_v54 }
 0x479   :  { %v5235_v59 = vunpack.c.l.bf16 %v5020_v62  ;;  %v5359_v63 = vmul.f32 %v5231_v37, %v5103_v58  ;;  %v5236_v12 = vunpack.c.h.bf16 %v5020_v62  ;;  %v5360_v31 = vmul.f32 %v5232_v24, %v5104_v3 }
 0x47a   :  { %v12295_v6 = vunpack.c.h.bf16 %v10920_v21  ;;  %v10993_v52 = vunpack.c.l.bf16 %v2619_v17  ;;  %v10995_v35 = vunpack.c.h.bf16 %v2619_v17  ;;  %v3693_v49 = vmul.f32 0.044677734, %v3565_v39 }
 0x47b   :  { %v5363_v47 = vmul.f32 %v5235_v59, %v12294_v19  ;;  %v3694_v58 = vmul.f32 0.044677734, %v3566_v44  ;;  %v3450_v45 = vpack.c.bf16 %v3376_v10, %v3375_v0  ;;  %v2620_v3 = vpack.c.bf16 %v2553_v14, %v2464_v33  ;;  %v12299_v14 = vld [vmem:[#allocation109_spill] sm:$0xff] }
 0x47c   :  { %v5364_v56 = vmul.f32 %v5236_v12, %v12295_v6  ;;  %12296 = vst [vmem:[#allocation94_spill] sm:$0xff] %v10995_v35  ;;  %v3057_v25 = vmul.f32 %v10993_v52, %v10993_v52  ;;  %v3058_v22 = vmul.f32 %v10995_v35, %v10995_v35  ;;  %v11007_v44 = vpack.c.bf16 %v10953_v28, %v10950_v5 }
 0x47d   :  { %v5467_v42 = vpack.c.bf16 %v5363_v47, %v5359_v63  ;;  %v3769_v57 = vpack.c.bf16 %v3694_v58, %v3693_v49  ;;  %v3567_v4 = vunpack.c.l.bf16 %v3450_v45  ;;  %v3568_v21 = vunpack.c.h.bf16 %v3450_v45 }
 0x47e   :  { %v5468_v16 = vpack.c.bf16 %v5364_v56, %v5360_v31  ;;  %v11001_v62 = vunpack.c.l.bf16 %v2620_v3  ;;  %v3131_v17 = vpack.c.bf16 %v3058_v22, %v3057_v25  ;;  %v11003_v37 = vunpack.c.h.bf16 %v2620_v3 }
 0x47f   :  { %5977 = vmatmul.bf16.gmra.mxu3 %v5467_v42  ;;  %v12300_v24 = vunpack.c.l.bf16 %v12299_v14  ;;  %v3885_v33 = vunpack.c.l.bf16 %v3769_v57  ;;  %v3886_v59 = vunpack.c.h.bf16 %v3769_v57  ;;  %v3695_v63 = vmul.f32 0.044677734, %v3567_v4 }
 0x480   :  { %12297 = vst [vmem:[#allocation100_spill] sm:$0xff] %v11001_v62  ;;  %6066 = vmatmul.bf16.gmra.mxu0 %v5468_v16  ;;  %v3696_v12 = vmul.f32 0.044677734, %v3568_v21  ;;  %v3249_v31 = vunpack.c.l.bf16 %v3131_v17  ;;  %v3250_v39 = vunpack.c.h.bf16 %v3131_v17  ;;  %v3059_v0 = vmul.f32 %v11001_v62, %v11001_v62 }
 0x481   :  { %12298 = vst [vmem:[#allocation95_spill] sm:$0xff] %v11003_v37  ;;  %6990 = vtanh.f32 %v12300_v24  ;;  %v3060_v10 = vmul.f32 %v11003_v37, %v11003_v37  ;;  %v4013_v19 = vadd.f32 %v3885_v33, %v10942_v50  ;;  %v4014_v5 = vadd.f32 %v3886_v59, %v10944_v55 }
 0x482   :  { %v3770_v28 = vpack.c.bf16 %v3696_v12, %v3695_v63  ;;  %v4473_v47 = vunpack.c.l.bf16 %v10310_v8  ;;  %v3377_v6 = vmul.f32 %v3249_v31, %v10993_v52  ;;  %v3378_v56 = vmul.f32 %v3250_v39, %v10995_v35 }
 0x483   :  { %v3132_v49 = vpack.c.bf16 %v3060_v10, %v3059_v0  ;;  %v4474_v58 = vunpack.c.h.bf16 %v10310_v8  ;;  %v4089_v45 = vpack.c.bf16 %v4014_v5, %v4013_v19  ;;  %v12301_v16 = vunpack.c.h.bf16 %v12299_v14 }
 0x484   :  { %v3887_v3 = vunpack.c.l.bf16 %v3770_v28  ;;  %v3888_v42 = vunpack.c.h.bf16 %v3770_v28  ;;  %v3451_v22 = vpack.c.bf16 %v3378_v56, %v3377_v6  ;;  %v11025_v21 = vpack.c.bf16 %v10963_v51, %v10960_v30 }
 0x485   :  { %6992 = vtanh.f32 %v12301_v16  ;;  %v3251_v57 = vunpack.c.l.bf16 %v3132_v49  ;;  %v3252_v4 = vunpack.c.h.bf16 %v3132_v49  ;;  %v11031_v8 = vpack.c.bf16 %v10969_v40, %v10966_v18 }
 0x486   :  { %v4015_v17 = vadd.f32 %v3887_v3, %v10971_v27  ;;  %v4016_v24 = vadd.f32 %v3888_v42, %v10973_v54  ;;  %6994 = vtanh.f32 %v4473_v47  ;;  %v3569_v33 = vunpack.c.l.bf16 %v3451_v22 }
 0x487   :  { %v6991_v25 = vpop.eup %6990  ;;  %v3570_v14 = vunpack.c.h.bf16 %v3451_v22  ;;  %v3379_v59 = vmul.f32 %v3251_v57, %v11001_v62  ;;  %v3380_v63 = vmul.f32 %v3252_v4, %v11003_v37  ;;  %v4205_v12 = vunpack.c.l.bf16 %v4089_v45 }
 0x488   :  { %v4206_v31 = vunpack.c.h.bf16 %v4089_v45  ;;  %v4090_v39 = vpack.c.bf16 %v4016_v24, %v4015_v17  ;;  %6996 = vtanh.f32 %v4474_v58  ;;  %v3697_v30 = vmul.f32 0.044677734, %v3569_v33  ;;  %v2555_v58 = vpop.f32.mrf.mxu0 }
 0x489   :  { %v3698_v51 = vmul.f32 0.044677734, %v3570_v14  ;;  %v3452_v0 = vpack.c.bf16 %v3380_v63, %v3379_v59  ;;  %v5109_v10 = vunpack.c.l.bf16 %v10976_v9  ;;  %v5110_v40 = vunpack.c.h.bf16 %v10976_v9 }
 0x48a   :  { %v4207_v5 = vunpack.c.l.bf16 %v4090_v39  ;;  %v4208_v28 = vunpack.c.h.bf16 %v4090_v39  ;;  %v4333_v45 = vmul.f32 0.796875, %v4205_v12  ;;  %v4334_v42 = vmul.f32 0.796875, %v4206_v31 }
 0x48b   :  { %v6993_v19 = vpop.eup %6992  ;;  %v3771_v47 = vpack.c.bf16 %v3698_v51, %v3697_v30  ;;  %v3571_v6 = vunpack.c.l.bf16 %v3452_v0  ;;  %v3572_v56 = vunpack.c.h.bf16 %v3452_v0  ;;  %v4475_v16 = vunpack.c.l.bf16 %v10313_v11  ;;  %v2288_v51 = vpop.f32.mrf.mxu1 }
 0x48c   :  { %v4701_v49 = vpack.c.bf16 %v6993_v19, %v6991_v25  ;;  %v6995_v3 = vpop.eup %6994  ;;  %v4335_v33 = vmul.f32 0.796875, %v4207_v5  ;;  %v4336_v14 = vmul.f32 0.796875, %v4208_v28  ;;  %v11042_v31 = vpack.c.bf16 %v4334_v42, %v4333_v45 }
 0x48d   :  { %v3889_v22 = vunpack.c.l.bf16 %v3771_v47  ;;  %v3890_v57 = vunpack.c.h.bf16 %v3771_v47  ;;  %v3699_v4 = vmul.f32 0.044677734, %v3571_v6  ;;  %v3700_v17 = vmul.f32 0.044677734, %v3572_v56 }
 0x48e   :  { %v6997_v24 = vpop.eup %6996  ;;  %v4789_v59 = vunpack.c.l.bf16 %v4701_v49  ;;  %v4790_v63 = vunpack.c.h.bf16 %v4701_v49  ;;  %12302 = vst [vmem:[#allocation96_spill] sm:$0xff] %v11042_v31  ;;  %v12303_v47 = vunpack.c.l.bf16 %v10261_v60 }
 0x48f   :  { %v4017_v39 = vadd.f32 %v3889_v22, %v10993_v52  ;;  %v4018_v25 = vadd.f32 %v3890_v57, %v10995_v35  ;;  %v3772_v30 = vpack.c.bf16 %v3700_v17, %v3699_v4  ;;  %v4703_v12 = vpack.c.bf16 %v6997_v24, %v6995_v3 }
 0x490   :  { %v4917_v0 = vadd.f32 1.0, %v4789_v59  ;;  %v4918_v19 = vadd.f32 1.0, %v4790_v63  ;;  %6998 = vtanh.f32 %v12303_v47  ;;  %v4476_v22 = vunpack.c.h.bf16 %v10313_v11 }
 0x491   :  { %v4091_v6 = vpack.c.bf16 %v4018_v25, %v4017_v39  ;;  %v3891_v56 = vunpack.c.l.bf16 %v3772_v30  ;;  %v3892_v5 = vunpack.c.h.bf16 %v3772_v30  ;;  %v4793_v28 = vunpack.c.l.bf16 %v4703_v12 }
 0x492   :  { %v4794_v49 = vunpack.c.h.bf16 %v4703_v12  ;;  %v5021_v18 = vpack.c.bf16 %v4918_v19, %v4917_v0  ;;  %v12304_v57 = vunpack.c.h.bf16 %v10261_v60  ;;  %v11049_v3 = vpack.c.bf16 %v4336_v14, %v4335_v33  ;;  %v2377_v12 = vpop.f32.mrf.mxu2 }
 0x493   :  { %v4019_v45 = vadd.f32 %v3891_v56, %v11001_v62  ;;  %v4020_v42 = vadd.f32 %v3892_v5, %v11003_v37  ;;  %v2289_v4 = vadd.f32 %v2288_v51, %v9280_v61  ;;  %v4209_v17 = vunpack.c.l.bf16 %v4091_v6 }
 0x494   :  { %7000 = vtanh.f32 %v12304_v57  ;;  %12305 = vst [vmem:[#allocation101_spill] sm:$0xff] %v11049_v3  ;;  %v4210_v24 = vunpack.c.h.bf16 %v4091_v6  ;;  %v4921_v59 = vadd.f32 1.0, %v4793_v28  ;;  %v4922_v63 = vadd.f32 1.0, %v4794_v49 }
 0x495   :  { %v2556_v39 = vadd.f32 %v2555_v58, %v9296_v2  ;;  %v5237_v25 = vunpack.c.l.bf16 %v5021_v18  ;;  %v5238_v30 = vunpack.c.h.bf16 %v5021_v18  ;;  %7002 = vtanh.f32 %v4475_v16 }
 0x496   :  { %v6999_v11 = vpop.eup %6998  ;;  %v4092_v33 = vpack.c.bf16 %v4020_v42, %v4019_v45  ;;  %v5023_v14 = vpack.c.bf16 %v4922_v63, %v4921_v59  ;;  %7004 = vtanh.f32 %v4476_v22  ;;  %v5111_v47 = vunpack.c.l.bf16 %v11025_v21 }
 0x497   :  { %v11060_v58 = vmul.f32 0.796875, %v4209_v17  ;;  %v11062_v18 = vmul.f32 0.796875, %v4210_v24  ;;  %v5365_v5 = vmul.f32 %v5237_v25, %v5109_v10  ;;  %v5366_v28 = vmul.f32 %v5238_v30, %v5110_v40 }
 0x498   :  { %v5241_v16 = vunpack.c.l.bf16 %v5023_v14  ;;  %v5242_v56 = vunpack.c.h.bf16 %v5023_v14  ;;  %v2378_v22 = vadd.f32 %v2377_v12, %v9316_v23  ;;  %v4211_v57 = vunpack.c.l.bf16 %v4092_v33 }
 0x499   :  { %v4212_v45 = vunpack.c.h.bf16 %v4092_v33  ;;  %v12306_v42 = vunpack.c.l.bf16 %v11007_v44  ;;  %v12307_v17 = vunpack.c.h.bf16 %v11007_v44  ;;  %v5115_v51 = vunpack.c.l.bf16 %v11031_v8  ;;  %v2466_v33 = vpop.f32.mrf.mxu3 }
 0x49a   :  { %v7001_v6 = vpop.eup %7000  ;;  %v2621_v10 = vpack.c.bf16 %v2378_v22, %v2289_v4  ;;  %v5112_v30 = vunpack.c.h.bf16 %v11025_v21  ;;  %v11078_v44 = vmul.f32 0.796875, %v4211_v57  ;;  %v2290_v57 = vpop.f32.mrf.mxu1 }
 0x49b   :  { %v4702_v49 = vpack.c.bf16 %v7001_v6, %v6999_v11  ;;  %v5369_v59 = vmul.f32 %v5241_v16, %v12306_v42  ;;  %v5370_v24 = vmul.f32 %v5242_v56, %v12307_v17  ;;  %v7003_v63 = vpop.eup %7002  ;;  %v5116_v11 = vunpack.c.h.bf16 %v11031_v8  ;;  %v12309_v17 = vld [vmem:[#allocation106_spill] sm:$0xff] }
 0x49c   :  { %v7005_v25 = vpop.eup %7004  ;;  %v11076_v42 = vunpack.c.l.bf16 %v2621_v10  ;;  %v11080_v56 = vmul.f32 0.796875, %v4212_v45  ;;  %v11082_v4 = vunpack.c.h.bf16 %v2621_v10 }
 0x49d   :  { %v4791_v19 = vunpack.c.l.bf16 %v4702_v49  ;;  %v4792_v14 = vunpack.c.h.bf16 %v4702_v49  ;;  %v5469_v9 = vpack.c.bf16 %v5369_v59, %v5365_v5  ;;  %v5470_v40 = vpack.c.bf16 %v5370_v24, %v5366_v28  ;;  %v12308_v59 = vld [vmem:[#allocation105_spill] sm:$0xff] }
 0x49e   :  { %v4704_v12 = vpack.c.bf16 %v7005_v25, %v7003_v63  ;;  %v2467_v5 = vadd.f32 %v2466_v33, %v9323_v38  ;;  %v3061_v8 = vmul.f32 %v11076_v42, %v11076_v42  ;;  %v11090_v45 = vmul.f32 0.5, %v12308_v59 }
 0x49f   :  { %v4919_v6 = vadd.f32 1.0, %v4791_v19  ;;  %v4920_v16 = vadd.f32 1.0, %v4792_v14  ;;  %5804 = vmatmul.bf16.gmra.mxu1 %v5469_v9  ;;  %5893 = vmatmul.bf16.gmra.mxu2 %v5470_v40  ;;  %v3062_v19 = vmul.f32 %v11082_v4, %v11082_v4  ;;  %v11093_v24 = vmul.f32 0.5, %v12309_v17 }
 0x4a0   :  { %v4795_v28 = vunpack.c.l.bf16 %v4704_v12  ;;  %v4796_v21 = vunpack.c.h.bf16 %v4704_v12  ;;  %v2622_v22 = vpack.c.bf16 %v2556_v39, %v2467_v5  ;;  %v11096_v25 = vmul.f32 0.5, %v10264_v1  ;;  %v2557_v12 = vpop.f32.mrf.mxu0  ;;  %v2379_v39 = vpop.f32.mrf.mxu2 }
 0x4a1   :  { %v5022_v49 = vpack.c.bf16 %v4920_v16, %v4919_v6  ;;  %v3133_v9 = vpack.c.bf16 %v3062_v19, %v3061_v8  ;;  %v11103_v6 = vmul.f32 0.5, %v10266_v13  ;;  %v2558_v0 = vadd.f32 %v2557_v12, %v9296_v2  ;;  %v2468_v60 = vpop.f32.mrf.mxu3 }
 0x4a2   :  { %v4923_v63 = vadd.f32 1.0, %v4795_v28  ;;  %v4924_v14 = vadd.f32 1.0, %v4796_v21  ;;  %v11098_v40 = vunpack.c.l.bf16 %v2622_v22  ;;  %v11100_v33 = vunpack.c.h.bf16 %v2622_v22 }
 0x4a3   :  { %v5239_v10 = vunpack.c.l.bf16 %v5022_v49  ;;  %v5240_v59 = vunpack.c.h.bf16 %v5022_v49  ;;  %v2291_v28 = vadd.f32 %v2290_v57, %v9280_v61  ;;  %v3253_v21 = vunpack.c.l.bf16 %v3133_v9 }
 0x4a4   :  { %12310 = vst [vmem:[#allocation102_spill] sm:$0xff] %v11098_v40  ;;  %v5024_v16 = vpack.c.bf16 %v4924_v14, %v4923_v63  ;;  %v3254_v17 = vunpack.c.h.bf16 %v3133_v9  ;;  %v3063_v1 = vmul.f32 %v11098_v40, %v11098_v40  ;;  %v3064_v8 = vmul.f32 %v11100_v33, %v11100_v33 }
 0x4a5   :  { %12311 = vst [vmem:[#allocation97_spill] sm:$0xff] %v11100_v33  ;;  %v5367_v5 = vmul.f32 %v5239_v10, %v5111_v47  ;;  %v2380_v13 = vadd.f32 %v2379_v39, %v9316_v23  ;;  %v3381_v47 = vmul.f32 %v3253_v21, %v11076_v42  ;;  %v2469_v63 = vadd.f32 %v2468_v60, %v9323_v38 }
 0x4a6   :  { %v5243_v19 = vunpack.c.l.bf16 %v5024_v16  ;;  %v5244_v22 = vunpack.c.h.bf16 %v5024_v16  ;;  %v3382_v49 = vmul.f32 %v3254_v17, %v11082_v4  ;;  %v3134_v57 = vpack.c.bf16 %v3064_v8, %v3063_v1 }
 0x4a7   :  { %v5368_v10 = vmul.f32 %v5240_v59, %v5112_v30  ;;  %v2623_v3 = vpack.c.bf16 %v2380_v13, %v2291_v28  ;;  %v2624_v16 = vpack.c.bf16 %v2558_v0, %v2469_v63  ;;  %v12315_v28 = vld [vmem:[#allocation115_spill] sm:$0xff] }
 0x4a8   :  { %v5371_v14 = vmul.f32 %v5243_v19, %v5115_v51  ;;  %v5372_v9 = vmul.f32 %v5244_v22, %v5116_v11  ;;  %v3453_v37 = vpack.c.bf16 %v3382_v49, %v3381_v47  ;;  %v3255_v62 = vunpack.c.l.bf16 %v3134_v57 }
 0x4a9   :  { %v3256_v54 = vunpack.c.h.bf16 %v3134_v57  ;;  %v11115_v31 = vunpack.c.l.bf16 %v2623_v3  ;;  %v11117_v39 = vunpack.c.h.bf16 %v2623_v3  ;;  %v11125_v30 = vunpack.c.l.bf16 %v2624_v16 }
 0x4aa   :  { %v5471_v27 = vpack.c.bf16 %v5371_v14, %v5367_v5  ;;  %v5472_v12 = vpack.c.bf16 %v5372_v9, %v5368_v10  ;;  %v3573_v21 = vunpack.c.l.bf16 %v3453_v37  ;;  %v3574_v35 = vunpack.c.h.bf16 %v3453_v37 }
 0x4ab   :  { %v3383_v17 = vmul.f32 %v3255_v62, %v11098_v40  ;;  %v3384_v60 = vmul.f32 %v3256_v54, %v11100_v33  ;;  %v3065_v51 = vmul.f32 %v11115_v31, %v11115_v31  ;;  %v3066_v0 = vmul.f32 %v11117_v39, %v11117_v39  ;;  %12312 = vst [vmem:[#allocation99_spill] sm:$0xff] %v11125_v30 }
 0x4ac   :  { %5982 = vmatmul.bf16.gmra.mxu3 %v5471_v27  ;;  %6071 = vmatmul.bf16.gmra.mxu0 %v5472_v12  ;;  %v11127_v11 = vunpack.c.h.bf16 %v2624_v16  ;;  %v3701_v3 = vmul.f32 0.044677734, %v3573_v21  ;;  %v3702_v5 = vmul.f32 0.044677734, %v3574_v35  ;;  %v12314_v37 = vunpack.c.l.bf16 %v10295_v20 }
 0x4ad   :  { %v3454_v59 = vpack.c.bf16 %v3384_v60, %v3383_v17  ;;  %v3135_v62 = vpack.c.bf16 %v3066_v0, %v3065_v51  ;;  %v3067_v27 = vmul.f32 %v11125_v30, %v11125_v30  ;;  %v4481_v1 = vunpack.c.l.bf16 %v12315_v28 }
 0x4ae   :  { %12313 = vst [vmem:[#allocation103_spill] sm:$0xff] %v11127_v11  ;;  %7006 = vtanh.f32 %v12314_v37  ;;  %v3068_v54 = vmul.f32 %v11127_v11, %v11127_v11  ;;  %v3773_v8 = vpack.c.bf16 %v3702_v5, %v3701_v3  ;;  %v4482_v13 = vunpack.c.h.bf16 %v12315_v28 }
 0x4af   :  { %v3575_v19 = vunpack.c.l.bf16 %v3454_v59  ;;  %v3576_v22 = vunpack.c.h.bf16 %v3454_v59  ;;  %v3257_v47 = vunpack.c.l.bf16 %v3135_v62  ;;  %v3258_v35 = vunpack.c.h.bf16 %v3135_v62 }
 0x4b0   :  { %v3136_v49 = vpack.c.bf16 %v3068_v54, %v3067_v27  ;;  %v12316_v57 = vunpack.c.h.bf16 %v10295_v20  ;;  %v3893_v63 = vunpack.c.l.bf16 %v3773_v8  ;;  %v3894_v14 = vunpack.c.h.bf16 %v3773_v8 }
 0x4b1   :  { %v3703_v10 = vmul.f32 0.044677734, %v3575_v19  ;;  %v3704_v9 = vmul.f32 0.044677734, %v3576_v22  ;;  %v3385_v16 = vmul.f32 %v3257_v47, %v11115_v31  ;;  %v3386_v12 = vmul.f32 %v3258_v35, %v11117_v39 }
 0x4b2   :  { %7008 = vtanh.f32 %v12316_v57  ;;  %v3259_v21 = vunpack.c.l.bf16 %v3136_v49  ;;  %v3260_v17 = vunpack.c.h.bf16 %v3136_v49  ;;  %v4021_v51 = vadd.f32 %v3893_v63, %v11076_v42 }
 0x4b3   :  { %v4022_v0 = vadd.f32 %v3894_v14, %v11082_v4  ;;  %v3774_v3 = vpack.c.bf16 %v3704_v9, %v3703_v10  ;;  %7010 = vtanh.f32 %v4481_v1  ;;  %v3455_v5 = vpack.c.bf16 %v3386_v12, %v3385_v16 }
 0x4b4   :  { %v7007_v60 = vpop.eup %7006  ;;  %v3387_v20 = vmul.f32 %v3259_v21, %v11125_v30  ;;  %v3388_v59 = vmul.f32 %v3260_v17, %v11127_v11  ;;  %7012 = vtanh.f32 %v4482_v13  ;;  %v11147_v37 = vpack.c.bf16 %v11062_v18, %v11060_v58  ;;  %v2293_v21 = vpop.f32.mrf.mxu1 }
 0x4b5   :  { %v4093_v62 = vpack.c.bf16 %v4022_v0, %v4021_v51  ;;  %v3895_v27 = vunpack.c.l.bf16 %v3774_v3  ;;  %v3896_v54 = vunpack.c.h.bf16 %v3774_v3  ;;  %v3577_v8 = vunpack.c.l.bf16 %v3455_v5 }
 0x4b6   :  { %v3578_v19 = vunpack.c.h.bf16 %v3455_v5  ;;  %v3456_v22 = vpack.c.bf16 %v3388_v59, %v3387_v20  ;;  %v11151_v1 = vpack.c.bf16 %v11093_v24, %v11090_v45  ;;  %v11155_v47 = vpack.c.bf16 %v11080_v56, %v11078_v44 }
 0x4b7   :  { %v4023_v13 = vadd.f32 %v3895_v27, %v11098_v40  ;;  %v4024_v58 = vadd.f32 %v3896_v54, %v11100_v33  ;;  %v11161_v18 = vpack.c.bf16 %v11103_v6, %v11096_v25  ;;  %v3705_v35 = vmul.f32 0.044677734, %v3577_v8 }
 0x4b8   :  { %v7009_v28 = vpop.eup %7008  ;;  %v3706_v49 = vmul.f32 0.044677734, %v3578_v19  ;;  %v3579_v57 = vunpack.c.l.bf16 %v3456_v22  ;;  %v3580_v63 = vunpack.c.h.bf16 %v3456_v22  ;;  %v4213_v10 = vunpack.c.l.bf16 %v4093_v62 }
 0x4b9   :  { %v7011_v14 = vpop.eup %7010  ;;  %v4214_v45 = vunpack.c.h.bf16 %v4093_v62  ;;  %v4094_v24 = vpack.c.bf16 %v4024_v58, %v4023_v13  ;;  %v4705_v9 = vpack.c.bf16 %v7009_v28, %v7007_v60  ;;  %v5117_v17 = vunpack.c.l.bf16 %v11151_v1  ;;  %v2560_v13 = vpop.f32.mrf.mxu0 }
 0x4ba   :  { %v7013_v16 = vpop.eup %7012  ;;  %v3775_v44 = vpack.c.bf16 %v3706_v49, %v3705_v35  ;;  %v3707_v56 = vmul.f32 0.044677734, %v3579_v57  ;;  %v3708_v12 = vmul.f32 0.044677734, %v3580_v63  ;;  %v5121_v6 = vunpack.c.l.bf16 %v11161_v18 }
 0x4bb   :  { %v4215_v51 = vunpack.c.l.bf16 %v4094_v24  ;;  %v4216_v0 = vunpack.c.h.bf16 %v4094_v24  ;;  %v4707_v25 = vpack.c.bf16 %v7013_v16, %v7011_v14  ;;  %v4797_v59 = vunpack.c.l.bf16 %v4705_v9 }
 0x4bc   :  { %v3897_v3 = vunpack.c.l.bf16 %v3775_v44  ;;  %v3898_v5 = vunpack.c.h.bf16 %v3775_v44  ;;  %v3776_v20 = vpack.c.bf16 %v3708_v12, %v3707_v56  ;;  %v4341_v27 = vmul.f32 0.796875, %v4213_v10  ;;  %v12317_v56 = vld [vmem:[#allocation107_spill] sm:$0xff] }
 0x4bd   :  { %v4342_v62 = vmul.f32 0.796875, %v4214_v45  ;;  %v4343_v54 = vmul.f32 0.796875, %v4215_v51  ;;  %v11166_v60 = vadd.f32 %v2293_v21, %v9280_v61  ;;  %v4344_v58 = vmul.f32 0.796875, %v4216_v0 }
 0x4be   :  { %v4025_v28 = vadd.f32 %v3897_v3, %v11115_v31  ;;  %v4026_v8 = vadd.f32 %v3898_v5, %v11117_v39  ;;  %v3899_v19 = vunpack.c.l.bf16 %v3776_v20  ;;  %v3900_v22 = vunpack.c.h.bf16 %v3776_v20  ;;  %v12318_v20 = vld [vmem:[#allocation108_spill] sm:$0xff] }
 0x4bf   :  { %v4798_v35 = vunpack.c.h.bf16 %v4705_v9  ;;  %v4801_v49 = vunpack.c.l.bf16 %v4707_v25  ;;  %v4802_v57 = vunpack.c.h.bf16 %v4707_v25  ;;  %v4925_v45 = vadd.f32 1.0, %v4797_v59 }
 0x4c0   :  { %v4095_v63 = vpack.c.bf16 %v4026_v8, %v4025_v28  ;;  %v4027_v14 = vadd.f32 %v3899_v19, %v11125_v30  ;;  %v4028_v10 = vadd.f32 %v3900_v22, %v11127_v11  ;;  %v11173_v24 = vadd.f32 %v2560_v13, %v9296_v2 }
 0x4c1   :  { %v4926_v16 = vadd.f32 1.0, %v4798_v35  ;;  %v4929_v44 = vadd.f32 1.0, %v4801_v49  ;;  %v2815_v12 = vmul.f32 0.5, %v12317_v56  ;;  %v4930_v0 = vadd.f32 1.0, %v4802_v57  ;;  %v12321_v56 = vld [vmem:[#allocation110_spill] sm:$0xff]  ;;  %v2562_v11 = vpop.f32.mrf.mxu0 }
 0x4c2   :  { %v4217_v21 = vunpack.c.l.bf16 %v4095_v63  ;;  %v4218_v51 = vunpack.c.h.bf16 %v4095_v63  ;;  %v4096_v3 = vpack.c.bf16 %v4028_v10, %v4027_v14  ;;  %v5118_v25 = vunpack.c.h.bf16 %v11151_v1  ;;  %v12322_v10 = vld [vmem:[#allocation111_spill] sm:$0xff] }
 0x4c3   :  { %v5025_v9 = vpack.c.bf16 %v4926_v16, %v4925_v45  ;;  %v5122_v5 = vunpack.c.h.bf16 %v11161_v18  ;;  %v2816_v28 = vmul.f32 0.5, %v12318_v20  ;;  %v11179_v8 = vpack.c.bf16 %v4342_v62, %v4341_v27 }
 0x4c4   :  { %v11181_v59 = vpack.c.bf16 %v4344_v58, %v4343_v54  ;;  %v4219_v19 = vunpack.c.l.bf16 %v4096_v3  ;;  %v4220_v22 = vunpack.c.h.bf16 %v4096_v3  ;;  %v5027_v13 = vpack.c.bf16 %v4930_v0, %v4929_v44  ;;  %v12323_v54 = vld [vmem:[#allocation53_spill] sm:$0xff]  ;;  %v12324_v44 = vld [vmem:[#allocation112_spill] sm:$0xff] }
 0x4c5   :  { %12319 = vst [vmem:[#allocation104_spill] sm:$0xff] %v11179_v8  ;;  %v5245_v35 = vunpack.c.l.bf16 %v5025_v9  ;;  %v5246_v49 = vunpack.c.h.bf16 %v5025_v9  ;;  %v2819_v63 = vmul.f32 0.5, %v12321_v56  ;;  %v4345_v14 = vmul.f32 0.796875, %v4217_v21  ;;  %v2382_v9 = vpop.f32.mrf.mxu2 }
 0x4c6   :  { %12320 = vst [vmem:[#allocation109_spill] sm:$0xff] %v11181_v59  ;;  %v4346_v57 = vmul.f32 0.796875, %v4218_v51  ;;  %v2820_v45 = vmul.f32 0.5, %v12322_v10  ;;  %v11185_v1 = vpack.c.bf16 %v2816_v28, %v2815_v12  ;;  %v4347_v18 = vmul.f32 0.796875, %v4219_v19 }
 0x4c7   :  { %v4348_v16 = vmul.f32 0.796875, %v4220_v22  ;;  %v5249_v20 = vunpack.c.l.bf16 %v5027_v13  ;;  %v5250_v27 = vunpack.c.h.bf16 %v5027_v13  ;;  %v5373_v62 = vmul.f32 %v5245_v35, %v5117_v17 }
 0x4c8   :  { %v4483_v58 = vunpack.c.l.bf16 %v12323_v54  ;;  %v4484_v3 = vunpack.c.h.bf16 %v12323_v54  ;;  %v12325_v0 = vunpack.c.l.bf16 %v12324_v44  ;;  %v5374_v21 = vmul.f32 %v5246_v49, %v5118_v25 }
 0x4c9   :  { %v5377_v56 = vmul.f32 %v5249_v20, %v5121_v6  ;;  %v5378_v51 = vmul.f32 %v5250_v27, %v5122_v5  ;;  %v12326_v10 = vunpack.c.h.bf16 %v12324_v44  ;;  %v11195_v19 = vpack.c.bf16 %v2820_v45, %v2819_v63  ;;  %v2471_v45 = vpop.f32.mrf.mxu3  ;;  %v12329_v20 = vld [vmem:[#allocation113_spill] sm:$0xff] }
 0x4ca   :  { %7014 = vtanh.f32 %v12325_v0  ;;  %v2383_v13 = vadd.f32 %v2382_v9, %v9316_v23  ;;  %v11200_v25 = vpack.c.bf16 %v4346_v57, %v4345_v14  ;;  %v11202_v5 = vpack.c.bf16 %v4348_v16, %v4347_v18 }
 0x4cb   :  { %7016 = vtanh.f32 %v12326_v10  ;;  %v5473_v17 = vpack.c.bf16 %v5377_v56, %v5373_v62  ;;  %v5474_v22 = vpack.c.bf16 %v5378_v51, %v5374_v21  ;;  %v5119_v49 = vunpack.c.l.bf16 %v11185_v1  ;;  %v12330_v62 = vld [vmem:[#allocation114_spill] sm:$0xff]  ;;  %v12333_v56 = vld [vmem:[#allocation52_spill] sm:$0xff] }
 0x4cc   :  { %7018 = vtanh.f32 %v4483_v58  ;;  %12327 = vst [vmem:[#allocation105_spill] sm:$0xff] %v11200_v25  ;;  %v2625_v63 = vpack.c.bf16 %v2383_v13, %v11166_v60  ;;  %v2821_v27 = vmul.f32 0.5, %v12329_v20  ;;  %v2822_v54 = vmul.f32 0.5, %v12330_v62  ;;  %v12332_v60 = vld [vmem:[#allocation51_spill] sm:$0xff] }
 0x4cd   :  { %7020 = vtanh.f32 %v4484_v3  ;;  %12328 = vst [vmem:[#allocation106_spill] sm:$0xff] %v11202_v5  ;;  %5809 = vmatmul.bf16.gmra.mxu1 %v5473_v17  ;;  %5898 = vmatmul.bf16.gmra.mxu2 %v5474_v22  ;;  %v5120_v44 = vunpack.c.h.bf16 %v11185_v1  ;;  %v5124_v14 = vunpack.c.h.bf16 %v11195_v19  ;;  %v2472_v57 = vadd.f32 %v2471_v45, %v9323_v38  ;;  %v12334_v22 = vld [vmem:[#allocation116_spill] sm:$0xff]  ;;  %v12335_v1 = vld [vmem:[#allocation117_spill] sm:$0xff]  ;;  %v2384_v12 = vpop.f32.mrf.mxu2 }
 0x4ce   :  { %v11212_v16 = vunpack.c.l.bf16 %v2625_v63  ;;  %v11214_v0 = vunpack.c.h.bf16 %v2625_v63  ;;  %v2825_v9 = vmul.f32 0.5, %v12332_v60  ;;  %v2826_v21 = vmul.f32 0.5, %v12333_v56  ;;  %v2295_v60 = vpop.f32.mrf.mxu1  ;;  %v12336_v56 = vld [vmem:[#allocation55_spill] sm:$0xff] }
 0x4cf   :  { %v2626_v17 = vpack.c.bf16 %v11173_v24, %v2472_v57  ;;  %v11220_v13 = vmul.f32 0.5, %v12334_v22  ;;  %v11223_v20 = vmul.f32 0.5, %v12335_v1  ;;  %v11229_v6 = vpack.c.bf16 %v2822_v54, %v2821_v27 }
 0x4d0   :  { %v7015_v58 = vpop.eup %7014  ;;  %12331 = vst [vmem:[#allocation115_spill] sm:$0xff] %v11214_v0  ;;  %v3069_v62 = vmul.f32 %v11212_v16, %v11212_v16  ;;  %v3070_v63 = vmul.f32 %v11214_v0, %v11214_v0  ;;  %v2296_v28 = vadd.f32 %v2295_v60, %v9280_v61  ;;  %v11239_v3 = vpack.c.bf16 %v2826_v21, %v2825_v9 }
 0x4d1   :  { %v7017_v18 = vpop.eup %7016  ;;  %v11234_v22 = vunpack.c.l.bf16 %v2626_v17  ;;  %v11236_v35 = vunpack.c.h.bf16 %v2626_v17  ;;  %v2385_v61 = vadd.f32 %v2384_v12, %v9316_v23  ;;  %v2563_v60 = vadd.f32 %v2562_v11, %v9296_v2  ;;  %v2473_v33 = vpop.f32.mrf.mxu3 }
 0x4d2   :  { %v7019_v51 = vpop.eup %7018  ;;  %v4706_v10 = vpack.c.bf16 %v7017_v18, %v7015_v58  ;;  %v11232_v58 = vmul.f32 0.5, %v12336_v56  ;;  %v3137_v1 = vpack.c.bf16 %v3070_v63, %v3069_v62  ;;  %v12339_v11 = vunpack.c.l.bf16 %v11195_v19 }
 0x4d3   :  { %v7021_v45 = vpop.eup %7020  ;;  %12337 = vst [vmem:[#allocation107_spill] sm:$0xff] %v11234_v22 }
 0x4d4   :  { %v4708_v24 = vpack.c.bf16 %v7021_v45, %v7019_v51  ;;  %v4799_v57 = vunpack.c.l.bf16 %v4706_v10  ;;  %v4800_v18 = vunpack.c.h.bf16 %v4706_v10  ;;  %12338 = vst [vmem:[#allocation108_spill] sm:$0xff] %v11236_v35  ;;  %v3261_v56 = vunpack.c.l.bf16 %v3137_v1 }
 0x4d5   :  { %v3262_v30 = vunpack.c.h.bf16 %v3137_v1  ;;  %v3071_v51 = vmul.f32 %v11234_v22, %v11234_v22  ;;  %v3072_v10 = vmul.f32 %v11236_v35, %v11236_v35  ;;  %v2627_v1 = vpack.c.bf16 %v2385_v61, %v2296_v28 }
 0x4d6   :  { %v4803_v59 = vunpack.c.l.bf16 %v4708_v24  ;;  %v4804_v5 = vunpack.c.h.bf16 %v4708_v24  ;;  %v4927_v27 = vadd.f32 1.0, %v4799_v57  ;;  %v4928_v54 = vadd.f32 1.0, %v4800_v18 }
 0x4d7   :  { %v3389_v9 = vmul.f32 %v3261_v56, %v11212_v16  ;;  %v3390_v21 = vmul.f32 %v3262_v30, %v11214_v0  ;;  %v3138_v63 = vpack.c.bf16 %v3072_v10, %v3071_v51  ;;  %v11254_v10 = vunpack.c.l.bf16 %v2627_v1 }
 0x4d8   :  { %v4931_v17 = vadd.f32 1.0, %v4803_v59  ;;  %v4932_v45 = vadd.f32 1.0, %v4804_v5  ;;  %v5026_v62 = vpack.c.bf16 %v4928_v54, %v4927_v27  ;;  %v2474_v59 = vadd.f32 %v2473_v33, %v9323_v38 }
 0x4d9   :  { %v3457_v40 = vpack.c.bf16 %v3390_v21, %v3389_v9  ;;  %v3263_v8 = vunpack.c.l.bf16 %v3138_v63  ;;  %v3264_v25 = vunpack.c.h.bf16 %v3138_v63  ;;  %12340 = vst [vmem:[#allocation110_spill] sm:$0xff] %v11254_v10  ;;  %v12341_v63 = vld [vmem:[#allocation54_spill] sm:$0xff] }
 0x4da   :  { %v5028_v24 = vpack.c.bf16 %v4932_v45, %v4931_v17  ;;  %v5247_v57 = vunpack.c.l.bf16 %v5026_v62  ;;  %v5248_v18 = vunpack.c.h.bf16 %v5026_v62  ;;  %v11256_v17 = vunpack.c.h.bf16 %v2627_v1 }
 0x4db   :  { %v3581_v54 = vunpack.c.l.bf16 %v3457_v40  ;;  %v3582_v56 = vunpack.c.h.bf16 %v3457_v40  ;;  %v3391_v30 = vmul.f32 %v3263_v8, %v11234_v22  ;;  %v3392_v2 = vmul.f32 %v3264_v25, %v11236_v35 }
 0x4dc   :  { %v5251_v5 = vunpack.c.l.bf16 %v5028_v24  ;;  %v5375_v27 = vmul.f32 %v5247_v57, %v5119_v49  ;;  %v5252_v23 = vunpack.c.h.bf16 %v5028_v24  ;;  %v5376_v12 = vmul.f32 %v5248_v18, %v5120_v44  ;;  %v12342_v24 = vld [vmem:[#allocation56_spill] sm:$0xff] }
 0x4dd   :  { %v3709_v45 = vmul.f32 0.044677734, %v3581_v54  ;;  %v3710_v38 = vmul.f32 0.044677734, %v3582_v56  ;;  %v3458_v33 = vpack.c.bf16 %v3392_v2, %v3391_v30  ;;  %v2628_v49 = vpack.c.bf16 %v2563_v60, %v2474_v59 }
 0x4de   :  { %v5379_v51 = vmul.f32 %v5251_v5, %v12339_v11  ;;  %v5380_v28 = vmul.f32 %v5252_v23, %v5124_v14  ;;  %v3073_v40 = vmul.f32 %v11254_v10, %v11254_v10  ;;  %v3074_v8 = vmul.f32 %v11256_v17, %v11256_v17  ;;  %v12343_v11 = vld [vmem:[#allocation59_spill] sm:$0xff] }
 0x4df   :  { %v3777_v25 = vpack.c.bf16 %v3710_v38, %v3709_v45  ;;  %v3583_v19 = vunpack.c.l.bf16 %v3458_v33  ;;  %v3584_v61 = vunpack.c.h.bf16 %v3458_v33  ;;  %v11262_v14 = vunpack.c.l.bf16 %v2628_v49 }
 0x4e0   :  { %v5475_v62 = vpack.c.bf16 %v5379_v51, %v5375_v27  ;;  %v5476_v44 = vpack.c.bf16 %v5380_v28, %v5376_v12  ;;  %v3139_v9 = vpack.c.bf16 %v3074_v8, %v3073_v40  ;;  %v11264_v21 = vunpack.c.h.bf16 %v2628_v49 }
 0x4e1   :  { %v4489_v60 = vunpack.c.l.bf16 %v12341_v63  ;;  %v11268_v57 = vmul.f32 0.5, %v12342_v24  ;;  %v3901_v18 = vunpack.c.l.bf16 %v3777_v25  ;;  %v3902_v1 = vunpack.c.h.bf16 %v3777_v25 }
 0x4e2   :  { %5987 = vmatmul.bf16.gmra.mxu3 %v5475_v62  ;;  %6076 = vmatmul.bf16.gmra.mxu0 %v5476_v44  ;;  %v3711_v59 = vmul.f32 0.044677734, %v3583_v19  ;;  %v3712_v5 = vmul.f32 0.044677734, %v3584_v61  ;;  %v3265_v27 = vunpack.c.l.bf16 %v3139_v9  ;;  %v3266_v23 = vunpack.c.h.bf16 %v3139_v9 }
 0x4e3   :  { %v3075_v12 = vmul.f32 %v11262_v14, %v11262_v14  ;;  %v3076_v54 = vmul.f32 %v11264_v21, %v11264_v21  ;;  %v4029_v56 = vadd.f32 %v3901_v18, %v11212_v16  ;;  %v4030_v30 = vadd.f32 %v3902_v1, %v11214_v0 }
 0x4e4   :  { %v3778_v2 = vpack.c.bf16 %v3712_v5, %v3711_v59  ;;  %v12344_v51 = vunpack.c.l.bf16 %v12343_v11  ;;  %v3393_v28 = vmul.f32 %v3265_v27, %v11254_v10  ;;  %v3394_v45 = vmul.f32 %v3266_v23, %v11256_v17 }
 0x4e5   :  { %v3140_v38 = vpack.c.bf16 %v3076_v54, %v3075_v12  ;;  %v4490_v33 = vunpack.c.h.bf16 %v12341_v63  ;;  %v4097_v49 = vpack.c.bf16 %v4030_v30, %v4029_v56  ;;  %v12345_v40 = vunpack.c.h.bf16 %v12343_v11 }
 0x4e6   :  { %7022 = vtanh.f32 %v12344_v51  ;;  %v3903_v62 = vunpack.c.l.bf16 %v3778_v2  ;;  %v3904_v44 = vunpack.c.h.bf16 %v3778_v2  ;;  %v3459_v8 = vpack.c.bf16 %v3394_v45, %v3393_v28 }
 0x4e7   :  { %7024 = vtanh.f32 %v12345_v40  ;;  %v3267_v25 = vunpack.c.l.bf16 %v3140_v38  ;;  %v3268_v19 = vunpack.c.h.bf16 %v3140_v38  ;;  %v4221_v61 = vunpack.c.l.bf16 %v4097_v49  ;;  %v5775_v40 = vpop.f32.mrf.mxu1 }
 0x4e8   :  { %7026 = vtanh.f32 %v4489_v60  ;;  %v4222_v9 = vunpack.c.h.bf16 %v4097_v49  ;;  %v4031_v24 = vadd.f32 %v3903_v62, %v11234_v22  ;;  %v4032_v18 = vadd.f32 %v3904_v44, %v11236_v35  ;;  %v5953_v35 = vpop.f32.mrf.mxu3 }
 0x4e9   :  { %v3585_v1 = vunpack.c.l.bf16 %v3459_v8  ;;  %v3586_v59 = vunpack.c.h.bf16 %v3459_v8  ;;  %v3395_v63 = vmul.f32 %v3267_v25, %v11262_v14  ;;  %v3396_v5 = vmul.f32 %v3268_v19, %v11264_v21 }
 0x4ea   :  { %v4098_v23 = vpack.c.bf16 %v4032_v18, %v4031_v24  ;;  %7028 = vtanh.f32 %v4490_v33  ;;  %v11290_v60 = vpack.c.bf16 %v11223_v20, %v11220_v13  ;;  %v4349_v51 = vmul.f32 0.796875, %v4221_v61  ;;  %v5864_v61 = vpop.f32.mrf.mxu2  ;;  %v12346_v20 = vld [vmem:[#allocation57_spill] sm:$0xff] }
 0x4eb   :  { %v3713_v54 = vmul.f32 0.044677734, %v3585_v1  ;;  %v3714_v56 = vmul.f32 0.044677734, %v3586_v59  ;;  %v3460_v30 = vpack.c.bf16 %v3396_v5, %v3395_v63  ;;  %v4350_v28 = vmul.f32 0.796875, %v4222_v9  ;;  %v7152_v5 = vld [vmem:[#allocation7] sm:$0xff] }
 0x4ec   :  { %v7023_v27 = vpop.eup %7022  ;;  %v4223_v45 = vunpack.c.l.bf16 %v4098_v23  ;;  %v4224_v38 = vunpack.c.h.bf16 %v4098_v23  ;;  %v5126_v13 = vunpack.c.h.bf16 %v11229_v6  ;;  %v11297_v23 = vperm.slane %v7152_v5, 5 }
 0x4ed   :  { %v7025_v11 = vpop.eup %7024  ;;  %v3779_v62 = vpack.c.bf16 %v3714_v56, %v3713_v54  ;;  %v3587_v44 = vunpack.c.l.bf16 %v3460_v30  ;;  %v3588_v33 = vunpack.c.h.bf16 %v3460_v30  ;;  %v11295_v63 = vpack.c.bf16 %v4350_v28, %v4349_v51  ;;  %v11299_v54 = vpop.f32.mrf.mxu0 }
 0x4ee   :  { %v7027_v49 = vpop.eup %7026  ;;  %v4709_v8 = vpack.c.bf16 %v7025_v11, %v7023_v27  ;;  %v4351_v25 = vmul.f32 0.796875, %v4223_v45  ;;  %v4352_v19 = vmul.f32 0.796875, %v4224_v38  ;;  %v4491_v51 = vunpack.c.l.bf16 %v12346_v20 }
 0x4ef   :  { %v3905_v24 = vunpack.c.l.bf16 %v3779_v62  ;;  %v3906_v18 = vunpack.c.h.bf16 %v3779_v62  ;;  %v3715_v1 = vmul.f32 0.044677734, %v3587_v44  ;;  %v3716_v59 = vmul.f32 0.044677734, %v3588_v33 }
 0x4f0   :  { %v7029_v9 = vpop.eup %7028  ;;  %v4805_v27 = vunpack.c.l.bf16 %v4709_v8  ;;  %v4806_v56 = vunpack.c.h.bf16 %v4709_v8  ;;  %v11303_v62 = vpack.c.bf16 %v4352_v19, %v4351_v25  ;;  %v4492_v8 = vunpack.c.h.bf16 %v12346_v20  ;;  %v5777_v20 = vpop.f32.mrf.mxu1 }
 0x4f1   :  { %v4033_v30 = vadd.f32 %v3905_v24, %v11254_v10  ;;  %v4034_v11 = vadd.f32 %v3906_v18, %v11256_v17  ;;  %v3780_v45 = vpack.c.bf16 %v3716_v59, %v3715_v1  ;;  %v4711_v38 = vpack.c.bf16 %v7029_v9, %v7027_v49  ;;  %v12347_v24 = vld [vmem:[#allocation68_spill] sm:$0xff] }
 0x4f2   :  { %v4933_v44 = vadd.f32 1.0, %v4805_v27  ;;  %v4934_v33 = vadd.f32 1.0, %v4806_v56  ;;  %v12348_v10 = vunpack.c.l.bf16 %v12347_v24 }
 0x4f3   :  { %v4099_v28 = vpack.c.bf16 %v4034_v11, %v4033_v30  ;;  %v3907_v2 = vunpack.c.l.bf16 %v3780_v45  ;;  %v3908_v5 = vunpack.c.h.bf16 %v3780_v45  ;;  %v4809_v12 = vunpack.c.l.bf16 %v4711_v38 }
 0x4f4   :  { %v4810_v22 = vunpack.c.h.bf16 %v4711_v38  ;;  %v5029_v0 = vpack.c.bf16 %v4934_v33, %v4933_v44  ;;  %7030 = vtanh.f32 %v12348_v10  ;;  %v12349_v45 = vunpack.c.h.bf16 %v12347_v24  ;;  %v5866_v44 = vpop.f32.mrf.mxu2 }
 0x4f5   :  { %v4225_v18 = vunpack.c.l.bf16 %v4099_v28  ;;  %v4226_v49 = vunpack.c.h.bf16 %v4099_v28  ;;  %v4035_v25 = vadd.f32 %v3907_v2, %v11262_v14  ;;  %v4036_v19 = vadd.f32 %v3908_v5, %v11264_v21 }
 0x4f6   :  { %v4937_v1 = vadd.f32 1.0, %v4809_v12  ;;  %v4938_v59 = vadd.f32 1.0, %v4810_v22  ;;  %v5253_v9 = vunpack.c.l.bf16 %v5029_v0  ;;  %v5254_v27 = vunpack.c.h.bf16 %v5029_v0 }
 0x4f7   :  { %v4353_v56 = vmul.f32 0.796875, %v4225_v18  ;;  %v4354_v30 = vmul.f32 0.796875, %v4226_v49  ;;  %v11311_v11 = vpack.c.bf16 %v4036_v19, %v4035_v25  ;;  %7032 = vtanh.f32 %v12349_v45  ;;  %v6044_v18 = vpop.f32.mrf.mxu0  ;;  %v12354_v19 = vld [vmem:[#allocation20_spill] sm:$0xff] }
 0x4f8   :  { %v5776_v10 = vadd.f32 %v5775_v40, %v11297_v23  ;;  %v5031_v38 = vpack.c.bf16 %v4938_v59, %v4937_v1  ;;  %v11318_v2 = vpack.c.bf16 %v11268_v57, %v11232_v58  ;;  %7034 = vtanh.f32 %v4491_v51 }
 0x4f9   :  { %v4227_v12 = vunpack.c.l.bf16 %v11311_v11  ;;  %7036 = vtanh.f32 %v4492_v8  ;;  %v5127_v40 = vunpack.c.l.bf16 %v11290_v60  ;;  %v11325_v49 = vpack.c.bf16 %v4354_v30, %v4353_v56 }
 0x4fa   :  { %v7031_v33 = vpop.eup %7030  ;;  %v5257_v5 = vunpack.c.l.bf16 %v5031_v38  ;;  %v5258_v24 = vunpack.c.h.bf16 %v5031_v38  ;;  %v12350_v58 = vunpack.c.l.bf16 %v11229_v6  ;;  %v5382_v51 = vmul.f32 %v5254_v27, %v5126_v13  ;;  %v5955_v13 = vpop.f32.mrf.mxu3 }
 0x4fb   :  { %v5865_v25 = vadd.f32 %v5864_v61, %v5776_v10  ;;  %v12351_v8 = vunpack.c.l.bf16 %v11239_v3  ;;  %v12352_v59 = vunpack.c.h.bf16 %v11239_v3  ;;  %v5778_v38 = vadd.f32 %v5777_v20, %v11297_v23 }
 0x4fc   :  { %v5381_v57 = vmul.f32 %v5253_v9, %v12350_v58  ;;  %v11335_v0 = vmul.f32 0.796875, %v4227_v12  ;;  %v5131_v56 = vunpack.c.l.bf16 %v11318_v2  ;;  %v5128_v6 = vunpack.c.h.bf16 %v11290_v60  ;;  %v12353_v12 = vld [vmem:[#allocation62_spill] sm:$0xff] }
 0x4fd   :  { %v5385_v1 = vmul.f32 %v5257_v5, %v12351_v8  ;;  %v5386_v45 = vmul.f32 %v5258_v24, %v12352_v59  ;;  %v7033_v28 = vpop.eup %7032  ;;  %v5954_v9 = vadd.f32 %v5953_v35, %v5865_v25  ;;  %v5867_v58 = vadd.f32 %v5866_v44, %v5778_v38 }
 0x4fe   :  { %v7035_v61 = vpop.eup %7034  ;;  %v4710_v10 = vpack.c.bf16 %v7033_v28, %v7031_v33  ;;  %v2829_v24 = vmul.f32 0.5, %v10447_v29  ;;  %v2830_v20 = vmul.f32 0.5, %v10449_v48  ;;  %v2833_v8 = vmul.f32 0.5, %v12353_v12  ;;  %v12358_v12 = vld [vmem:[#allocation58_spill] sm:$0xff] }
 0x4ff   :  { %v5477_v27 = vpack.c.bf16 %v5385_v1, %v5381_v57  ;;  %v5478_v30 = vpack.c.bf16 %v5386_v45, %v5382_v51  ;;  %v7037_v5 = vpop.eup %7036  ;;  %v6043_v3 = vadd.f32 %v11299_v54, %v5954_v9  ;;  %v5956_v25 = vadd.f32 %v5955_v13, %v5867_v58  ;;  %v5780_v51 = vpop.f32.mrf.mxu1 }
 0x500   :  { %v4712_v59 = vpack.c.bf16 %v7037_v5, %v7035_v61  ;;  %v4807_v22 = vunpack.c.l.bf16 %v4710_v10  ;;  %v4808_v35 = vunpack.c.h.bf16 %v4710_v10  ;;  %v2834_v44 = vmul.f32 0.5, %v10491_v34  ;;  %v12357_v10 = vld [vmem:[#allocation19_spill] sm:$0xff] }
 0x501   :  { %5814 = vmatmul.bf16.gmra.mxu1 %v5477_v27  ;;  %5903 = vmatmul.bf16.gmra.mxu2 %v5478_v30  ;;  %v6122_v57 = vadd.f32 %v6043_v3, %v12354_v19  ;;  %v4497_v33 = vunpack.c.l.bf16 %v10568_v53  ;;  %v4498_v54 = vunpack.c.h.bf16 %v10568_v53  ;;  %v5132_v45 = vunpack.c.h.bf16 %v11318_v2  ;;  %v5869_v19 = vpop.f32.mrf.mxu2  ;;  %v6047_v30 = vpop.f32.mrf.mxu0 }
 0x502   :  { %v4811_v29 = vunpack.c.l.bf16 %v4712_v59  ;;  %v4812_v28 = vunpack.c.h.bf16 %v4712_v59  ;;  %v4935_v48 = vadd.f32 1.0, %v4807_v22  ;;  %v4936_v1 = vadd.f32 1.0, %v4808_v35  ;;  %v12359_v35 = vld [vmem:[#allocation73_spill] sm:$0xff] }
 0x503   :  { %6154 = vst [vmem:[#allocation13] sm:$0xff] %v6122_v57  ;;  %v6045_v38 = vadd.f32 %v6044_v18, %v5956_v25  ;;  %v11348_v9 = vpack.c.bf16 %v2830_v20, %v2829_v24  ;;  %v12355_v13 = vunpack.c.l.bf16 %v10540_v36  ;;  %v12356_v53 = vunpack.c.h.bf16 %v10540_v36  ;;  %v5958_v57 = vpop.f32.mrf.mxu3 }
 0x504   :  { %v4939_v61 = vadd.f32 1.0, %v4811_v29  ;;  %v4940_v34 = vadd.f32 1.0, %v4812_v28  ;;  %v5030_v27 = vpack.c.bf16 %v4936_v1, %v4935_v48  ;;  %v5781_v58 = vadd.f32 %v5780_v51, %v11297_v23 }
 0x505   :  { %7038 = vtanh.f32 %v12355_v13  ;;  %v6123_v22 = vadd.f32 %v6045_v38, %v12357_v10  ;;  %v11356_v5 = vpack.c.bf16 %v2834_v44, %v2833_v8  ;;  %v5133_v20 = vunpack.c.l.bf16 %v11348_v9  ;;  %v12360_v44 = vld [vmem:[#allocation60_spill] sm:$0xff] }
 0x506   :  { %7040 = vtanh.f32 %v12356_v53  ;;  %v5032_v18 = vpack.c.bf16 %v4940_v34, %v4939_v61  ;;  %v5255_v3 = vunpack.c.l.bf16 %v5030_v27  ;;  %v5256_v24 = vunpack.c.h.bf16 %v5030_v27  ;;  %v12361_v34 = vld [vmem:[#allocation61_spill] sm:$0xff] }
 0x507   :  { %7042 = vtanh.f32 %v4497_v33  ;;  %6155 = vst [vmem:[#allocation13 + $0x8] sm:$0xff] %v6123_v22  ;;  %v2831_v59 = vmul.f32 0.5, %v12358_v12  ;;  %v2832_v25 = vmul.f32 0.5, %v12359_v35  ;;  %v2835_v36 = vmul.f32 0.5, %v10500_v26 }
 0x508   :  { %7044 = vtanh.f32 %v4498_v54  ;;  %v5259_v29 = vunpack.c.l.bf16 %v5032_v18  ;;  %v5383_v8 = vmul.f32 %v5255_v3, %v5127_v40  ;;  %v5260_v51 = vunpack.c.h.bf16 %v5032_v18  ;;  %v5782_v18 = vpop.f32.mrf.mxu1 }
 0x509   :  { %v2836_v33 = vmul.f32 0.5, %v12360_v44  ;;  %v5384_v48 = vmul.f32 %v5256_v24, %v5128_v6  ;;  %v11365_v54 = vpack.c.bf16 %v2832_v25, %v2831_v59  ;;  %v4499_v1 = vunpack.c.l.bf16 %v10635_v46 }
 0x50a   :  { %v4500_v38 = vunpack.c.h.bf16 %v10635_v46  ;;  %v5387_v26 = vmul.f32 %v5259_v29, %v5131_v56  ;;  %v5388_v61 = vmul.f32 %v5260_v51, %v5132_v45  ;;  %v12362_v27 = vunpack.c.l.bf16 %v12361_v34  ;;  %v6049_v29 = vpop.f32.mrf.mxu0 }
 0x50b   :  { %v7039_v28 = vpop.eup %7038  ;;  %v5870_v60 = vadd.f32 %v5869_v19, %v5781_v58  ;;  %v5137_v10 = vunpack.c.l.bf16 %v11356_v5  ;;  %v5134_v6 = vunpack.c.h.bf16 %v11348_v9  ;;  %v12363_v22 = vunpack.c.h.bf16 %v12361_v34  ;;  %v5871_v19 = vpop.f32.mrf.mxu2  ;;  %v12369_v9 = vld [vmem:[#allocation70_spill] sm:$0xff] }
 0x50c   :  { %v7041_v13 = vpop.eup %7040  ;;  %7046 = vtanh.f32 %v12362_v27  ;;  %v5479_v3 = vpack.c.bf16 %v5387_v26, %v5383_v8  ;;  %v5480_v24 = vpack.c.bf16 %v5388_v61, %v5384_v48  ;;  %v11377_v2 = vpack.c.bf16 %v2836_v33, %v2835_v36  ;;  %v5960_v34 = vpop.f32.mrf.mxu3 }
 0x50d   :  { %v7043_v40 = vpop.eup %7042  ;;  %v4713_v53 = vpack.c.bf16 %v7041_v13, %v7039_v28  ;;  %7048 = vtanh.f32 %v12363_v22  ;;  %v5138_v58 = vunpack.c.h.bf16 %v11356_v5  ;;  %v5135_v59 = vunpack.c.l.bf16 %v11365_v54 }
 0x50e   :  { %v7045_v46 = vpop.eup %7044  ;;  %7050 = vtanh.f32 %v4499_v1  ;;  %5992 = vmatmul.bf16.gmra.mxu3 %v5479_v3  ;;  %6081 = vmatmul.bf16.gmra.mxu0 %v5480_v24  ;;  %v5959_v35 = vadd.f32 %v5958_v57, %v5870_v60  ;;  %v5783_v25 = vadd.f32 %v5782_v18, %v11297_v23  ;;  %v5139_v28 = vunpack.c.l.bf16 %v11377_v2  ;;  %v12364_v57 = vld [vmem:[#allocation65_spill] sm:$0xff] }
 0x50f   :  { %v4715_v56 = vpack.c.bf16 %v7045_v46, %v7043_v40  ;;  %v4813_v45 = vunpack.c.l.bf16 %v4713_v53  ;;  %v4814_v12 = vunpack.c.h.bf16 %v4713_v53  ;;  %7052 = vtanh.f32 %v4500_v38  ;;  %v12365_v53 = vld [vmem:[#allocation22_spill] sm:$0xff] }
 0x510   :  { %v5136_v48 = vunpack.c.h.bf16 %v11365_v54  ;;  %v6048_v1 = vadd.f32 %v6047_v30, %v5959_v35  ;;  %v5872_v38 = vadd.f32 %v5871_v19, %v5783_v25  ;;  %v2837_v27 = vmul.f32 0.5, %v12364_v57  ;;  %v12366_v46 = vld [vmem:[#allocation66_spill] sm:$0xff] }
 0x511   :  { %v4817_v8 = vunpack.c.l.bf16 %v4715_v56  ;;  %v4818_v51 = vunpack.c.h.bf16 %v4715_v56  ;;  %v4941_v36 = vadd.f32 1.0, %v4813_v45  ;;  %v4942_v44 = vadd.f32 1.0, %v4814_v12 }
 0x512   :  { %v7047_v33 = vpop.eup %7046  ;;  %v6124_v22 = vadd.f32 %v6048_v1, %v12365_v53  ;;  %v5961_v18 = vadd.f32 %v5960_v34, %v5872_v38  ;;  %v2838_v3 = vmul.f32 0.5, %v12366_v46  ;;  %v2841_v30 = vmul.f32 0.5, %v10605_v43 }
 0x513   :  { %v7049_v13 = vpop.eup %7048  ;;  %v4945_v26 = vadd.f32 1.0, %v4817_v8  ;;  %v4946_v5 = vadd.f32 1.0, %v4818_v51  ;;  %v5033_v61 = vpack.c.bf16 %v4942_v44, %v4941_v36  ;;  %v5874_v46 = vpop.f32.mrf.mxu2 }
 0x514   :  { %v7051_v60 = vpop.eup %7050  ;;  %v4714_v40 = vpack.c.bf16 %v7049_v13, %v7047_v33  ;;  %6156 = vst [vmem:[#allocation13 + $0x10] sm:$0xff] %v6124_v22  ;;  %v6050_v8 = vadd.f32 %v6049_v29, %v5961_v18  ;;  %v12367_v33 = vld [vmem:[#allocation67_spill] sm:$0xff]  ;;  %v11392_v18 = vpop.f32.mrf.mxu0 }
 0x515   :  { %v7053_v24 = vpop.eup %7052  ;;  %v5035_v56 = vpack.c.bf16 %v4946_v5, %v4945_v26  ;;  %v5261_v45 = vunpack.c.l.bf16 %v5033_v61  ;;  %v5262_v12 = vunpack.c.h.bf16 %v5033_v61  ;;  %v2842_v1 = vmul.f32 0.5, %v12367_v33  ;;  %v5785_v5 = vpop.f32.mrf.mxu1 }
 0x516   :  { %v4716_v19 = vpack.c.bf16 %v7053_v24, %v7051_v60  ;;  %v4815_v35 = vunpack.c.l.bf16 %v4714_v40  ;;  %v4816_v25 = vunpack.c.h.bf16 %v4714_v40  ;;  %v12368_v60 = vld [vmem:[#allocation21_spill] sm:$0xff] }
 0x517   :  { %v5265_v51 = vunpack.c.l.bf16 %v5035_v56  ;;  %v5389_v36 = vmul.f32 %v5261_v45, %v5133_v20  ;;  %v5266_v44 = vunpack.c.h.bf16 %v5035_v56  ;;  %v5390_v57 = vmul.f32 %v5262_v12, %v5134_v6 }
 0x518   :  { %v4819_v38 = vunpack.c.l.bf16 %v4716_v19  ;;  %v4820_v13 = vunpack.c.h.bf16 %v4716_v19  ;;  %v4943_v34 = vadd.f32 1.0, %v4815_v35  ;;  %v4944_v26 = vadd.f32 1.0, %v4816_v25  ;;  %v12370_v19 = vld [vmem:[#allocation81_spill] sm:$0xff] }
 0x519   :  { %v5393_v61 = vmul.f32 %v5265_v51, %v5137_v10  ;;  %v5394_v43 = vmul.f32 %v5266_v44, %v5138_v58  ;;  %v6125_v53 = vadd.f32 %v6050_v8, %v12368_v60  ;;  %v4505_v20 = vunpack.c.l.bf16 %v12369_v9 }
 0x51a   :  { %v4947_v40 = vadd.f32 1.0, %v4819_v38  ;;  %v4948_v22 = vadd.f32 1.0, %v4820_v13  ;;  %v5034_v29 = vpack.c.bf16 %v4944_v26, %v4943_v34  ;;  %v4506_v45 = vunpack.c.h.bf16 %v12369_v9  ;;  %v5963_v13 = vpop.f32.mrf.mxu3  ;;  %v12373_v26 = vld [vmem:[#allocation63_spill] sm:$0xff] }
 0x51b   :  { %v5481_v24 = vpack.c.bf16 %v5393_v61, %v5389_v36  ;;  %v5482_v56 = vpack.c.bf16 %v5394_v43, %v5390_v57  ;;  %6157 = vst [vmem:[#allocation13 + $0x18] sm:$0xff] %v6125_v53  ;;  %v12371_v35 = vunpack.c.l.bf16 %v12370_v19  ;;  %v12372_v12 = vunpack.c.h.bf16 %v12370_v19  ;;  %v12374_v57 = vld [vmem:[#allocation64_spill] sm:$0xff] }
 0x51c   :  { %v5036_v10 = vpack.c.bf16 %v4948_v22, %v4947_v40  ;;  %v5263_v6 = vunpack.c.l.bf16 %v5034_v29  ;;  %v5264_v58 = vunpack.c.h.bf16 %v5034_v29  ;;  %v5140_v25 = vunpack.c.h.bf16 %v11377_v2  ;;  %v12376_v53 = vld [vmem:[#allocation76_spill] sm:$0xff] }
 0x51d   :  { %7054 = vtanh.f32 %v12371_v35  ;;  %5819 = vmatmul.bf16.gmra.mxu1 %v5481_v24  ;;  %5908 = vmatmul.bf16.gmra.mxu2 %v5482_v56  ;;  %v5786_v8 = vadd.f32 %v5785_v5, %v11297_v23  ;;  %v11402_v51 = vpack.c.bf16 %v2838_v3, %v2837_v27  ;;  %v11406_v38 = vpack.c.bf16 %v2842_v1, %v2841_v30  ;;  %v12375_v5 = vld [vmem:[#allocation82_spill] sm:$0xff]  ;;  %v5787_v56 = vpop.f32.mrf.mxu1 }
 0x51e   :  { %7056 = vtanh.f32 %v12372_v12  ;;  %v5267_v36 = vunpack.c.l.bf16 %v5036_v10  ;;  %v5391_v44 = vmul.f32 %v5263_v6, %v5135_v59  ;;  %v5268_v33 = vunpack.c.h.bf16 %v5036_v10  ;;  %v12377_v1 = vld [vmem:[#allocation74_spill] sm:$0xff] }
 0x51f   :  { %7058 = vtanh.f32 %v4505_v20  ;;  %v5392_v34 = vmul.f32 %v5264_v58, %v5136_v48  ;;  %v2839_v61 = vmul.f32 0.5, %v12373_v26  ;;  %v2840_v43 = vmul.f32 0.5, %v12374_v57  ;;  %v12378_v48 = vld [vmem:[#allocation69_spill] sm:$0xff] }
 0x520   :  { %7060 = vtanh.f32 %v4506_v45  ;;  %v5395_v27 = vmul.f32 %v5267_v36, %v5139_v28  ;;  %v5396_v3 = vmul.f32 %v5268_v33, %v5140_v25  ;;  %v2843_v60 = vmul.f32 0.5, %v12375_v5  ;;  %v6054_v25 = vpop.f32.mrf.mxu0  ;;  %v5876_v36 = vpop.f32.mrf.mxu2 }
 0x521   :  { %v2844_v59 = vmul.f32 0.5, %v12376_v53  ;;  %v11416_v30 = vpack.c.bf16 %v2840_v43, %v2839_v61  ;;  %v4507_v22 = vunpack.c.l.bf16 %v12377_v1  ;;  %v4508_v54 = vunpack.c.h.bf16 %v12377_v1 }
 0x522   :  { %v12379_v29 = vunpack.c.l.bf16 %v12378_v48  ;;  %v5483_v20 = vpack.c.bf16 %v5395_v27, %v5391_v44  ;;  %v5484_v24 = vpack.c.bf16 %v5396_v3, %v5392_v34  ;;  %v12380_v28 = vunpack.c.h.bf16 %v12378_v48 }
 0x523   :  { %v7055_v40 = vpop.eup %7054  ;;  %v11422_v2 = vpack.c.bf16 %v2844_v59, %v2843_v60  ;;  %v5141_v35 = vunpack.c.l.bf16 %v11402_v51  ;;  %v5145_v10 = vunpack.c.l.bf16 %v11406_v38  ;;  %v5142_v6 = vunpack.c.h.bf16 %v11402_v51 }
 0x524   :  { %7062 = vtanh.f32 %v12379_v29  ;;  %v7057_v9 = vpop.eup %7056  ;;  %5997 = vmatmul.bf16.gmra.mxu3 %v5483_v20  ;;  %6086 = vmatmul.bf16.gmra.mxu0 %v5484_v24  ;;  %v5146_v58 = vunpack.c.h.bf16 %v11406_v38  ;;  %v5875_v12 = vadd.f32 %v5874_v46, %v5786_v8  ;;  %v5143_v26 = vunpack.c.l.bf16 %v11416_v30 }
 0x525   :  { %7064 = vtanh.f32 %v12380_v28  ;;  %v7059_v45 = vpop.eup %7058  ;;  %v4717_v19 = vpack.c.bf16 %v7057_v9, %v7055_v40  ;;  %v5788_v61 = vadd.f32 %v5787_v56, %v11297_v23  ;;  %v5147_v43 = vunpack.c.l.bf16 %v11422_v2 }
 0x526   :  { %7066 = vtanh.f32 %v4507_v22  ;;  %v7061_v44 = vpop.eup %7060  ;;  %v5144_v27 = vunpack.c.h.bf16 %v11416_v30  ;;  %v5964_v3 = vadd.f32 %v5963_v13, %v5875_v12  ;;  %v2845_v46 = vmul.f32 0.5, %v10683_v7  ;;  %v5965_v22 = vpop.f32.mrf.mxu3 }
 0x527   :  { %7068 = vtanh.f32 %v4508_v54  ;;  %v4821_v33 = vunpack.c.l.bf16 %v4717_v19  ;;  %v4822_v34 = vunpack.c.h.bf16 %v4717_v19  ;;  %v4719_v57 = vpack.c.bf16 %v7061_v44, %v7059_v45  ;;  %v12381_v45 = vld [vmem:[#allocation23_spill] sm:$0xff] }
 0x528   :  { %v5877_v53 = vadd.f32 %v5876_v36, %v5788_v61  ;;  %v6053_v1 = vadd.f32 %v11392_v18, %v5964_v3  ;;  %v2846_v54 = vmul.f32 0.5, %v10685_v41  ;;  %v2849_v13 = vmul.f32 0.5, %v10731_v32  ;;  %v5790_v61 = vpop.f32.mrf.mxu1 }
 0x529   :  { %v4949_v5 = vadd.f32 1.0, %v4821_v33  ;;  %v4950_v60 = vadd.f32 1.0, %v4822_v34  ;;  %v4825_v59 = vunpack.c.l.bf16 %v4719_v57  ;;  %v4826_v40 = vunpack.c.h.bf16 %v4719_v57  ;;  %v12382_v57 = vld [vmem:[#allocation85_spill] sm:$0xff] }
 0x52a   :  { %v7063_v51 = vpop.eup %7062  ;;  %v5966_v20 = vadd.f32 %v5965_v22, %v5877_v53  ;;  %v6126_v19 = vadd.f32 %v6053_v1, %v12381_v45  ;;  %v2850_v7 = vmul.f32 0.5, %v10733_v15  ;;  %v4513_v3 = vunpack.c.l.bf16 %v12382_v57  ;;  %v11441_v15 = vpop.f32.mrf.mxu0 }
 0x52b   :  { %v7065_v8 = vpop.eup %7064  ;;  %v5037_v29 = vpack.c.bf16 %v4950_v60, %v4949_v5  ;;  %v4953_v28 = vadd.f32 1.0, %v4825_v59  ;;  %v4954_v56 = vadd.f32 1.0, %v4826_v40  ;;  %v5148_v45 = vunpack.c.h.bf16 %v11422_v2 }
 0x52c   :  { %v7067_v48 = vpop.eup %7066  ;;  %v4718_v9 = vpack.c.bf16 %v7065_v8, %v7063_v51  ;;  %6158 = vst [vmem:[#allocation13 + $0x20] sm:$0xff] %v6126_v19  ;;  %v6055_v41 = vadd.f32 %v6054_v25, %v5966_v20  ;;  %v5879_v25 = vpop.f32.mrf.mxu2  ;;  %v5791_v19 = vadd.f32 %v5790_v61, %v11297_v23 }
 0x52d   :  { %v7069_v24 = vpop.eup %7068  ;;  %v5269_v12 = vunpack.c.l.bf16 %v5037_v29  ;;  %v5270_v36 = vunpack.c.h.bf16 %v5037_v29  ;;  %v5039_v33 = vpack.c.bf16 %v4954_v56, %v4953_v28 }
 0x52e   :  { %v4720_v44 = vpack.c.bf16 %v7069_v24, %v7067_v48  ;;  %v4823_v18 = vunpack.c.l.bf16 %v4718_v9  ;;  %v4824_v34 = vunpack.c.h.bf16 %v4718_v9  ;;  %v12383_v48 = vld [vmem:[#allocation24_spill] sm:$0xff]  ;;  %v4514_v9 = vunpack.c.h.bf16 %v12382_v57  ;;  %v12384_v24 = vld [vmem:[#allocation78_spill] sm:$0xff]  ;;  %v5968_v38 = vpop.f32.mrf.mxu3 }
 0x52f   :  { %v5397_v51 = vmul.f32 %v5269_v12, %v5141_v35  ;;  %v5398_v32 = vmul.f32 %v5270_v36, %v5142_v6  ;;  %v5273_v53 = vunpack.c.l.bf16 %v5039_v33  ;;  %v5274_v8 = vunpack.c.h.bf16 %v5039_v33 }
 0x530   :  { %v4827_v5 = vunpack.c.l.bf16 %v4720_v44  ;;  %v4828_v60 = vunpack.c.h.bf16 %v4720_v44  ;;  %v4951_v59 = vadd.f32 1.0, %v4823_v18  ;;  %v4952_v40 = vadd.f32 1.0, %v4824_v34 }
 0x531   :  { %v6127_v29 = vadd.f32 %v6055_v41, %v12383_v48  ;;  %v5401_v20 = vmul.f32 %v5273_v53, %v5145_v10  ;;  %v5402_v35 = vmul.f32 %v5274_v8, %v5146_v58  ;;  %v12385_v28 = vunpack.c.l.bf16 %v12384_v24  ;;  %v12389_v53 = vld [vmem:[#allocation72_spill] sm:$0xff] }
 0x532   :  { %v4955_v1 = vadd.f32 1.0, %v4827_v5  ;;  %v4956_v22 = vadd.f32 1.0, %v4828_v60  ;;  %v5038_v6 = vpack.c.bf16 %v4952_v40, %v4951_v59  ;;  %v12386_v12 = vunpack.c.h.bf16 %v12384_v24  ;;  %v12387_v5 = vld [vmem:[#allocation75_spill] sm:$0xff]  ;;  %v12390_v59 = vld [vmem:[#allocation77_spill] sm:$0xff] }
 0x533   :  { %7070 = vtanh.f32 %v12385_v28  ;;  %6159 = vst [vmem:[#allocation13 + $0x28] sm:$0xff] %v6127_v29  ;;  %v5485_v36 = vpack.c.bf16 %v5401_v20, %v5397_v51  ;;  %v5486_v44 = vpack.c.bf16 %v5402_v35, %v5398_v32  ;;  %v11453_v34 = vpack.c.bf16 %v2846_v54, %v2845_v46  ;;  %v12388_v46 = vld [vmem:[#allocation71_spill] sm:$0xff] }
 0x534   :  { %v5040_v56 = vpack.c.bf16 %v4956_v22, %v4955_v1  ;;  %7072 = vtanh.f32 %v12386_v12  ;;  %v5271_v18 = vunpack.c.l.bf16 %v5038_v6  ;;  %v5272_v33 = vunpack.c.h.bf16 %v5038_v6  ;;  %v6059_v6 = vpop.f32.mrf.mxu0  ;;  %v5881_v24 = vpop.f32.mrf.mxu2 }
 0x535   :  { %7074 = vtanh.f32 %v4513_v3  ;;  %5824 = vmatmul.bf16.gmra.mxu1 %v5485_v36  ;;  %5913 = vmatmul.bf16.gmra.mxu2 %v5486_v44  ;;  %v11459_v57 = vpack.c.bf16 %v2850_v7, %v2849_v13  ;;  %v2847_v60 = vmul.f32 0.5, %v12387_v5  ;;  %v2848_v54 = vmul.f32 0.5, %v12388_v46 }
 0x536   :  { %v5275_v10 = vunpack.c.l.bf16 %v5040_v56  ;;  %v5276_v58 = vunpack.c.h.bf16 %v5040_v56  ;;  %v5399_v41 = vmul.f32 %v5271_v18, %v5143_v26  ;;  %v5400_v61 = vmul.f32 %v5272_v33, %v5144_v27  ;;  %v12391_v26 = vld [vmem:[#allocation86_spill] sm:$0xff]  ;;  %v5792_v27 = vpop.f32.mrf.mxu1 }
 0x537   :  { %7076 = vtanh.f32 %v4514_v9  ;;  %v2851_v8 = vmul.f32 0.5, %v12389_v53  ;;  %v2852_v40 = vmul.f32 0.5, %v12390_v59  ;;  %v4515_v1 = vunpack.c.l.bf16 %v12391_v26 }
 0x538   :  { %v5403_v51 = vmul.f32 %v5275_v10, %v5147_v43  ;;  %v5404_v32 = vmul.f32 %v5276_v58, %v5148_v45  ;;  %v4516_v30 = vunpack.c.h.bf16 %v12391_v26  ;;  %v5149_v2 = vunpack.c.l.bf16 %v11453_v34  ;;  %v12392_v43 = vld [vmem:[#allocation79_spill] sm:$0xff] }
 0x539   :  { %v7071_v3 = vpop.eup %7070  ;;  %v12393_v48 = vunpack.c.l.bf16 %v12392_v43  ;;  %v11472_v9 = vpack.c.bf16 %v2848_v54, %v2847_v60  ;;  %v12394_v20 = vunpack.c.h.bf16 %v12392_v43  ;;  %v5880_v35 = vadd.f32 %v5879_v25, %v5791_v19 }
 0x53a   :  { %v7073_v13 = vpop.eup %7072  ;;  %v5487_v7 = vpack.c.bf16 %v5403_v51, %v5399_v41  ;;  %v5488_v22 = vpack.c.bf16 %v5404_v32, %v5400_v61  ;;  %v5153_v56 = vunpack.c.l.bf16 %v11459_v57  ;;  %v5150_v45 = vunpack.c.h.bf16 %v11453_v34  ;;  %v5970_v32 = vpop.f32.mrf.mxu3 }
 0x53b   :  { %7078 = vtanh.f32 %v12393_v48  ;;  %v4721_v29 = vpack.c.bf16 %v7073_v13, %v7071_v3  ;;  %v7075_v28 = vpop.eup %7074  ;;  %v5793_v12 = vadd.f32 %v5792_v27, %v11297_v23  ;;  %v11479_v33 = vpack.c.bf16 %v2852_v40, %v2851_v8  ;;  %v12396_v40 = vld [vmem:[#allocation83_spill] sm:$0xff] }
 0x53c   :  { %7080 = vtanh.f32 %v12394_v20  ;;  %6002 = vmatmul.bf16.gmra.mxu3 %v5487_v7  ;;  %6091 = vmatmul.bf16.gmra.mxu0 %v5488_v22  ;;  %v5154_v25 = vunpack.c.h.bf16 %v11459_v57  ;;  %v5969_v19 = vadd.f32 %v5968_v38, %v5880_v35  ;;  %v5151_v51 = vunpack.c.l.bf16 %v11472_v9  ;;  %v12395_v57 = vld [vmem:[#allocation80_spill] sm:$0xff]  ;;  %v12397_v7 = vld [vmem:[#allocation25_spill] sm:$0xff] }
 0x53d   :  { %7082 = vtanh.f32 %v4515_v1  ;;  %v7077_v36 = vpop.eup %7076  ;;  %v4829_v44 = vunpack.c.l.bf16 %v4721_v29  ;;  %v4830_v18 = vunpack.c.h.bf16 %v4721_v29  ;;  %v5882_v58 = vadd.f32 %v5881_v24, %v5793_v12  ;;  %v12398_v35 = vld [vmem:[#allocation88_spill] sm:$0xff] }
 0x53e   :  { %7084 = vtanh.f32 %v4516_v30  ;;  %v4723_v10 = vpack.c.bf16 %v7077_v36, %v7075_v28  ;;  %v5152_v34 = vunpack.c.h.bf16 %v11472_v9  ;;  %v6058_v54 = vadd.f32 %v11441_v15, %v5969_v19  ;;  %v5795_v15 = vpop.f32.mrf.mxu1  ;;  %v12399_v19 = vld [vmem:[#allocation26_spill] sm:$0xff]  ;;  %v12410_v9 = vld [vmem:[#allocation91_spill] sm:$0xff] }
 0x53f   :  { %v4957_v41 = vadd.f32 1.0, %v4829_v44  ;;  %v4958_v61 = vadd.f32 1.0, %v4830_v18  ;;  %v5971_v3 = vadd.f32 %v5970_v32, %v5882_v58  ;;  %v5155_v59 = vunpack.c.l.bf16 %v11479_v33 }
 0x540   :  { %v4833_v60 = vunpack.c.l.bf16 %v4723_v10  ;;  %v4834_v46 = vunpack.c.h.bf16 %v4723_v10  ;;  %v2853_v38 = vmul.f32 0.5, %v12395_v57  ;;  %v2854_v26 = vmul.f32 0.5, %v12396_v40 }
 0x541   :  { %v7079_v5 = vpop.eup %7078  ;;  %v5041_v8 = vpack.c.bf16 %v4958_v61, %v4957_v41  ;;  %v6128_v22 = vadd.f32 %v6058_v54, %v12397_v7  ;;  %v6060_v20 = vadd.f32 %v6059_v6, %v5971_v3  ;;  %v2857_v24 = vmul.f32 0.5, %v12398_v35  ;;  %v11491_v41 = vpop.f32.mrf.mxu0  ;;  %v12400_v61 = vld [vmem:[#allocation118_spill] sm:$0xff] }
 0x542   :  { %v7081_v53 = vpop.eup %7080  ;;  %v4961_v30 = vadd.f32 1.0, %v4833_v60  ;;  %v4962_v27 = vadd.f32 1.0, %v4834_v46  ;;  %v2858_v32 = vmul.f32 0.5, %v12400_v61  ;;  %v12402_v7 = vld [vmem:[#allocation98_spill] sm:$0xff] }
 0x543   :  { %v7083_v1 = vpop.eup %7082  ;;  %v4722_v13 = vpack.c.bf16 %v7081_v53, %v7079_v5  ;;  %v5277_v48 = vunpack.c.l.bf16 %v5041_v8  ;;  %v5278_v29 = vunpack.c.h.bf16 %v5041_v8  ;;  %6160 = vst [vmem:[#allocation13 + $0x30] sm:$0xff] %v6128_v22  ;;  %v6129_v58 = vadd.f32 %v6060_v20, %v12399_v19  ;;  %v12401_v53 = vld [vmem:[#allocation92_spill] sm:$0xff] }
 0x544   :  { %v7085_v43 = vpop.eup %7084  ;;  %v5043_v28 = vpack.c.bf16 %v4962_v27, %v4961_v30  ;;  %v4521_v8 = vunpack.c.l.bf16 %v12401_v53  ;;  %v4522_v57 = vunpack.c.h.bf16 %v12401_v53  ;;  %v5156_v27 = vunpack.c.h.bf16 %v11479_v33 }
 0x545   :  { %v4724_v12 = vpack.c.bf16 %v7085_v43, %v7083_v1  ;;  %v4831_v36 = vunpack.c.l.bf16 %v4722_v13  ;;  %v4832_v44 = vunpack.c.h.bf16 %v4722_v13  ;;  %v5405_v18 = vmul.f32 %v5277_v48, %v5149_v2  ;;  %6161 = vst [vmem:[#allocation13 + $0x38] sm:$0xff] %v6129_v58  ;;  %v5884_v43 = vpop.f32.mrf.mxu2  ;;  %v12406_v58 = vld [vmem:[#allocation87_spill] sm:$0xff] }
 0x546   :  { %v5406_v10 = vmul.f32 %v5278_v29, %v5150_v45  ;;  %v5281_v5 = vunpack.c.l.bf16 %v5043_v28  ;;  %v5282_v60 = vunpack.c.h.bf16 %v5043_v28  ;;  %v5796_v13 = vadd.f32 %v5795_v15, %v11297_v23 }
 0x547   :  { %v4835_v46 = vunpack.c.l.bf16 %v4724_v12  ;;  %v4836_v6 = vunpack.c.h.bf16 %v4724_v12  ;;  %v4959_v54 = vadd.f32 1.0, %v4831_v36  ;;  %v4960_v3 = vadd.f32 1.0, %v4832_v44  ;;  %v5973_v36 = vpop.f32.mrf.mxu3 }
 0x548   :  { %v5409_v40 = vmul.f32 %v5281_v5, %v5153_v56  ;;  %v5410_v2 = vmul.f32 %v5282_v60, %v5154_v25  ;;  %v12403_v22 = vunpack.c.l.bf16 %v12402_v7  ;;  %v12404_v35 = vunpack.c.h.bf16 %v12402_v7  ;;  %v12407_v60 = vld [vmem:[#allocation119_spill] sm:$0xff] }
 0x549   :  { %v4963_v45 = vadd.f32 1.0, %v4835_v46  ;;  %v4964_v1 = vadd.f32 1.0, %v4836_v6  ;;  %v5042_v30 = vpack.c.bf16 %v4960_v3, %v4959_v54  ;;  %v11502_v25 = vpack.c.bf16 %v2854_v26, %v2853_v38  ;;  %v5797_v26 = vpop.f32.mrf.mxu1  ;;  %v12408_v6 = vld [vmem:[#allocation120_spill] sm:$0xff]  ;;  %v12409_v3 = vld [vmem:[#allocation89_spill] sm:$0xff] }
 0x54a   :  { %7086 = vtanh.f32 %v12403_v22  ;;  %v5489_v48 = vpack.c.bf16 %v5409_v40, %v5405_v18  ;;  %v5490_v29 = vpack.c.bf16 %v5410_v2, %v5406_v10  ;;  %v11504_v15 = vpack.c.bf16 %v2858_v32, %v2857_v24  ;;  %v12405_v10 = vld [vmem:[#allocation84_spill] sm:$0xff] }
 0x54b   :  { %v5044_v20 = vpack.c.bf16 %v4964_v1, %v4963_v45  ;;  %7088 = vtanh.f32 %v12404_v35  ;;  %v5279_v28 = vunpack.c.l.bf16 %v5042_v30  ;;  %v5280_v56 = vunpack.c.h.bf16 %v5042_v30 }
 0x54c   :  { %7090 = vtanh.f32 %v4521_v8  ;;  %5829 = vmatmul.bf16.gmra.mxu1 %v5489_v48  ;;  %5918 = vmatmul.bf16.gmra.mxu2 %v5490_v29  ;;  %v2855_v19 = vmul.f32 0.5, %v12405_v10  ;;  %v2856_v38 = vmul.f32 0.5, %v12406_v58  ;;  %v2859_v46 = vmul.f32 0.5, %v12407_v60  ;;  %v6064_v8 = vpop.f32.mrf.mxu0 }
 0x54d   :  { %v5283_v33 = vunpack.c.l.bf16 %v5044_v20  ;;  %v5284_v12 = vunpack.c.h.bf16 %v5044_v20  ;;  %7092 = vtanh.f32 %v4522_v57  ;;  %v5407_v44 = vmul.f32 %v5279_v28, %v5151_v51 }
 0x54e   :  { %v5408_v18 = vmul.f32 %v5280_v56, %v5152_v34  ;;  %v2860_v24 = vmul.f32 0.5, %v12408_v6  ;;  %v11514_v54 = vpack.c.bf16 %v2856_v38, %v2855_v19  ;;  %v4523_v53 = vunpack.c.l.bf16 %v12409_v3 }
 0x54f   :  { %v5411_v61 = vmul.f32 %v5283_v33, %v5155_v59  ;;  %v5412_v5 = vmul.f32 %v5284_v12, %v5156_v27  ;;  %v4524_v51 = vunpack.c.h.bf16 %v12409_v3  ;;  %v12411_v34 = vunpack.c.l.bf16 %v12410_v9  ;;  %v5886_v12 = vpop.f32.mrf.mxu2  ;;  %v5975_v60 = vpop.f32.mrf.mxu3 }
 0x550   :  { %v7087_v32 = vpop.eup %7086  ;;  %v11520_v59 = vpack.c.bf16 %v2860_v24, %v2859_v46  ;;  %v12412_v45 = vunpack.c.h.bf16 %v12410_v9  ;;  %v5157_v27 = vunpack.c.l.bf16 %v11502_v25  ;;  %v5161_v7 = vunpack.c.l.bf16 %v11504_v15  ;;  %v12413_v9 = vld [vmem:[#allocation28_spill] sm:$0xff] }
 0x551   :  { %7094 = vtanh.f32 %v12411_v34  ;;  %v7089_v57 = vpop.eup %7088  ;;  %v5491_v40 = vpack.c.bf16 %v5411_v61, %v5407_v44  ;;  %v5492_v2 = vpack.c.bf16 %v5412_v5, %v5408_v18  ;;  %v5158_v48 = vunpack.c.h.bf16 %v11502_v25 }
 0x552   :  { %7096 = vtanh.f32 %v12412_v45  ;;  %v7091_v1 = vpop.eup %7090  ;;  %v4725_v30 = vpack.c.bf16 %v7089_v57, %v7087_v32  ;;  %v5162_v29 = vunpack.c.h.bf16 %v11504_v15  ;;  %v5885_v20 = vadd.f32 %v5884_v43, %v5796_v13 }
 0x553   :  { %7098 = vtanh.f32 %v4523_v53  ;;  %v7093_v22 = vpop.eup %7092  ;;  %6007 = vmatmul.bf16.gmra.mxu3 %v5491_v40  ;;  %6096 = vmatmul.bf16.gmra.mxu0 %v5492_v2  ;;  %v5159_v33 = vunpack.c.l.bf16 %v11514_v54  ;;  %v5163_v44 = vunpack.c.l.bf16 %v11520_v59  ;;  %v5160_v18 = vunpack.c.h.bf16 %v11514_v54  ;;  %v12414_v2 = vld [vmem:[#allocation94_spill] sm:$0xff] }
 0x554   :  { %7100 = vtanh.f32 %v4524_v51  ;;  %v4727_v35 = vpack.c.bf16 %v7093_v22, %v7091_v1  ;;  %v4837_v28 = vunpack.c.l.bf16 %v4725_v30  ;;  %v4838_v56 = vunpack.c.h.bf16 %v4725_v30  ;;  %v11538_v22 = vpop.f32.mrf.mxu0 }
 0x555   :  { %v5974_v10 = vadd.f32 %v5973_v36, %v5885_v20  ;;  %v5798_v19 = vadd.f32 %v5797_v26, %v11297_v23  ;;  %v2861_v46 = vmul.f32 0.5, %v10942_v50  ;;  %v2862_v6 = vmul.f32 0.5, %v10944_v55  ;;  %v5800_v26 = vpop.f32.mrf.mxu1 }
 0x556   :  { %v4841_v38 = vunpack.c.l.bf16 %v4727_v35  ;;  %v4842_v25 = vunpack.c.h.bf16 %v4727_v35  ;;  %v4965_v61 = vadd.f32 1.0, %v4837_v28  ;;  %v4966_v15 = vadd.f32 1.0, %v4838_v56 }
 0x557   :  { %v7095_v58 = vpop.eup %7094  ;;  %v6063_v13 = vadd.f32 %v11491_v41, %v5974_v10  ;;  %v5887_v43 = vadd.f32 %v5886_v12, %v5798_v19  ;;  %v2865_v40 = vmul.f32 0.5, %v10993_v52  ;;  %v2866_v41 = vmul.f32 0.5, %v12414_v2 }
 0x558   :  { %v7097_v5 = vpop.eup %7096  ;;  %v4969_v32 = vadd.f32 1.0, %v4841_v38  ;;  %v4970_v3 = vadd.f32 1.0, %v4842_v25  ;;  %v5045_v36 = vpack.c.bf16 %v4966_v15, %v4965_v61  ;;  %v4529_v28 = vunpack.c.l.bf16 %v11147_v37 }
 0x559   :  { %v7099_v24 = vpop.eup %7098  ;;  %v4726_v53 = vpack.c.bf16 %v7097_v5, %v7095_v58  ;;  %v6130_v34 = vadd.f32 %v6063_v13, %v12413_v9  ;;  %v5976_v57 = vadd.f32 %v5975_v60, %v5887_v43  ;;  %v12415_v5 = vld [vmem:[#allocation27_spill] sm:$0xff]  ;;  %v4530_v43 = vunpack.c.h.bf16 %v11147_v37  ;;  %v5978_v37 = vpop.f32.mrf.mxu3 }
 0x55a   :  { %v7101_v51 = vpop.eup %7100  ;;  %v5047_v45 = vpack.c.bf16 %v4970_v3, %v4969_v32  ;;  %v5285_v1 = vunpack.c.l.bf16 %v5045_v36  ;;  %v5286_v30 = vunpack.c.h.bf16 %v5045_v36  ;;  %v5889_v36 = vpop.f32.mrf.mxu2  ;;  %v11551_v2 = vpack.c.bf16 %v2866_v41, %v2865_v40 }
 0x55b   :  { %v4728_v50 = vpack.c.bf16 %v7101_v51, %v7099_v24  ;;  %v4839_v55 = vunpack.c.l.bf16 %v4726_v53  ;;  %v4840_v20 = vunpack.c.h.bf16 %v4726_v53  ;;  %6162 = vst [vmem:[#allocation13 + $0x40] sm:$0xff] %v6130_v34  ;;  %v6065_v35 = vadd.f32 %v6064_v8, %v5976_v57  ;;  %v12416_v8 = vld [vmem:[#allocation96_spill] sm:$0xff] }
 0x55c   :  { %v5289_v56 = vunpack.c.l.bf16 %v5047_v45  ;;  %v5413_v12 = vmul.f32 %v5285_v1, %v5157_v27  ;;  %v5290_v10 = vunpack.c.h.bf16 %v5047_v45  ;;  %v5414_v19 = vmul.f32 %v5286_v30, %v5158_v48  ;;  %v11561_v40 = vpop.f32.mrf.mxu0 }
 0x55d   :  { %v4843_v58 = vunpack.c.l.bf16 %v4728_v50  ;;  %v4844_v52 = vunpack.c.h.bf16 %v4728_v50  ;;  %v4967_v38 = vadd.f32 1.0, %v4839_v55  ;;  %v4968_v25 = vadd.f32 1.0, %v4840_v20  ;;  %v5802_v45 = vpop.f32.mrf.mxu1  ;;  %v12419_v20 = vld [vmem:[#allocation90_spill] sm:$0xff] }
 0x55e   :  { %v5417_v61 = vmul.f32 %v5289_v56, %v5161_v7  ;;  %v5418_v15 = vmul.f32 %v5290_v10, %v5162_v29  ;;  %v6131_v13 = vadd.f32 %v6065_v35, %v12415_v5  ;;  %v12417_v3 = vunpack.c.l.bf16 %v12416_v8 }
 0x55f   :  { %v4971_v60 = vadd.f32 1.0, %v4843_v58  ;;  %v4972_v24 = vadd.f32 1.0, %v4844_v52  ;;  %v5046_v32 = vpack.c.bf16 %v4968_v25, %v4967_v38  ;;  %v5164_v48 = vunpack.c.h.bf16 %v11520_v59  ;;  %v12424_v25 = vld [vmem:[#allocation101_spill] sm:$0xff] }
 0x560   :  { %7102 = vtanh.f32 %v12417_v3  ;;  %v5493_v27 = vpack.c.bf16 %v5417_v61, %v5413_v12  ;;  %v5494_v53 = vpack.c.bf16 %v5418_v15, %v5414_v19  ;;  %6163 = vst [vmem:[#allocation13 + $0x48] sm:$0xff] %v6131_v13  ;;  %v12418_v51 = vunpack.c.h.bf16 %v12416_v8  ;;  %v12421_v12 = vld [vmem:[#allocation100_spill] sm:$0xff] }
 0x561   :  { %v5048_v7 = vpack.c.bf16 %v4972_v24, %v4971_v60  ;;  %v5287_v29 = vunpack.c.l.bf16 %v5046_v32  ;;  %v5288_v9 = vunpack.c.h.bf16 %v5046_v32  ;;  %v5801_v34 = vadd.f32 %v5800_v26, %v11297_v23 }
 0x562   :  { %7104 = vtanh.f32 %v12418_v51  ;;  %5834 = vmatmul.bf16.gmra.mxu1 %v5493_v27  ;;  %5923 = vmatmul.bf16.gmra.mxu2 %v5494_v53  ;;  %v11549_v57 = vpack.c.bf16 %v2862_v6, %v2861_v46  ;;  %v2863_v35 = vmul.f32 0.5, %v12419_v20  ;;  %v2867_v26 = vmul.f32 0.5, %v12421_v12  ;;  %v12422_v46 = vld [vmem:[#allocation95_spill] sm:$0xff] }
 0x563   :  { %7106 = vtanh.f32 %v4529_v28  ;;  %v5291_v1 = vunpack.c.l.bf16 %v5048_v7  ;;  %v5415_v30 = vmul.f32 %v5287_v29, %v5159_v33  ;;  %v5292_v50 = vunpack.c.h.bf16 %v5048_v7  ;;  %v12420_v28 = vld [vmem:[#allocation93_spill] sm:$0xff] }
 0x564   :  { %7108 = vtanh.f32 %v4530_v43  ;;  %v5416_v55 = vmul.f32 %v5288_v9, %v5160_v18  ;;  %v2864_v56 = vmul.f32 0.5, %v12420_v28  ;;  %v2868_v6 = vmul.f32 0.5, %v12422_v46  ;;  %v12427_v46 = vld [vmem:[#allocation29_spill] sm:$0xff] }
 0x565   :  { %v5419_v10 = vmul.f32 %v5291_v1, %v5163_v44  ;;  %v5420_v19 = vmul.f32 %v5292_v50, %v5164_v48  ;;  %v4531_v33 = vunpack.c.l.bf16 %v11155_v47  ;;  %v4532_v54 = vunpack.c.h.bf16 %v11155_v47  ;;  %v5980_v1 = vpop.f32.mrf.mxu3  ;;  %v5805_v28 = vpop.f32.mrf.mxu1 }
 0x566   :  { %v7103_v41 = vpop.eup %7102  ;;  %v12423_v58 = vunpack.c.h.bf16 %v11311_v11  ;;  %v5165_v38 = vunpack.c.l.bf16 %v11549_v57  ;;  %v12425_v61 = vunpack.c.l.bf16 %v12424_v25  ;;  %v5890_v15 = vadd.f32 %v5889_v36, %v5801_v34  ;;  %v5891_v36 = vpop.f32.mrf.mxu2 }
 0x567   :  { %v5495_v13 = vpack.c.bf16 %v5419_v10, %v5415_v30  ;;  %v5496_v59 = vpack.c.bf16 %v5420_v19, %v5416_v55  ;;  %v12426_v43 = vunpack.c.h.bf16 %v12424_v25  ;;  %v5169_v47 = vunpack.c.l.bf16 %v11551_v2  ;;  %v11589_v10 = vpop.f32.mrf.mxu0 }
 0x568   :  { %v7105_v18 = vpop.eup %7104  ;;  %v11569_v52 = vmul.f32 0.796875, %v12423_v58  ;;  %7110 = vtanh.f32 %v12425_v61  ;;  %v11577_v24 = vpack.c.bf16 %v2864_v56, %v2863_v35  ;;  %v11579_v11 = vpack.c.bf16 %v2868_v6, %v2867_v26 }
 0x569   :  { %v7107_v5 = vpop.eup %7106  ;;  %v4729_v44 = vpack.c.bf16 %v7105_v18, %v7103_v41  ;;  %7112 = vtanh.f32 %v12426_v43  ;;  %6012 = vmatmul.bf16.gmra.mxu3 %v5495_v13  ;;  %6101 = vmatmul.bf16.gmra.mxu0 %v5496_v59  ;;  %v5166_v27 = vunpack.c.h.bf16 %v11549_v57  ;;  %v5170_v53 = vunpack.c.h.bf16 %v11551_v2 }
 0x56a   :  { %v7109_v60 = vpop.eup %7108  ;;  %7114 = vtanh.f32 %v4531_v33  ;;  %v5979_v48 = vadd.f32 %v5978_v37, %v5890_v15  ;;  %v5803_v51 = vadd.f32 %v5802_v45, %v11297_v23  ;;  %v5167_v50 = vunpack.c.l.bf16 %v11577_v24 }
 0x56b   :  { %v4731_v32 = vpack.c.bf16 %v7109_v60, %v7107_v5  ;;  %v4845_v8 = vunpack.c.l.bf16 %v4729_v44  ;;  %v4846_v3 = vunpack.c.h.bf16 %v4729_v44  ;;  %7116 = vtanh.f32 %v4532_v54 }
 0x56c   :  { %v5171_v55 = vunpack.c.l.bf16 %v11579_v11  ;;  %v6068_v20 = vadd.f32 %v11538_v22, %v5979_v48  ;;  %v5892_v35 = vadd.f32 %v5891_v36, %v5803_v51  ;;  %v2869_v45 = vmul.f32 0.5, %v11076_v42  ;;  %v12428_v48 = vld [vmem:[#allocation30_spill] sm:$0xff] }
 0x56d   :  { %v4849_v7 = vunpack.c.l.bf16 %v4731_v32  ;;  %v4850_v29 = vunpack.c.h.bf16 %v4731_v32  ;;  %v4973_v9 = vadd.f32 1.0, %v4845_v8  ;;  %v4974_v34 = vadd.f32 1.0, %v4846_v3 }
 0x56e   :  { %v7111_v30 = vpop.eup %7110  ;;  %v6132_v6 = vadd.f32 %v6068_v20, %v12427_v46  ;;  %v5981_v41 = vadd.f32 %v5980_v1, %v5892_v35  ;;  %v2870_v19 = vmul.f32 0.5, %v11082_v4  ;;  %v2873_v58 = vmul.f32 0.5, %v11115_v31  ;;  %v5983_v35 = vpop.f32.mrf.mxu3 }
 0x56f   :  { %v7113_v57 = vpop.eup %7112  ;;  %v4977_v56 = vadd.f32 1.0, %v4849_v7  ;;  %v4978_v2 = vadd.f32 1.0, %v4850_v29  ;;  %v5049_v37 = vpack.c.bf16 %v4974_v34, %v4973_v9  ;;  %v2874_v44 = vmul.f32 0.5, %v11117_v39  ;;  %v12429_v9 = vld [vmem:[#allocation105_spill] sm:$0xff] }
 0x570   :  { %v7115_v12 = vpop.eup %7114  ;;  %v4730_v26 = vpack.c.bf16 %v7113_v57, %v7111_v30  ;;  %6164 = vst [vmem:[#allocation13 + $0x50] sm:$0xff] %v6132_v6  ;;  %v6070_v42 = vadd.f32 %v11561_v40, %v5981_v41  ;;  %v4537_v34 = vunpack.c.l.bf16 %v12429_v9  ;;  %v5894_v40 = vpop.f32.mrf.mxu2  ;;  %v4538_v39 = vunpack.c.h.bf16 %v12429_v9  ;;  %v12430_v30 = vld [vmem:[#allocation104_spill] sm:$0xff] }
 0x571   :  { %v7117_v33 = vpop.eup %7116  ;;  %v5051_v54 = vpack.c.bf16 %v4978_v2, %v4977_v56  ;;  %v5293_v22 = vunpack.c.l.bf16 %v5049_v37  ;;  %v5294_v18 = vunpack.c.h.bf16 %v5049_v37  ;;  %v12431_v20 = vunpack.c.l.bf16 %v12430_v30  ;;  %v5807_v56 = vpop.f32.mrf.mxu1 }
 0x572   :  { %v4732_v25 = vpack.c.bf16 %v7117_v33, %v7115_v12  ;;  %v4847_v61 = vunpack.c.l.bf16 %v4730_v26  ;;  %v4848_v15 = vunpack.c.h.bf16 %v4730_v26  ;;  %v6133_v31 = vadd.f32 %v6070_v42, %v12428_v48  ;;  %v11609_v33 = vpop.f32.mrf.mxu0 }
 0x573   :  { %v5297_v5 = vunpack.c.l.bf16 %v5051_v54  ;;  %v5421_v13 = vmul.f32 %v5293_v22, %v5165_v38  ;;  %v5298_v59 = vunpack.c.h.bf16 %v5051_v54  ;;  %v5422_v3 = vmul.f32 %v5294_v18, %v5166_v27  ;;  %v12433_v22 = vld [vmem:[#allocation102_spill] sm:$0xff] }
 0x574   :  { %v4851_v43 = vunpack.c.l.bf16 %v4732_v25  ;;  %v4852_v60 = vunpack.c.h.bf16 %v4732_v25  ;;  %v4975_v4 = vadd.f32 1.0, %v4847_v61  ;;  %v4976_v32 = vadd.f32 1.0, %v4848_v15  ;;  %6165 = vst [vmem:[#allocation13 + $0x58] sm:$0xff] %v6133_v31  ;;  %v12434_v25 = vld [vmem:[#allocation97_spill] sm:$0xff] }
 0x575   :  { %v5425_v8 = vmul.f32 %v5297_v5, %v5169_v47  ;;  %v5426_v36 = vmul.f32 %v5298_v59, %v5170_v53  ;;  %7118 = vtanh.f32 %v12431_v20  ;;  %v12432_v57 = vunpack.c.h.bf16 %v12430_v30  ;;  %v12435_v5 = vld [vmem:[#allocation99_spill] sm:$0xff]  ;;  %v12437_v59 = vld [vmem:[#allocation106_spill] sm:$0xff] }
 0x576   :  { %v4979_v51 = vadd.f32 1.0, %v4851_v43  ;;  %v4980_v7 = vadd.f32 1.0, %v4852_v60  ;;  %v5050_v29 = vpack.c.bf16 %v4976_v32, %v4975_v4  ;;  %v5168_v2 = vunpack.c.h.bf16 %v11577_v24 }
 0x577   :  { %v5497_v1 = vpack.c.bf16 %v5425_v8, %v5421_v13  ;;  %v5498_v38 = vpack.c.bf16 %v5426_v36, %v5422_v3  ;;  %7120 = vtanh.f32 %v12432_v57  ;;  %v5172_v37 = vunpack.c.h.bf16 %v11579_v11 }
 0x578   :  { %v5052_v47 = vpack.c.bf16 %v4980_v7, %v4979_v51  ;;  %v5295_v27 = vunpack.c.l.bf16 %v5050_v29  ;;  %v5296_v53 = vunpack.c.h.bf16 %v5050_v29  ;;  %v5806_v12 = vadd.f32 %v5805_v28, %v11297_v23  ;;  %v5896_v29 = vpop.f32.mrf.mxu2 }
 0x579   :  { %5839 = vmatmul.bf16.gmra.mxu1 %v5497_v1  ;;  %5928 = vmatmul.bf16.gmra.mxu2 %v5498_v38  ;;  %7122 = vtanh.f32 %v4537_v34  ;;  %v11605_v6 = vpack.c.bf16 %v2870_v19, %v2869_v45  ;;  %v11607_v41 = vpack.c.bf16 %v2874_v44, %v2873_v58  ;;  %v2871_v18 = vmul.f32 0.5, %v12433_v22  ;;  %v12436_v58 = vld [vmem:[#allocation103_spill] sm:$0xff] }
 0x57a   :  { %v5299_v26 = vunpack.c.l.bf16 %v5052_v47  ;;  %v5300_v46 = vunpack.c.h.bf16 %v5052_v47  ;;  %v5423_v54 = vmul.f32 %v5295_v27, %v5167_v50  ;;  %7124 = vtanh.f32 %v4538_v39  ;;  %v12438_v50 = vld [vmem:[#allocation109_spill] sm:$0xff]  ;;  %v11639_v27 = vpop.f32.mrf.mxu1 }
 0x57b   :  { %v2872_v61 = vmul.f32 0.5, %v12434_v25  ;;  %v5424_v15 = vmul.f32 %v5296_v53, %v5168_v2  ;;  %v2875_v45 = vmul.f32 0.5, %v12435_v5  ;;  %v7119_v19 = vpop.eup %7118  ;;  %v2876_v13 = vmul.f32 0.5, %v12436_v58 }
 0x57c   :  { %v5427_v28 = vmul.f32 %v5299_v26, %v5171_v55  ;;  %v5428_v42 = vmul.f32 %v5300_v46, %v5172_v37  ;;  %v4539_v44 = vunpack.c.l.bf16 %v12437_v59  ;;  %v4540_v24 = vunpack.c.h.bf16 %v12437_v59 }
 0x57d   :  { %v12439_v43 = vunpack.c.l.bf16 %v12438_v50  ;;  %v7121_v60 = vpop.eup %7120  ;;  %v11623_v8 = vpack.c.bf16 %v2872_v61, %v2871_v18  ;;  %v12440_v11 = vunpack.c.h.bf16 %v12438_v50  ;;  %v11629_v3 = vpack.c.bf16 %v11569_v52, %v11335_v0  ;;  %v5985_v52 = vpop.f32.mrf.mxu3  ;;  %v12442_v61 = vld [vmem:[#allocation110_spill] sm:$0xff] }
 0x57e   :  { %v5499_v4 = vpack.c.bf16 %v5427_v28, %v5423_v54  ;;  %v5500_v32 = vpack.c.bf16 %v5428_v42, %v5424_v15  ;;  %v4733_v36 = vpack.c.bf16 %v7121_v60, %v7119_v19  ;;  %v5173_v48 = vunpack.c.l.bf16 %v11605_v6 }
 0x57f   :  { %7126 = vtanh.f32 %v12439_v43  ;;  %v7123_v55 = vpop.eup %7122  ;;  %v5177_v31 = vunpack.c.l.bf16 %v11607_v41  ;;  %v5174_v51 = vunpack.c.h.bf16 %v11605_v6  ;;  %v5895_v7 = vadd.f32 %v5894_v40, %v5806_v12  ;;  %v11643_v6 = vpop.f32.mrf.mxu0 }
 0x580   :  { %7128 = vtanh.f32 %v12440_v11  ;;  %6017 = vmatmul.bf16.gmra.mxu3 %v5499_v4  ;;  %6106 = vmatmul.bf16.gmra.mxu0 %v5500_v32  ;;  %v7125_v9 = vpop.eup %7124  ;;  %v4853_v34 = vunpack.c.l.bf16 %v4733_v36  ;;  %v4854_v1 = vunpack.c.h.bf16 %v4733_v36  ;;  %v5178_v38 = vunpack.c.h.bf16 %v11607_v41  ;;  %v12441_v41 = vld [vmem:[#allocation115_spill] sm:$0xff] }
 0x581   :  { %7130 = vtanh.f32 %v4539_v44  ;;  %v5808_v0 = vadd.f32 %v5807_v56, %v11297_v23  ;;  %v4735_v39 = vpack.c.bf16 %v7125_v9, %v7123_v55  ;;  %v11636_v30 = vpack.c.bf16 %v2876_v13, %v2875_v45  ;;  %v12443_v45 = vld [vmem:[#allocation31_spill] sm:$0xff] }
 0x582   :  { %7132 = vtanh.f32 %v4540_v24  ;;  %v5175_v20 = vunpack.c.l.bf16 %v11623_v8  ;;  %v5984_v47 = vadd.f32 %v5983_v35, %v5895_v7  ;;  %v4981_v57 = vadd.f32 1.0, %v4853_v34  ;;  %v12444_v34 = vld [vmem:[#allocation32_spill] sm:$0xff] }
 0x583   :  { %v4982_v40 = vadd.f32 1.0, %v4854_v1  ;;  %v5897_v2 = vadd.f32 %v5896_v29, %v5808_v0  ;;  %v2877_v37 = vmul.f32 0.5, %v11212_v16  ;;  %v4857_v26 = vunpack.c.l.bf16 %v4735_v39 }
 0x584   :  { %v4858_v46 = vunpack.c.h.bf16 %v4735_v39  ;;  %v6073_v56 = vadd.f32 %v11589_v10, %v5984_v47  ;;  %v2878_v54 = vmul.f32 0.5, %v12441_v41  ;;  %v2881_v28 = vmul.f32 0.5, %v12442_v61 }
 0x585   :  { %v7127_v53 = vpop.eup %7126  ;;  %v5053_v18 = vpack.c.bf16 %v4982_v40, %v4981_v57  ;;  %v5986_v25 = vadd.f32 %v5985_v52, %v5897_v2  ;;  %v4985_v42 = vadd.f32 1.0, %v4857_v26  ;;  %v2882_v19 = vmul.f32 0.5, %v11256_v17  ;;  %v5899_v52 = vpop.f32.mrf.mxu2 }
 0x586   :  { %v7129_v12 = vpop.eup %7128  ;;  %v4986_v5 = vadd.f32 1.0, %v4858_v46  ;;  %v6134_v16 = vadd.f32 %v6073_v56, %v12443_v45  ;;  %v4545_v43 = vunpack.c.l.bf16 %v11325_v49  ;;  %v4546_v0 = vunpack.c.h.bf16 %v11325_v49  ;;  %v5988_v39 = vpop.f32.mrf.mxu3 }
 0x587   :  { %v7131_v22 = vpop.eup %7130  ;;  %v4734_v35 = vpack.c.bf16 %v7129_v12, %v7127_v53  ;;  %v5301_v58 = vunpack.c.l.bf16 %v5053_v18  ;;  %v5302_v13 = vunpack.c.h.bf16 %v5053_v18  ;;  %v6075_v50 = vadd.f32 %v11609_v33, %v5986_v25 }
 0x588   :  { %v7133_v15 = vpop.eup %7132  ;;  %v5055_v44 = vpack.c.bf16 %v4986_v5, %v4985_v42  ;;  %6166 = vst [vmem:[#allocation13 + $0x60] sm:$0xff] %v6134_v16  ;;  %v5179_v40 = vunpack.c.l.bf16 %v11636_v30  ;;  %v5176_v2 = vunpack.c.h.bf16 %v11623_v8  ;;  %v12446_v12 = vunpack.c.h.bf16 %v11295_v63 }
 0x589   :  { %v4736_v10 = vpack.c.bf16 %v7133_v15, %v7131_v22  ;;  %v4855_v59 = vunpack.c.l.bf16 %v4734_v35  ;;  %v4856_v24 = vunpack.c.h.bf16 %v4734_v35  ;;  %v5429_v60 = vmul.f32 %v5301_v58, %v5173_v48 }
 0x58a   :  { %v5430_v4 = vmul.f32 %v5302_v13, %v5174_v51  ;;  %v5305_v55 = vunpack.c.l.bf16 %v5055_v44  ;;  %v5306_v36 = vunpack.c.h.bf16 %v5055_v44  ;;  %v6135_v1 = vadd.f32 %v6075_v50, %v12444_v34  ;;  %v5812_v51 = vpop.f32.mrf.mxu1 }
 0x58b   :  { %v4859_v32 = vunpack.c.l.bf16 %v4736_v10  ;;  %v4860_v11 = vunpack.c.h.bf16 %v4736_v10  ;;  %v4983_v7 = vadd.f32 1.0, %v4855_v59  ;;  %v4984_v29 = vadd.f32 1.0, %v4856_v24 }
 0x58c   :  { %v5433_v47 = vmul.f32 %v5305_v55, %v5177_v31  ;;  %v5434_v33 = vmul.f32 %v5306_v36, %v5178_v38  ;;  %v12445_v48 = vunpack.c.l.bf16 %v11295_v63  ;;  %6167 = vst [vmem:[#allocation13 + $0x68] sm:$0xff] %v6135_v1  ;;  %v11659_v31 = vpop.f32.mrf.mxu0  ;;  %v5180_v41 = vunpack.c.h.bf16 %v11636_v30 }
 0x58d   :  { %v4987_v17 = vadd.f32 1.0, %v4859_v32  ;;  %v4988_v9 = vadd.f32 1.0, %v4860_v11  ;;  %v5054_v53 = vpack.c.bf16 %v4984_v29, %v4983_v7  ;;  %v4544_v18 = vunpack.c.h.bf16 %v11303_v62 }
 0x58e   :  { %7134 = vtanh.f32 %v12445_v48  ;;  %v5501_v26 = vpack.c.bf16 %v5433_v47, %v5429_v60  ;;  %v5502_v49 = vpack.c.bf16 %v5434_v33, %v5430_v4  ;;  %v11663_v35 = vpack.c.bf16 %v2878_v54, %v2877_v37  ;;  %v5990_v8 = vpop.f32.mrf.mxu3  ;;  %v12449_v4 = vld [vmem:[#allocation108_spill] sm:$0xff] }
 0x58f   :  { %v5056_v57 = vpack.c.bf16 %v4988_v9, %v4987_v17  ;;  %7136 = vtanh.f32 %v12446_v12  ;;  %v5303_v46 = vunpack.c.l.bf16 %v5054_v53  ;;  %v5304_v56 = vunpack.c.h.bf16 %v5054_v53 }
 0x590   :  { %7138 = vtanh.f32 %v4545_v43  ;;  %5844 = vmatmul.bf16.gmra.mxu1 %v5501_v26  ;;  %5933 = vmatmul.bf16.gmra.mxu2 %v5502_v49  ;;  %v11665_v25 = vpack.c.bf16 %v2882_v19, %v2881_v28  ;;  %v5811_v30 = vadd.f32 %v11639_v27, %v11297_v23  ;;  %v4547_v45 = vunpack.c.l.bf16 %v11629_v3  ;;  %v5901_v19 = vpop.f32.mrf.mxu2 }
 0x591   :  { %v5307_v38 = vunpack.c.l.bf16 %v5056_v57  ;;  %v5308_v22 = vunpack.c.h.bf16 %v5056_v57  ;;  %7140 = vtanh.f32 %v4546_v0  ;;  %v5431_v63 = vmul.f32 %v5303_v46, %v5175_v20 }
 0x592   :  { %v5432_v15 = vmul.f32 %v5304_v56, %v5176_v2  ;;  %v4548_v16 = vunpack.c.h.bf16 %v11629_v3  ;;  %v12447_v28 = vunpack.c.l.bf16 %v11303_v62  ;;  %v5181_v13 = vunpack.c.l.bf16 %v11663_v35  ;;  %v5815_v59 = vpop.f32.mrf.mxu1  ;;  %v12448_v3 = vld [vmem:[#allocation107_spill] sm:$0xff] }
 0x593   :  { %v5435_v61 = vmul.f32 %v5307_v38, %v5179_v40  ;;  %v5436_v42 = vmul.f32 %v5308_v22, %v5180_v41  ;;  %v5900_v10 = vadd.f32 %v5899_v52, %v5811_v30  ;;  %v5185_v27 = vunpack.c.l.bf16 %v11665_v25  ;;  %v12451_v30 = vld [vmem:[#allocation34_spill] sm:$0xff] }
 0x594   :  { %v7135_v5 = vpop.eup %7134  ;;  %7142 = vtanh.f32 %v12447_v28  ;;  %v2879_v24 = vmul.f32 0.5, %v12448_v3  ;;  %v5813_v50 = vadd.f32 %v5812_v51, %v11297_v23  ;;  %v2880_v32 = vmul.f32 0.5, %v12449_v4  ;;  %v6082_v1 = vpop.f32.mrf.mxu0 }
 0x595   :  { %v7137_v58 = vpop.eup %7136  ;;  %v5503_v37 = vpack.c.bf16 %v5435_v61, %v5431_v63  ;;  %v5504_v54 = vpack.c.bf16 %v5436_v42, %v5432_v15  ;;  %7144 = vtanh.f32 %v4544_v18  ;;  %v5182_v55 = vunpack.c.h.bf16 %v11663_v35 }
 0x596   :  { %v4737_v20 = vpack.c.bf16 %v7137_v58, %v7135_v5  ;;  %v7139_v44 = vpop.eup %7138  ;;  %7146 = vtanh.f32 %v4547_v45  ;;  %v5989_v36 = vadd.f32 %v5988_v39, %v5900_v10  ;;  %v5902_v7 = vadd.f32 %v5901_v19, %v5813_v50  ;;  %v5993_v38 = vpop.f32.mrf.mxu3  ;;  %v12452_v50 = vld [vmem:[#allocation35_spill] sm:$0xff] }
 0x597   :  { %6022 = vmatmul.bf16.gmra.mxu3 %v5503_v37  ;;  %6111 = vmatmul.bf16.gmra.mxu0 %v5504_v54  ;;  %v7141_v62 = vpop.eup %7140  ;;  %7148 = vtanh.f32 %v4548_v16  ;;  %v5186_v9 = vunpack.c.h.bf16 %v11665_v25  ;;  %v2883_v34 = vmul.f32 0.5, %v11262_v14  ;;  %v2884_v57 = vmul.f32 0.5, %v11264_v21  ;;  %v12450_v14 = vld [vmem:[#allocation33_spill] sm:$0xff] }
 0x598   :  { %v4861_v43 = vunpack.c.l.bf16 %v4737_v20  ;;  %v4862_v60 = vunpack.c.h.bf16 %v4737_v20  ;;  %v4739_v11 = vpack.c.bf16 %v7141_v62, %v7139_v44  ;;  %v6078_v33 = vadd.f32 %v11643_v6, %v5989_v36  ;;  %v5904_v56 = vpop.f32.mrf.mxu2 }
 0x599   :  { %v5991_v53 = vadd.f32 %v5990_v8, %v5902_v7  ;;  %v11685_v40 = vpack.c.bf16 %v2880_v32, %v2879_v24  ;;  %v5816_v39 = vadd.f32 %v5815_v59, %v11297_v23  ;;  %v2948_v5 = vpack.c.bf16 %v2884_v57, %v2883_v34 }
 0x59a   :  { %v4989_v29 = vadd.f32 1.0, %v4861_v43  ;;  %v4990_v17 = vadd.f32 1.0, %v4862_v60  ;;  %v7143_v0 = vpop.eup %7142  ;;  %v4865_v52 = vunpack.c.l.bf16 %v4739_v11  ;;  %v4866_v47 = vunpack.c.h.bf16 %v4739_v11  ;;  %v5817_v25 = vpop.f32.mrf.mxu1 }
 0x59b   :  { %v7145_v48 = vpop.eup %7144  ;;  %v6136_v46 = vadd.f32 %v6078_v33, %v12450_v14  ;;  %v6080_v18 = vadd.f32 %v11659_v31, %v5991_v53  ;;  %v5905_v35 = vadd.f32 %v5904_v56, %v5816_v39  ;;  %v5818_v62 = vadd.f32 %v5817_v25, %v11297_v23 }
 0x59c   :  { %v5057_v51 = vpack.c.bf16 %v4990_v17, %v4989_v29  ;;  %v7147_v2 = vpop.eup %7146  ;;  %v4993_v12 = vadd.f32 1.0, %v4865_v52  ;;  %v4994_v26 = vadd.f32 1.0, %v4866_v47  ;;  %v4738_v49 = vpack.c.bf16 %v7145_v48, %v7143_v0  ;;  %v6084_v43 = vpop.f32.mrf.mxu0 }
 0x59d   :  { %v7149_v41 = vpop.eup %7148  ;;  %6168 = vst [vmem:[#allocation13 + $0x70] sm:$0xff] %v6136_v46  ;;  %v6137_v45 = vadd.f32 %v6080_v18, %v12451_v30  ;;  %v5994_v16 = vadd.f32 %v5993_v38, %v5905_v35  ;;  %v5183_v11 = vunpack.c.l.bf16 %v11685_v40  ;;  %v5184_v29 = vunpack.c.h.bf16 %v11685_v40  ;;  %v12455_v30 = vld [vmem:[#allocation38_spill] sm:$0xff] }
 0x59e   :  { %v5309_v22 = vunpack.c.l.bf16 %v5057_v51  ;;  %v5310_v6 = vunpack.c.h.bf16 %v5057_v51  ;;  %v5059_v21 = vpack.c.bf16 %v4994_v26, %v4993_v12  ;;  %v4740_v63 = vpack.c.bf16 %v7149_v41, %v7147_v2  ;;  %v5995_v36 = vpop.f32.mrf.mxu3  ;;  %v12453_v12 = vld [vmem:[#allocation36_spill] sm:$0xff] }
 0x59f   :  { %v4863_v61 = vunpack.c.l.bf16 %v4738_v49  ;;  %v4864_v15 = vunpack.c.h.bf16 %v4738_v49  ;;  %6169 = vst [vmem:[#allocation13 + $0x78] sm:$0xff] %v6137_v45  ;;  %v6083_v31 = vadd.f32 %v6082_v1, %v5994_v16  ;;  %v5187_v34 = vunpack.c.l.bf16 %v2948_v5 }
 0x5a0   :  { %v5437_v42 = vmul.f32 %v5309_v22, %v5181_v13  ;;  %v5313_v58 = vunpack.c.l.bf16 %v5059_v21  ;;  %v5314_v37 = vunpack.c.h.bf16 %v5059_v21  ;;  %v4867_v54 = vunpack.c.l.bf16 %v4740_v63 }
 0x5a1   :  { %v4868_v28 = vunpack.c.h.bf16 %v4740_v63  ;;  %v5438_v19 = vmul.f32 %v5310_v6, %v5182_v55  ;;  %v4991_v8 = vadd.f32 1.0, %v4863_v61  ;;  %v4992_v20 = vadd.f32 1.0, %v4864_v15  ;;  %v5906_v55 = vpop.f32.mrf.mxu2  ;;  %v12454_v6 = vld [vmem:[#allocation37_spill] sm:$0xff] }
 0x5a2   :  { %v5441_v10 = vmul.f32 %v5313_v58, %v5185_v27  ;;  %v5442_v59 = vmul.f32 %v5314_v37, %v5186_v9  ;;  %v4995_v44 = vadd.f32 1.0, %v4867_v54  ;;  %v6138_v13 = vadd.f32 %v6083_v31, %v12452_v50  ;;  %v5820_v9 = vpop.f32.mrf.mxu1 }
 0x5a3   :  { %v4996_v3 = vadd.f32 1.0, %v4868_v28  ;;  %v5058_v24 = vpack.c.bf16 %v4992_v20, %v4991_v8  ;;  %v5907_v17 = vadd.f32 %v5906_v55, %v5818_v62  ;;  %v5188_v0 = vunpack.c.h.bf16 %v2948_v5 }
 0x5a4   :  { %v5505_v60 = vpack.c.bf16 %v5441_v10, %v5437_v42  ;;  %v5506_v4 = vpack.c.bf16 %v5442_v59, %v5438_v19  ;;  %6170 = vst [vmem:[#allocation13 + $0x80] sm:$0xff] %v6138_v13  ;;  %v5821_v26 = vadd.f32 %v5820_v9, %v11297_v23  ;;  %v6087_v46 = vpop.f32.mrf.mxu0  ;;  %v12456_v59 = vld [vmem:[#allocation39_spill] sm:$0xff] }
 0x5a5   :  { %v5060_v32 = vpack.c.bf16 %v4996_v3, %v4995_v44  ;;  %v5311_v7 = vunpack.c.l.bf16 %v5058_v24  ;;  %v5312_v27 = vunpack.c.h.bf16 %v5058_v24  ;;  %v5996_v47 = vadd.f32 %v5995_v36, %v5907_v17 }
 0x5a6   :  { %5849 = vmatmul.bf16.gmra.mxu1 %v5505_v60  ;;  %5938 = vmatmul.bf16.gmra.mxu2 %v5506_v4  ;;  %v12457_v60 = vld [vmem:[#allocation40_spill] sm:$0xff] }
 0x5a7   :  { %v5315_v1 = vunpack.c.l.bf16 %v5060_v32  ;;  %v5316_v52 = vunpack.c.h.bf16 %v5060_v32  ;;  %v5439_v33 = vmul.f32 %v5311_v7, %v5183_v11  ;;  %v5440_v48 = vmul.f32 %v5312_v27, %v5184_v29  ;;  %v5998_v56 = vpop.f32.mrf.mxu3 }
 0x5a8   :  { %v6085_v57 = vadd.f32 %v6084_v43, %v5996_v47 }
 0x5a9   :  { %v5443_v53 = vmul.f32 %v5315_v1, %v5187_v34  ;;  %v5444_v51 = vmul.f32 %v5316_v52, %v5188_v0  ;;  %v5909_v49 = vpop.f32.mrf.mxu2  ;;  %v12458_v1 = vld [vmem:[#allocation41_spill] sm:$0xff] }
 0x5aa   :  { %v6139_v40 = vadd.f32 %v6085_v57, %v12453_v12  ;;  %v5910_v14 = vadd.f32 %v5909_v49, %v5821_v26  ;;  %v5822_v41 = vpop.f32.mrf.mxu1  ;;  %v12459_v57 = vld [vmem:[#allocation42_spill] sm:$0xff] }
 0x5ab   :  { %v5507_v39 = vpack.c.bf16 %v5443_v53, %v5439_v33  ;;  %v5508_v2 = vpack.c.bf16 %v5444_v51, %v5440_v48  ;;  %v5823_v35 = vadd.f32 %v5822_v41, %v11297_v23 }
 0x5ac   :  { %6171 = vst [vmem:[#allocation13 + $0x88] sm:$0xff] %v6139_v40  ;;  %v5999_v38 = vadd.f32 %v5998_v56, %v5910_v14  ;;  %v6089_v15 = vpop.f32.mrf.mxu0 }
 0x5ad   :  { %6027 = vmatmul.bf16.gmra.mxu3 %v5507_v39  ;;  %6116 = vmatmul.bf16.gmra.mxu0 %v5508_v2 }
 0x5ae   :  { %v6088_v22 = vadd.f32 %v6087_v46, %v5999_v38 }
 0x5af   :  { %v6000_v63 = vpop.f32.mrf.mxu3 }
 0x5b0   :  { %v6140_v18 = vadd.f32 %v6088_v22, %v12454_v6  ;;  %v12460_v22 = vld [vmem:[#allocation44_spill] sm:$0xff] }
 0x5b1   :  { %v5911_v25 = vpop.f32.mrf.mxu2 }
 0x5b2   :  { %6172 = vst [vmem:[#allocation13 + $0x90] sm:$0xff] %v6140_v18  ;;  %v5912_v21 = vadd.f32 %v5911_v25, %v5823_v35  ;;  %v5825_v5 = vpop.f32.mrf.mxu1 }
 0x5b3   :  { %v5826_v16 = vadd.f32 %v5825_v5, %v11297_v23 }
 0x5b4   :  { %v6001_v61 = vadd.f32 %v6000_v63, %v5912_v21 }
 0x5b6   :  { %v6090_v42 = vadd.f32 %v6089_v15, %v6001_v61  ;;  %v12461_v15 = vld [vmem:[#allocation43_spill] sm:$0xff] }
 0x5b8   :  { %v6141_v45 = vadd.f32 %v6090_v42, %v12455_v30 }
 0x5b9   :  { %v5914_v58 = vpop.f32.mrf.mxu2  ;;  %v6092_v54 = vpop.f32.mrf.mxu0 }
 0x5ba   :  { %6173 = vst [vmem:[#allocation13 + $0x98] sm:$0xff] %v6141_v45  ;;  %v5915_v37 = vadd.f32 %v5914_v58, %v5826_v16  ;;  %v5827_v19 = vpop.f32.mrf.mxu1 }
 0x5bb   :  { %v5828_v31 = vadd.f32 %v5827_v19, %v11297_v23 }
 0x5bf   :  { %v6003_v28 = vpop.f32.mrf.mxu3 }
 0x5c0   :  { %v6004_v8 = vadd.f32 %v6003_v28, %v5915_v37 }
 0x5c1   :  { %v5916_v10 = vpop.f32.mrf.mxu2  ;;  %v6094_v13 = vpop.f32.mrf.mxu0 }
 0x5c2   :  { %v6093_v20 = vadd.f32 %v6092_v54, %v6004_v8  ;;  %v5917_v3 = vadd.f32 %v5916_v10, %v5828_v31 }
 0x5c4   :  { %v6142_v44 = vadd.f32 %v6093_v20, %v12456_v59  ;;  %v12462_v20 = vld [vmem:[#allocation45_spill] sm:$0xff] }
 0x5c6   :  { %6174 = vst [vmem:[#allocation13 + $0xa0] sm:$0xff] %v6142_v44 }
 0x5c7   :  { %v6005_v24 = vpop.f32.mrf.mxu3 }
 0x5c8   :  { %v6006_v50 = vadd.f32 %v6005_v24, %v5917_v3 }
 0x5c9   :  { %v5830_v43 = vpop.f32.mrf.mxu1 }
 0x5ca   :  { %v6095_v62 = vadd.f32 %v6094_v13, %v6006_v50  ;;  %v5831_v11 = vadd.f32 %v5830_v43, %v11297_v23  ;;  %v12463_v13 = vld [vmem:[#allocation46_spill] sm:$0xff] }
 0x5cc   :  { %v6143_v4 = vadd.f32 %v6095_v62, %v12457_v60 }
 0x5ce   :  { %6175 = vst [vmem:[#allocation13 + $0xa8] sm:$0xff] %v6143_v4 }
 0x5cf   :  { %v5919_v32 = vpop.f32.mrf.mxu2 }
 0x5d0   :  { %v5920_v55 = vadd.f32 %v5919_v32, %v5831_v11  ;;  %v6097_v36 = vpop.f32.mrf.mxu0 }
 0x5d1   :  { %v5832_v29 = vpop.f32.mrf.mxu1 }
 0x5d2   :  { %v5833_v34 = vadd.f32 %v5832_v29, %v11297_v23 }
 0x5d6   :  { %v6008_v7 = vpop.f32.mrf.mxu3 }
 0x5d7   :  { %v6009_v27 = vadd.f32 %v6008_v7, %v5920_v55  ;;  %v5921_v17 = vpop.f32.mrf.mxu2 }
 0x5d8   :  { %v5922_v52 = vadd.f32 %v5921_v17, %v5833_v34  ;;  %v6099_v53 = vpop.f32.mrf.mxu0  ;;  %v12464_v17 = vld [vmem:[#allocation47_spill] sm:$0xff] }
 0x5d9   :  { %v6098_v9 = vadd.f32 %v6097_v36, %v6009_v27 }
 0x5db   :  { %v6144_v0 = vadd.f32 %v6098_v9, %v12458_v1 }
 0x5dd   :  { %6176 = vst [vmem:[#allocation13 + $0xb0] sm:$0xff] %v6144_v0 }
 0x5de   :  { %v6010_v47 = vpop.f32.mrf.mxu3 }
 0x5df   :  { %v6011_v33 = vadd.f32 %v6010_v47, %v5922_v52  ;;  %v5835_v51 = vpop.f32.mrf.mxu1 }
 0x5e0   :  { %v5836_v12 = vadd.f32 %v5835_v51, %v11297_v23 }
 0x5e1   :  { %v6100_v48 = vadd.f32 %v6099_v53, %v6011_v33  ;;  %v12465_v53 = vld [vmem:[#allocation48_spill] sm:$0xff] }
 0x5e3   :  { %v6145_v39 = vadd.f32 %v6100_v48, %v12459_v57 }
 0x5e5   :  { %6177 = vst [vmem:[#allocation13 + $0xb8] sm:$0xff] %v6145_v39  ;;  %v5924_v2 = vpop.f32.mrf.mxu2 }
 0x5e6   :  { %v5925_v40 = vadd.f32 %v5924_v2, %v5836_v12  ;;  %v6102_v26 = vpop.f32.mrf.mxu0 }
 0x5e7   :  { %v5837_v14 = vpop.f32.mrf.mxu1 }
 0x5e8   :  { %v5838_v41 = vadd.f32 %v5837_v14, %v11297_v23 }
 0x5ec   :  { %v6013_v49 = vpop.f32.mrf.mxu3 }
 0x5ed   :  { %v6014_v46 = vadd.f32 %v6013_v49, %v5925_v40  ;;  %v5926_v56 = vpop.f32.mrf.mxu2 }
 0x5ee   :  { %v5927_v18 = vadd.f32 %v5926_v56, %v5838_v41  ;;  %v6104_v21 = vpop.f32.mrf.mxu0  ;;  %v12466_v56 = vld [vmem:[#allocation50_spill] sm:$0xff] }
 0x5ef   :  { %v6103_v38 = vadd.f32 %v6102_v26, %v6014_v46 }
 0x5f1   :  { %v6146_v6 = vadd.f32 %v6103_v38, %v12460_v22 }
 0x5f3   :  { %6178 = vst [vmem:[#allocation13 + $0xc0] sm:$0xff] %v6146_v6 }
 0x5f4   :  { %v6015_v35 = vpop.f32.mrf.mxu3 }
 0x5f5   :  { %v6016_v25 = vadd.f32 %v6015_v35, %v5927_v18 }
 0x5f6   :  { %v5840_v61 = vpop.f32.mrf.mxu1 }
 0x5f7   :  { %v6105_v63 = vadd.f32 %v6104_v21, %v6016_v25  ;;  %v5841_v30 = vadd.f32 %v5840_v61, %v11297_v23  ;;  %v12467_v25 = vld [vmem:[#allocation49_spill] sm:$0xff] }
 0x5f9   :  { %v6147_v42 = vadd.f32 %v6105_v63, %v12461_v15 }
 0x5fb   :  { %6179 = vst [vmem:[#allocation13 + $0xc8] sm:$0xff] %v6147_v42 }
 0x5fc   :  { %v5929_v5 = vpop.f32.mrf.mxu2 }
 0x5fd   :  { %v5930_v45 = vadd.f32 %v5929_v5, %v5841_v30  ;;  %v6107_v16 = vpop.f32.mrf.mxu0 }
 0x5fe   :  { %v5842_v37 = vpop.f32.mrf.mxu1 }
 0x5ff   :  { %v5843_v8 = vadd.f32 %v5842_v37, %v11297_v23 }
 0x603   :  { %v6018_v58 = vpop.f32.mrf.mxu3 }
 0x604   :  { %v6019_v54 = vadd.f32 %v6018_v58, %v5930_v45  ;;  %v5931_v28 = vpop.f32.mrf.mxu2 }
 0x605   :  { %v5932_v10 = vadd.f32 %v5931_v28, %v5843_v8  ;;  %v6109_v3 = vpop.f32.mrf.mxu0 }
 0x606   :  { %v6108_v19 = vadd.f32 %v6107_v16, %v6019_v54 }
 0x608   :  { %v6148_v31 = vadd.f32 %v6108_v19, %v12462_v20 }
 0x60a   :  { %6180 = vst [vmem:[#allocation13 + $0xd0] sm:$0xff] %v6148_v31 }
 0x60b   :  { %v6020_v59 = vpop.f32.mrf.mxu3 }
 0x60c   :  { %v6021_v44 = vadd.f32 %v6020_v59, %v5932_v10 }
 0x60d   :  { %v5845_v50 = vpop.f32.mrf.mxu1 }
 0x60e   :  { %v6110_v24 = vadd.f32 %v6109_v3, %v6021_v44  ;;  %v5846_v43 = vadd.f32 %v5845_v50, %v11297_v23 }
 0x610   :  { %v6149_v62 = vadd.f32 %v6110_v24, %v12463_v13 }
 0x612   :  { %6181 = vst [vmem:[#allocation13 + $0xd8] sm:$0xff] %v6149_v62 }
 0x613   :  { %v5934_v60 = vpop.f32.mrf.mxu2 }
 0x614   :  { %v5935_v4 = vadd.f32 %v5934_v60, %v5846_v43  ;;  %v6112_v32 = vpop.f32.mrf.mxu0 }
 0x615   :  { %v5847_v55 = vpop.f32.mrf.mxu1 }
 0x616   :  { %v5848_v29 = vadd.f32 %v5847_v55, %v11297_v23 }
 0x61a   :  { %v6023_v11 = vpop.f32.mrf.mxu3 }
 0x61b   :  { %v6024_v36 = vadd.f32 %v6023_v11, %v5935_v4  ;;  %v5936_v27 = vpop.f32.mrf.mxu2 }
 0x61c   :  { %v5937_v34 = vadd.f32 %v5936_v27, %v5848_v29  ;;  %v6114_v52 = vpop.f32.mrf.mxu0 }
 0x61d   :  { %v6113_v7 = vadd.f32 %v6112_v32, %v6024_v36 }
 0x61f   :  { %v6150_v9 = vadd.f32 %v6113_v7, %v12464_v17 }
 0x621   :  { %6182 = vst [vmem:[#allocation13 + $0xe0] sm:$0xff] %v6150_v9 }
 0x622   :  { %v6025_v1 = vpop.f32.mrf.mxu3 }
 0x623   :  { %v6026_v0 = vadd.f32 %v6025_v1, %v5937_v34  ;;  %v5850_v33 = vpop.f32.mrf.mxu1 }
 0x624   :  { %v5851_v57 = vadd.f32 %v5850_v33, %v11297_v23 }
 0x625   :  { %v6115_v47 = vadd.f32 %v6114_v52, %v6026_v0 }
 0x627   :  { %v6151_v48 = vadd.f32 %v6115_v47, %v12465_v53 }
 0x629   :  { %6183 = vst [vmem:[#allocation13 + $0xe8] sm:$0xff] %v6151_v48  ;;  %v5939_v51 = vpop.f32.mrf.mxu2 }
 0x62a   :  { %v5940_v39 = vadd.f32 %v5939_v51, %v5851_v57  ;;  %v6117_v2 = vpop.f32.mrf.mxu0 }
 0x62b   :  { %v5852_v40 = vpop.f32.mrf.mxu1 }
 0x62c   :  { %v5853_v46 = vadd.f32 %v5852_v40, %v11297_v23 }
 0x630   :  { %v6028_v12 = vpop.f32.mrf.mxu3 }
 0x631   :  { %v6029_v26 = vadd.f32 %v6028_v12, %v5940_v39  ;;  %v5941_v49 = vpop.f32.mrf.mxu2 }
 0x632   :  { %v5942_v41 = vadd.f32 %v5941_v49, %v5853_v46  ;;  %v6119_v18 = vpop.f32.mrf.mxu0 }
 0x633   :  { %v6118_v14 = vadd.f32 %v6117_v2, %v6029_v26 }
 0x635   :  { %v6152_v38 = vadd.f32 %v6118_v14, %v12466_v56 }
 0x637   :  { %6184 = vst [vmem:[#allocation13 + $0xf0] sm:$0xff] %v6152_v38 }
 0x638   :  { %v6030_v22 = vpop.f32.mrf.mxu3 }
 0x639   :  { %v6031_v6 = vadd.f32 %v6030_v22, %v5942_v41 }
 0x63b   :  { %v6120_v35 = vadd.f32 %v6119_v18, %v6031_v6 }
 0x63d   :  { %v6153_v21 = vadd.f32 %v6120_v35, %v12467_v25 }
 0x63f   :  { %6185 = vst [vmem:[#allocation13 + $0xf8] sm:$0xff] %v6153_v21 }
 0x640   :  { %6198 = dma.vmem_to_hbm [thread:$0]  %s6191_s5, 4096, %s6193_s29, [#allocation4], %s7343_s30, %s7343_s30, %s7344_s7  }
 0x641   :  { %7329 = dma.done.wait [#allocation4], 4096  }
 0x642   :  { %7330 = vsyncadd [#allocation4], 4294963200 }
 0x643   :  { %6203 = vsyncpa [#allocation3], 1 }
 0x644   :  { %6204 = vsyncpa [#allocation6], 1 }
 0x645   :  { %6205 = vsyncpa [#allocation9], 1 }
 0x646   :  { %6206 = vsyncpa [#allocation12], 1 }
 0x647   :  { %6207 = vsyncpa [#allocation4], 1 }

</bundles_post_ra>
